<compile_context>
chip_gen: v5e
topology: v5e:2x2
jax: 0.10.0
libtpu: 0.0.40
codegen_flags: <defaults>
</compile_context>

<pallas_src>
import numpy as np
import jax
import jax.numpy as jnp
from jax.experimental import pallas as pl
from jax.experimental.pallas import tpu as pltpu

NEG_INF = -1e30
LEAKY_SLOPE = 0.2  # PyG GATConv default negative_slope


def fused_gat_kernel(counts_ref,                         # SMEM (ni*nk,) int32 (prefetch)
                     xh_ref, sdst_ref, ssrc_ref, adj_ref,
                     expand_ref, scatter_ref, wout_ref, b_ref,
                     o_ref,
                     m_scr, l_scr, acc_scr):
    """Grid = (row tiles i, source tiles k).  Flash-style online softmax over k.

    xh_ref      (TK, HF)       bf16  pre-projected source features (all heads, concat)
    sdst_ref    (TM, H)        f32   destination attention logits per head
    ssrc_ref    (H, TK)        f32   source attention logits per head
    adj_ref     (TM, TK)       int8  adjacency tile (nonzero => edge source->target)
    expand_ref  (H, HF)        f32   0/1 expander: head column -> its F_out lane block
    scatter_ref (HF, HF)       f32   identity; rows [h*F:(h+1)*F] place head h's block
    wout_ref    (HF, OUT_PAD)  f32   zero-padded output linear weight
    b_ref       (1, OUT_PAD)   f32   zero-padded fused bias
    scratch: m (TM,H), l (TM,H), acc (TM,HF) persist across the k axis.
    """
    H = ssrc_ref.shape[0]
    HF = acc_scr.shape[1]
    F_out = HF // H
    TM = adj_ref.shape[0]
    i = pl.program_id(0)
    k = pl.program_id(1)
    nk = pl.num_programs(1)

    @pl.when(k == 0)
    def _init():
        # running max is clamped to >= 0, so zero is a valid (and cheap) init
        m_scr[...] = jnp.zeros_like(m_scr)
        l_scr[...] = jnp.zeros_like(l_scr)
        acc_scr[...] = jnp.zeros_like(acc_scr)

    # ---- skip the whole tile when the adjacency block has no edges ----
    @pl.when(counts_ref[i * nk + k] != 0)
    def _compute():
        mask = adj_ref[...] != 0                               # (TM, TK)
        s_dst = sdst_ref[...]                                  # (TM, H)
        s_src = ssrc_ref[...]                                  # (H, TK)
        m_prev = m_scr[...]                                    # (TM, H)

        pv_cat = jnp.zeros((TM, HF), jnp.float32)              # lane-dense head slab
        for h in range(H):                                     # static unroll, H small
            lo = h * F_out
            e = s_dst[:, h:h + 1] + s_src[h:h + 1, :]          # (TM, TK) broadcast add
            e = jnp.maximum(e, LEAKY_SLOPE * e)                # LeakyReLU (slope < 1)
            e = jnp.where(mask, e, NEG_INF)                    # single mask select
            m_prev_h = m_prev[:, h:h + 1]
            # clamp to 0: exp(NEG_INF - m_new) underflows to exactly 0 -> no re-mask
            m_new_h = jnp.maximum(
                jnp.maximum(m_prev_h, jnp.max(e, axis=-1, keepdims=True)), 0.0)
            p = jnp.exp(e - m_new_h)                           # masked entries -> 0
            alpha_h = jnp.exp(m_prev_h - m_new_h)
            l_scr[:, h:h + 1] = (alpha_h * l_scr[:, h:h + 1]
                                 + jnp.sum(p, axis=-1, keepdims=True))
            m_scr[:, h:h + 1] = m_new_h
            pv_h = jnp.dot(p.astype(jnp.bfloat16), xh_ref[:, lo:lo + F_out],
                           preferred_element_type=jnp.float32)           # (TM, F_out)
            # scatter head h's columns into the 128-wide slab via a 0/1 selector matmul
            pv_cat = pv_cat + jnp.dot(pv_h, scatter_ref[lo:lo + F_out, :],
                                      preferred_element_type=jnp.float32)

        # one dense (TM, HF) accumulator update instead of per-head masked RMW slices
        alpha = jnp.exp(m_prev - m_scr[...])                   # (TM, H)
        alpha_full = jnp.dot(alpha, expand_ref[...],
                             preferred_element_type=jnp.float32)          # (TM, HF)
        acc_scr[...] = alpha_full * acc_scr[...] + pv_cat

    @pl.when(k == nk - 1)
    def _finalize():
        l_safe = jnp.maximum(l_scr[...], 1e-20)                # guard rows w/o in-edges
        inv_l = pl.reciprocal(l_safe, approx=True)             # (TM, H) on the EUP
        inv_full = jnp.dot(inv_l, expand_ref[...],
                           preferred_element_type=jnp.float32)            # (TM, HF)
        hcat = acc_scr[...] * inv_full                         # normalized concat heads
        y = jnp.dot(hcat, wout_ref[...],
                    preferred_element_type=jnp.float32) + b_ref[...]
        o_ref[...] = jnp.maximum(y, 0.0).astype(o_ref.dtype)   # lane-dense (TM,128) store


def multi_head_gat_conv(x, adj, params, *, tm=128, tk=256):
    """x: (N, F_in) f32; adj: (N, N) (adj[i,j]!=0 iff edge j->i, incl. self loops).

    For large graphs raise tm/tk to 256-512 (tm multiple of 8, tk multiple of 128) but
    keep N // tm >= 2 so both v7x TensorCores get row tiles.
    """
    W, a_src, a_dst, bias, W_out, b_out = params
    H, F_in, F_out = W.shape
    N = x.shape[0]
    HF = H * F_out
    out_lanes = ((F_out + 127) // 128) * 128                   # lane-dense padded output
    assert N % tm == 0 and N % tk == 0, "demo requires N divisible by the tile sizes"
    assert HF % 128 == 0, "concat head slab must be lane dense"
    # TODO(synk): pad HF up to a multiple of 128 for arbitrary (heads, out_features).

    # ---- hoisted one-time host precompute (tiny XLA matmuls, NOT per tile) ----
    W_all = jnp.transpose(W, (1, 0, 2)).reshape(F_in, HF)      # concat-ordered weights
    xh = (x @ W_all).astype(jnp.bfloat16)                      # (N, HF) projected feats
    v_src = jnp.einsum('hf,hif->hi', a_src[:, 0, :], W)        # (H, F_in)
    v_dstT = jnp.einsum('hf,hif->ih', a_dst[:, 0, :], W)       # (F_in, H)
    s_dst = x @ v_dstT                                         # (N, H)  dst logits
    s_src = v_src @ x.T                                        # (H, N)  src logits

    bias_row = bias[:, 0, :].reshape(1, HF)
    b_fused = b_out + bias_row @ W_out                         # fold per-head bias
    W_out_pad = jnp.zeros((HF, out_lanes), jnp.float32).at[:, :F_out].set(W_out)
    b_pad = jnp.zeros((1, out_lanes), jnp.float32).at[:, :F_out].set(b_fused)

    expand = jnp.repeat(jnp.eye(H, dtype=jnp.float32), F_out, axis=1)   # (H, HF)
    scatter = jnp.eye(HF, dtype=jnp.float32)                            # (HF, HF)

    adj_i8 = adj if adj.dtype == jnp.int8 else adj.astype(jnp.int8)
    ni, nk = N // tm, N // tk
    counts = ((adj_i8 != 0).astype(jnp.int32)
              .reshape(ni, tm, nk, tk).sum(axis=(1, 3)).reshape(-1))    # per-tile nnz

    out = pl.pallas_call(
        fused_gat_kernel,
        out_shape=jax.ShapeDtypeStruct((N, out_lanes), x.dtype),
        grid_spec=pltpu.PrefetchScalarGridSpec(
            num_scalar_prefetch=1,
            grid=(ni, nk),
            in_specs=[
                pl.BlockSpec((tk, HF), lambda i, k, c: (k, 0)),          # xh source tile
                pl.BlockSpec((tm, H), lambda i, k, c: (i, 0)),           # dst logits
                pl.BlockSpec((H, tk), lambda i, k, c: (0, k)),           # src logits
                pl.BlockSpec((tm, tk), lambda i, k, c: (i, k)),          # adjacency (int8)
                pl.BlockSpec((H, HF), lambda i, k, c: (0, 0)),           # expander
                pl.BlockSpec((HF, HF), lambda i, k, c: (0, 0)),          # scatter (eye)
                pl.BlockSpec((HF, out_lanes), lambda i, k, c: (0, 0)),   # W_out (padded)
                pl.BlockSpec((1, out_lanes), lambda i, k, c: (0, 0)),    # bias (padded)
            ],
            out_specs=pl.BlockSpec((tm, out_lanes), lambda i, k, c: (i, 0)),
            scratch_shapes=[
                pltpu.VMEM((tm, H), jnp.float32),                        # running max
                pltpu.VMEM((tm, H), jnp.float32),                        # running sum
                pltpu.VMEM((tm, HF), jnp.float32),                       # concat accum
            ],
        ),
        compiler_params=pltpu.CompilerParams(
            dimension_semantics=("parallel", "arbitrary"),
            vmem_limit_bytes=16 * 1024 * 1024,
        ),
    )(counts, xh, s_dst, s_src, adj_i8, expand, scatter, W_out_pad, b_pad)
    return out[:, :F_out]


def reference_mhgat(x, adj, params):
    """Pure-JAX f32 reference matching the torch module's forward."""
    W, a_src, a_dst, bias, W_out, b_out = params
    H = W.shape[0]
    mask = adj != 0
    outs = []
    for h in range(H):
        xh = x @ W[h]
        ss = xh @ a_src[h, 0]
        sd = xh @ a_dst[h, 0]
        e = sd[:, None] + ss[None, :]
        e = jnp.where(e > 0, e, LEAKY_SLOPE * e)
        e = jnp.where(mask, e, -jnp.inf)
        attn = jax.nn.softmax(e, axis=-1)
        outs.append(attn @ xh + bias[h])
    concat = jnp.concatenate(outs, axis=1)
    return jax.nn.relu(concat @ W_out + b_out)


if __name__ == "__main__":
    key = jax.random.PRNGKey(0)
    N, F_in, F_out, H, E = 512, 8, 32, 4, 2048
    TM, TK = 128, 256   # ni=4 (>=2 row tiles for v7x), nk=2

    ks = jax.random.split(key, 8)
    x = jax.random.normal(ks[0], (N, F_in), jnp.float32)

    # synthetic edge list; sources restricted to the first half so some adjacency tiles
    # are completely empty and the tile-skip (scalar-prefetch + pl.when) path is used.
    src = jax.random.randint(ks[1], (E,), 0, N // 2)
    dst = jax.random.randint(ks[2], (E,), 0, N)
    adj = jnp.zeros((N, N), jnp.int8).at[dst, src].set(1)
    adj = jnp.maximum(adj, jnp.eye(N, dtype=jnp.int8))   # add_self_loops=True

    # deterministic parameter init
    W = jax.random.normal(ks[3], (H, F_in, F_out), jnp.float32) / jnp.sqrt(F_in)
    a_src = jax.random.normal(ks[4], (H, 1, F_out), jnp.float32) * 0.1
    a_dst = jax.random.normal(ks[5], (H, 1, F_out), jnp.float32) * 0.1
    bias = jax.random.normal(ks[6], (H, 1, F_out), jnp.float32) * 0.05
    W_out = jax.random.normal(ks[7], (H * F_out, F_out), jnp.float32) / jnp.sqrt(H * F_out)
    b_out = jnp.zeros((1, F_out), jnp.float32)
    params = (W, a_src, a_dst, bias, W_out, b_out)

    out = multi_head_gat_conv(x, adj, params, tm=TM, tk=TK)
    jax.block_until_ready(out)
    assert out.shape == (N, F_out)

    ref = reference_mhgat(x, adj, params)
    np.testing.assert_allclose(np.asarray(out), np.asarray(ref), rtol=5e-2, atol=5e-2)
    print("KERNEL_OK")
</pallas_src>

<mosaic_0001>
module attributes {stable_mosaic.version = 11 : i64} {
  func.func @fused_gat_kernel(%arg0: i32, %arg1: i32, %arg2: memref<8xi32, #tpu.memory_space<smem>>, %arg3: memref<256x128xbf16, #tpu.memory_space<vmem>>, %arg4: memref<128x4xf32, #tpu.memory_space<vmem>>, %arg5: memref<4x256xf32, #tpu.memory_space<vmem>>, %arg6: memref<128x256xi8, #tpu.memory_space<vmem>>, %arg7: memref<4x128xf32, #tpu.memory_space<vmem>>, %arg8: memref<128x128xf32, #tpu.memory_space<vmem>>, %arg9: memref<128x128xf32, #tpu.memory_space<vmem>>, %arg10: memref<1x128xf32, #tpu.memory_space<vmem>>, %arg11: memref<128x128xf32, #tpu.memory_space<vmem>>, %arg12: memref<128x4xf32, #tpu.memory_space<vmem>>, %arg13: memref<128x4xf32, #tpu.memory_space<vmem>>, %arg14: memref<128x128xf32, #tpu.memory_space<vmem>>) attributes {dimension_semantics = [#tpu.dimension_semantics<parallel>, #tpu.dimension_semantics<arbitrary>], iteration_bounds = array<i64: 4, 2>, scalar_prefetch = 1 : i64, scratch_operands = 3 : i64, tpu.core_type = #tpu.core_type<tc>, window_params = [{transform_indices = @transform_0, window_bounds = array<i64: 256, 128>}, {transform_indices = @transform_1, window_bounds = array<i64: 128, 4>}, {transform_indices = @transform_2, window_bounds = array<i64: 4, 256>}, {transform_indices = @transform_3, window_bounds = array<i64: 128, 256>}, {pipeline_mode = #tpu.pipeline_mode<synchronous>, transform_indices = @transform_4, window_bounds = array<i64: 4, 128>}, {pipeline_mode = #tpu.pipeline_mode<synchronous>, transform_indices = @transform_5, window_bounds = array<i64: 128, 128>}, {pipeline_mode = #tpu.pipeline_mode<synchronous>, transform_indices = @transform_6, window_bounds = array<i64: 128, 128>}, {pipeline_mode = #tpu.pipeline_mode<synchronous>, transform_indices = @transform_7, window_bounds = array<i64: 1, 128>}, {transform_indices = @transform_8, window_bounds = array<i64: 128, 128>}]} {
    %c0_i32 = arith.constant 0 : i32
    %0 = arith.cmpi eq, %arg1, %c0_i32 : i32
    %1 = arith.extui %0 : i1 to i32
    %c0_i32_0 = arith.constant 0 : i32
    %2 = arith.cmpi ne, %1, %c0_i32_0 : i32
    scf.if %2 {
      %cst = arith.constant 0.000000e+00 : f32
      %13 = vector.broadcast %cst : f32 to vector<128x4xf32>
      %c0 = arith.constant 0 : index
      %c0_4 = arith.constant 0 : index
      %14 = vector.load %arg12[%c0, %c0_4] : memref<128x4xf32, #tpu.memory_space<vmem>>, vector<128x4xf32>
      tpu.vector_store %arg12[%c0, %c0_4], %13 {strides = array<i32>} : memref<128x4xf32, #tpu.memory_space<vmem>>, vector<128x4xf32>,
      %cst_5 = arith.constant 0.000000e+00 : f32
      %15 = vector.broadcast %cst_5 : f32 to vector<128x4xf32>
      %c0_6 = arith.constant 0 : index
      %c0_7 = arith.constant 0 : index
      %16 = vector.load %arg13[%c0_6, %c0_7] : memref<128x4xf32, #tpu.memory_space<vmem>>, vector<128x4xf32>
      tpu.vector_store %arg13[%c0_6, %c0_7], %15 {strides = array<i32>} : memref<128x4xf32, #tpu.memory_space<vmem>>, vector<128x4xf32>,
      %cst_8 = arith.constant 0.000000e+00 : f32
      %17 = vector.broadcast %cst_8 : f32 to vector<128x128xf32>
      %c0_9 = arith.constant 0 : index
      %c0_10 = arith.constant 0 : index
      %18 = vector.load %arg14[%c0_9, %c0_10] : memref<128x128xf32, #tpu.memory_space<vmem>>, vector<128x128xf32>
      tpu.vector_store %arg14[%c0_9, %c0_10], %17 {strides = array<i32>} : memref<128x128xf32, #tpu.memory_space<vmem>>, vector<128x128xf32>,
    } else {
    }
    %c2_i32 = arith.constant 2 : i32
    %3 = arith.muli %arg0, %c2_i32 : i32
    %4 = arith.addi %3, %arg1 : i32
    %5 = arith.index_cast %4 : i32 to index
    %6 = memref.load %arg2[%5] : memref<8xi32, #tpu.memory_space<smem>>
    %c0_i32_1 = arith.constant 0 : i32
    %7 = arith.cmpi ne, %6, %c0_i32_1 : i32
    %8 = arith.extui %7 : i1 to i32
    %c0_i32_2 = arith.constant 0 : i32
    %9 = arith.cmpi ne, %8, %c0_i32_2 : i32
    scf.if %9 {
      %c0 = arith.constant 0 : index
      %c0_4 = arith.constant 0 : index
      %13 = vector.load %arg6[%c0, %c0_4] : memref<128x256xi8, #tpu.memory_space<vmem>>, vector<128x256xi8>
      %c0_i8 = arith.constant 0 : i8
      %14 = vector.broadcast %c0_i8 : i8 to vector<128x256xi8>
      %15 = arith.cmpi ne, %13, %14 : vector<128x256xi8>
      %c0_5 = arith.constant 0 : index
      %c0_6 = arith.constant 0 : index
      %16 = vector.load %arg4[%c0_5, %c0_6] : memref<128x4xf32, #tpu.memory_space<vmem>>, vector<128x4xf32>
      %c0_7 = arith.constant 0 : index
      %c0_8 = arith.constant 0 : index
      %17 = vector.load %arg5[%c0_7, %c0_8] : memref<4x256xf32, #tpu.memory_space<vmem>>, vector<4x256xf32>
      %c0_9 = arith.constant 0 : index
      %c0_10 = arith.constant 0 : index
      %18 = vector.load %arg12[%c0_9, %c0_10] : memref<128x4xf32, #tpu.memory_space<vmem>>, vector<128x4xf32>
      %cst = arith.constant 0.000000e+00 : f32
      %19 = vector.broadcast %cst : f32 to vector<128x128xf32>
      %20 = vector.extract_strided_slice %16 {offsets = [0, 0], sizes = [128, 1], strides = [1, 1]} : vector<128x4xf32> to vector<128x1xf32>
      %21 = vector.extract_strided_slice %17 {offsets = [0, 0], sizes = [1, 256], strides = [1, 1]} : vector<4x256xf32> to vector<1x256xf32>
      %22 = vector.broadcast %20 : vector<128x1xf32> to vector<128x256xf32>
      %23 = vector.broadcast %21 : vector<1x256xf32> to vector<128x256xf32>
      %24 = arith.addf %22, %23 : vector<128x256xf32>
      %cst_11 = arith.constant 2.000000e-01 : f32
      %25 = vector.broadcast %cst_11 : f32 to vector<128x256xf32>
      %26 = arith.mulf %25, %24 : vector<128x256xf32>
      %27 = arith.maximumf %24, %26 : vector<128x256xf32>
      %cst_12 = arith.constant -1.000000e+30 : f32
      %28 = vector.broadcast %cst_12 : f32 to vector<128x256xf32>
      %29 = arith.select %15, %27, %28 : vector<128x256xi1>, vector<128x256xf32>
      %30 = vector.extract_strided_slice %18 {offsets = [0, 0], sizes = [128, 1], strides = [1, 1]} : vector<128x4xf32> to vector<128x1xf32>
      %cst_13 = arith.constant dense<0xFF800000> : vector<128xf32>
      %31 = vector.multi_reduction <maximumf>, %29, %cst_13 [1] : vector<128x256xf32> to vector<128xf32>
      %32 = vector.shape_cast %31 : vector<128xf32> to vector<128x1xf32>
      %33 = arith.maximumf %30, %32 : vector<128x1xf32>
      %cst_14 = arith.constant 0.000000e+00 : f32
      %34 = vector.broadcast %cst_14 : f32 to vector<128x1xf32>
      %35 = arith.maximumf %33, %34 : vector<128x1xf32>
      %36 = vector.broadcast %35 : vector<128x1xf32> to vector<128x256xf32>
      %37 = arith.subf %29, %36 : vector<128x256xf32>
      %38 = math.exp %37 : vector<128x256xf32>
      %39 = arith.subf %30, %35 : vector<128x1xf32>
      %40 = math.exp %39 : vector<128x1xf32>
      %c0_15 = arith.constant 0 : index
      %c0_16 = arith.constant 0 : index
      %41 = vector.load %arg13[%c0_15, %c0_16] : memref<128x4xf32, #tpu.memory_space<vmem>>, vector<128x1xf32>
      %42 = arith.mulf %40, %41 : vector<128x1xf32>
      %cst_17 = arith.constant dense<0.000000e+00> : vector<128xf32>
      %43 = vector.multi_reduction <add>, %38, %cst_17 [1] : vector<128x256xf32> to vector<128xf32>
      %44 = vector.shape_cast %43 : vector<128xf32> to vector<128x1xf32>
      %45 = arith.addf %42, %44 : vector<128x1xf32>
      %c0_18 = arith.constant 0 : index
      %c0_19 = arith.constant 0 : index
      %46 = vector.load %arg13[%c0_18, %c0_19] : memref<128x4xf32, #tpu.memory_space<vmem>>, vector<128x1xf32>
      tpu.vector_store %arg13[%c0_18, %c0_19], %45 {strides = array<i32>} : memref<128x4xf32, #tpu.memory_space<vmem>>, vector<128x1xf32>,
      %c0_20 = arith.constant 0 : index
      %c0_21 = arith.constant 0 : index
      %47 = vector.load %arg12[%c0_20, %c0_21] : memref<128x4xf32, #tpu.memory_space<vmem>>, vector<128x1xf32>
      tpu.vector_store %arg12[%c0_20, %c0_21], %35 {strides = array<i32>} : memref<128x4xf32, #tpu.memory_space<vmem>>, vector<128x1xf32>,
      %48 = arith.truncf %38 : vector<128x256xf32> to vector<128x256xbf16>
      %c0_22 = arith.constant 0 : index
      %c0_23 = arith.constant 0 : index
      %49 = vector.load %arg3[%c0_22, %c0_23] : memref<256x128xbf16, #tpu.memory_space<vmem>>, vector<256x32xbf16>
      %cst_24 = arith.constant dense<0.000000e+00> : vector<128x32xf32>
      %50 = tpu.matmul %48, %49, %cst_24 {dimension_numbers = #tpu.dot_dimension_numbers<[1], [0], [0], [1], [0, 0, 1, 1], [], []>} : vector<128x256xbf16>, vector<256x32xbf16>, vector<128x32xf32> -> vector<128x32xf32>
      %c0_25 = arith.constant 0 : index
      %c0_26 = arith.constant 0 : index
      %51 = vector.load %arg8[%c0_25, %c0_26] : memref<128x128xf32, #tpu.memory_space<vmem>>, vector<32x128xf32>
      %cst_27 = arith.constant dense<0.000000e+00> : vector<128x128xf32>
      %52 = tpu.matmul %50, %51, %cst_27 {dimension_numbers = #tpu.dot_dimension_numbers<[1], [0], [0], [1], [0, 0, 1, 1], [], []>} : vector<128x32xf32>, vector<32x128xf32>, vector<128x128xf32> -> vector<128x128xf32>
      %53 = arith.addf %19, %52 : vector<128x128xf32>
      %54 = vector.extract_strided_slice %16 {offsets = [0, 1], sizes = [128, 1], strides = [1, 1]} : vector<128x4xf32> to vector<128x1xf32>
      %55 = vector.extract_strided_slice %17 {offsets = [1, 0], sizes = [1, 256], strides = [1, 1]} : vector<4x256xf32> to vector<1x256xf32>
      %56 = vector.broadcast %54 : vector<128x1xf32> to vector<128x256xf32>
      %57 = vector.broadcast %55 : vector<1x256xf32> to vector<128x256xf32>
      %58 = arith.addf %56, %57 : vector<128x256xf32>
      %cst_28 = arith.constant 2.000000e-01 : f32
      %59 = vector.broadcast %cst_28 : f32 to vector<128x256xf32>
      %60 = arith.mulf %59, %58 : vector<128x256xf32>
      %61 = arith.maximumf %58, %60 : vector<128x256xf32>
      %cst_29 = arith.constant -1.000000e+30 : f32
      %62 = vector.broadcast %cst_29 : f32 to vector<128x256xf32>
      %63 = arith.select %15, %61, %62 : vector<128x256xi1>, vector<128x256xf32>
      %64 = vector.extract_strided_slice %18 {offsets = [0, 1], sizes = [128, 1], strides = [1, 1]} : vector<128x4xf32> to vector<128x1xf32>
      %cst_30 = arith.constant dense<0xFF800000> : vector<128xf32>
      %65 = vector.multi_reduction <maximumf>, %63, %cst_30 [1] : vector<128x256xf32> to vector<128xf32>
      %66 = vector.shape_cast %65 : vector<128xf32> to vector<128x1xf32>
      %67 = arith.maximumf %64, %66 : vector<128x1xf32>
      %cst_31 = arith.constant 0.000000e+00 : f32
      %68 = vector.broadcast %cst_31 : f32 to vector<128x1xf32>
      %69 = arith.maximumf %67, %68 : vector<128x1xf32>
      %70 = vector.broadcast %69 : vector<128x1xf32> to vector<128x256xf32>
      %71 = arith.subf %63, %70 : vector<128x256xf32>
      %72 = math.exp %71 : vector<128x256xf32>
      %73 = arith.subf %64, %69 : vector<128x1xf32>
      %74 = math.exp %73 : vector<128x1xf32>
      %c0_32 = arith.constant 0 : index
      %c1 = arith.constant 1 : index
      %75 = vector.load %arg13[%c0_32, %c1] : memref<128x4xf32, #tpu.memory_space<vmem>>, vector<128x1xf32>
      %76 = arith.mulf %74, %75 : vector<128x1xf32>
      %cst_33 = arith.constant dense<0.000000e+00> : vector<128xf32>
      %77 = vector.multi_reduction <add>, %72, %cst_33 [1] : vector<128x256xf32> to vector<128xf32>
      %78 = vector.shape_cast %77 : vector<128xf32> to vector<128x1xf32>
      %79 = arith.addf %76, %78 : vector<128x1xf32>
      %c0_34 = arith.constant 0 : index
      %c1_35 = arith.constant 1 : index
      %80 = vector.load %arg13[%c0_34, %c1_35] : memref<128x4xf32, #tpu.memory_space<vmem>>, vector<128x1xf32>
      tpu.vector_store %arg13[%c0_34, %c1_35], %79 {strides = array<i32>} : memref<128x4xf32, #tpu.memory_space<vmem>>, vector<128x1xf32>,
      %c0_36 = arith.constant 0 : index
      %c1_37 = arith.constant 1 : index
      %81 = vector.load %arg12[%c0_36, %c1_37] : memref<128x4xf32, #tpu.memory_space<vmem>>, vector<128x1xf32>
      tpu.vector_store %arg12[%c0_36, %c1_37], %69 {strides = array<i32>} : memref<128x4xf32, #tpu.memory_space<vmem>>, vector<128x1xf32>,
      %82 = arith.truncf %72 : vector<128x256xf32> to vector<128x256xbf16>
      %c0_38 = arith.constant 0 : index
      %c32 = arith.constant 32 : index
      %83 = vector.load %arg3[%c0_38, %c32] : memref<256x128xbf16, #tpu.memory_space<vmem>>, vector<256x32xbf16>
      %cst_39 = arith.constant dense<0.000000e+00> : vector<128x32xf32>
      %84 = tpu.matmul %82, %83, %cst_39 {dimension_numbers = #tpu.dot_dimension_numbers<[1], [0], [0], [1], [0, 0, 1, 1], [], []>} : vector<128x256xbf16>, vector<256x32xbf16>, vector<128x32xf32> -> vector<128x32xf32>
      %c32_40 = arith.constant 32 : index
      %c0_41 = arith.constant 0 : index
      %85 = vector.load %arg8[%c32_40, %c0_41] : memref<128x128xf32, #tpu.memory_space<vmem>>, vector<32x128xf32>
      %cst_42 = arith.constant dense<0.000000e+00> : vector<128x128xf32>
      %86 = tpu.matmul %84, %85, %cst_42 {dimension_numbers = #tpu.dot_dimension_numbers<[1], [0], [0], [1], [0, 0, 1, 1], [], []>} : vector<128x32xf32>, vector<32x128xf32>, vector<128x128xf32> -> vector<128x128xf32>
      %87 = arith.addf %53, %86 : vector<128x128xf32>
      %88 = vector.extract_strided_slice %16 {offsets = [0, 2], sizes = [128, 1], strides = [1, 1]} : vector<128x4xf32> to vector<128x1xf32>
      %89 = vector.extract_strided_slice %17 {offsets = [2, 0], sizes = [1, 256], strides = [1, 1]} : vector<4x256xf32> to vector<1x256xf32>
      %90 = vector.broadcast %88 : vector<128x1xf32> to vector<128x256xf32>
      %91 = vector.broadcast %89 : vector<1x256xf32> to vector<128x256xf32>
      %92 = arith.addf %90, %91 : vector<128x256xf32>
      %cst_43 = arith.constant 2.000000e-01 : f32
      %93 = vector.broadcast %cst_43 : f32 to vector<128x256xf32>
      %94 = arith.mulf %93, %92 : vector<128x256xf32>
      %95 = arith.maximumf %92, %94 : vector<128x256xf32>
      %cst_44 = arith.constant -1.000000e+30 : f32
      %96 = vector.broadcast %cst_44 : f32 to vector<128x256xf32>
      %97 = arith.select %15, %95, %96 : vector<128x256xi1>, vector<128x256xf32>
      %98 = vector.extract_strided_slice %18 {offsets = [0, 2], sizes = [128, 1], strides = [1, 1]} : vector<128x4xf32> to vector<128x1xf32>
      %cst_45 = arith.constant dense<0xFF800000> : vector<128xf32>
      %99 = vector.multi_reduction <maximumf>, %97, %cst_45 [1] : vector<128x256xf32> to vector<128xf32>
      %100 = vector.shape_cast %99 : vector<128xf32> to vector<128x1xf32>
      %101 = arith.maximumf %98, %100 : vector<128x1xf32>
      %cst_46 = arith.constant 0.000000e+00 : f32
      %102 = vector.broadcast %cst_46 : f32 to vector<128x1xf32>
      %103 = arith.maximumf %101, %102 : vector<128x1xf32>
      %104 = vector.broadcast %103 : vector<128x1xf32> to vector<128x256xf32>
      %105 = arith.subf %97, %104 : vector<128x256xf32>
      %106 = math.exp %105 : vector<128x256xf32>
      %107 = arith.subf %98, %103 : vector<128x1xf32>
      %108 = math.exp %107 : vector<128x1xf32>
      %c0_47 = arith.constant 0 : index
      %c2 = arith.constant 2 : index
      %109 = vector.load %arg13[%c0_47, %c2] : memref<128x4xf32, #tpu.memory_space<vmem>>, vector<128x1xf32>
      %110 = arith.mulf %108, %109 : vector<128x1xf32>
      %cst_48 = arith.constant dense<0.000000e+00> : vector<128xf32>
      %111 = vector.multi_reduction <add>, %106, %cst_48 [1] : vector<128x256xf32> to vector<128xf32>
      %112 = vector.shape_cast %111 : vector<128xf32> to vector<128x1xf32>
      %113 = arith.addf %110, %112 : vector<128x1xf32>
      %c0_49 = arith.constant 0 : index
      %c2_50 = arith.constant 2 : index
      %114 = vector.load %arg13[%c0_49, %c2_50] : memref<128x4xf32, #tpu.memory_space<vmem>>, vector<128x1xf32>
      tpu.vector_store %arg13[%c0_49, %c2_50], %113 {strides = array<i32>} : memref<128x4xf32, #tpu.memory_space<vmem>>, vector<128x1xf32>,
      %c0_51 = arith.constant 0 : index
      %c2_52 = arith.constant 2 : index
      %115 = vector.load %arg12[%c0_51, %c2_52] : memref<128x4xf32, #tpu.memory_space<vmem>>, vector<128x1xf32>
      tpu.vector_store %arg12[%c0_51, %c2_52], %103 {strides = array<i32>} : memref<128x4xf32, #tpu.memory_space<vmem>>, vector<128x1xf32>,
      %116 = arith.truncf %106 : vector<128x256xf32> to vector<128x256xbf16>
      %c0_53 = arith.constant 0 : index
      %c64 = arith.constant 64 : index
      %117 = vector.load %arg3[%c0_53, %c64] : memref<256x128xbf16, #tpu.memory_space<vmem>>, vector<256x32xbf16>
      %cst_54 = arith.constant dense<0.000000e+00> : vector<128x32xf32>
      %118 = tpu.matmul %116, %117, %cst_54 {dimension_numbers = #tpu.dot_dimension_numbers<[1], [0], [0], [1], [0, 0, 1, 1], [], []>} : vector<128x256xbf16>, vector<256x32xbf16>, vector<128x32xf32> -> vector<128x32xf32>
      %c64_55 = arith.constant 64 : index
      %c0_56 = arith.constant 0 : index
      %119 = vector.load %arg8[%c64_55, %c0_56] : memref<128x128xf32, #tpu.memory_space<vmem>>, vector<32x128xf32>
      %cst_57 = arith.constant dense<0.000000e+00> : vector<128x128xf32>
      %120 = tpu.matmul %118, %119, %cst_57 {dimension_numbers = #tpu.dot_dimension_numbers<[1], [0], [0], [1], [0, 0, 1, 1], [], []>} : vector<128x32xf32>, vector<32x128xf32>, vector<128x128xf32> -> vector<128x128xf32>
      %121 = arith.addf %87, %120 : vector<128x128xf32>
      %122 = vector.extract_strided_slice %16 {offsets = [0, 3], sizes = [128, 1], strides = [1, 1]} : vector<128x4xf32> to vector<128x1xf32>
      %123 = vector.extract_strided_slice %17 {offsets = [3, 0], sizes = [1, 256], strides = [1, 1]} : vector<4x256xf32> to vector<1x256xf32>
      %124 = vector.broadcast %122 : vector<128x1xf32> to vector<128x256xf32>
      %125 = vector.broadcast %123 : vector<1x256xf32> to vector<128x256xf32>
      %126 = arith.addf %124, %125 : vector<128x256xf32>
      %cst_58 = arith.constant 2.000000e-01 : f32
      %127 = vector.broadcast %cst_58 : f32 to vector<128x256xf32>
      %128 = arith.mulf %127, %126 : vector<128x256xf32>
      %129 = arith.maximumf %126, %128 : vector<128x256xf32>
      %cst_59 = arith.constant -1.000000e+30 : f32
      %130 = vector.broadcast %cst_59 : f32 to vector<128x256xf32>
      %131 = arith.select %15, %129, %130 : vector<128x256xi1>, vector<128x256xf32>
      %132 = vector.extract_strided_slice %18 {offsets = [0, 3], sizes = [128, 1], strides = [1, 1]} : vector<128x4xf32> to vector<128x1xf32>
      %cst_60 = arith.constant dense<0xFF800000> : vector<128xf32>
      %133 = vector.multi_reduction <maximumf>, %131, %cst_60 [1] : vector<128x256xf32> to vector<128xf32>
      %134 = vector.shape_cast %133 : vector<128xf32> to vector<128x1xf32>
      %135 = arith.maximumf %132, %134 : vector<128x1xf32>
      %cst_61 = arith.constant 0.000000e+00 : f32
      %136 = vector.broadcast %cst_61 : f32 to vector<128x1xf32>
      %137 = arith.maximumf %135, %136 : vector<128x1xf32>
      %138 = vector.broadcast %137 : vector<128x1xf32> to vector<128x256xf32>
      %139 = arith.subf %131, %138 : vector<128x256xf32>
      %140 = math.exp %139 : vector<128x256xf32>
      %141 = arith.subf %132, %137 : vector<128x1xf32>
      %142 = math.exp %141 : vector<128x1xf32>
      %c0_62 = arith.constant 0 : index
      %c3 = arith.constant 3 : index
      %143 = vector.load %arg13[%c0_62, %c3] : memref<128x4xf32, #tpu.memory_space<vmem>>, vector<128x1xf32>
      %144 = arith.mulf %142, %143 : vector<128x1xf32>
      %cst_63 = arith.constant dense<0.000000e+00> : vector<128xf32>
      %145 = vector.multi_reduction <add>, %140, %cst_63 [1] : vector<128x256xf32> to vector<128xf32>
      %146 = vector.shape_cast %145 : vector<128xf32> to vector<128x1xf32>
      %147 = arith.addf %144, %146 : vector<128x1xf32>
      %c0_64 = arith.constant 0 : index
      %c3_65 = arith.constant 3 : index
      %148 = vector.load %arg13[%c0_64, %c3_65] : memref<128x4xf32, #tpu.memory_space<vmem>>, vector<128x1xf32>
      tpu.vector_store %arg13[%c0_64, %c3_65], %147 {strides = array<i32>} : memref<128x4xf32, #tpu.memory_space<vmem>>, vector<128x1xf32>,
      %c0_66 = arith.constant 0 : index
      %c3_67 = arith.constant 3 : index
      %149 = vector.load %arg12[%c0_66, %c3_67] : memref<128x4xf32, #tpu.memory_space<vmem>>, vector<128x1xf32>
      tpu.vector_store %arg12[%c0_66, %c3_67], %137 {strides = array<i32>} : memref<128x4xf32, #tpu.memory_space<vmem>>, vector<128x1xf32>,
      %150 = arith.truncf %140 : vector<128x256xf32> to vector<128x256xbf16>
      %c0_68 = arith.constant 0 : index
      %c96 = arith.constant 96 : index
      %151 = vector.load %arg3[%c0_68, %c96] : memref<256x128xbf16, #tpu.memory_space<vmem>>, vector<256x32xbf16>
      %cst_69 = arith.constant dense<0.000000e+00> : vector<128x32xf32>
      %152 = tpu.matmul %150, %151, %cst_69 {dimension_numbers = #tpu.dot_dimension_numbers<[1], [0], [0], [1], [0, 0, 1, 1], [], []>} : vector<128x256xbf16>, vector<256x32xbf16>, vector<128x32xf32> -> vector<128x32xf32>
      %c96_70 = arith.constant 96 : index
      %c0_71 = arith.constant 0 : index
      %153 = vector.load %arg8[%c96_70, %c0_71] : memref<128x128xf32, #tpu.memory_space<vmem>>, vector<32x128xf32>
      %cst_72 = arith.constant dense<0.000000e+00> : vector<128x128xf32>
      %154 = tpu.matmul %152, %153, %cst_72 {dimension_numbers = #tpu.dot_dimension_numbers<[1], [0], [0], [1], [0, 0, 1, 1], [], []>} : vector<128x32xf32>, vector<32x128xf32>, vector<128x128xf32> -> vector<128x128xf32>
      %155 = arith.addf %121, %154 : vector<128x128xf32>
      %c0_73 = arith.constant 0 : index
      %c0_74 = arith.constant 0 : index
      %156 = vector.load %arg12[%c0_73, %c0_74] : memref<128x4xf32, #tpu.memory_space<vmem>>, vector<128x4xf32>
      %157 = arith.subf %18, %156 : vector<128x4xf32>
      %158 = math.exp %157 : vector<128x4xf32>
      %c0_75 = arith.constant 0 : index
      %c0_76 = arith.constant 0 : index
      %159 = vector.load %arg7[%c0_75, %c0_76] : memref<4x128xf32, #tpu.memory_space<vmem>>, vector<4x128xf32>
      %cst_77 = arith.constant dense<0.000000e+00> : vector<128x128xf32>
      %160 = tpu.matmul %158, %159, %cst_77 {dimension_numbers = #tpu.dot_dimension_numbers<[1], [0], [0], [1], [0, 0, 1, 1], [], []>} : vector<128x4xf32>, vector<4x128xf32>, vector<128x128xf32> -> vector<128x128xf32>
      %c0_78 = arith.constant 0 : index
      %c0_79 = arith.constant 0 : index
      %161 = vector.load %arg14[%c0_78, %c0_79] : memref<128x128xf32, #tpu.memory_space<vmem>>, vector<128x128xf32>
      %162 = arith.mulf %160, %161 : vector<128x128xf32>
      %163 = arith.addf %162, %155 : vector<128x128xf32>
      %c0_80 = arith.constant 0 : index
      %c0_81 = arith.constant 0 : index
      %164 = vector.load %arg14[%c0_80, %c0_81] : memref<128x128xf32, #tpu.memory_space<vmem>>, vector<128x128xf32>
      tpu.vector_store %arg14[%c0_80, %c0_81], %163 {strides = array<i32>} : memref<128x128xf32, #tpu.memory_space<vmem>>, vector<128x128xf32>,
    } else {
    }
    %c1_i32 = arith.constant 1 : i32
    %10 = arith.cmpi eq, %arg1, %c1_i32 : i32
    %11 = arith.extui %10 : i1 to i32
    %c0_i32_3 = arith.constant 0 : i32
    %12 = arith.cmpi ne, %11, %c0_i32_3 : i32
    scf.if %12 {
      %c0 = arith.constant 0 : index
      %c0_4 = arith.constant 0 : index
      %13 = vector.load %arg13[%c0, %c0_4] : memref<128x4xf32, #tpu.memory_space<vmem>>, vector<128x4xf32>
      %cst = arith.constant 9.99999968E-21 : f32
      %14 = vector.broadcast %cst : f32 to vector<128x4xf32>
      %15 = arith.maximumf %13, %14 : vector<128x4xf32>
      %16 = tpu.reciprocal %15 {approx = true} : vector<128x4xf32> -> vector<128x4xf32>
      %c0_5 = arith.constant 0 : index
      %c0_6 = arith.constant 0 : index
      %17 = vector.load %arg7[%c0_5, %c0_6] : memref<4x128xf32, #tpu.memory_space<vmem>>, vector<4x128xf32>
      %cst_7 = arith.constant dense<0.000000e+00> : vector<128x128xf32>
      %18 = tpu.matmul %16, %17, %cst_7 {dimension_numbers = #tpu.dot_dimension_numbers<[1], [0], [0], [1], [0, 0, 1, 1], [], []>} : vector<128x4xf32>, vector<4x128xf32>, vector<128x128xf32> -> vector<128x128xf32>
      %c0_8 = arith.constant 0 : index
      %c0_9 = arith.constant 0 : index
      %19 = vector.load %arg14[%c0_8, %c0_9] : memref<128x128xf32, #tpu.memory_space<vmem>>, vector<128x128xf32>
      %20 = arith.mulf %19, %18 : vector<128x128xf32>
      %c0_10 = arith.constant 0 : index
      %c0_11 = arith.constant 0 : index
      %21 = vector.load %arg9[%c0_10, %c0_11] : memref<128x128xf32, #tpu.memory_space<vmem>>, vector<128x128xf32>
      %cst_12 = arith.constant dense<0.000000e+00> : vector<128x128xf32>
      %22 = tpu.matmul %20, %21, %cst_12 {dimension_numbers = #tpu.dot_dimension_numbers<[1], [0], [0], [1], [0, 0, 1, 1], [], []>} : vector<128x128xf32>, vector<128x128xf32>, vector<128x128xf32> -> vector<128x128xf32>
      %c0_13 = arith.constant 0 : index
      %c0_14 = arith.constant 0 : index
      %23 = vector.load %arg10[%c0_13, %c0_14] : memref<1x128xf32, #tpu.memory_space<vmem>>, vector<1x128xf32>
      %24 = vector.broadcast %23 : vector<1x128xf32> to vector<128x128xf32>
      %25 = arith.addf %22, %24 : vector<128x128xf32>
      %cst_15 = arith.constant 0.000000e+00 : f32
      %26 = vector.broadcast %cst_15 : f32 to vector<128x128xf32>
      %27 = arith.maximumf %25, %26 : vector<128x128xf32>
      %c0_16 = arith.constant 0 : index
      %c0_17 = arith.constant 0 : index
      %28 = vector.load %arg11[%c0_16, %c0_17] : memref<128x128xf32, #tpu.memory_space<vmem>>, vector<128x128xf32>
      tpu.vector_store %arg11[%c0_16, %c0_17], %27 {strides = array<i32>} : memref<128x128xf32, #tpu.memory_space<vmem>>, vector<128x128xf32>,
    } else {
    }
    return
  }
  func.func @transform_0(%arg0: i32, %arg1: i32, %arg2: memref<8xi32, #tpu.memory_space<smem>>) -> (i32, i32) {
    %c0_i32 = arith.constant 0 : i32
    %c0_i32_0 = arith.constant 0 : i32
    return %arg1, %c0_i32 : i32, i32
  }
  func.func @transform_1(%arg0: i32, %arg1: i32, %arg2: memref<8xi32, #tpu.memory_space<smem>>) -> (i32, i32) {
    %c0_i32 = arith.constant 0 : i32
    %c0_i32_0 = arith.constant 0 : i32
    return %arg0, %c0_i32 : i32, i32
  }
  func.func @transform_2(%arg0: i32, %arg1: i32, %arg2: memref<8xi32, #tpu.memory_space<smem>>) -> (i32, i32) {
    %c0_i32 = arith.constant 0 : i32
    %c0_i32_0 = arith.constant 0 : i32
    return %c0_i32, %arg1 : i32, i32
  }
  func.func @transform_3(%arg0: i32, %arg1: i32, %arg2: memref<8xi32, #tpu.memory_space<smem>>) -> (i32, i32) {
    %c0_i32 = arith.constant 0 : i32
    return %arg0, %arg1 : i32, i32
  }
  func.func @transform_4(%arg0: i32, %arg1: i32, %arg2: memref<8xi32, #tpu.memory_space<smem>>) -> (i32, i32) {
    %c0_i32 = arith.constant 0 : i32
    %c0_i32_0 = arith.constant 0 : i32
    %c0_i32_1 = arith.constant 0 : i32
    return %c0_i32, %c0_i32_0 : i32, i32
  }
  func.func @transform_5(%arg0: i32, %arg1: i32, %arg2: memref<8xi32, #tpu.memory_space<smem>>) -> (i32, i32) {
    %c0_i32 = arith.constant 0 : i32
    %c0_i32_0 = arith.constant 0 : i32
    %c0_i32_1 = arith.constant 0 : i32
    return %c0_i32, %c0_i32_0 : i32, i32
  }
  func.func @transform_6(%arg0: i32, %arg1: i32, %arg2: memref<8xi32, #tpu.memory_space<smem>>) -> (i32, i32) {
    %c0_i32 = arith.constant 0 : i32
    %c0_i32_0 = arith.constant 0 : i32
    %c0_i32_1 = arith.constant 0 : i32
    return %c0_i32, %c0_i32_0 : i32, i32
  }
  func.func @transform_7(%arg0: i32, %arg1: i32, %arg2: memref<8xi32, #tpu.memory_space<smem>>) -> (i32, i32) {
    %c0_i32 = arith.constant 0 : i32
    %c0_i32_0 = arith.constant 0 : i32
    %c0_i32_1 = arith.constant 0 : i32
    return %c0_i32, %c0_i32_0 : i32, i32
  }
  func.func @transform_8(%arg0: i32, %arg1: i32, %arg2: memref<8xi32, #tpu.memory_space<smem>>) -> (i32, i32) {
    %c0_i32 = arith.constant 0 : i32
    %c0_i32_0 = arith.constant 0 : i32
    return %arg0, %c0_i32 : i32, i32
  }
}

</mosaic_0001>

<bundles_post_ra>
// kernel: tpu_custom_call.1
= control target key start
LH: loop header
LB: loop body
LE: loop exit
PB: predicated region body
PF: predicated region fallthrough
CT: control target
= control target key end

     0   :  { %s7083_s12 = smov [#allocation6]   ;;  %s10391_s0 = inlined_call_operand.vmem [shape: s32[8], index: 0, kind: input, shape index: {}]   ;;  %s10392_s1 = inlined_call_operand.hbm [shape: bf16[512,128], index: 1, kind: input, shape index: {}]   ;;  %s10393_s2 = inlined_call_operand.vmem [shape: f32[512,4], index: 2, kind: input, shape index: {}]   ;;  %s10394_s3 = inlined_call_operand.vmem [shape: f32[4,512], index: 3, kind: input, shape index: {}]   ;;  %s10395_s4 = inlined_call_operand.vmem [shape: s8[512,512], index: 4, kind: input, shape index: {}]   ;;  %s10396_s5 = inlined_call_operand.hbm [shape: f32[4,128], index: 5, kind: input, shape index: {}]   ;;  %s10397_s6 = inlined_call_operand.hbm [shape: f32[128,128], index: 6, kind: input, shape index: {}]   ;;  %s10398_s7 = inlined_call_operand.hbm [shape: f32[128,128], index: 7, kind: input, shape index: {}]   ;;  %s10399_s8 = inlined_call_operand.vmem [shape: f32[1,128], index: 8, kind: input, shape index: {}]   ;;  %s10400_s9 = inlined_call_operand.hbm [shape: f32[512,128], index: 9, kind: output, shape index: {}]  }
   0x1   :  { %10702 = sst [smem:[#allocation122_spill]] %s10393_s2  ;;  %s15_s11 = sshll.u32 %s10391_s0, 4  ;;  %s16_s11 = int_to_ptr.vmem [resolvable:$true] %s15_s11 }
   0x2   :  { %10703 = sst [smem:[#allocation123_spill]] %s10394_s3 }
   0x3   :  { %10704 = sst [smem:[#allocation124_spill]] %s10396_s5 }
   0x4   :  { %10705 = sst [smem:[#allocation125_spill]] %s10397_s6 }
   0x5   :  { %10706 = sst [smem:[#allocation126_spill]] %s10398_s7 }
   0x6   :  { %10707 = sst [smem:[#allocation127_spill]] %s10399_s8 }
   0x7   :  { %10708 = sst [smem:[#allocation128_spill]] %s10400_s9 }
   0x8   :  { %18 = dma.vmem_to_smem %s16_s11, 16, %s7083_s12, [#allocation5] }
   0x9   :  { %7013 = dma.done.wait [#allocation5], 16 }
   0xa   :  { %7014 = vsyncadd [#allocation5], 4294967280 }
   0xb   :  { %21 = sfence }
   0xc   :  { %22 = vsyncpa [#allocation8], 0 }
   0xd   :  { %24 = vsyncpa [#allocation8 + $0x1], 0 }
   0xe   :  { %25 = vsyncpa [#allocation12], 0 }
   0xf   :  { %26 = vsyncpa [#allocation15], 0 }
  0x10   :  { %27 = vsyncpa [#allocation9], 0 }
  0x11   :  { %29 = vsyncpa [#allocation9 + $0x1], 0  ;;  %s7154_s13 = smov 0   ;;  %s7156_s14 = smov 0  }
  0x12   :  { %s7158_s15 = smov 0   ;;  %s7160_s16 = smov 0  }
  0x13   :  { %s7162_s0 = smov 0   ;;  %s7164_s17 = smov 0  }
  0x14   :  { %s7166_s18 = smov 0   ;;  %s7168_s19 = smov 0  }
  0x15   :  { %s7170_s20 = smov 0   ;;  %s7172_s21 = smov 0  }
  0x16   :  { %s7174_s22 = smov 0   ;;  %s7176_s23 = smov 0  }
  0x17   :  { %s7178_s24 = smov 0  }
  0x18 LB: > { %10709 = sst [smem:[#allocation22_spill]] %s7033_s13  ;;  %s10401_s25 = sadd.s32 4294967295, %s7081_s24   ;;  %s7081_s24 = sphi %s7178_s24, %s35_s24   ;;  %s7077_s23 = sphi %s7176_s23, %s11425_s23   ;;  %s7073_s22 = sphi %s7174_s22, %s11424_s22   ;;  %s7069_s21 = sphi %s7172_s21, %s11423_s21   ;;  %s7065_s20 = sphi %s7170_s20, %s11422_s20   ;;  %s7061_s19 = sphi %s7168_s19, %s11421_s19   ;;  %s7057_s18 = sphi %s7166_s18, %s11420_s18   ;;  %s7053_s17 = sphi %s7164_s17, %s11419_s17   ;;  %s7049_s0 = sphi %s7162_s0, %s11418_s0   ;;  %s7045_s16 = sphi %s7160_s16, %s11417_s16   ;;  %s7041_s15 = sphi %s7158_s15, %s11410_s15   ;;  %s7037_s14 = sphi %s7156_s14, %s11416_s14   ;;  %s7033_s13 = sphi %s7154_s13, %s11415_s13  }
  0x19   : > { %10710 = sst [smem:[#allocation23_spill]] %s7041_s15  ;;  %s44_s27 = sadd.s32 1, %s7073_s22 }
  0x1a   : > { %10711 = sst [smem:[#allocation24_spill]] %s7065_s20  ;;  %s47_s28 = sadd.s32 1, %s7077_s23 }
  0x1b   : > { %p45_p0 = scmp.ge.s32.totalorder %s44_s27, 2  ;;  %s54_s29 = sadd.s32 1, %s7061_s19 }
  0x1c   : > { %p61_p1 = scmp.ne.s32.totalorder %s7061_s19, %s7057_s18  ;;  %p62_p2 = scmp.eq.s32.totalorder %s7081_s24, 0 }
  0x1d   : > { %s11427_s27 = smov (%p45_p0, %s44_s27), 0  ;;  %s11429_s28 = smov (!%p45_p0, %s47_s28), %s7077_s23 }
  0x1e   : > { %10712 = sst [smem:[#allocation25_spill]] %s11427_s27  ;;  %s51_s30 = ssub.s32 %s7073_s22, %s11427_s27 }
  0x1f   : > { %p7232_p3 = por %p62_p2, %p61_p1  ;;  %p49_p4 = scmp.ge.s32.totalorder %s11429_s28, 4 }
  0x20   : > { %p52_p5 = scmp.eq.s32.totalorder %s51_s30, 0  ;;  %p67_p6 = scmp.ne.s32.totalorder %s7057_s18, %s7053_s17 }
  0x21   : > { %p7239_p7 = scmp.eq.s32.totalorder %s10401_s25, 0  ;;  %s11431_s28 = smov (%p49_p4, %s11429_s28), 0 }
  0x22   : > { %10715 = sst [smem:[#allocation26_spill]] %s11431_s28  ;;  %s129_s17 = ssub.s32 %s7077_s23, %s11431_s28 }
  0x23   : > { %s7246_s12 = scalar_select %p52_p5, %s7061_s19, %s54_s29  }
  0x24   : > { %p7250_p8 = por %p7239_p7, %p67_p6  ;;  %s131_s25 = sor.u32 %s129_s17, %s51_s30 }
  0x25   : > { %10716 = sst [smem:[#allocation27_spill]] %s7246_s12  ;;  %s134_s27 = sadd.s32 1, %s7049_s0 }
  0x26   : > { %s10717_s26 = scalar_select %p7250_p8, 1, 0 }
  0x27   : > { %p132_p9 = scmp.eq.s32.totalorder %s131_s25, 0  ;;  %p141_p10 = scmp.ne.s32.totalorder %s7049_s0, %s7045_s16 }
  0x28   : > { %p242_p11 = scmp.eq.s32.totalorder %s129_s17, 0  ;;  %s244_s9 = sadd.s32 1, %s7041_s15 }
  0x29   : > { %s7261_s8 = scalar_select %p132_p9, %s7049_s0, %s134_s27  }
  0x2a   : > { %p7265_p12 = por %p141_p10, %p62_p2  ;;  %p254_p13 = scmp.ne.s32.totalorder %s7041_s15, %s7037_s14 }
  0x2b   : > { %10718 = sst [smem:[#allocation28_spill]] %s7261_s8  ;;  %s10721_s3 = sadd.s32 4294967295, %s7081_s24  }
  0x2c   : > { %s7272_s12 = scalar_select %p242_p11, %s7041_s15, %s244_s9  }
  0x2d   : > { %p255_p0 = scmp.eq.s32.totalorder %s10721_s3, 7  ;;  %p260_p1 = scmp.ne.s32.totalorder %s7037_s14, %s7033_s13 }
  0x2e   : > { %10720 = sst [smem:[#allocation29_spill]] %s7272_s12  ;;  %s10722_s30 = sadd.s32 4294967294, %s7081_s24  }
  0x2f   : > { %p261_p4 = scmp.eq.s32.totalorder %s10722_s30, 7  ;;  %p5630_p5 = scmp.ge.s32.totalorder %s7081_s24, 1 }
  0x30   : > { %p7281_p6 = por %p255_p0, %p254_p13  ;;  %p268_p9 = scmp.lt.s32.totalorder %s7081_s24, 9 }
  0x31   : > { %p7286_p8 = por %p261_p4, %p260_p1  ;;  %s10728_s5 = sld [smem:[#allocation124_spill]] }
  0x32   : > { %s10723_s25 = scalar_select %p7281_p6, 1, 0 }
  0x33   : > { %s10725_s27 = scalar_select %p7286_p8, 1, 0 }
  0x34   : > { %10724 = sst [smem:[#allocation30_spill]] %s10723_s25  ;;  %p7290_p2 = pnand %p5630_p5, %p268_p9 }
  0x35   : > { %10726 = sst [smem:[#allocation31_spill]] %s10725_s27  ;;  %s7084_s30 = smov [#allocation11]  }
  0x36   : > { %p6157_p10 = pneg %p7290_p2  ;;  %s282_s8 = sshll.u32 %s7084_s30, 4  ;;  %s283_s8 = int_to_ptr.vmem [resolvable:$true] %s282_s8 }
  0x37   : > { %s280_s3 = sshll.u32 %s10728_s5, 4  ;;  %s10729_s6 = sld [smem:[#allocation125_spill]]  ;;  %s281_s3 = int_to_ptr.hbm [resolvable:$true] %s280_s3 }
  0x38   : > { %p7304_p11 = pnand %p6157_p10, %p7239_p7  ;;  %s7085_s28 = smov [#allocation13]  }
  0x39   : > { %s293_s9 = sshll.u32 %s7085_s28, 4  ;;  %s7086_s30 = smov 128   ;;  %s294_s9 = int_to_ptr.vmem [resolvable:$true] %s293_s9 }
  0x3a   : > { %6160 = dma.hbm_to_vmem [thread:$0]  (!%p7304_p11), %s281_s3, 64, %s283_s8, [#allocation12]  }
  0x3b   : > { %s7087_s5 = smov 8   ;;  %s10731_s7 = sld [smem:[#allocation126_spill]] }
  0x3c   : > { %s7088_s25 = smov [#allocation14]   ;;  %p5634_p13 = scmp.ge.s32.totalorder %s7081_s24, 8 }
  0x3d   : > { %s291_s13 = sshll.u32 %s10729_s6, 4  ;;  %s307_s2 = sshll.u32 %s7088_s25, 4  ;;  %s292_s13 = int_to_ptr.hbm [resolvable:$true] %s291_s13  ;;  %s308_s2 = int_to_ptr.vmem [resolvable:$true] %s307_s2 }
  0x3e   : > { %6163 = dma.hbm_to_vmem [thread:$0]  (!%p7304_p11), %s292_s13, 2048, %s294_s9, [#allocation12], %s7086_s30, %s7086_s30, %s7087_s5  }
  0x3f   : > { %320 = sbr.rel (%p5634_p13) target bundleno = 86 (0x56), region = 32  ;;  %s324_s8 = sand.u32 (!%p5634_p13), 1, %s7061_s19  }
  0x40   : > { %s6017_s3 = sshll.u32 (!%p5634_p13), %s7073_s22, 7  ;;  %s5635_s28 = sshll.u32 (!%p5634_p13), %s324_s8, 7 }
  0x41   : > { %s305_s6 = sshll.u32 %s10731_s7, 4  ;;  %s333_s15 = scalar_lea.hbm (!%p5634_p13), %s10392_s1, %s6017_s3  ;;  %s306_s6 = int_to_ptr.hbm [resolvable:$true] %s305_s6 }
  0x42   : > { %6166 = dma.hbm_to_vmem [thread:$0]  (!%p7304_p11), %s306_s6, 2048, %s308_s2, [#allocation15], %s7086_s30, %s7086_s30, %s7087_s5  }
  0x43   : > { %s334_s12 = sshll.u32 (!%p5634_p13), %s333_s15, 4  ;;  %s328_s7 = scalar_lea.vmem (!%p5634_p13), [#allocation7], %s5635_s28  ;;  %s335_s12 = int_to_ptr.hbm [resolvable:$true] %s334_s12 }
  0x44   : > { %s336_s20 = sshll.u32 %s328_s7, 4  ;;  %s325_s25 = scalar_lea.sflag [#allocation8], %s324_s8  ;;  %s337_s20 = int_to_ptr.vmem [resolvable:$true] %s336_s20 }
  0x45   : > { %s7089_s2 = smov 64   ;;  %s7090_s5 = smov 4  }
  0x46   : > { %6147 = dma.hbm_to_vmem [thread:$0]  (%p7232_p3), %s335_s12, 2048, %s337_s20, %s325_s25, %s7089_s2, %s7089_s2, %s7090_s5  }
  0x47   : > { %363 = sbr.rel (!%p7265_p12) target bundleno = 86 (0x56), region = 48  ;;  %s365_s6 = sand.u32 (%p7265_p12), 1, %s7049_s0  }
  0x48   : > { %s5640_s27 = sshll.u32 (%p7265_p12), %s7073_s22, 1  ;;  %s5638_s30 = sshll.u32 (%p7265_p12), %s365_s6, 6 }
  0x49   : > { %s6018_s3 = sshll.u32 (%p7265_p12), %s7077_s23, 4  ;;  %s367_s20 = scalar_lea.vmem (%p7265_p12), [#allocation10], %s5638_s30 }
  0x4a   : > { %s371_s13 = sadd.s32 (%p7265_p12), %s6018_s3, %s5640_s27 }
  0x4b   : > { %s5642_s28 = sshll.u32 (%p7265_p12), %s371_s13, 3 }
  0x4c   : > { %s373_s8 = scalar_lea.vmem %s10395_s4, %s5642_s28 }
  0x4d   : > { %v386_v0 = vld [vmem:[%s373_s8] sm:$0xff]  ;;  %v388_v1 = vld [vmem:[%s373_s8 + $0x8] sm:$0xff] }
  0x4e   : > { %v390_v2 = vld [vmem:[%s373_s8 + $0x20] sm:$0xff]  ;;  %387 = vst [vmem:[%s367_s20] sm:$0xff] %v386_v0  ;;  %v392_v3 = vld [vmem:[%s373_s8 + $0x28] sm:$0xff] }
  0x4f   : > { %389 = vst [vmem:[%s367_s20 + $0x8] sm:$0xff] %v388_v1  ;;  %v394_v4 = vld [vmem:[%s373_s8 + $0x40] sm:$0xff]  ;;  %v396_v5 = vld [vmem:[%s373_s8 + $0x48] sm:$0xff] }
  0x50   : > { %391 = vst [vmem:[%s367_s20 + $0x10] sm:$0xff] %v390_v2  ;;  %v398_v6 = vld [vmem:[%s373_s8 + $0x60] sm:$0xff]  ;;  %v400_v7 = vld [vmem:[%s373_s8 + $0x68] sm:$0xff] }
  0x51   : > { %393 = vst [vmem:[%s367_s20 + $0x18] sm:$0xff] %v392_v3 }
  0x52   : > { %395 = vst [vmem:[%s367_s20 + $0x20] sm:$0xff] %v394_v4 }
  0x53   : > { %397 = vst [vmem:[%s367_s20 + $0x28] sm:$0xff] %v396_v5 }
  0x54   : > { %399 = vst [vmem:[%s367_s20 + $0x30] sm:$0xff] %v398_v6 }
  0x55   : > { %401 = vst [vmem:[%s367_s20 + $0x38] sm:$0xff] %v400_v7 }
  0x56 PF: > { %410 = sbr.rel (%p7290_p2) target bundleno = 3131 (0xc3b), region = 71  ;;  %s412_s10 = sand.u32 (!%p7290_p2), 1, %s7057_s18  }
  0x57   : > { %s5644_s29 = sshll.u32 (!%p7290_p2), %s412_s10, 7  ;;  %s413_s15 = scalar_lea.sflag (!%p7290_p2), [#allocation8], %s412_s10 }
  0x58   : > { %s7336_s12 = scalar_lea.vmem (!%p7290_p2), [#allocation7], %s5644_s29  ;;  %p10732_p3 = scmp.ne.s32.totalorder (!%p7290_p2), %s10717_s26, 0 }
  0x5b   : > { %7016 = dma.done.wait (%p10732_p3), %s413_s15, 2048  }
  0x5c   : > { %7018 = vsyncadd (%p10732_p3), %s413_s15, 4294965248  ;;  %s423_s25 = sand.u32 1, %s7045_s16  }
  0x5d   : > { %s5645_s2 = sshll.u32 %s423_s25, 6 }
  0x5e   : > { %s7343_s5 = scalar_lea.vmem [#allocation10], %s5645_s2 }
  0x5f   : > { %7020 = dma.done.wait (%p7239_p7), [#allocation12], 2112  }
  0x60   : > { %7022 = vsyncadd (%p7239_p7), [#allocation12], 4294965184 }
  0x61   : > { %7024 = dma.done.wait (%p7239_p7), [#allocation15], 2048  }
  0x62   : > { %7026 = vsyncadd (%p7239_p7), [#allocation15], 4294965248  ;;  %s10733_s26 = sld [smem:[#allocation24_spill]]  ;;  %s483_s17 = sand.u32 1, %s7037_s14  }
  0x63   : > { %s5650_s16 = sshll.u32 %s7069_s21, 4  ;;  %s5649_s6 = sshll.u32 %s483_s17, 7 }
  0x64   : > { %p488_p12 = scmp.lt.s32.totalorder %s5650_s16, 63  ;;  %s10734_s28 = sld [smem:[#allocation122_spill]] }
  0x65   : > { %s10735_s20 = sld [smem:[#allocation123_spill]]  ;;  %s7368_s29 = scalar_lea.vmem [#allocation16], %s5649_s6 }
  0x66   : > { %s11433_s16 = smov (!%p488_p12, %s5650_s16), 63 }
  0x67   : > { %s5651_s30 = sshll.u32 %s11433_s16, 3 }
  0x68   : > { %s5652_s27 = sshll.u32 %s10733_s26, 1  ;;  %p5654_p7 = scmp.ne.s32.totalorder %s10733_s26, 0 }
  0x69   : > { %p494_p0 = scmp.lt.s32.totalorder %s5652_s27, 3 }
  0x6a   : > { %s7361_s7 = scalar_lea.vmem %s10734_s28, %s5651_s30  ;;  %507 = sbr.rel (%p5654_p7) target bundleno = 160 (0xa0), region = 95 }
  0x6b   : > { %s11435_s27 = smov (!%p494_p0, %s5652_s27), 3 }
  0x6c   : > { %s5653_s11 = sshll.u32 %s11435_s27, 2 }
  0x6d   : > { %s7366_s10 = scalar_lea.vmem %s10735_s20, %s5653_s11 }
  0x6f   : > { %vm508_vm0 = vcmask 31744   ;;  %v7091_v8 = vmov 0.0  }
  0x70   : > { %509 = vst.msk [vmem:[#allocation2] sm:$0xff] %vm508_vm0, %v7091_v8 }
  0x71   : > { %510 = vst.msk [vmem:[#allocation2 + $0x8] sm:$0xff] %vm508_vm0, %v7091_v8 }
  0x72   : > { %511 = vst.msk [vmem:[#allocation2 + $0x10] sm:$0xff] %vm508_vm0, %v7091_v8 }
  0x73   : > { %512 = vst.msk [vmem:[#allocation2 + $0x18] sm:$0xff] %vm508_vm0, %v7091_v8 }
  0x74   : > { %513 = vst.msk [vmem:[#allocation2 + $0x20] sm:$0xff] %vm508_vm0, %v7091_v8 }
  0x75   : > { %514 = vst.msk [vmem:[#allocation2 + $0x28] sm:$0xff] %vm508_vm0, %v7091_v8 }
  0x76   : > { %515 = vst.msk [vmem:[#allocation2 + $0x30] sm:$0xff] %vm508_vm0, %v7091_v8 }
  0x77   : > { %516 = vst.msk [vmem:[#allocation2 + $0x38] sm:$0xff] %vm508_vm0, %v7091_v8 }
  0x78   : > { %517 = vst.msk [vmem:[#allocation2 + $0x40] sm:$0xff] %vm508_vm0, %v7091_v8 }
  0x79   : > { %518 = vst.msk [vmem:[#allocation2 + $0x48] sm:$0xff] %vm508_vm0, %v7091_v8 }
  0x7a   : > { %519 = vst.msk [vmem:[#allocation2 + $0x50] sm:$0xff] %vm508_vm0, %v7091_v8 }
  0x7b   : > { %520 = vst.msk [vmem:[#allocation2 + $0x58] sm:$0xff] %vm508_vm0, %v7091_v8 }
  0x7c   : > { %521 = vst.msk [vmem:[#allocation2 + $0x60] sm:$0xff] %vm508_vm0, %v7091_v8 }
  0x7d   : > { %522 = vst.msk [vmem:[#allocation2 + $0x68] sm:$0xff] %vm508_vm0, %v7091_v8 }
  0x7e   : > { %523 = vst.msk [vmem:[#allocation2 + $0x70] sm:$0xff] %vm508_vm0, %v7091_v8 }
  0x7f   : > { %524 = vst.msk [vmem:[#allocation2 + $0x78] sm:$0xff] %vm508_vm0, %v7091_v8 }
  0x80   : > { %525 = vst.msk [vmem:[#allocation3] sm:$0xff] %vm508_vm0, %v7091_v8 }
  0x81   : > { %526 = vst.msk [vmem:[#allocation3 + $0x8] sm:$0xff] %vm508_vm0, %v7091_v8 }
  0x82   : > { %527 = vst.msk [vmem:[#allocation3 + $0x10] sm:$0xff] %vm508_vm0, %v7091_v8 }
  0x83   : > { %528 = vst.msk [vmem:[#allocation3 + $0x18] sm:$0xff] %vm508_vm0, %v7091_v8 }
  0x84   : > { %529 = vst.msk [vmem:[#allocation3 + $0x20] sm:$0xff] %vm508_vm0, %v7091_v8 }
  0x85   : > { %530 = vst.msk [vmem:[#allocation3 + $0x28] sm:$0xff] %vm508_vm0, %v7091_v8 }
  0x86   : > { %531 = vst.msk [vmem:[#allocation3 + $0x30] sm:$0xff] %vm508_vm0, %v7091_v8 }
  0x87   : > { %532 = vst.msk [vmem:[#allocation3 + $0x38] sm:$0xff] %vm508_vm0, %v7091_v8 }
  0x88   : > { %533 = vst.msk [vmem:[#allocation3 + $0x40] sm:$0xff] %vm508_vm0, %v7091_v8 }
  0x89   : > { %534 = vst.msk [vmem:[#allocation3 + $0x48] sm:$0xff] %vm508_vm0, %v7091_v8 }
  0x8a   : > { %535 = vst.msk [vmem:[#allocation3 + $0x50] sm:$0xff] %vm508_vm0, %v7091_v8 }
  0x8b   : > { %536 = vst.msk [vmem:[#allocation3 + $0x58] sm:$0xff] %vm508_vm0, %v7091_v8 }
  0x8c   : > { %537 = vst.msk [vmem:[#allocation3 + $0x60] sm:$0xff] %vm508_vm0, %v7091_v8 }
  0x8d   : > { %538 = vst.msk [vmem:[#allocation3 + $0x68] sm:$0xff] %vm508_vm0, %v7091_v8 }
  0x8e   : > { %539 = vst.msk [vmem:[#allocation3 + $0x70] sm:$0xff] %vm508_vm0, %v7091_v8 }
  0x8f   : > { %540 = vst.msk [vmem:[#allocation3 + $0x78] sm:$0xff] %vm508_vm0, %v7091_v8 }
  0x90   : > { %541 = vst [vmem:[#allocation4 + $0x30] sm:$0xff] %v7091_v8 }
  0x91   : > { %542 = vst [vmem:[#allocation4] sm:$0xff] %v7091_v8 }
  0x92   : > { %543 = vst [vmem:[#allocation4 + $0x58] sm:$0xff] %v7091_v8 }
  0x93   : > { %544 = vst [vmem:[#allocation4 + $0x18] sm:$0xff] %v7091_v8 }
  0x94   : > { %545 = vst [vmem:[#allocation4 + $0x50] sm:$0xff] %v7091_v8 }
  0x95   : > { %546 = vst [vmem:[#allocation4 + $0x68] sm:$0xff] %v7091_v8 }
  0x96   : > { %547 = vst [vmem:[#allocation4 + $0x8] sm:$0xff] %v7091_v8 }
  0x97   : > { %548 = vst [vmem:[#allocation4 + $0x48] sm:$0xff] %v7091_v8 }
  0x98   : > { %549 = vst [vmem:[#allocation4 + $0x40] sm:$0xff] %v7091_v8 }
  0x99   : > { %550 = vst [vmem:[#allocation4 + $0x20] sm:$0xff] %v7091_v8 }
  0x9a   : > { %551 = vst [vmem:[#allocation4 + $0x10] sm:$0xff] %v7091_v8 }
  0x9b   : > { %552 = vst [vmem:[#allocation4 + $0x38] sm:$0xff] %v7091_v8 }
  0x9c   : > { %553 = vst [vmem:[#allocation4 + $0x60] sm:$0xff] %v7091_v8 }
  0x9d   : > { %554 = vst [vmem:[#allocation4 + $0x70] sm:$0xff] %v7091_v8 }
  0x9e   : > { %555 = vst [vmem:[#allocation4 + $0x78] sm:$0xff] %v7091_v8 }
  0x9f   : > { %556 = vst [vmem:[#allocation4 + $0x28] sm:$0xff] %v7091_v8 }
  0xa0 PF: > { %s10736_s15 = sld [smem:[#allocation24_spill]]  ;;  %s5655_s25 = sshll.u32 %s7069_s21, 1 }
  0xa6   : > { %s558_s2 = sadd.s32 %s10736_s15, %s5655_s25 }
  0xa7   : > { %s559_s26 = sld [smem:[#allocation6 + %s558_s2]] }
  0xad   : > { %p5656_p1 = scmp.eq.s32.totalorder %s559_s26, 0 }
  0xaf   : > { %563 = sbr.rel (%p5656_p1) target bundleno = 2725 (0xaa5), region = 99 }
  0xb4   : > { %v7406_v9 = vld [vmem:[%s7361_s7 + $0x10] sm:$0xff]  ;;  %v7409_v10 = vld [vmem:[%s7361_s7] sm:$0xff]  ;;  %v10417_v11 = vmov 0   ;;  %v7421_v13 = vld [vmem:[%s7361_s7 + $0x18] sm:$0xff]  ;;  %s7096_s16 = smov 64   ;;  %s7098_s6 = smov 32  }
  0xb5   : > { %6301 = vset.pattern.permute.xlu1 %v10417_v11  ;;  %6300 = vset.pattern.permute.xlu0 %v10417_v11  ;;  %v7414_v12 = vld [vmem:[%s7361_s7 + $0x20] sm:$0xff]  ;;  %v7424_v14 = vld [vmem:[%s7361_s7 + $0x8] sm:$0xff]  ;;  %v7433_v16 = vld [vmem:[%s7361_s7 + $0x38] sm:$0xff] }
  0xb6   : > { %625 = vperm.xlu1 %6301, %v7406_v9   ;;  %615 = vperm.xlu0 %6300, %v7409_v10   ;;  %v7427_v15 = vld [vmem:[%s7361_s7 + $0x28] sm:$0xff]  ;;  %v7436_v17 = vld [vmem:[%s7361_s7 + $0x30] sm:$0xff]  ;;  %v7439_v18 = vld [vmem:[%s7361_s7 + $0x40] sm:$0xff] }
  0xb7   : > { %6302 = vset.pattern.permute.xlu2 %v10417_v11  ;;  %v7445_v19 = vld [vmem:[%s7361_s7 + $0x50] sm:$0xff]  ;;  %v7448_v20 = vld [vmem:[%s7361_s7 + $0x48] sm:$0xff]  ;;  %v7451_v21 = vld [vmem:[%s7361_s7 + $0x58] sm:$0xff] }
  0xb8   : > { %635 = vperm.xlu2 %6302, %v7414_v12   ;;  %v7457_v22 = vld [vmem:[%s7361_s7 + $0x68] sm:$0xff]  ;;  %v7460_v23 = vld [vmem:[%s7361_s7 + $0x60] sm:$0xff]  ;;  %v594_v24 = vld [vmem:[%s7361_s7 + $0x70] sm:$0xff] }
  0xb9   : > { %v595_v25 = vld [vmem:[%s7361_s7 + $0x78] sm:$0xff]  ;;  %v564_v26 = vld [vmem:[%s7343_s5] sm:$0xff]  ;;  %v565_v27 = vld [vmem:[%s7343_s5 + $0x8] sm:$0xff] }
  0xba   : > { %vm572_vm1 = vnez %v564_v26  ;;  %vm573_vm2 = vnez %v565_v27  ;;  %v566_v34 = vld [vmem:[%s7343_s5 + $0x10] sm:$0xff]  ;;  %v567_v35 = vld [vmem:[%s7343_s5 + $0x18] sm:$0xff]  ;;  %v7473_v36 = vld [vmem:[%s7366_s10] sm:$0xff] }
  0xbb   : > { %v796_v28 = vsel %vm572_vm1, 16843009, %v10417_v11  ;;  %v797_v29 = vsel %vm573_vm2, 16843009, %v10417_v11  ;;  %vm574_vm3 = vnez %v566_v34  ;;  %vm575_vm4 = vnez %v567_v35  ;;  %v568_v8 = vld [vmem:[%s7343_s5 + $0x20] sm:$0xff]  ;;  %v569_v26 = vld [vmem:[%s7343_s5 + $0x28] sm:$0xff] }
  0xbc   : > { %v808_v30 = vunpack.c.2.s8 %v796_v28  ;;  %v809_v31 = vunpack.c.2.s8 %v797_v29  ;;  %v804_v32 = vunpack.c.0.s8 %v796_v28  ;;  %v805_v33 = vunpack.c.0.s8 %v797_v29 }
  0xbd   : > { %v7476_v39 = vsel %vm574_vm3, 16843009, %v10417_v11  ;;  %v7479_v40 = vsel %vm575_vm4, 16843009, %v10417_v11  ;;  %v694_v41 = vperm.slane %v7473_v36, 0  ;;  %v695_v42 = vperm.slane %v7473_v36, 4 }
  0xbe   : > { %630 = vperm.xlu1 %6301, %v7421_v13   ;;  %620 = vperm.xlu0 %6300, %v7424_v14   ;;  %v840_v37 = vpack.c.b16 %v809_v31, %v808_v30  ;;  %v836_v38 = vpack.c.b16 %v805_v33, %v804_v32  ;;  %v812_v43 = vunpack.c.0.s8 %v7476_v39  ;;  %v813_v44 = vunpack.c.0.s8 %v7479_v40 }
  0xbf   : > { %v806_v47 = vunpack.c.1.s8 %v796_v28  ;;  %v807_v48 = vunpack.c.1.s8 %v797_v29  ;;  %v810_v50 = vunpack.c.3.s8 %v796_v28  ;;  %v811_v51 = vunpack.c.3.s8 %v797_v29 }
  0xc0   : > { %640 = vperm.xlu2 %6302, %v7427_v15   ;;  %v841_v45 = vpack.c.b8 %v840_v37, %v840_v37  ;;  %v837_v46 = vpack.c.b8 %v836_v38, %v836_v38  ;;  %v844_v49 = vpack.c.b16 %v813_v44, %v812_v43  ;;  %v7485_v52 = vperm.slane %v694_v41, 0 }
  0xc1   : > { %v7487_v54 = vperm.slane %v695_v42, 0  ;;  %v838_v57 = vpack.c.b16 %v807_v48, %v806_v47  ;;  %v816_v59 = vunpack.c.2.s8 %v7476_v39  ;;  %v842_v60 = vpack.c.b16 %v811_v51, %v810_v50 }
  0xc2   : > { %v845_v55 = vpack.c.b8 %v844_v49, %v844_v49  ;;  %vm870_vm5 = vnez %v841_v45  ;;  %vm868_vm6 = vnez %v837_v46  ;;  %v817_v61 = vunpack.c.2.s8 %v7479_v40 }
  0xc3   : > { %v886_v62 = vsel %vm870_vm5, 16843009, %v10417_v11  ;;  %v884_v63 = vsel %vm868_vm6, 16843009, %v10417_v11  ;;  %v839_v1 = vpack.c.b8 %v838_v57, %v838_v57  ;;  %v818_v3 = vunpack.c.3.s8 %v7476_v39 }
  0xc4   : > { %vm872_vm7 = vnez %v845_v55  ;;  %v848_v2 = vpack.c.b16 %v817_v61, %v816_v59  ;;  %v819_v4 = vunpack.c.3.s8 %v7479_v40  ;;  %v843_v7 = vpack.c.b8 %v842_v60, %v842_v60 }
  0xc5   : > { %v888_v0 = vsel %vm872_vm7, 16843009, %v10417_v11  ;;  %v904_v27 = vunpack.c.0.s8 %v886_v62  ;;  %v905_v28 = vunpack.c.1.s8 %v886_v62  ;;  %v900_v29 = vunpack.c.0.s8 %v884_v63 }
  0xc6   : > { %650 = vperm.xlu1 %6301, %v7433_v16   ;;  %645 = vperm.xlu0 %6300, %v7436_v17   ;;  %v849_v30 = vpack.c.b8 %v848_v2, %v848_v2  ;;  %v901_v32 = vunpack.c.1.s8 %v884_v63  ;;  %vm869_vm8 = vnez %v839_v1  ;;  %v850_v33 = vpack.c.b16 %v819_v4, %v818_v3 }
  0xc7   : > { %vm576_vm9 = vnez %v568_v8  ;;  %vm871_vm10 = vnez %v843_v7  ;;  %vm577_vm11 = vnez %v569_v26  ;;  %v10737_v37 = vmov 0 }
  0xc8   : > { %655 = vperm.xlu2 %6302, %v7439_v18   ;;  %v10740_v38 = vmov 0  ;;  %v7509_v41 = vsel %vm576_vm9, 16843009, %v10417_v11  ;;  %v7512_v42 = vsel %vm577_vm11, 16843009, %v10417_v11  ;;  %vm874_vm14 = vnez %v849_v30 }
  0xc9   : > { %v851_v43 = vpack.c.b8 %v850_v33, %v850_v33  ;;  %v822_v44 = vunpack.c.1.s8 %v7509_v41  ;;  %v823_v45 = vunpack.c.1.s8 %v7512_v42  ;;  %v885_v46 = vsel %vm869_vm8, 16843009, %v10417_v11 }
  0xca   : > { %v887_v47 = vsel %vm871_vm10, 16843009, %v10417_v11  ;;  %v814_v48 = vunpack.c.1.s8 %v7476_v39  ;;  %v815_v49 = vunpack.c.1.s8 %v7479_v40  ;;  %vm7537_vm15 = vcmp.ne.s32.totalorder %v904_v27, 0 }
  0xcb   : > { %v854_v39 = vpack.c.b16 %v823_v45, %v822_v44  ;;  %v10745_v40 = vmov 0  ;;  %vm7541_vm0 = vcmp.ne.s32.totalorder %v905_v28, 0  ;;  %v10748_v57 = vmov 0  ;;  %v570_v28 = vld [vmem:[%s7343_s5 + $0x30] sm:$0xff] }
  0xcc   : > { %v10746_v40 = vsel %vm7537_vm15, 4294967295, %v10745_v40  ;;  %v10749_v57 = vsel %vm7541_vm0, 4294967295, %v10748_v57  ;;  %vm7545_vm1 = vcmp.ne.s32.totalorder %v900_v29, 0  ;;  %vm7549_vm2 = vnez %v851_v43 }
  0xcd   : > { %10747 = vst [vmem:[#allocation36_spill] sm:$0xff] %v10746_v40  ;;  %v846_v60 = vpack.c.b16 %v815_v49, %v814_v48  ;;  %v824_v61 = vunpack.c.2.s8 %v7509_v41  ;;  %v825_v62 = vunpack.c.2.s8 %v7512_v42  ;;  %vm7555_vm3 = vcmp.ne.s32.totalorder %v901_v32, 0 }
  0xce   : > { %665 = vperm.xlu1 %6301, %v7445_v19   ;;  %660 = vperm.xlu0 %6300, %v7448_v20   ;;  %10750 = vst [vmem:[#allocation37_spill] sm:$0xff] %v10749_v57  ;;  %v10756_v63 = vmov 0  ;;  %v903_v1 = vunpack.c.1.s8 %v885_v46  ;;  %v906_v3 = vunpack.c.0.s8 %v887_v47  ;;  %v7572_v26 = vsel %vm7549_vm2, 16843009, %v10417_v11 }
  0xcf   : > { %v10757_v63 = vsel %vm7555_vm3, 4294967295, %v10756_v63  ;;  %v847_v7 = vpack.c.b8 %v846_v60, %v846_v60  ;;  %v855_v27 = vpack.c.b8 %v854_v39, %v854_v39  ;;  %v856_v33 = vpack.c.b16 %v825_v62, %v824_v61 }
  0xd0   : > { %670 = vperm.xlu2 %6302, %v7451_v21   ;;  %10758 = vst [vmem:[#allocation39_spill] sm:$0xff] %v10757_v63  ;;  %v914_v45 = vunpack.c.0.s8 %v7572_v26  ;;  %vm578_vm5 = vnez %v570_v28  ;;  %v10759_v60 = vmov 0  ;;  %vm7595_vm8 = vcmp.ne.s32.totalorder %v903_v1, 0 }
  0xd1   : > { %vm873_vm4 = vnez %v847_v7  ;;  %vm877_vm6 = vnez %v855_v27  ;;  %v857_v7 = vpack.c.b8 %v856_v33, %v856_v33  ;;  %v10762_v2 = vmov 0 }
  0xd2   : > { %v10763_v2 = vsel %vm7595_vm8, 4294967295, %v10762_v2  ;;  %vm7599_vm9 = vcmp.ne.s32.totalorder %v906_v3, 0  ;;  %v10765_v27 = vmov 0  ;;  %v10771_v1 = vmov 0 }
  0xd3   : > { %10764 = vst [vmem:[#allocation41_spill] sm:$0xff] %v10763_v2  ;;  %v10766_v27 = vsel %vm7599_vm9, 4294967295, %v10765_v27  ;;  %vm7640_vm2 = vnez %v857_v7  ;;  %v10789_v28 = vmov 0 }
  0xd4   : > { %10767 = vst [vmem:[#allocation42_spill] sm:$0xff] %v10766_v27  ;;  %v821_v27 = vunpack.c.0.s8 %v7512_v42 }
  0xd6   : > { %680 = vperm.xlu1 %6301, %v7457_v22   ;;  %675 = vperm.xlu0 %6300, %v7460_v23  }
  0xd8   : > { %685 = vperm.xlu2 %6302, %v594_v24   ;;  %v908_v24 = vunpack.c.0.s8 %v888_v0 }
  0xda   : > { %vm7500_vm12 = vcmp.ne.s32.totalorder %v908_v24, 0 }
  0xdb   : > { %v10738_v37 = vsel %vm7500_vm12, 4294967295, %v10737_v37 }
  0xdc   : > { %10739 = vst [vmem:[#allocation32_spill] sm:$0xff] %v10738_v37 }
  0xde   : > { %690 = vperm.xlu0 %6300, %v595_v25   ;;  %v909_v25 = vunpack.c.1.s8 %v888_v0  ;;  %v902_v0 = vunpack.c.0.s8 %v885_v46  ;;  %v915_v46 = vunpack.c.1.s8 %v7572_v26 }
  0xe0   : > { %vm7504_vm13 = vcmp.ne.s32.totalorder %v909_v25, 0  ;;  %vm7588_vm7 = vcmp.ne.s32.totalorder %v902_v0, 0  ;;  %v10768_v0 = vmov 0 }
  0xe1   : > { %v10741_v38 = vsel %vm7504_vm13, 4294967295, %v10740_v38  ;;  %v10760_v60 = vsel %vm7588_vm7, 4294967295, %v10759_v60 }
  0xe2   : > { %10742 = vst [vmem:[#allocation33_spill] sm:$0xff] %v10741_v38 }
  0xe3   : > { %10761 = vst [vmem:[#allocation40_spill] sm:$0xff] %v10760_v60 }
 0x112   : > { %v636_v53 = vpop.permute.xlu2 %635 }
 0x113   : > { %v708_v56 = vadd.f32 %v7485_v52, %v636_v53  ;;  %v709_v58 = vadd.f32 %v7487_v54, %v636_v53 }
 0x115   : > { %v740_v5 = vmul.f32 0.2, %v708_v56  ;;  %v741_v6 = vmul.f32 0.2, %v709_v58 }
 0x117   : > { %v772_v34 = vmax.f32 %v708_v56, %v740_v5  ;;  %v773_v35 = vmax.f32 %v709_v58, %v741_v6  ;;  %v7535_v56 = vsel %vm874_vm14, 16843009, %v10417_v11  ;;  %v10751_v58 = vmov 0 }
 0x118   : > { %v10752_v58 = vsel %vm7545_vm1, 4294967295, %v10751_v58  ;;  %v907_v6 = vunpack.c.1.s8 %v887_v47  ;;  %v912_v24 = vunpack.c.0.s8 %v7535_v56  ;;  %v889_v47 = vsel %vm873_vm4, 16843009, %v10417_v11 }
 0x119   : > { %v7528_v53 = vsel %vm7500_vm12, %v772_v34, -1e+30  ;;  %v7532_v55 = vsel %vm7504_vm13, %v773_v35, -1e+30  ;;  %10753 = vst [vmem:[#allocation38_spill] sm:$0xff] %v10752_v58  ;;  %v910_v61 = vunpack.c.0.s8 %v889_v47  ;;  %v911_v62 = vunpack.c.1.s8 %v889_v47 }
 0x11a   : > { %v641_v31 = vpop.permute.xlu2 %640  ;;  %10743 = vst [vmem:[#allocation34_spill] sm:$0xff] %v7528_v53  ;;  %vm7603_vm10 = vcmp.ne.s32.totalorder %v907_v6, 0  ;;  %v7608_v47 = vsel %vm877_vm6, 16843009, %v10417_v11  ;;  %vm7664_vm6 = vcmp.ne.s32.totalorder %v912_v24, 0  ;;  %vm7668_vm13 = vcmp.ne.s32.totalorder %v914_v45, 0 }
 0x11b   : > { %v7521_v50 = vadd.f32 %v7485_v52, %v641_v31  ;;  %v7524_v51 = vadd.f32 %v7487_v54, %v641_v31  ;;  %10744 = vst [vmem:[#allocation35_spill] sm:$0xff] %v7532_v55  ;;  %v10769_v0 = vsel %vm7603_vm10, 4294967295, %v10768_v0  ;;  %vm7612_vm11 = vcmp.ne.s32.totalorder %v910_v61, 0 }
 0x11c   : > { %10770 = vst [vmem:[#allocation43_spill] sm:$0xff] %v10769_v0  ;;  %v10772_v1 = vsel %vm7612_vm11, 4294967295, %v10771_v1  ;;  %vm7636_vm14 = vcmp.ne.s32.totalorder %v911_v62, 0  ;;  %vm7672_vm12 = vcmp.ne.s32.totalorder %v915_v46, 0  ;;  %v10794_v46 = vmov 0 }
 0x11d   : > { %v7562_v4 = vmul.f32 0.2, %v7521_v50  ;;  %v7565_v5 = vmul.f32 0.2, %v7524_v51  ;;  %10773 = vst [vmem:[#allocation44_spill] sm:$0xff] %v10772_v1  ;;  %v10790_v28 = vsel %vm7672_vm12, 4294967295, %v10789_v28  ;;  %v919_v37 = vunpack.c.1.s8 %v7608_v47 }
 0x11e   : > { %10791 = vst [vmem:[#allocation52_spill] sm:$0xff] %v10790_v28 }
 0x122   : > { %v656_v8 = vpop.permute.xlu2 %655 }
 0x123   : > { %v7576_v31 = vadd.f32 %v7485_v52, %v656_v8  ;;  %v7579_v32 = vadd.f32 %v7487_v54, %v656_v8 }
 0x125   : > { %v7593_v8 = vmul.f32 0.2, %v7576_v31 }
 0x128   : > { %v626_v29 = vpop.permute.xlu1 %625  ;;  %v616_v30 = vpop.permute.xlu0 %615 }
 0x129   : > { %v704_v34 = vadd.f32 %v7485_v52, %v626_v29  ;;  %v705_v35 = vadd.f32 %v7487_v54, %v626_v29  ;;  %v700_v43 = vadd.f32 %v7485_v52, %v616_v30  ;;  %v701_v44 = vadd.f32 %v7487_v54, %v616_v30 }
 0x12b   : > { %v736_v48 = vmul.f32 0.2, %v704_v34  ;;  %v737_v49 = vmul.f32 0.2, %v705_v35  ;;  %v732_v39 = vmul.f32 0.2, %v700_v43 }
 0x12c   : > { %v733_v59 = vmul.f32 0.2, %v701_v44 }
 0x12d   : > { %v768_v29 = vmax.f32 %v704_v34, %v736_v48  ;;  %v769_v26 = vmax.f32 %v705_v35, %v737_v49  ;;  %v764_v30 = vmax.f32 %v700_v43, %v732_v39  ;;  %v774_v34 = vmax.f32 %v7521_v50, %v7562_v4 }
 0x12e   : > { %v765_v33 = vmax.f32 %v701_v44, %v733_v59  ;;  %v775_v43 = vmax.f32 %v7524_v51, %v7565_v5  ;;  %v10778_v49 = vmov 0  ;;  %v571_v59 = vld [vmem:[%s7343_s5 + $0x38] sm:$0xff]  ;;  %s7094_s5 = smov 96  }
 0x12f   : > { %v7618_v3 = vsel %vm7537_vm15, %v768_v29, -1e+30  ;;  %v7622_v6 = vsel %vm7541_vm0, %v769_v26, -1e+30  ;;  %v7626_v35 = vsel %vm7545_vm1, %v764_v30, -1e+30  ;;  %vm579_vm4 = vnez %v571_v59 }
 0x130   : > { %10774 = vst [vmem:[#allocation45_spill] sm:$0xff] %v7618_v3  ;;  %v631_v50 = vpop.permute.xlu1 %630  ;;  %v621_v4 = vpop.permute.xlu0 %620  ;;  %v1002_v44 = vmax.f32 %v7618_v3, %v7622_v6  ;;  %v7634_v48 = vsel %vm7555_vm3, %v765_v33, -1e+30  ;;  %v10779_v49 = vsel %vm7636_vm14, 4294967295, %v10778_v49  ;;  %v7650_v26 = vmul.f32 0.2, %v7579_v32 }
 0x131   : > { %10775 = vst [vmem:[#allocation46_spill] sm:$0xff] %v7622_v6  ;;  %v706_v51 = vadd.f32 %v7485_v52, %v631_v50  ;;  %v707_v5 = vadd.f32 %v7487_v54, %v631_v50  ;;  %v702_v61 = vadd.f32 %v7485_v52, %v621_v4  ;;  %v703_v29 = vadd.f32 %v7487_v54, %v621_v4 }
 0x132   : > { %10776 = vst [vmem:[#allocation47_spill] sm:$0xff] %v7626_v35  ;;  %1003 = vmax.xlane.f32.xlu0 %v1002_v44  ;;  %v996_v62 = vmax.f32 %v7626_v35, %v7634_v48  ;;  %v7656_v7 = vsel %vm7612_vm11, %v774_v34, -1e+30  ;;  %v7660_v30 = vsel %vm578_vm5, 16843009, %v10417_v11  ;;  %v10783_v44 = vmov 0  ;;  %v7684_v35 = vpop.permute.xlu2 %670 }
 0x133   : > { %10777 = vst [vmem:[#allocation48_spill] sm:$0xff] %v7634_v48  ;;  %v738_v33 = vmul.f32 0.2, %v706_v51  ;;  %v739_v50 = vmul.f32 0.2, %v707_v5  ;;  %v10784_v44 = vsel %vm7664_vm6, 4294967295, %v10783_v44  ;;  %v918_v34 = vunpack.c.0.s8 %v7608_v47 }
 0x134   : > { %10780 = vst [vmem:[#allocation49_spill] sm:$0xff] %v10779_v49  ;;  %v734_v25 = vmul.f32 0.2, %v702_v61  ;;  %v735_v4 = vmul.f32 0.2, %v703_v29  ;;  %997 = vmax.xlane.f32.xlu1 %v996_v62  ;;  %v10786_v48 = vmov 0  ;;  %v10793_v6 = vunpack.c.1.s8 %v7535_v56 }
 0x135   : > { %10785 = vst [vmem:[#allocation50_spill] sm:$0xff] %v10784_v44  ;;  %v10787_v48 = vsel %vm7668_vm13, 4294967295, %v10786_v48  ;;  %v7679_v11 = vsel %vm7636_vm14, %v775_v43, -1e+30  ;;  %v10792_v62 = vmov 0   ;;  %v770_v3 = vmax.f32 %v706_v51, %v738_v33 }
 0x136   : > { %10788 = vst [vmem:[#allocation51_spill] sm:$0xff] %v10787_v48  ;;  %v894_v24 = vsel %vm7640_vm2, 16843009, %v10792_v62  ;;  %v766_v45 = vmax.f32 %v702_v61, %v734_v25  ;;  %vm7688_vm5 = vcmp.ne.s32.totalorder %v10793_v6, 0  ;;  %v771_v38 = vmax.f32 %v707_v5, %v739_v50 }
 0x137   : > { %v10795_v46 = vsel %vm7688_vm5, 4294967295, %v10794_v46  ;;  %v7695_v43 = vadd.f32 %v7485_v52, %v7684_v35  ;;  %v767_v63 = vmax.f32 %v703_v29, %v735_v4  ;;  %v7699_v39 = vsel %vm579_vm4, 16843009, %v10792_v62 }
 0x138   : > { %10796 = vst [vmem:[#allocation53_spill] sm:$0xff] %v10795_v46  ;;  %v828_v25 = vunpack.c.0.s8 %v7660_v30  ;;  %v7704_v56 = vsel %vm7588_vm7, %v766_v45, -1e+30  ;;  %v920_v51 = vunpack.c.0.s8 %v894_v24  ;;  %v829_v47 = vunpack.c.0.s8 %v7699_v39  ;;  %v651_v5 = vpop.permute.xlu1 %650  ;;  %v646_v61 = vpop.permute.xlu0 %645 }
 0x139   : > { %10797 = vst [vmem:[#allocation54_spill] sm:$0xff] %v7704_v56  ;;  %v7711_v29 = vsel %vm7595_vm8, %v767_v63, -1e+30  ;;  %v7715_v59 = vsel %vm7599_vm9, %v770_v3, -1e+30  ;;  %v921_v50 = vunpack.c.1.s8 %v894_v24  ;;  %v714_v4 = vadd.f32 %v7485_v52, %v651_v5 }
 0x13a   : > { %10798 = vst [vmem:[#allocation55_spill] sm:$0xff] %v7711_v29  ;;  %v7719_v33 = vsel %vm7603_vm10, %v771_v38, -1e+30  ;;  %v715_v45 = vadd.f32 %v7487_v54, %v651_v5  ;;  %v712_v6 = vadd.f32 %v7485_v52, %v646_v61  ;;  %v713_v58 = vadd.f32 %v7487_v54, %v646_v61 }
 0x13b   : > { %10799 = vst [vmem:[#allocation56_spill] sm:$0xff] %v7715_v59  ;;  %v999_v63 = vmax.f32 %v7704_v56, %v7711_v29  ;;  %v860_v2 = vpack.c.b16 %v829_v47, %v828_v25  ;;  %v820_v3 = vunpack.c.0.s8 %v7509_v41  ;;  %v746_v0 = vmul.f32 0.2, %v714_v4 }
 0x13c   : > { %10800 = vst [vmem:[#allocation57_spill] sm:$0xff] %v7719_v33  ;;  %v747_v38 = vmul.f32 0.2, %v715_v45  ;;  %v744_v60 = vmul.f32 0.2, %v712_v6  ;;  %v830_v24 = vunpack.c.1.s8 %v7660_v30  ;;  %v10801_v5 = vmax.f32 %v7528_v53, %v7532_v55 }
 0x13d   : > { %v745_v49 = vmul.f32 0.2, %v713_v58  ;;  %1000 = vmax.xlane.f32.xlu2 %v999_v63  ;;  %vm7733_vm2 = vcmp.ne.s32.totalorder %v918_v34, 0  ;;  %v10802_v61 = vmov 0  ;;  %vm7737_vm4 = vcmp.ne.s32.totalorder %v920_v51, 0 }
 0x13e   : > { %1009 = vmax.xlane.f32.xlu1 %v10801_v5  ;;  %v10803_v61 = vsel %vm7733_vm2, 4294967295, %v10802_v61  ;;  %v10805_v25 = vmov 0  ;;  %vm7741_vm10 = vcmp.ne.s32.totalorder %v921_v50, 0  ;;  %v10808_v47 = vmov 0 }
 0x13f   : > { %10804 = vst [vmem:[#allocation58_spill] sm:$0xff] %v10803_v61  ;;  %v10806_v25 = vsel %vm7737_vm4, 4294967295, %v10805_v25  ;;  %v10809_v47 = vsel %vm7741_vm10, 4294967295, %v10808_v47  ;;  %v861_v29 = vpack.c.b8 %v860_v2, %v860_v2  ;;  %v852_v56 = vpack.c.b16 %v821_v27, %v820_v3 }
 0x140   : > { %10807 = vst [vmem:[#allocation59_spill] sm:$0xff] %v10806_v25  ;;  %v831_v63 = vunpack.c.1.s8 %v7699_v39  ;;  %v776_v1 = vmax.f32 %v712_v6, %v744_v60  ;;  %v1005_v5 = vmax.f32 %v7715_v59, %v7719_v33  ;;  %v778_v34 = vmax.f32 %v714_v4, %v746_v0  ;;  %v666_v0 = vpop.permute.xlu1 %665  ;;  %v661_v6 = vpop.permute.xlu0 %660 }
 0x141   : > { %10810 = vst [vmem:[#allocation60_spill] sm:$0xff] %v10809_v47  ;;  %v779_v55 = vmax.f32 %v715_v45, %v747_v38  ;;  %vm7748_vm9 = vcmp.ne.s32.totalorder %v919_v37, 0  ;;  %v10811_v53 = vmov 0  ;;  %v777_v51 = vmax.f32 %v713_v58, %v745_v49 }
 0x142   : > { %v10812_v53 = vsel %vm7748_vm9, 4294967295, %v10811_v53  ;;  %vm880_vm3 = vnez %v861_v29  ;;  %v853_v50 = vpack.c.b8 %v852_v56, %v852_v56  ;;  %v834_v57 = vunpack.c.3.s8 %v7660_v30 }
 0x143   : > { %10813 = vst [vmem:[#allocation61_spill] sm:$0xff] %v10812_v53  ;;  %v7755_v2 = vsel %vm7664_vm6, %v776_v1, -1e+30  ;;  %v7759_v60 = vsel %vm7668_vm13, %v778_v34, -1e+30  ;;  %v862_v37 = vpack.c.b16 %v831_v63, %v830_v24  ;;  %v720_v56 = vadd.f32 %v7485_v52, %v666_v0 }
 0x144   : > { %10814 = vst [vmem:[#allocation62_spill] sm:$0xff] %v7755_v2  ;;  %v7763_v27 = vsel %vm7672_vm12, %v779_v55, -1e+30  ;;  %v7767_v58 = vsel %vm7688_vm5, %v777_v51, -1e+30  ;;  %vm876_vm6 = vnez %v853_v50  ;;  %v721_v29 = vadd.f32 %v7487_v54, %v666_v0 }
 0x145   : > { %10815 = vst [vmem:[#allocation63_spill] sm:$0xff] %v7759_v60  ;;  %v1017_v49 = vmax.f32 %v7759_v60, %v7763_v27  ;;  %v896_v1 = vsel %vm880_vm3, 16843009, %v10792_v62  ;;  %v718_v55 = vadd.f32 %v7485_v52, %v661_v6  ;;  %v719_v4 = vadd.f32 %v7487_v54, %v661_v6  ;;  %1006 = vmax.xlane.f32.xlu2 %v1005_v5 }
 0x146   : > { %10816 = vst [vmem:[#allocation64_spill] sm:$0xff] %v7763_v27  ;;  %v1014_v45 = vmax.f32 %v7755_v2, %v7767_v58  ;;  %v924_v3 = vunpack.c.0.s8 %v896_v1  ;;  %v925_v38 = vunpack.c.1.s8 %v896_v1  ;;  %v892_v24 = vsel %vm876_vm6, 16843009, %v10792_v62 }
 0x147   : > { %10817 = vst [vmem:[#allocation65_spill] sm:$0xff] %v7767_v58  ;;  %v752_v63 = vmul.f32 0.2, %v720_v56  ;;  %v753_v34 = vmul.f32 0.2, %v721_v29  ;;  %v835_v50 = vunpack.c.3.s8 %v7699_v39  ;;  %v780_v0 = vmax.f32 %v7576_v31, %v7593_v8  ;;  %1018 = vmax.xlane.f32.xlu1 %v1017_v49 }
 0x148   : > { %v750_v51 = vmul.f32 0.2, %v718_v55  ;;  %v751_v27 = vmul.f32 0.2, %v719_v4  ;;  %1015 = vmax.xlane.f32.xlu0 %v1014_v45  ;;  %v781_v6 = vmax.f32 %v7579_v32, %v7650_v26  ;;  %v916_v60 = vunpack.c.0.s8 %v892_v24  ;;  %v676_v49 = vpop.permute.xlu0 %675 }
 0x149   : > { %v784_v1 = vmax.f32 %v720_v56, %v752_v63  ;;  %v785_v2 = vmax.f32 %v721_v29, %v753_v34  ;;  %vm7784_vm3 = vcmp.ne.s32.totalorder %v924_v3, 0  ;;  %v10818_v33 = vmov 0 }
 0x14a   : > { %v782_v58 = vmax.f32 %v718_v55, %v750_v51  ;;  %v10819_v33 = vsel %vm7784_vm3, 4294967295, %v10818_v33  ;;  %v783_v59 = vmax.f32 %v719_v4, %v751_v27  ;;  %vm7788_vm6 = vcmp.ne.s32.totalorder %v925_v38, 0  ;;  %v681_v27 = vpop.permute.xlu1 %680 }
 0x14b   : > { %10820 = vst [vmem:[#allocation66_spill] sm:$0xff] %v10819_v33  ;;  %v10821_v46 = vmov 0  ;;  %v917_v5 = vunpack.c.1.s8 %v892_v24  ;;  %v863_v45 = vpack.c.b8 %v862_v37, %v862_v37  ;;  %v7798_v32 = vsel %vm7737_vm4, %v784_v1, -1e+30 }
 0x14c   : > { %v10822_v46 = vsel %vm7788_vm6, 4294967295, %v10821_v46  ;;  %v7794_v31 = vsel %vm7733_vm2, %v782_v58, -1e+30  ;;  %v7802_v8 = vsel %vm7741_vm10, %v785_v2, -1e+30  ;;  %v866_v26 = vpack.c.b16 %v835_v50, %v834_v57 }
 0x14d   : > { %10823 = vst [vmem:[#allocation67_spill] sm:$0xff] %v10822_v46  ;;  %v7806_v56 = vsel %vm7748_vm9, %v783_v59, -1e+30  ;;  %v1026_v37 = vmax.f32 %v7798_v32, %v7802_v8  ;;  %vm7810_vm2 = vcmp.ne.s32.totalorder %v916_v60, 0  ;;  %v10825_v58 = vmov 0 }
 0x14e   : > { %10824 = vst [vmem:[#allocation68_spill] sm:$0xff] %v7806_v56  ;;  %v10826_v58 = vsel %vm7810_vm2, 4294967295, %v10825_v58  ;;  %vm881_vm4 = vnez %v863_v45  ;;  %v726_v29 = vadd.f32 %v7485_v52, %v681_v27  ;;  %v727_v2 = vadd.f32 %v7487_v54, %v681_v27 }
 0x14f   : > { %10827 = vst [vmem:[#allocation69_spill] sm:$0xff] %v10826_v58  ;;  %v724_v57 = vadd.f32 %v7485_v52, %v676_v49  ;;  %v725_v55 = vadd.f32 %v7487_v54, %v676_v49  ;;  %v1023_v59 = vmax.f32 %v7794_v31, %v7806_v56  ;;  %vm7820_vm9 = vcmp.ne.s32.totalorder %v917_v5, 0  ;;  %1027 = vmax.xlane.f32.xlu1 %v1026_v37 }
 0x150   : > { %v10828_v4 = vmov 0  ;;  %v897_v60 = vsel %vm881_vm4, 16843009, %v10792_v62  ;;  %v867_v3 = vpack.c.b8 %v866_v26, %v866_v26  ;;  %v758_v38 = vmul.f32 0.2, %v726_v29 }
 0x151   : > { %v10829_v4 = vsel %vm7820_vm9, 4294967295, %v10828_v4  ;;  %v759_v24 = vmul.f32 0.2, %v727_v2  ;;  %v756_v63 = vmul.f32 0.2, %v724_v57  ;;  %v926_v34 = vunpack.c.0.s8 %v897_v60  ;;  %1024 = vmax.xlane.f32.xlu0 %v1023_v59 }
 0x152   : > { %10830 = vst [vmem:[#allocation70_spill] sm:$0xff] %v10829_v4  ;;  %v757_v51 = vmul.f32 0.2, %v725_v55  ;;  %v10831_v50 = vmax.f32 %v7656_v7, %v7679_v11  ;;  %v7830_v1 = vsel %vm7810_vm2, %v780_v0, -1e+30  ;;  %v927_v5 = vunpack.c.1.s8 %v897_v60 }
 0x153   : > { %vm883_vm10 = vnez %v867_v3  ;;  %v788_v45 = vmax.f32 %v724_v57, %v756_v63  ;;  %v790_v27 = vmax.f32 %v726_v29, %v758_v38  ;;  %v791_v26 = vmax.f32 %v727_v2, %v759_v24  ;;  %v691_v57 = vpop.permute.xlu0 %690 }
 0x154   : > { %1012 = vmax.xlane.f32.xlu2 %v10831_v50  ;;  %vm7832_vm4 = vcmp.ne.s32.totalorder %v926_v34, 0  ;;  %v10832_v49 = vmov 0  ;;  %v789_v56 = vmax.f32 %v725_v55, %v757_v51  ;;  %v7838_v59 = vsel %vm7820_vm9, %v781_v6, -1e+30 }
 0x155   : > { %v10833_v49 = vsel %vm7832_vm4, 4294967295, %v10832_v49  ;;  %vm7840_vm5 = vcmp.ne.s32.totalorder %v927_v5, 0  ;;  %v10835_v50 = vmov 0  ;;  %v899_v0 = vsel %vm883_vm10, 16843009, %v10792_v62 }
 0x156   : > { %10834 = vst [vmem:[#allocation71_spill] sm:$0xff] %v10833_v49  ;;  %v10836_v50 = vsel %vm7840_vm5, 4294967295, %v10835_v50  ;;  %v723_v37 = vadd.f32 %v7487_v54, %v7684_v35  ;;  %v7849_v29 = vsel %vm7784_vm3, %v788_v45, -1e+30  ;;  %v7853_v2 = vsel %vm7832_vm4, %v790_v27, -1e+30  ;;  %v686_v45 = vpop.permute.xlu2 %685 }
 0x157   : > { %10837 = vst [vmem:[#allocation72_spill] sm:$0xff] %v10836_v50  ;;  %v7857_v6 = vsel %vm7840_vm5, %v791_v26, -1e+30  ;;  %v7861_v55 = vsel %vm7788_vm6, %v789_v56, -1e+30  ;;  %v930_v60 = vunpack.c.0.s8 %v899_v0  ;;  %v931_v3 = vunpack.c.1.s8 %v899_v0 }
 0x158   : > { %10838 = vst [vmem:[#allocation73_spill] sm:$0xff] %v7849_v29  ;;  %v826_v35 = vunpack.c.3.s8 %v7509_v41  ;;  %v730_v38 = vadd.f32 %v7485_v52, %v691_v57  ;;  %v731_v24 = vadd.f32 %v7487_v54, %v691_v57  ;;  %v1032_v63 = vmax.f32 %v7849_v29, %v7861_v55 }
 0x159   : > { %10839 = vst [vmem:[#allocation74_spill] sm:$0xff] %v7861_v55  ;;  %v1035_v34 = vmax.f32 %v7853_v2, %v7857_v6  ;;  %v754_v51 = vmul.f32 0.2, %v7695_v43  ;;  %v1020_v56 = vmax.f32 %v7830_v1, %v7838_v59  ;;  %v827_v5 = vunpack.c.3.s8 %v7512_v42 }
 0x15a   : > { %v762_v27 = vmul.f32 0.2, %v730_v38  ;;  %v763_v41 = vmul.f32 0.2, %v731_v24  ;;  %v832_v26 = vunpack.c.2.s8 %v7660_v30  ;;  %v833_v0 = vunpack.c.2.s8 %v7699_v39  ;;  %1033 = vmax.xlane.f32.xlu0 %v1032_v63 }
 0x15b   : > { %vm7876_vm10 = vcmp.ne.s32.totalorder %v930_v60, 0  ;;  %v10840_v57 = vmov 0  ;;  %vm7880_vm6 = vcmp.ne.s32.totalorder %v931_v3, 0  ;;  %v10843_v46 = vmov 0  ;;  %1036 = vmax.xlane.f32.xlu1 %v1035_v34 }
 0x15c   : > { %1021 = vmax.xlane.f32.xlu2 %v1020_v56  ;;  %v10841_v57 = vsel %vm7876_vm10, 4294967295, %v10840_v57  ;;  %v10844_v46 = vsel %vm7880_vm6, 4294967295, %v10843_v46  ;;  %v858_v33 = vpack.c.b16 %v827_v5, %v826_v35  ;;  %v755_v50 = vmul.f32 0.2, %v723_v37 }
 0x15d   : > { %10842 = vst [vmem:[#allocation75_spill] sm:$0xff] %v10841_v57  ;;  %v794_v42 = vmax.f32 %v730_v38, %v762_v27  ;;  %v795_v49 = vmax.f32 %v731_v24, %v763_v41  ;;  %v864_v55 = vpack.c.b16 %v833_v0, %v832_v26  ;;  %v10497_v29 = vmov 1  }
 0x15e   : > { %10845 = vst [vmem:[#allocation76_spill] sm:$0xff] %v10844_v46  ;;  %6305 = vset.pattern.permute.xlu0 %v10497_v29  ;;  %v728_v30 = vadd.f32 %v7485_v52, %v686_v45  ;;  %v859_v39 = vpack.c.b8 %v858_v33, %v858_v33  ;;  %6304 = vset.pattern.permute.xlu1 %v10497_v29  ;;  %v10852_v0 = vmov 0  ;;  %v10886_v57 = vmov 1  }
 0x15f   : > { %6303 = vset.pattern.permute.xlu2 %v10497_v29  ;;  %v729_v60 = vadd.f32 %v7487_v54, %v686_v45  ;;  %v7891_v3 = vsel %vm7876_vm10, %v794_v42, -1e+30  ;;  %v7895_v35 = vsel %vm7880_vm6, %v795_v49, -1e+30  ;;  %v865_v38 = vpack.c.b8 %v864_v55, %v864_v55 }
 0x160   : > { %v1041_v24 = vmax.f32 %v7891_v3, %v7895_v35  ;;  %vm879_vm3 = vnez %v859_v39  ;;  %v786_v52 = vmax.f32 %v7695_v43, %v754_v51  ;;  %v787_v33 = vmax.f32 %v723_v37, %v755_v50 }
 0x161   : > { %v895_v63 = vsel %vm879_vm3, 16843009, %v10792_v62  ;;  %vm882_vm5 = vnez %v865_v38  ;;  %v760_v5 = vmul.f32 0.2, %v728_v30  ;;  %v761_v45 = vmul.f32 0.2, %v729_v60 }
 0x162   : > { %v922_v54 = vunpack.c.0.s8 %v895_v63  ;;  %v923_v34 = vunpack.c.1.s8 %v895_v63  ;;  %v898_v56 = vsel %vm882_vm5, 16843009, %v10792_v62  ;;  %1042 = vmax.xlane.f32.xlu0 %v1041_v24  ;;  %v10846_v49 = vmov 0  ;;  %v7991_v63 = vld [vmem:[#allocation2 + $0x38] sm:$0xff] }
 0x163   : > { %v10849_v55 = vmov 0  ;;  %v928_v43 = vunpack.c.0.s8 %v898_v56  ;;  %v929_v50 = vunpack.c.1.s8 %v898_v56  ;;  %v792_v41 = vmax.f32 %v728_v30, %v760_v5  ;;  %10867 = vst [vmem:[#allocation90_spill] sm:$0xff] %v7991_v63 }
 0x164   : > { %vm7902_vm6 = vcmp.ne.s32.totalorder %v922_v54, 0  ;;  %vm7906_vm10 = vcmp.ne.s32.totalorder %v923_v34, 0  ;;  %v793_v26 = vmax.f32 %v729_v60, %v761_v45  ;;  %v10855_v42 = vmov 0 }
 0x165   : > { %v10847_v49 = vsel %vm7902_vm6, 4294967295, %v10846_v49  ;;  %v10850_v55 = vsel %vm7906_vm10, 4294967295, %v10849_v55  ;;  %v7912_v37 = vsel %vm7902_vm6, %v786_v52, -1e+30  ;;  %v7916_v51 = vsel %vm7906_vm10, %v787_v33, -1e+30 }
 0x166   : > { %10848 = vst [vmem:[#allocation77_spill] sm:$0xff] %v10847_v49  ;;  %v1029_v27 = vmax.f32 %v7912_v37, %v7916_v51  ;;  %vm7920_vm5 = vcmp.ne.s32.totalorder %v928_v43, 0  ;;  %vm7924_vm3 = vcmp.ne.s32.totalorder %v929_v50, 0  ;;  %v7987_v52 = vld [vmem:[#allocation2 + $0x30] sm:$0xff]  ;;  %v7989_v33 = vld [vmem:[#allocation2 + $0x18] sm:$0xff] }
 0x167   : > { %10851 = vst [vmem:[#allocation78_spill] sm:$0xff] %v10850_v55  ;;  %v10853_v0 = vsel %vm7920_vm5, 4294967295, %v10852_v0  ;;  %v10856_v42 = vsel %vm7924_vm3, 4294967295, %v10855_v42  ;;  %v7930_v39 = vsel %vm7920_vm5, %v792_v41, -1e+30  ;;  %v8008_v41 = vld [vmem:[#allocation2 + $0x48] sm:$0xff] }
 0x168   : > { %1030 = vmax.xlane.f32.xlu2 %v1029_v27  ;;  %10854 = vst [vmem:[#allocation79_spill] sm:$0xff] %v10853_v0  ;;  %v7934_v38 = vsel %vm7924_vm3, %v793_v26, -1e+30  ;;  %vm10552_vm3 = vcmask 7168   ;;  %v8010_v26 = vld [vmem:[#allocation2 + $0x28] sm:$0xff] }
 0x169   : > { %10857 = vst [vmem:[#allocation80_spill] sm:$0xff] %v10856_v42  ;;  %v1038_v30 = vmax.f32 %v7930_v39, %v7934_v38 }
 0x16a   : > { %10865 = vst [vmem:[#allocation88_spill] sm:$0xff] %v7987_v52 }
 0x16b   : > { %10866 = vst [vmem:[#allocation89_spill] sm:$0xff] %v7989_v33 }
 0x16c   : > { %10871 = vst [vmem:[#allocation94_spill] sm:$0xff] %v8008_v41 }
 0x16d   : > { %10872 = vst [vmem:[#allocation95_spill] sm:$0xff] %v8010_v26 }
 0x170   : > { %1039 = vmax.xlane.f32.xlu2 %v1038_v30  ;;  %v8014_v30 = vld [vmem:[#allocation2 + $0x50] sm:$0xff] }
 0x171   : > { %10873 = vst [vmem:[#allocation96_spill] sm:$0xff] %v8014_v30 }
 0x174   : > { %1680 = vperm.xlu1 %6304, %v7424_v14  }
 0x176   : > { %1684 = vperm.xlu0 %6305, %v7406_v9   ;;  %v7953_v9 = vld [vmem:[#allocation2 + $0x10] sm:$0xff] }
 0x177   : > { %10858 = vst [vmem:[#allocation81_spill] sm:$0xff] %v7953_v9 }
 0x17c   : > { %1692 = vperm.xlu1 %6304, %v7414_v12   ;;  %v7955_v12 = vld [vmem:[#allocation2] sm:$0xff] }
 0x17e   : > { %1712 = vperm.xlu0 %6305, %v7448_v20  }
 0x184   : > { %1700 = vperm.xlu1 %6304, %v7436_v17  }
 0x186   : > { %1724 = vperm.xlu0 %6305, %v7460_v23  }
 0x188   : > { %1676 = vperm.xlu2 %6303, %v7409_v10  }
 0x18c   : > { %1708 = vperm.xlu1 %6304, %v7439_v18   ;;  %v7970_v18 = vld [vmem:[#allocation2 + $0x8] sm:$0xff] }
 0x18d   : > { %10861 = vst [vmem:[#allocation84_spill] sm:$0xff] %v7970_v18 }
 0x18e   : > { %6308 = vset.pattern.permute.xlu0 %v10792_v62 }
 0x190   : > { %1688 = vperm.xlu2 %6303, %v7421_v13  }
 0x194   : > { %1720 = vperm.xlu1 %6304, %v7451_v21  }
 0x198   : > { %1696 = vperm.xlu2 %6303, %v7427_v15  }
 0x19c   : > { %6306 = vset.pattern.permute.xlu1 %v10792_v62 }
 0x1a0   : > { %1704 = vperm.xlu2 %6303, %v7433_v16  }
 0x1a5   : > { %v1004_v10 = vpop.xlane.xlu0 %1003 }
 0x1a6   : > { %v1046_v14 = vmax.f32 %v7953_v9, %v1004_v10 }
 0x1a7   : > { %v998_v13 = vpop.xlane.xlu1 %997 }
 0x1a8   : > { %1716 = vperm.xlu2 %6303, %v7445_v19   ;;  %v7959_v17 = vmax.f32 %v1046_v14, 0.0  ;;  %v1044_v15 = vmax.f32 %v7955_v12, %v998_v13  ;;  %v7972_v19 = vld [vmem:[#allocation2 + $0x20] sm:$0xff] }
 0x1a9   : > { %10862 = vst [vmem:[#allocation85_spill] sm:$0xff] %v7972_v19 }
 0x1aa   : > { %10859 = vst [vmem:[#allocation82_spill] sm:$0xff] %v7959_v17  ;;  %v7964_v16 = vmax.f32 %v1044_v15, 0.0  ;;  %1088 = vperm.xlu0 %6308, %v7959_v17  }
 0x1ab   : > { %1415 = vst.msk [vmem:[#allocation2 + $0x10] sm:$0xff] %vm10552_vm3, %v7959_v17 }
 0x1ac   : > { %10860 = vst [vmem:[#allocation83_spill] sm:$0xff] %v7964_v16  ;;  %1078 = vperm.xlu1 %6306, %v7964_v16  }
 0x1ad   : > { %1413 = vst.msk [vmem:[#allocation2] sm:$0xff] %vm10552_vm3, %v7964_v16 }
 0x1b0   : > { %1728 = vperm.xlu2 %6303, %v7457_v22   ;;  %v1001_v20 = vpop.xlane.xlu2 %1000 }
 0x1b1   : > { %v1010_v21 = vpop.xlane.xlu1 %1009  ;;  %v1045_v22 = vmax.f32 %v7970_v18, %v1001_v20 }
 0x1b2   : > { %v1048_v23 = vmax.f32 %v7972_v19, %v1010_v21 }
 0x1b3   : > { %v7977_v60 = vmax.f32 %v1045_v22, 0.0 }
 0x1b4   : > { %v7979_v24 = vmax.f32 %v1048_v23, 0.0 }
 0x1b5   : > { %10863 = vst [vmem:[#allocation86_spill] sm:$0xff] %v7977_v60 }
 0x1b6   : > { %10864 = vst [vmem:[#allocation87_spill] sm:$0xff] %v7979_v24  ;;  %1098 = vperm.xlu0 %6308, %v7979_v24  }
 0x1b7   : > { %1414 = vst.msk [vmem:[#allocation2 + $0x8] sm:$0xff] %vm10552_vm3, %v7977_v60 }
 0x1b8   : > { %6307 = vset.pattern.permute.xlu2 %v10792_v62  ;;  %1417 = vst.msk [vmem:[#allocation2 + $0x20] sm:$0xff] %vm10552_vm3, %v7979_v24  ;;  %v1007_v54 = vpop.xlane.xlu2 %1006 }
 0x1b9   : > { %1083 = vperm.xlu2 %6307, %v7977_v60   ;;  %v1047_v56 = vmax.f32 %v7989_v33, %v1007_v54  ;;  %v8032_v54 = vld [vmem:[#allocation2 + $0x60] sm:$0xff] }
 0x1ba   : > { %v1019_v5 = vpop.xlane.xlu1 %1018  ;;  %10877 = vst [vmem:[#allocation100_spill] sm:$0xff] %v8032_v54 }
 0x1bb   : > { %v1016_v62 = vpop.xlane.xlu0 %1015  ;;  %v1051_v45 = vmax.f32 %v7991_v63, %v1019_v5  ;;  %v7998_v50 = vmax.f32 %v1047_v56, 0.0  ;;  %v8038_v56 = vld [vmem:[#allocation2 + $0x68] sm:$0xff] }
 0x1bc   : > { %v1050_v34 = vmax.f32 %v7987_v52, %v1016_v62  ;;  %10879 = vst [vmem:[#allocation102_spill] sm:$0xff] %v8038_v56 }
 0x1bd   : > { %10869 = vst [vmem:[#allocation92_spill] sm:$0xff] %v7998_v50  ;;  %v8000_v27 = vmax.f32 %v1051_v45, 0.0  ;;  %1093 = vperm.xlu1 %6306, %v7998_v50  }
 0x1be   : > { %v7996_v43 = vmax.f32 %v1050_v34, 0.0  ;;  %1416 = vst.msk [vmem:[#allocation2 + $0x18] sm:$0xff] %vm10552_vm3, %v7998_v50  ;;  %v8034_v34 = vld [vmem:[#allocation2 + $0x40] sm:$0xff] }
 0x1bf   : > { %10870 = vst [vmem:[#allocation93_spill] sm:$0xff] %v8000_v27  ;;  %1113 = vperm.xlu0 %6308, %v8000_v27  }
 0x1c0   : > { %10868 = vst [vmem:[#allocation91_spill] sm:$0xff] %v7996_v43 }
 0x1c1   : > { %1419 = vst.msk [vmem:[#allocation2 + $0x30] sm:$0xff] %vm10552_vm3, %v7996_v43 }
 0x1c2   : > { %1420 = vst.msk [vmem:[#allocation2 + $0x38] sm:$0xff] %vm10552_vm3, %v8000_v27  ;;  %v1028_v20 = vpop.xlane.xlu1 %1027 }
 0x1c3   : > { %v1054_v21 = vmax.f32 %v8014_v30, %v1028_v20  ;;  %10878 = vst [vmem:[#allocation101_spill] sm:$0xff] %v8034_v34 }
 0x1c4   : > { %v1025_v10 = vpop.xlane.xlu0 %1024 }
 0x1c5   : > { %v1053_v13 = vmax.f32 %v8008_v41, %v1025_v10  ;;  %v8023_v62 = vmax.f32 %v1054_v21, 0.0  ;;  %1108 = vperm.xlu1 %6306, %v7996_v43   ;;  %v6026_v43 = vld [vmem:[%s7336_s12 + $0x38] sm:$0xff] }
 0x1c6   : > { %1573 = vmatpush.bf16.msra.mxu0 %v6026_v43  ;;  %6084 = vmatpush.bf16.msra.mxu1 %v6026_v43 }
 0x1c7   : > { %v1013_v14 = vpop.xlane.xlu2 %1012  ;;  %v8019_v22 = vmax.f32 %v1053_v13, 0.0  ;;  %10876 = vst [vmem:[#allocation99_spill] sm:$0xff] %v8023_v62  ;;  %1128 = vperm.xlu0 %6308, %v8023_v62   ;;  %6085 = vmatpush.bf16.msra.mxu2 %v6026_v43 }
 0x1c8   : > { %v1049_v15 = vmax.f32 %v8010_v26, %v1013_v14  ;;  %1423 = vst.msk [vmem:[#allocation2 + $0x50] sm:$0xff] %vm10552_vm3, %v8023_v62  ;;  %6086 = vmatpush.bf16.msra.mxu3 %v6026_v43 }
 0x1c9   : > { %10874 = vst [vmem:[#allocation97_spill] sm:$0xff] %v8019_v22 }
 0x1ca   : > { %v8021_v23 = vmax.f32 %v1049_v15, 0.0  ;;  %1422 = vst.msk [vmem:[#allocation2 + $0x48] sm:$0xff] %vm10552_vm3, %v8019_v22 }
 0x1cc   : > { %10875 = vst [vmem:[#allocation98_spill] sm:$0xff] %v8021_v23  ;;  %1103 = vperm.xlu2 %6307, %v8021_v23  }
 0x1cd   : > { %1418 = vst.msk [vmem:[#allocation2 + $0x28] sm:$0xff] %vm10552_vm3, %v8021_v23  ;;  %v1034_v5 = vpop.xlane.xlu0 %1033  ;;  %1123 = vperm.xlu1 %6306, %v8019_v22  }
 0x1ce   : > { %v1056_v10 = vmax.f32 %v8032_v54, %v1034_v5  ;;  %v1037_v13 = vpop.xlane.xlu1 %1036  ;;  %v8056_v5 = vld [vmem:[#allocation2 + $0x78] sm:$0xff] }
 0x1cf   : > { %v1022_v45 = vpop.xlane.xlu2 %1021  ;;  %v1057_v15 = vmax.f32 %v8038_v56, %v1037_v13  ;;  %10883 = vst [vmem:[#allocation106_spill] sm:$0xff] %v8056_v5 }
 0x1d0   : > { %v1052_v14 = vmax.f32 %v8034_v34, %v1022_v45  ;;  %v8043_v20 = vmax.f32 %v1056_v10, 0.0 }
 0x1d1   : > { %v8047_v29 = vmax.f32 %v1057_v15, 0.0 }
 0x1d2   : > { %10880 = vst [vmem:[#allocation103_spill] sm:$0xff] %v8043_v20  ;;  %v8045_v21 = vmax.f32 %v1052_v14, 0.0  ;;  %v8061_v14 = vld [vmem:[#allocation2 + $0x58] sm:$0xff] }
 0x1d3   : > { %10882 = vst [vmem:[#allocation105_spill] sm:$0xff] %v8047_v29  ;;  %1143 = vperm.xlu0 %6308, %v8047_v29  }
 0x1d4   : > { %10881 = vst [vmem:[#allocation104_spill] sm:$0xff] %v8045_v21  ;;  %1118 = vperm.xlu2 %6307, %v8045_v21  }
 0x1d5   : > { %1425 = vst.msk [vmem:[#allocation2 + $0x60] sm:$0xff] %vm10552_vm3, %v8043_v20  ;;  %v1043_v45 = vpop.xlane.xlu0 %1042  ;;  %1138 = vperm.xlu1 %6306, %v8043_v20  }
 0x1d6   : > { %1421 = vst.msk [vmem:[#allocation2 + $0x40] sm:$0xff] %vm10552_vm3, %v8045_v21  ;;  %v1059_v10 = vmax.f32 %v8056_v5, %v1043_v45  ;;  %v8075_v45 = vld [vmem:[#allocation2 + $0x70] sm:$0xff]  ;;  %v1740_v5 = vperm.slane %v7473_v36, 5 }
 0x1d7   : > { %1426 = vst.msk [vmem:[#allocation2 + $0x68] sm:$0xff] %vm10552_vm3, %v8047_v29 }
 0x1d8   : > { %10884 = vst [vmem:[#allocation107_spill] sm:$0xff] %v8061_v14  ;;  %v8063_v13 = vmax.f32 %v1059_v10, 0.0  ;;  %v8088_v20 = vperm.slane %v1740_v5, 1 }
 0x1d9   : > { %10888 = vst [vmem:[#allocation110_spill] sm:$0xff] %v8075_v45 }
 0x1da   : > { %10885 = vst [vmem:[#allocation108_spill] sm:$0xff] %v8063_v13 }
 0x1db   : > { %v1031_v15 = vpop.xlane.xlu2 %1030  ;;  %1428 = vst.msk [vmem:[#allocation2 + $0x78] sm:$0xff] %vm10552_vm3, %v8063_v13  ;;  %6310 = vset.pattern.permute.xlu0 %v10886_v57 }
 0x1dc   : > { %v1055_v46 = vmax.f32 %v8061_v14, %v1031_v15  ;;  %v1739_v15 = vperm.slane %v7473_v36, 1 }
 0x1dd   : > { %1153 = vperm.xlu1 %6306, %v8063_v13  }
 0x1de   : > { %v8070_v42 = vmax.f32 %v1055_v46, 0.0  ;;  %v8086_v46 = vperm.slane %v1739_v15, 1 }
 0x1e0   : > { %10887 = vst [vmem:[#allocation109_spill] sm:$0xff] %v8070_v42  ;;  %1133 = vperm.xlu2 %6307, %v8070_v42  }
 0x1e1   : > { %1424 = vst.msk [vmem:[#allocation2 + $0x58] sm:$0xff] %vm10552_vm3, %v8070_v42 }
 0x1e3   : > { %v1040_v10 = vpop.xlane.xlu2 %1039 }
 0x1e4   : > { %v1058_v0 = vmax.f32 %v8075_v45, %v1040_v10 }
 0x1e5   : > { %6309 = vset.pattern.permute.xlu1 %v10886_v57 }
 0x1e6   : > { %v8081_v54 = vmax.f32 %v1058_v0, 0.0  ;;  %v1681_v56 = vpop.permute.xlu1 %1680 }
 0x1e7   : > { %v1747_v50 = vadd.f32 %v8086_v46, %v1681_v56 }
 0x1e8   : > { %10889 = vst [vmem:[#allocation111_spill] sm:$0xff] %v8081_v54  ;;  %1148 = vperm.xlu2 %6307, %v8081_v54   ;;  %v1685_v10 = vpop.permute.xlu0 %1684 }
 0x1e9   : > { %1427 = vst.msk [vmem:[#allocation2 + $0x70] sm:$0xff] %vm10552_vm3, %v8081_v54  ;;  %v1749_v13 = vadd.f32 %v8086_v46, %v1685_v10  ;;  %v1750_v22 = vadd.f32 %v8088_v20, %v1685_v10  ;;  %v1779_v27 = vmul.f32 0.2, %v1747_v50 }
 0x1eb   : > { %v1677_v29 = vpop.permute.xlu2 %1676  ;;  %v1781_v0 = vmul.f32 0.2, %v1749_v13  ;;  %v1782_v45 = vmul.f32 0.2, %v1750_v22 }
 0x1ec   : > { %v1745_v21 = vadd.f32 %v8086_v46, %v1677_v29 }
 0x1ed   : > { %v1813_v62 = vmax.f32 %v1749_v13, %v1781_v0  ;;  %v1814_v15 = vmax.f32 %v1750_v22, %v1782_v45 }
 0x1ee   : > { %v1693_v36 = vpop.permute.xlu1 %1692 }
 0x1ef   : > { %v8099_v42 = vsel %vm7537_vm15, %v1813_v62, -1e+30  ;;  %v8103_v10 = vsel %vm7541_vm0, %v1814_v15, -1e+30 }
 0x1f0   : > { %6311 = vset.pattern.permute.xlu2 %v10886_v57  ;;  %10890 = vst [vmem:[#allocation112_spill] sm:$0xff] %v8099_v42  ;;  %v1748_v57 = vadd.f32 %v8088_v20, %v1681_v56  ;;  %v1879_v22 = vmax.f32 %v8099_v42, %v8103_v10  ;;  %v1746_v56 = vadd.f32 %v8088_v20, %v1677_v29  ;;  %v6025_v42 = vld [vmem:[%s7336_s12 + $0x30] sm:$0xff] }
 0x1f1   : > { %10892 = vst [vmem:[#allocation113_spill] sm:$0xff] %v8103_v10  ;;  %v1811_v29 = vmax.f32 %v1747_v50, %v1779_v27  ;;  %1574 = vmatpush.bf16.msra.mxu0 %v6025_v42  ;;  %6087 = vmatpush.bf16.msra.mxu1 %v6025_v42 }
 0x1f2   : > { %v1780_v40 = vmul.f32 0.2, %v1748_v57  ;;  %6088 = vmatpush.bf16.msra.mxu2 %v6025_v42  ;;  %6089 = vmatpush.bf16.msra.mxu3 %v6025_v42  ;;  %v6023_v42 = vld [vmem:[%s7336_s12 + $0x20] sm:$0xff] }
 0x1f3   : > { %v1689_v54 = vpop.permute.xlu2 %1688 }
 0x1f4   : > { %v1812_v60 = vmax.f32 %v1748_v57, %v1780_v40  ;;  %v1751_v50 = vadd.f32 %v8086_v46, %v1689_v54  ;;  %v1752_v40 = vadd.f32 %v8088_v20, %v1689_v54  ;;  %v8133_v57 = vsel %vm7588_vm7, %v1811_v29, -1e+30 }
 0x1f5   : > { %10898 = vst [vmem:[#allocation116_spill] sm:$0xff] %v8133_v57 }
 0x1f6   : > { %v8095_v5 = vpop.permute.xlu1 %1700  ;;  %v8137_v33 = vsel %vm7595_vm8, %v1812_v60, -1e+30 }
 0x1f7   : > { %10900 = vst [vmem:[#allocation117_spill] sm:$0xff] %v8137_v33  ;;  %v1876_v29 = vmax.f32 %v8133_v57, %v8137_v33 }
 0x1fb   : > { %v1697_v13 = vpop.permute.xlu2 %1696 }
 0x1fc   : > { %v1755_v62 = vadd.f32 %v8086_v46, %v1697_v13  ;;  %v1756_v45 = vadd.f32 %v8088_v20, %v1697_v13 }
 0x1fd   : > { %1880 = vmax.xlane.f32.xlu0 %v1879_v22 }
 0x1fe   : > { %v1787_v0 = vmul.f32 0.2, %v1755_v62  ;;  %v1788_v15 = vmul.f32 0.2, %v1756_v45  ;;  %v1709_v24 = vpop.permute.xlu1 %1708 }
 0x1ff   : > { %v1761_v10 = vadd.f32 %v8086_v46, %v1709_v24  ;;  %v1762_v43 = vadd.f32 %v8088_v20, %v1709_v24  ;;  %v1778_v24 = vmul.f32 0.2, %v1746_v56 }
 0x200   : > { %v1819_v41 = vmax.f32 %v1755_v62, %v1787_v0  ;;  %v1820_v23 = vmax.f32 %v1756_v45, %v1788_v15  ;;  %v6024_v62 = vld [vmem:[%s7336_s12 + $0x28] sm:$0xff]  ;;  %v1777_v45 = vmul.f32 0.2, %v1745_v21  ;;  %v1753_v0 = vadd.f32 %v8086_v46, %v1693_v36 }
 0x201   : > { %v1793_v17 = vmul.f32 0.2, %v1761_v10  ;;  %v1794_v63 = vmul.f32 0.2, %v1762_v43  ;;  %1575 = vmatpush.bf16.msra.mxu0 %v6024_v62  ;;  %6090 = vmatpush.bf16.msra.mxu1 %v6024_v62 }
 0x202   : > { %v8118_v13 = vsel %vm7612_vm11, %v1819_v41, -1e+30  ;;  %v8122_v22 = vsel %vm7636_vm14, %v1820_v23, -1e+30  ;;  %v1754_v41 = vadd.f32 %v8088_v20, %v1693_v36  ;;  %v1809_v14 = vmax.f32 %v1745_v21, %v1777_v45  ;;  %6091 = vmatpush.bf16.msra.mxu2 %v6024_v62  ;;  %6092 = vmatpush.bf16.msra.mxu3 %v6024_v62  ;;  %v10904_v62 = vld [vmem:[#allocation39_spill] sm:$0xff] }
 0x203   : > { %10894 = vst [vmem:[#allocation114_spill] sm:$0xff] %v8118_v13  ;;  %v1705_v52 = vpop.permute.xlu2 %1704  ;;  %v1888_v23 = vmax.f32 %v8118_v13, %v8122_v22  ;;  %v1825_v15 = vmax.f32 %v1761_v10, %v1793_v17  ;;  %v1826_v16 = vmax.f32 %v1762_v43, %v1794_v63  ;;  %v1785_v54 = vmul.f32 0.2, %v1753_v0 }
 0x204   : > { %10896 = vst [vmem:[#allocation115_spill] sm:$0xff] %v8122_v22  ;;  %v1810_v22 = vmax.f32 %v1746_v56, %v1778_v24  ;;  %v1786_v10 = vmul.f32 0.2, %v1754_v41  ;;  %v1783_v21 = vmul.f32 0.2, %v1751_v50  ;;  %v1759_v4 = vadd.f32 %v8086_v46, %v1705_v52 }
 0x205   : > { %1889 = vmax.xlane.f32.xlu0 %v1888_v23  ;;  %v8142_v17 = vsel %vm7810_vm2, %v1825_v15, -1e+30  ;;  %v8146_v63 = vsel %vm7820_vm9, %v1826_v16, -1e+30  ;;  %v1784_v56 = vmul.f32 0.2, %v1752_v40  ;;  %1576 = vmatpush.bf16.msra.mxu0 %v6023_v42  ;;  %vm10905_vm3 = vnez %v10904_v62 }
 0x206   : > { %v1721_v36 = vpop.permute.xlu1 %1720  ;;  %10901 = vst [vmem:[#allocation118_spill] sm:$0xff] %v8142_v17  ;;  %v1897_v16 = vmax.f32 %v8142_v17, %v8146_v63  ;;  %v6022_v15 = vld [vmem:[%s7336_s12 + $0x18] sm:$0xff]  ;;  %v8158_v30 = vsel %vm7545_vm1, %v1809_v14, -1e+30  ;;  %6093 = vmatpush.bf16.msra.mxu1 %v6023_v42  ;;  %6094 = vmatpush.bf16.msra.mxu2 %v6023_v42  ;;  %v1760_v27 = vadd.f32 %v8088_v20, %v1705_v52  ;;  %v6021_v62 = vld [vmem:[%s7336_s12 + $0x10] sm:$0xff] }
 0x207   : > { %10902 = vst [vmem:[#allocation119_spill] sm:$0xff] %v8146_v63  ;;  %v1767_v60 = vadd.f32 %v8086_v46, %v1721_v36  ;;  %v1768_v43 = vadd.f32 %v8088_v20, %v1721_v36  ;;  %v8162_v36 = vsel %vm10905_vm3, %v1810_v22, -1e+30  ;;  %v1817_v13 = vmax.f32 %v1753_v0, %v1785_v54  ;;  %6095 = vmatpush.bf16.msra.mxu3 %v6023_v42  ;;  %v10906_v42 = vld [vmem:[#allocation32_spill] sm:$0xff] }
 0x208   : > { %v1818_v33 = vmax.f32 %v1754_v41, %v1786_v10  ;;  %1877 = vmax.xlane.f32.xlu1 %v1876_v29  ;;  %v1873_v58 = vmax.f32 %v8158_v30, %v8162_v36  ;;  %v1815_v14 = vmax.f32 %v1751_v50, %v1783_v21  ;;  %v1816_v57 = vmax.f32 %v1752_v40, %v1784_v56  ;;  %v10908_v50 = vld [vmem:[#allocation33_spill] sm:$0xff]  ;;  %v1713_v10 = vpop.permute.xlu0 %1712  ;;  %v10914_v21 = vld [vmem:[#allocation43_spill] sm:$0xff] }
 0x209   : > { %v1799_v24 = vmul.f32 0.2, %v1767_v60  ;;  %v1800_v23 = vmul.f32 0.2, %v1768_v43  ;;  %1577 = vmatpush.bf16.msra.mxu0 %v6022_v15  ;;  %v1757_v22 = vadd.f32 %v8086_v46, %v8095_v5  ;;  %v1758_v52 = vadd.f32 %v8088_v20, %v8095_v5  ;;  %v6020_v56 = vld [vmem:[%s7336_s12 + $0x8] sm:$0xff] }
 0x20a   : > { %v1791_v0 = vmul.f32 0.2, %v1759_v4  ;;  %6096 = vmatpush.bf16.msra.mxu1 %v6022_v15  ;;  %6097 = vmatpush.bf16.msra.mxu2 %v6022_v15  ;;  %v1792_v41 = vmul.f32 0.2, %v1760_v27  ;;  %vm10907_vm0 = vnez %v10906_v42  ;;  %vm10909_vm15 = vnez %v10908_v50 }
 0x20b   : > { %v1717_v45 = vpop.permute.xlu2 %1716  ;;  %v1831_v63 = vmax.f32 %v1767_v60, %v1799_v24  ;;  %v1832_v17 = vmax.f32 %v1768_v43, %v1800_v23  ;;  %v8174_v54 = vsel %vm10907_vm0, %v1817_v13, -1e+30  ;;  %v8178_v40 = vsel %vm10909_vm15, %v1818_v33, -1e+30  ;;  %6098 = vmatpush.bf16.msra.mxu3 %v6022_v15 }
 0x20c   : > { %vm10915_vm0 = vnez %v10914_v21  ;;  %v1789_v29 = vmul.f32 0.2, %v1757_v22  ;;  %v1790_v24 = vmul.f32 0.2, %v1758_v52  ;;  %v1765_v23 = vadd.f32 %v8086_v46, %v1717_v45 }
 0x20d   : > { %1898 = vmax.xlane.f32.xlu0 %v1897_v16  ;;  %v8182_v60 = vsel %vm7902_vm6, %v1831_v63, -1e+30  ;;  %v8186_v5 = vsel %vm7906_vm10, %v1832_v17, -1e+30  ;;  %v8196_v33 = vsel %vm10915_vm0, %v1816_v57, -1e+30  ;;  %1578 = vmatpush.bf16.msra.mxu0 %v6021_v62  ;;  %v1885_v63 = vmax.f32 %v8174_v54, %v8178_v40 }
 0x20e   : > { %10910 = vst [vmem:[#allocation120_spill] sm:$0xff] %v8182_v60  ;;  %v1823_v17 = vmax.f32 %v1759_v4, %v1791_v0  ;;  %6099 = vmatpush.bf16.msra.mxu1 %v6021_v62  ;;  %6100 = vmatpush.bf16.msra.mxu2 %v6021_v62  ;;  %v1766_v16 = vadd.f32 %v8088_v20, %v1717_v45  ;;  %v6019_v4 = vld [vmem:[%s7336_s12] sm:$0xff]  ;;  %vm10924_vm10 = vnez %v10812_v53 }
 0x20f   : > { %10911 = vst [vmem:[#allocation121_spill] sm:$0xff] %v8186_v5  ;;  %v1906_v15 = vmax.f32 %v8182_v60, %v8186_v5  ;;  %v1824_v57 = vmax.f32 %v1760_v27, %v1792_v41  ;;  %6101 = vmatpush.bf16.msra.mxu3 %v6021_v62  ;;  %v1764_v50 = vadd.f32 %v8088_v20, %v1713_v10  ;;  %v1797_v27 = vmul.f32 0.2, %v1765_v23 }
 0x210   : > { %1886 = vmax.xlane.f32.xlu1 %v1885_v63  ;;  %v1821_v0 = vmax.f32 %v1757_v22, %v1789_v29  ;;  %v1822_v55 = vmax.f32 %v1758_v52, %v1790_v24  ;;  %v8212_v45 = vsel %vm7668_vm13, %v1823_v17, -1e+30  ;;  %v1798_v62 = vmul.f32 0.2, %v1766_v16  ;;  %v8218_v22 = vpop.permute.xlu0 %1724  ;;  %v10916_v52 = vld [vmem:[#allocation54_spill] sm:$0xff]  ;;  %v10918_v17 = vld [vmem:[#allocation53_spill] sm:$0xff] }
 0x211   : > { %1874 = vmax.xlane.f32.xlu2 %v1873_v58  ;;  %v10912_v58 = vld [vmem:[#allocation42_spill] sm:$0xff]  ;;  %1579 = vmatpush.bf16.msra.mxu0 %v6020_v56  ;;  %v8216_v41 = vsel %vm7672_vm12, %v1824_v57, -1e+30  ;;  %v1796_v63 = vmul.f32 0.2, %v1764_v50  ;;  %vm10917_vm13 = vnez %v10784_v44  ;;  %vm10919_vm15 = vnez %v10918_v17  ;;  %v10920_v57 = vld [vmem:[#allocation55_spill] sm:$0xff] }
 0x212   : > { %vm10913_vm9 = vnez %v10912_v58  ;;  %6102 = vmatpush.bf16.msra.mxu1 %v6020_v56  ;;  %6103 = vmatpush.bf16.msra.mxu2 %v6020_v56  ;;  %v8223_v24 = vsel %vm10917_vm13, %v1821_v0, -1e+30  ;;  %v1829_v48 = vmax.f32 %v1765_v23, %v1797_v27  ;;  %v1830_v49 = vmax.f32 %v1766_v16, %v1798_v62  ;;  %v6034_v17 = vld [vmem:[%s7336_s12 + $0x78] sm:$0xff]  ;;  %v10925_v16 = vld [vmem:[#allocation45_spill] sm:$0xff] }
 0x213   : > { %v8188_v43 = vpop.permute.xlu2 %1728  ;;  %v8192_v13 = vsel %vm10913_vm9, %v1815_v14, -1e+30  ;;  %v1763_v14 = vadd.f32 %v8086_v46, %v1713_v10  ;;  %6104 = vmatpush.bf16.msra.mxu3 %v6020_v56  ;;  %v1894_v56 = vmax.f32 %v8212_v45, %v8216_v41  ;;  %v1828_v21 = vmax.f32 %v1764_v50, %v1796_v63 }
 0x214   : > { %v1882_v42 = vmax.f32 %v8192_v13, %v8196_v33  ;;  %vm10921_vm12 = vnez %v10806_v25  ;;  %vm10923_vm13 = vnez %v10803_v61 }
 0x215   : > { %1907 = vmax.xlane.f32.xlu0 %v1906_v15  ;;  %v1795_v10 = vmul.f32 0.2, %v1763_v14  ;;  %1580 = vmatpush.bf16.msra.mxu0 %v6019_v4  ;;  %v8237_v58 = vsel %vm10921_vm12, %v1829_v48, -1e+30  ;;  %v8249_v50 = vsel %vm10924_vm10, %v1828_v21, -1e+30 }
 0x216   : > { %6105 = vmatpush.bf16.msra.mxu1 %v6019_v4  ;;  %6106 = vmatpush.bf16.msra.mxu2 %v6019_v4  ;;  %vm10599_vm12 = vcmask 15368   ;;  %vm10607_vm10 = vcmask 261120  }
 0x217   : > { %6107 = vmatpush.bf16.msra.mxu3 %v6019_v4  ;;  %v1827_v44 = vmax.f32 %v1763_v14, %v1795_v10 }
 0x218   : > { %1895 = vmax.xlane.f32.xlu1 %v1894_v56 }
 0x219   : > { %1883 = vmax.xlane.f32.xlu2 %v1882_v42  ;;  %v8227_v42 = vsel %vm10919_vm15, %v1822_v55, -1e+30  ;;  %vm10922_vm15 = vnez %v10809_v47  ;;  %v8245_v23 = vsel %vm10923_vm13, %v1827_v44, -1e+30 }
 0x21a   : > { %1622 = vmatpush.bf16.msrb.mxu1 %v6034_v17  ;;  %v1900_v44 = vmax.f32 %v8245_v23, %v8249_v50  ;;  %v10927_v17 = vld [vmem:[#allocation47_spill] sm:$0xff] }
 0x21b   : > { %v1084_v15 = vpop.permute.xlu2 %1083 }
 0x21c   : > { %v1158_v29 = vsub.f32 %v10916_v52, %v1084_v15  ;;  %v1159_v28 = vsub.f32 %v10920_v57, %v1084_v15  ;;  %v1891_v52 = vmax.f32 %v8223_v24, %v8227_v42  ;;  %v8241_v15 = vsel %vm10922_vm15, %v1830_v49, -1e+30  ;;  %v10926_v49 = vld [vmem:[#allocation46_spill] sm:$0xff]  ;;  %v10928_v57 = vld [vmem:[#allocation48_spill] sm:$0xff] }
 0x21d   : > { %v1903_v48 = vmax.f32 %v8237_v58, %v8241_v15 }
 0x21e   : > { %v1192_v0 = vmul.f32 1.442695, %v1158_v29  ;;  %v1194_v55 = vmul.f32 1.442695, %v1159_v28  ;;  %v1089_v28 = vpop.permute.xlu0 %1088  ;;  %v1079_v62 = vpop.permute.xlu1 %1078 }
 0x21f   : > { %v1160_v14 = vsub.f32 %v10925_v16, %v1089_v28  ;;  %v1161_v4 = vsub.f32 %v10926_v49, %v1089_v28  ;;  %v1156_v56 = vsub.f32 %v10927_v17, %v1079_v62  ;;  %v6032_v16 = vld [vmem:[%s7336_s12 + $0x68] sm:$0xff] }
 0x220   : > { %6324 = vpow2.f32 %v1192_v0  ;;  %1904 = vmax.xlane.f32.xlu1 %v1903_v48  ;;  %v6033_v0 = vld [vmem:[%s7336_s12 + $0x70] sm:$0xff] }
 0x221   : > { %1892 = vmax.xlane.f32.xlu2 %v1891_v52  ;;  %6326 = vpow2.f32 %v1194_v55  ;;  %v1196_v10 = vmul.f32 1.442695, %v1160_v14  ;;  %v1198_v21 = vmul.f32 1.442695, %v1161_v4  ;;  %v1157_v52 = vsub.f32 %v10928_v57, %v1079_v62  ;;  %1623 = vmatpush.bf16.msrb.mxu1 %v6033_v0  ;;  %v6031_v62 = vld [vmem:[%s7336_s12 + $0x60] sm:$0xff] }
 0x222   : > { %v1188_v28 = vmul.f32 1.442695, %v1156_v56  ;;  %v10930_v56 = vld [vmem:[#allocation35_spill] sm:$0xff] }
 0x223   : > { %6328 = vpow2.f32 %v1196_v10  ;;  %v1190_v48 = vmul.f32 1.442695, %v1157_v52 }
 0x224   : > { %6330 = vpow2.f32 %v1198_v21  ;;  %v10929_v21 = vld [vmem:[#allocation34_spill] sm:$0xff] }
 0x225   : > { %6332 = vpow2.f32 %v1188_v28  ;;  %1624 = vmatpush.bf16.msrb.mxu1 %v6032_v16 }
 0x226   : > { %v1104_v27 = vpop.permute.xlu2 %1103  ;;  %v6325_v55 = vpop.eup %6324  ;;  %6334 = vpow2.f32 %v1190_v48  ;;  %v6030_v48 = vld [vmem:[%s7336_s12 + $0x58] sm:$0xff] }
 0x227   : > { %v1166_v63 = vsub.f32 %v7656_v7, %v1104_v27  ;;  %v1167_v29 = vsub.f32 %v7679_v11, %v1104_v27  ;;  %v8263_v14 = vpop.eup %6326 }
 0x228   : > { %v1335_v11 = vadd.f32 %v8263_v14, %v6325_v55  ;;  %v1099_v27 = vpop.permute.xlu0 %1098 }
 0x229   : > { %1901 = vmax.xlane.f32.xlu2 %v1900_v44  ;;  %v1208_v49 = vmul.f32 1.442695, %v1166_v63  ;;  %v1210_v7 = vmul.f32 1.442695, %v1167_v29  ;;  %v8267_v44 = vpop.eup %6328  ;;  %v1164_v17 = vsub.f32 %v10929_v21, %v1099_v27  ;;  %v1165_v57 = vsub.f32 %v10930_v56, %v1099_v27  ;;  %1625 = vmatpush.bf16.msrb.mxu1 %v6031_v62 }
 0x22a   : > { %v8272_v63 = vpop.eup %6330 }
 0x22b   : > { %6336 = vpow2.f32 %v1208_v49  ;;  %v1204_v52 = vmul.f32 1.442695, %v1164_v17  ;;  %v1338_v0 = vadd.f32 %v8272_v63, %v8267_v44  ;;  %v1206_v28 = vmul.f32 1.442695, %v1165_v57  ;;  %v6333_v16 = vpop.eup %6332  ;;  %v10932_v57 = vld [vmem:[#allocation57_spill] sm:$0xff] }
 0x22c   : > { %6338 = vpow2.f32 %v1210_v7  ;;  %v8278_v49 = vpop.eup %6334  ;;  %v1429_v21 = vpack.c.bf16 %v6325_v55, %v6333_v16  ;;  %v10933_v55 = vld [vmem:[#allocation63_spill] sm:$0xff] }
 0x22d   : > { %1339 = vadd.xlane.f32.xlu1 %v1338_v0  ;;  %6340 = vpow2.f32 %v1204_v52  ;;  %1626 = vmatpush.bf16.msrb.mxu1 %v6030_v48  ;;  %v10934_v52 = vld [vmem:[#allocation64_spill] sm:$0xff] }
 0x22e   : > { %v1119_v4 = vpop.permute.xlu2 %1118  ;;  %6342 = vpow2.f32 %v1206_v28  ;;  %1581 = vmatmul.bf16.vlgmr.msra.gmra.mxu0 %v1429_v21 }
 0x22f   : > { %v1172_v10 = vsub.f32 %v7830_v1, %v1119_v4  ;;  %v1173_v29 = vsub.f32 %v7838_v59, %v1119_v4  ;;  %v1332_v59 = vadd.f32 %v8278_v49, %v6333_v16  ;;  %v6029_v4 = vld [vmem:[%s7336_s12 + $0x50] sm:$0xff] }
 0x231   : > { %1336 = vadd.xlane.f32.xlu2 %v1335_v11  ;;  %v1220_v1 = vmul.f32 1.442695, %v1172_v10  ;;  %v1222_v27 = vmul.f32 1.442695, %v1173_v29  ;;  %v6337_v56 = vpop.eup %6336  ;;  %v1094_v11 = vpop.permute.xlu1 %1093  ;;  %1333 = vadd.xlane.f32.xlu0 %v1332_v59  ;;  %v10931_v10 = vld [vmem:[#allocation56_spill] sm:$0xff] }
 0x232   : > { %v8281_v7 = vpop.eup %6338  ;;  %v1114_v62 = vpop.permute.xlu0 %1113  ;;  %v1162_v17 = vsub.f32 %v10931_v10, %v1094_v11  ;;  %v1163_v0 = vsub.f32 %v10932_v57, %v1094_v11  ;;  %1627 = vmatpush.bf16.msrb.mxu1 %v6029_v4 }
 0x233   : > { %6344 = vpow2.f32 %v1220_v1  ;;  %v1170_v29 = vsub.f32 %v10933_v55, %v1114_v62  ;;  %v1171_v16 = vsub.f32 %v10934_v52, %v1114_v62  ;;  %v1347_v28 = vadd.f32 %v8281_v7, %v6337_v56  ;;  %v6341_v1 = vpop.eup %6340 }
 0x234   : > { %6346 = vpow2.f32 %v1222_v27  ;;  %v1200_v47 = vmul.f32 1.442695, %v1162_v17  ;;  %v1202_v53 = vmul.f32 1.442695, %v1163_v0  ;;  %v6028_v27 = vld [vmem:[%s7336_s12 + $0x48] sm:$0xff]  ;;  %v8292_v11 = vpop.eup %6342  ;;  %v1433_v62 = vpack.c.bf16 %v6337_v56, %v6341_v1 }
 0x235   : > { %v1216_v25 = vmul.f32 1.442695, %v1170_v29  ;;  %v1218_v48 = vmul.f32 1.442695, %v1171_v16  ;;  %1348 = vadd.xlane.f32.xlu1 %v1347_v28  ;;  %v1344_v4 = vadd.f32 %v8292_v11, %v6341_v1  ;;  %v10936_v29 = vld [vmem:[#allocation65_spill] sm:$0xff]  ;;  %v6027_v16 = vld [vmem:[%s7336_s12 + $0x40] sm:$0xff] }
 0x236   : > { %6348 = vpow2.f32 %v1200_v47  ;;  %1591 = vmatmul.bf16.vlgmr.msra.gmra.mxu1 %v1433_v62 }
 0x237   : > { %6350 = vpow2.f32 %v1216_v25  ;;  %1628 = vmatpush.bf16.msrb.mxu1 %v6028_v27 }
 0x238   : > { %6352 = vpow2.f32 %v1218_v48 }
 0x239   : > { %v8294_v17 = vpop.eup %6344  ;;  %6354 = vpow2.f32 %v1202_v53  ;;  %1345 = vadd.xlane.f32.xlu2 %v1344_v4 }
 0x23a   : > { %v1134_v21 = vpop.permute.xlu2 %1133  ;;  %v8297_v0 = vpop.eup %6346 }
 0x23b   : > { %v1178_v59 = vsub.f32 %v7912_v37, %v1134_v21  ;;  %v1179_v10 = vsub.f32 %v7916_v51, %v1134_v21  ;;  %v1109_v37 = vpop.permute.xlu1 %1108  ;;  %v1129_v25 = vpop.permute.xlu0 %1128  ;;  %v10935_v51 = vld [vmem:[#allocation62_spill] sm:$0xff]  ;;  %v1356_v1 = vadd.f32 %v8297_v0, %v8294_v17  ;;  %1629 = vmatpush.bf16.msrb.mxu1 %v6027_v16 }
 0x23c   : > { %v1168_v56 = vsub.f32 %v10935_v51, %v1109_v37  ;;  %v1169_v52 = vsub.f32 %v10936_v29, %v1109_v37  ;;  %v1176_v28 = vsub.f32 %v7798_v32, %v1129_v25  ;;  %v1177_v21 = vsub.f32 %v7802_v8, %v1129_v25  ;;  %v6349_v53 = vpop.eup %6348 }
 0x23d   : > { %v1232_v57 = vmul.f32 1.442695, %v1178_v59  ;;  %v1234_v55 = vmul.f32 1.442695, %v1179_v10  ;;  %v6351_v59 = vpop.eup %6350  ;;  %v1431_v51 = vpack.c.bf16 %v6349_v53, %v8267_v44  ;;  %1357 = vadd.xlane.f32.xlu1 %v1356_v1 }
 0x23e   : > { %v1212_v48 = vmul.f32 1.442695, %v1168_v56  ;;  %v1228_v62 = vmul.f32 1.442695, %v1176_v28  ;;  %v1214_v4 = vmul.f32 1.442695, %v1169_v52  ;;  %v8309_v37 = vpop.eup %6352 }
 0x23f   : > { %6356 = vpow2.f32 %v1232_v57  ;;  %v1230_v57 = vmul.f32 1.442695, %v1177_v21  ;;  %v8313_v8 = vpop.eup %6354  ;;  %1586 = vmatmul.bf16.gmra.mxu0 %v1431_v51  ;;  %v10937_v28 = vld [vmem:[#allocation68_spill] sm:$0xff] }
 0x240   : > { %6358 = vpow2.f32 %v1234_v55  ;;  %v1353_v55 = vadd.f32 %v8309_v37, %v6351_v59  ;;  %v1341_v44 = vadd.f32 %v8313_v8, %v6349_v53  ;;  %v1771_v53 = vadd.f32 %v8086_v46, %v8188_v43 }
 0x241   : > { %6360 = vpow2.f32 %v1212_v48 }
 0x242   : > { %v1149_v10 = vpop.permute.xlu2 %1148  ;;  %6362 = vpow2.f32 %v1228_v62  ;;  %1354 = vadd.xlane.f32.xlu2 %v1353_v55  ;;  %1342 = vadd.xlane.f32.xlu0 %v1341_v44  ;;  %v1772_v62 = vadd.f32 %v8088_v20, %v8188_v43  ;;  %v1769_v44 = vadd.f32 %v8086_v46, %v8218_v22 }
 0x243   : > { %v1184_v27 = vsub.f32 %v7930_v39, %v1149_v10  ;;  %v1185_v32 = vsub.f32 %v7934_v38, %v1149_v10  ;;  %6364 = vpow2.f32 %v1230_v57  ;;  %v1124_v39 = vpop.permute.xlu1 %1123 }
 0x244   : > { %6366 = vpow2.f32 %v1214_v4  ;;  %v1174_v16 = vsub.f32 %v7794_v31, %v1124_v39  ;;  %v1175_v21 = vsub.f32 %v10937_v28, %v1124_v39  ;;  %v1803_v28 = vmul.f32 0.2, %v1771_v53 }
 0x245   : > { %v8316_v25 = vpop.eup %6356  ;;  %v1244_v56 = vmul.f32 1.442695, %v1184_v27  ;;  %v1246_v29 = vmul.f32 1.442695, %v1185_v32  ;;  %v1144_v38 = vpop.permute.xlu0 %1143 }
 0x246   : > { %v8319_v52 = vpop.eup %6358  ;;  %v1182_v48 = vsub.f32 %v7853_v2, %v1144_v38  ;;  %v1183_v1 = vsub.f32 %v7857_v6, %v1144_v38  ;;  %v1224_v57 = vmul.f32 1.442695, %v1174_v16  ;;  %v1226_v32 = vmul.f32 1.442695, %v1175_v21 }
 0x247   : > { %6368 = vpow2.f32 %v1244_v56  ;;  %v6361_v10 = vpop.eup %6360  ;;  %v1365_v4 = vadd.f32 %v8319_v52, %v8316_v25  ;;  %v1770_v16 = vadd.f32 %v8088_v20, %v8218_v22  ;;  %v1804_v21 = vmul.f32 0.2, %v1772_v62 }
 0x248   : > { %6370 = vpow2.f32 %v1246_v29  ;;  %v8331_v51 = vpop.eup %6362  ;;  %v1240_v31 = vmul.f32 1.442695, %v1182_v48  ;;  %v1242_v27 = vmul.f32 1.442695, %v1183_v1  ;;  %v1435_v55 = vpack.c.bf16 %v6351_v59, %v6361_v10  ;;  %v10938_v1 = vld [vmem:[#allocation73_spill] sm:$0xff] }
 0x249   : > { %v8333_v2 = vpop.eup %6364  ;;  %6372 = vpow2.f32 %v1224_v57  ;;  %1366 = vadd.xlane.f32.xlu1 %v1365_v4  ;;  %v10939_v4 = vld [vmem:[#allocation74_spill] sm:$0xff]  ;;  %v1802_v22 = vmul.f32 0.2, %v1770_v16 }
 0x24a   : > { %v8335_v6 = vpop.eup %6366  ;;  %6374 = vpow2.f32 %v1240_v31  ;;  %v1362_v43 = vadd.f32 %v8333_v2, %v8331_v51  ;;  %1596 = vmatmul.bf16.gmra.mxu1 %v1435_v55  ;;  %v1836_v55 = vmax.f32 %v1772_v62, %v1804_v21 }
 0x24b   : > { %6376 = vpow2.f32 %v1242_v27  ;;  %v1350_v59 = vadd.f32 %v8335_v6, %v6361_v10  ;;  %v1139_v48 = vpop.permute.xlu1 %1138  ;;  %v1801_v27 = vmul.f32 0.2, %v1769_v44 }
 0x24c   : > { %6378 = vpow2.f32 %v1226_v32  ;;  %1363 = vadd.xlane.f32.xlu2 %v1362_v43  ;;  %v1180_v57 = vsub.f32 %v10938_v1, %v1139_v48  ;;  %v1181_v31 = vsub.f32 %v10939_v4, %v1139_v48  ;;  %v1835_v32 = vmax.f32 %v1771_v53, %v1803_v28  ;;  %v10941_v53 = vld [vmem:[#allocation72_spill] sm:$0xff]  ;;  %v10943_v1 = vld [vmem:[#allocation66_spill] sm:$0xff] }
 0x24d   : > { %v8341_v29 = vpop.eup %6368  ;;  %1351 = vadd.xlane.f32.xlu0 %v1350_v59  ;;  %vm10942_vm15 = vnez %v10941_v53 }
 0x24e   : > { %v8348_v38 = vpop.eup %6370  ;;  %v1236_v56 = vmul.f32 1.442695, %v1180_v57  ;;  %v1238_v39 = vmul.f32 1.442695, %v1181_v31  ;;  %v8371_v62 = vsel %vm10942_vm15, %v1836_v55, -1e+30 }
 0x24f   : > { %v6373_v10 = vpop.eup %6372  ;;  %v1374_v47 = vadd.f32 %v8348_v38, %v8341_v29 }
 0x250   : > { %v6375_v61 = vpop.eup %6374  ;;  %v1437_v5 = vpack.c.bf16 %v6373_v10, %v8294_v17  ;;  %6380 = vpow2.f32 %v1236_v56  ;;  %v8367_v17 = vsel %vm7832_vm4, %v1835_v32, -1e+30  ;;  %v1834_v56 = vmax.f32 %v1770_v16, %v1802_v22 }
 0x251   : > { %v8357_v60 = vpop.eup %6376  ;;  %1375 = vadd.xlane.f32.xlu1 %v1374_v47  ;;  %6382 = vpow2.f32 %v1238_v39  ;;  %v1833_v47 = vmax.f32 %v1769_v44, %v1801_v27  ;;  %vm10944_vm4 = vnez %v10943_v1  ;;  %v10945_v44 = vld [vmem:[#allocation67_spill] sm:$0xff]  ;;  %v1430_v22 = vpack.c.bf16 %v8263_v14, %v8278_v49 }
 0x252   : > { %v8359_v43 = vpop.eup %6378  ;;  %v1371_v59 = vadd.f32 %v8357_v60, %v6375_v61  ;;  %1601 = vmatmul.bf16.vlgmr.msra.gmra.mxu2 %v1437_v5  ;;  %vm10946_vm15 = vnez %v10945_v44  ;;  %v1432_v49 = vpack.c.bf16 %v8313_v8, %v8272_v63  ;;  %v10947_v63 = vpack.c.bf16 %v8281_v7, %v8292_v11  ;;  %v1301_v44 = vld [vmem:[#allocation3 + $0x8] sm:$0xff] }
 0x253   : > { %v1359_v48 = vadd.f32 %v8359_v43, %v6373_v10  ;;  %v1154_v57 = vpop.permute.xlu1 %1153  ;;  %v1912_v10 = vmax.f32 %v8367_v17, %v8371_v62  ;;  %v8381_v55 = vsel %vm10944_vm4, %v1833_v47, -1e+30  ;;  %v8385_v16 = vsel %vm10946_vm15, %v1834_v56, -1e+30  ;;  %v10957_v56 = vld [vmem:[#allocation83_spill] sm:$0xff] }
 0x254   : > { %1372 = vadd.xlane.f32.xlu2 %v1371_v59  ;;  %v1186_v5 = vsub.f32 %v7891_v3, %v1154_v57  ;;  %v1187_v39 = vsub.f32 %v7895_v35, %v1154_v57  ;;  %v1909_v59 = vmax.f32 %v8381_v55, %v8385_v16  ;;  %v1439_v57 = vpack.c.bf16 %v8316_v25, %v8331_v51 }
 0x255   : > { %1360 = vadd.xlane.f32.xlu0 %v1359_v48 }
 0x256   : > { %v6381_v28 = vpop.eup %6380  ;;  %v1248_v21 = vmul.f32 1.442695, %v1186_v5  ;;  %v1250_v31 = vmul.f32 1.442695, %v1187_v39 }
 0x257   : > { %v8377_v32 = vpop.eup %6382  ;;  %v1441_v27 = vpack.c.bf16 %v6375_v61, %v6381_v28 }
 0x258   : > { %6384 = vpow2.f32 %v1248_v21  ;;  %v1368_v3 = vadd.f32 %v8377_v32, %v6381_v28  ;;  %v6740_v28 = vld [vmem:[%s7361_s7 + $0x70] sm:$0xff] }
 0x259   : > { %1913 = vmax.xlane.f32.xlu1 %v1912_v10  ;;  %6386 = vpow2.f32 %v1250_v31  ;;  %1611 = vmatmul.bf16.vlgmr.msra.gmra.mxu3 %v1441_v27 }
 0x25a   : > { %1630 = vmatmul.bf16.vlgmr.msrb.gmra.mxu1 %v1430_v22 }
 0x25c   : > { %1910 = vmax.xlane.f32.xlu2 %v1909_v59 }
 0x25d   : > { %1369 = vadd.xlane.f32.xlu0 %v1368_v3 }
 0x25e   : > { %v6385_v61 = vpop.eup %6384 }
 0x25f   : > { %v8394_v48 = vpop.eup %6386  ;;  %v1443_v14 = vpack.c.bf16 %v6385_v61, %v8341_v29 }
 0x260   : > { %v1377_v47 = vadd.f32 %v8394_v48, %v6385_v61 }
 0x262   : > { %1606 = vmatmul.bf16.gmra.mxu2 %v1439_v57 }
 0x265   : > { %1378 = vadd.xlane.f32.xlu0 %v1377_v47 }
 0x269   : > { %1616 = vmatmul.bf16.gmra.mxu3 %v1443_v14  ;;  %v10948_v14 = vld [vmem:[#allocation107_spill] sm:$0xff] }
 0x26a   : > { %1635 = vmatmul.bf16.gmra.mxu1 %v1432_v49 }
 0x270   : > { %v1881_v5 = vpop.xlane.xlu0 %1880 }
 0x271   : > { %v1923_v39 = vmax.f32 %v7953_v9, %v1881_v5 }
 0x272   : > { %1732 = vperm.xlu1 %6309, %v6740_v28   ;;  %v10950_v28 = vld [vmem:[#allocation89_spill] sm:$0xff] }
 0x273   : > { %v8406_v25 = vmax.f32 %v1923_v39, 0.0 }
 0x275   : > { %2292 = vst.msk [vmem:[#allocation2 + $0x10] sm:$0xff] %vm10599_vm12, %v8406_v25 }
 0x278   : > { %v1890_v51 = vpop.xlane.xlu0 %1889 }
 0x279   : > { %v1926_v21 = vmax.f32 %v8010_v26, %v1890_v51 }
 0x27a   : > { %1640 = vmatmul.bf16.gmra.mxu1 %v10947_v63  ;;  %v10951_v63 = vpack.c.bf16 %v8309_v37, %v8335_v6 }
 0x27b   : > { %v8411_v29 = vmax.f32 %v1926_v21, 0.0  ;;  %v1878_v8 = vpop.xlane.xlu1 %1877 }
 0x27c   : > { %v1922_v10 = vmax.f32 %v7970_v18, %v1878_v8 }
 0x27d   : > { %2295 = vst.msk [vmem:[#allocation2 + $0x28] sm:$0xff] %vm10599_vm12, %v8411_v29 }
 0x27e   : > { %v8420_v22 = vmax.f32 %v1922_v10, 0.0  ;;  %v10952_v10 = vld [vmem:[#allocation86_spill] sm:$0xff] }
 0x280   : > { %v1899_v31 = vpop.xlane.xlu0 %1898  ;;  %2291 = vst.msk [vmem:[#allocation2 + $0x8] sm:$0xff] %vm10599_vm12, %v8420_v22 }
 0x281   : > { %v1929_v27 = vmax.f32 %v8034_v34, %v1899_v31 }
 0x283   : > { %v8423_v61 = vmax.f32 %v1929_v27, 0.0  ;;  %v1887_v11 = vpop.xlane.xlu1 %1886  ;;  %v1253_v27 = vsub.f32 %v7970_v18, %v10952_v10  ;;  %v1252_v10 = vsub.f32 %v7955_v12, %v10957_v56  ;;  %v10962_v56 = vpack.c.bf16 %v8359_v43, %v8297_v0  ;;  %v10964_v0 = vld [vmem:[#allocation104_spill] sm:$0xff] }
 0x284   : > { %v1875_v3 = vpop.xlane.xlu2 %1874  ;;  %v1925_v47 = vmax.f32 %v7972_v19, %v1887_v11  ;;  %v10954_v11 = vld [vmem:[#allocation82_spill] sm:$0xff]  ;;  %v1260_v43 = vsub.f32 %v8034_v34, %v10964_v0  ;;  %v10969_v34 = vld [vmem:[#allocation109_spill] sm:$0xff] }
 0x285   : > { %v1921_v59 = vmax.f32 %v7955_v12, %v1875_v3  ;;  %2298 = vst.msk [vmem:[#allocation2 + $0x40] sm:$0xff] %vm10599_vm12, %v8423_v61  ;;  %v10953_v3 = vld [vmem:[#allocation90_spill] sm:$0xff]  ;;  %v1254_v37 = vsub.f32 %v7953_v9, %v10954_v11 }
 0x286   : > { %v8436_v39 = vmax.f32 %v1925_v47, 0.0  ;;  %v10956_v47 = vld [vmem:[#allocation88_spill] sm:$0xff] }
 0x287   : > { %v8427_v7 = vmax.f32 %v1921_v59, 0.0 }
 0x288   : > { %v1908_v57 = vpop.xlane.xlu0 %1907  ;;  %10949 = vst [vmem:[#allocation54_spill] sm:$0xff] %v8436_v39 }
 0x289   : > { %2290 = vst.msk [vmem:[#allocation2] sm:$0xff] %vm10599_vm12, %v8427_v7  ;;  %1955 = vperm.xlu1 %6309, %v8427_v7   ;;  %v1932_v49 = vmax.f32 %v10948_v14, %v1908_v57 }
 0x28a   : > { %2294 = vst.msk [vmem:[#allocation2 + $0x20] sm:$0xff] %vm10599_vm12, %v8436_v39  ;;  %1645 = vmatmul.bf16.gmra.mxu1 %v10951_v63  ;;  %v1272_v63 = vmul.f32 1.442695, %v1254_v37  ;;  %v10961_v37 = vld [vmem:[#allocation94_spill] sm:$0xff] }
 0x28b   : > { %v8439_v21 = vmax.f32 %v1932_v49, 0.0  ;;  %v1896_v31 = vpop.xlane.xlu1 %1895 }
 0x28c   : > { %v1884_v5 = vpop.xlane.xlu2 %1883  ;;  %v1928_v59 = vmax.f32 %v10953_v3, %v1896_v31 }
 0x28d   : > { %v1924_v51 = vmax.f32 %v10950_v28, %v1884_v5  ;;  %2301 = vst.msk [vmem:[#allocation2 + $0x58] sm:$0xff] %vm10599_vm12, %v8439_v21  ;;  %v1270_v5 = vmul.f32 1.442695, %v1253_v27  ;;  %v1268_v27 = vmul.f32 1.442695, %v1252_v10 }
 0x28e   : > { %v8458_v57 = vmax.f32 %v1928_v59, 0.0  ;;  %v10958_v59 = vld [vmem:[#allocation96_spill] sm:$0xff] }
 0x28f   : > { %v8446_v8 = vmax.f32 %v1924_v51, 0.0  ;;  %6388 = vpow2.f32 %v1270_v5 }
 0x290   : > { %10955 = vst [vmem:[#allocation55_spill] sm:$0xff] %v8458_v57  ;;  %6390 = vpow2.f32 %v1272_v63  ;;  %v10963_v63 = vld [vmem:[#allocation87_spill] sm:$0xff] }
 0x291   : > { %2293 = vst.msk [vmem:[#allocation2 + $0x18] sm:$0xff] %vm10599_vm12, %v8446_v8  ;;  %1975 = vperm.xlu1 %6309, %v8436_v39   ;;  %6392 = vpow2.f32 %v1268_v27  ;;  %v1256_v10 = vsub.f32 %v7972_v19, %v10963_v63  ;;  %v1300_v63 = vld [vmem:[#allocation3] sm:$0xff]  ;;  %v10967_v39 = vld [vmem:[#allocation93_spill] sm:$0xff] }
 0x292   : > { %2297 = vst.msk [vmem:[#allocation2 + $0x38] sm:$0xff] %vm10599_vm12, %v8458_v57 }
 0x293   : > { %v1905_v31 = vpop.xlane.xlu1 %1904 }
 0x294   : > { %v1893_v6 = vpop.xlane.xlu2 %1892  ;;  %v1931_v11 = vmax.f32 %v10958_v59, %v1905_v31 }
 0x295   : > { %v1927_v49 = vmax.f32 %v10956_v47, %v1893_v6  ;;  %v10959_v6 = vld [vmem:[#allocation98_spill] sm:$0xff]  ;;  %v6389_v31 = vpop.eup %6388 }
 0x296   : > { %v1257_v35 = vsub.f32 %v8010_v26, %v10959_v6  ;;  %v8473_v53 = vmax.f32 %v1931_v11, 0.0  ;;  %v6391_v11 = vpop.eup %6390  ;;  %v1317_v1 = vmul.f32 %v6389_v31, %v1301_v44  ;;  %v1276_v26 = vmul.f32 1.442695, %v1256_v10 }
 0x297   : > { %v8463_v51 = vmax.f32 %v1927_v49, 0.0  ;;  %v6393_v9 = vpop.eup %6392  ;;  %v1259_v44 = vsub.f32 %v10953_v3, %v10967_v39  ;;  %v1284_v31 = vmul.f32 1.442695, %v1260_v43  ;;  %v10970_v39 = vpack.c.bf16 %v8319_v52, %v8333_v2  ;;  %v10971_v43 = vld [vmem:[#allocation91_spill] sm:$0xff] }
 0x298   : > { %10960 = vst [vmem:[#allocation45_spill] sm:$0xff] %v8473_v53  ;;  %v1278_v6 = vmul.f32 1.442695, %v1257_v35  ;;  %v1316_v10 = vmul.f32 %v6393_v9, %v1300_v63  ;;  %v1304_v9 = vld [vmem:[#allocation3 + $0x20] sm:$0xff] }
 0x299   : > { %2296 = vst.msk [vmem:[#allocation2 + $0x30] sm:$0xff] %vm10599_vm12, %v8463_v51  ;;  %1990 = vperm.xlu1 %6309, %v8458_v57   ;;  %v10965_v57 = vld [vmem:[#allocation92_spill] sm:$0xff]  ;;  %v10972_v63 = vld [vmem:[#allocation99_spill] sm:$0xff] }
 0x29a   : > { %2300 = vst.msk [vmem:[#allocation2 + $0x50] sm:$0xff] %vm10599_vm12, %v8473_v53  ;;  %1650 = vmatmul.bf16.gmra.mxu1 %v10962_v56  ;;  %6394 = vpow2.f32 %v1278_v6  ;;  %v1255_v19 = vsub.f32 %v10950_v28, %v10965_v57  ;;  %v1263_v57 = vsub.f32 %v10948_v14, %v10969_v34 }
 0x29b   : > { %6396 = vpow2.f32 %v1276_v26 }
 0x29c   : > { %v1902_v49 = vpop.xlane.xlu2 %1901  ;;  %6398 = vpow2.f32 %v1284_v31  ;;  %v1290_v34 = vmul.f32 1.442695, %v1263_v57  ;;  %v1303_v57 = vld [vmem:[#allocation3 + $0x18] sm:$0xff] }
 0x29d   : > { %v1930_v4 = vmax.f32 %v10961_v37, %v1902_v49  ;;  %v1302_v49 = vld [vmem:[#allocation3 + $0x10] sm:$0xff] }
 0x29e   : > { %v1318_v56 = vmul.f32 %v6391_v11, %v1302_v49  ;;  %v1305_v11 = vld [vmem:[#allocation3 + $0x28] sm:$0xff]  ;;  %v1274_v49 = vmul.f32 1.442695, %v1255_v19 }
 0x29f   : > { %v8481_v5 = vmax.f32 %v1930_v4, 0.0 }
 0x2a0   : > { %v1340_v35 = vpop.xlane.xlu1 %1339  ;;  %v6395_v6 = vpop.eup %6394  ;;  %6400 = vpow2.f32 %v1274_v49 }
 0x2a1   : > { %2299 = vst.msk [vmem:[#allocation2 + $0x48] sm:$0xff] %vm10599_vm12, %v8481_v5  ;;  %2005 = vperm.xlu1 %6309, %v8473_v53   ;;  %vm10966_vm12 = vcmask 7168   ;;  %v1382_v53 = vadd.f32 %v1340_v35, %v1318_v56  ;;  %v1321_v26 = vmul.f32 %v6395_v6, %v1305_v11  ;;  %v1258_v56 = vsub.f32 %v10956_v47, %v10971_v43  ;;  %v1308_v6 = vld [vmem:[#allocation3 + $0x40] sm:$0xff] }
 0x2a2   : > { %vm10968_vm15 = vmmov %vm10966_vm12  ;;  %v1262_v35 = vsub.f32 %v10958_v59, %v10972_v63  ;;  %v10974_v11 = vld [vmem:[#allocation111_spill] sm:$0xff]  ;;  %v10978_v63 = vld [vmem:[#allocation102_spill] sm:$0xff] }
 0x2a3   : > { %1399 = vst.msk [vmem:[#allocation3 + $0x10] sm:$0xff] %vm10968_vm15, %v1382_v53  ;;  %vm10973_vm15 = vmmov %vm10966_vm12  ;;  %v1280_v52 = vmul.f32 1.442695, %v1258_v56  ;;  %v10977_v56 = vld [vmem:[#allocation105_spill] sm:$0xff] }
 0x2a4   : > { %v1337_v4 = vpop.xlane.xlu2 %1336  ;;  %vm10985_vm4 = vmmov %vm10966_vm12 }
 0x2a5   : > { %v1381_v27 = vadd.f32 %v1337_v4, %v1317_v1  ;;  %v1334_v1 = vpop.xlane.xlu0 %1333  ;;  %v1282_v4 = vmul.f32 1.442695, %v1259_v44 }
 0x2a6   : > { %v1380_v0 = vadd.f32 %v1334_v1, %v1316_v10  ;;  %v1288_v1 = vmul.f32 1.442695, %v1262_v35  ;;  %v1265_v35 = vsub.f32 %v10978_v63, %v10977_v56 }
 0x2a7   : > { %1398 = vst.msk [vmem:[#allocation3 + $0x8] sm:$0xff] %vm10966_vm12, %v1381_v27  ;;  %v6397_v27 = vpop.eup %6396  ;;  %6402 = vpow2.f32 %v1282_v4 }
 0x2a8   : > { %1397 = vst.msk [vmem:[#allocation3] sm:$0xff] %vm10966_vm12, %v1380_v0  ;;  %v1349_v53 = vpop.xlane.xlu1 %1348  ;;  %v1320_v44 = vmul.f32 %v6397_v27, %v1304_v9  ;;  %v6399_v31 = vpop.eup %6398  ;;  %6404 = vpow2.f32 %v1290_v34  ;;  %v10975_v0 = vld [vmem:[#allocation110_spill] sm:$0xff]  ;;  %v10976_v9 = vld [vmem:[#allocation97_spill] sm:$0xff] }
 0x2a9   : > { %v1385_v19 = vadd.f32 %v1349_v53, %v1321_v26  ;;  %v6401_v49 = vpop.eup %6400  ;;  %v1324_v4 = vmul.f32 %v6399_v31, %v1308_v6  ;;  %v1307_v53 = vld [vmem:[#allocation3 + $0x38] sm:$0xff]  ;;  %6406 = vpow2.f32 %v1280_v52  ;;  %v1261_v43 = vsub.f32 %v10961_v37, %v10976_v9 }
 0x2aa   : > { %1655 = vmatmul.bf16.gmra.mxu1 %v10970_v39  ;;  %v1266_v39 = vsub.f32 %v10975_v0, %v10974_v11  ;;  %6408 = vpow2.f32 %v1288_v1  ;;  %v1311_v11 = vld [vmem:[#allocation3 + $0x58] sm:$0xff] }
 0x2ab   : > { %1402 = vst.msk [vmem:[#allocation3 + $0x28] sm:$0xff] %vm10973_vm15, %v1385_v19  ;;  %vm10979_vm15 = vmmov %vm10966_vm12  ;;  %v1286_v14 = vmul.f32 1.442695, %v1261_v43  ;;  %v1674_v9 = vld [vmem:[#allocation13 + $0x18] sm:$0xff]  ;;  %v1673_v1 = vld [vmem:[#allocation13 + $0x10] sm:$0xff] }
 0x2ac   : > { %v1346_v10 = vpop.xlane.xlu2 %1345  ;;  %v1296_v34 = vmul.f32 1.442695, %v1266_v39  ;;  %2758 = vmatpush.msra.mxu1 %v1674_v9 }
 0x2ad   : > { %v1384_v2 = vadd.f32 %v1346_v10, %v1320_v44  ;;  %v6403_v26 = vpop.eup %6402  ;;  %v1319_v10 = vmul.f32 %v6401_v49, %v1303_v57  ;;  %v1306_v57 = vld [vmem:[#allocation3 + $0x30] sm:$0xff] }
 0x2ae   : > { %v1323_v44 = vmul.f32 %v6403_v26, %v1307_v53  ;;  %6410 = vpow2.f32 %v1296_v34  ;;  %v10981_v26 = vpack.c.bf16 %v8357_v60, %v8377_v32  ;;  %v1310_v53 = vld [vmem:[#allocation3 + $0x50] sm:$0xff]  ;;  %2759 = vmatpush.msra.mxu1 %v1673_v1  ;;  %v10983_v34 = vld [vmem:[#allocation100_spill] sm:$0xff] }
 0x2af   : > { %1401 = vst.msk [vmem:[#allocation3 + $0x20] sm:$0xff] %vm10966_vm12, %v1384_v2  ;;  %v6405_v2 = vpop.eup %6404  ;;  %6412 = vpow2.f32 %v1286_v14 }
 0x2b0   : > { %v1358_v27 = vpop.xlane.xlu1 %1357  ;;  %v1327_v39 = vmul.f32 %v6405_v2, %v1311_v11 }
 0x2b1   : > { %v1388_v19 = vadd.f32 %v1358_v27, %v1324_v4  ;;  %v1294_v4 = vmul.f32 1.442695, %v1265_v35  ;;  %v6407_v27 = vpop.eup %6406  ;;  %v10982_v35 = vld [vmem:[#allocation103_spill] sm:$0xff] }
 0x2b2   : > { %v6409_v49 = vpop.eup %6408  ;;  %v1322_v2 = vmul.f32 %v6407_v27, %v1306_v57  ;;  %v1313_v27 = vld [vmem:[#allocation3 + $0x68] sm:$0xff] }
 0x2b3   : > { %1405 = vst.msk [vmem:[#allocation3 + $0x40] sm:$0xff] %vm10979_vm15, %v1388_v19  ;;  %v8515_v3 = vpop.f32.mrf.mxu1  ;;  %vm10980_vm15 = vmmov %vm10966_vm12  ;;  %v1672_v19 = vld [vmem:[#allocation13 + $0x8] sm:$0xff]  ;;  %6414 = vpow2.f32 %v1294_v4  ;;  %v10986_v57 = vld [vmem:[#allocation108_spill] sm:$0xff] }
 0x2b4   : > { %2760 = vmatpush.msra.mxu1 %v1672_v19 }
 0x2b5   : > { %v1355_v31 = vpop.xlane.xlu2 %1354  ;;  %v1343_v6 = vpop.xlane.xlu0 %1342 }
 0x2b6   : > { %v1387_v59 = vadd.f32 %v1355_v31, %v1323_v44  ;;  %v1383_v52 = vadd.f32 %v1343_v6, %v1319_v10  ;;  %v1264_v44 = vsub.f32 %v10983_v34, %v10982_v35  ;;  %v1326_v10 = vmul.f32 %v6409_v49, %v1310_v53  ;;  %v6411_v31 = vpop.eup %6410  ;;  %v1314_v6 = vld [vmem:[#allocation3 + $0x70] sm:$0xff]  ;;  %v1309_v49 = vld [vmem:[#allocation3 + $0x48] sm:$0xff] }
 0x2b7   : > { %v6413_v1 = vpop.eup %6412  ;;  %v1330_v4 = vmul.f32 %v6411_v31, %v1314_v6  ;;  %v10990_v6 = vpack.c.bf16 %v8394_v48, %v8348_v38  ;;  %v1582_v38 = vpop.f32.mrf.mxu0 }
 0x2b8   : > { %1404 = vst.msk [vmem:[#allocation3 + $0x38] sm:$0xff] %vm10966_vm12, %v1387_v59  ;;  %v1671_v59 = vld [vmem:[#allocation13] sm:$0xff]  ;;  %v1292_v14 = vmul.f32 1.442695, %v1264_v44  ;;  %v1325_v35 = vmul.f32 %v6413_v1, %v1309_v49 }
 0x2b9   : > { %1400 = vst.msk [vmem:[#allocation3 + $0x18] sm:$0xff] %vm10980_vm15, %v1383_v52  ;;  %2761 = vmatpush.msra.mxu1 %v1671_v59  ;;  %vm10984_vm15 = vmmov %vm10966_vm12 }
 0x2ba   : > { %1660 = vmatmul.bf16.gmra.mxu1 %v10981_v26  ;;  %6416 = vpow2.f32 %v1292_v14 }
 0x2bb   : > { %v8525_v9 = vpop.f32.mrf.mxu1 }
 0x2bc   : > { %v1367_v43 = vpop.xlane.xlu1 %1366 }
 0x2bd   : > { %v1391_v56 = vadd.f32 %v1367_v43, %v1327_v39  ;;  %v6415_v39 = vpop.eup %6414  ;;  %v10987_v43 = vld [vmem:[#allocation106_spill] sm:$0xff] }
 0x2be   : > { %v1267_v19 = vsub.f32 %v10987_v43, %v10986_v57 }
 0x2bf   : > { %1408 = vst.msk [vmem:[#allocation3 + $0x58] sm:$0xff] %vm10966_vm12, %v1391_v56  ;;  %v1364_v60 = vpop.xlane.xlu2 %1363  ;;  %v1329_v56 = vmul.f32 %v6415_v39, %v1313_v27  ;;  %vm10988_vm12 = vmmov %vm10985_vm4 }
 0x2c0   : > { %v1352_v32 = vpop.xlane.xlu0 %1351  ;;  %v1390_v11 = vadd.f32 %v1364_v60, %v1326_v10  ;;  %v1298_v60 = vmul.f32 1.442695, %v1267_v19  ;;  %v1315_v19 = vld [vmem:[#allocation3 + $0x78] sm:$0xff] }
 0x2c1   : > { %v1386_v52 = vadd.f32 %v1352_v32, %v1322_v2  ;;  %v6417_v32 = vpop.eup %6416 }
 0x2c2   : > { %1407 = vst.msk [vmem:[#allocation3 + $0x50] sm:$0xff] %vm10984_vm15, %v1390_v11  ;;  %vm10989_vm15 = vmmov %vm10985_vm4  ;;  %v1312_v11 = vld [vmem:[#allocation3 + $0x60] sm:$0xff]  ;;  %6418 = vpow2.f32 %v1298_v60 }
 0x2c3   : > { %1403 = vst.msk [vmem:[#allocation3 + $0x30] sm:$0xff] %vm10985_vm4, %v1386_v52  ;;  %v1328_v1 = vmul.f32 %v6417_v32, %v1312_v11 }
 0x2c4   : > { %v1376_v26 = vpop.xlane.xlu1 %1375 }
 0x2c5   : > { %v1394_v53 = vadd.f32 %v1376_v26, %v1330_v4 }
 0x2c7   : > { %1411 = vst.msk [vmem:[#allocation3 + $0x70] sm:$0xff] %vm10988_vm12, %v1394_v53  ;;  %v1373_v44 = vpop.xlane.xlu2 %1372  ;;  %v8532_v31 = vpop.f32.mrf.mxu1  ;;  %vm10991_vm12 = vcmask 15368  }
 0x2c8   : > { %v1361_v59 = vpop.xlane.xlu0 %1360  ;;  %v1393_v10 = vadd.f32 %v1373_v44, %v1329_v56  ;;  %v6419_v57 = vpop.eup %6418 }
 0x2c9   : > { %v1389_v2 = vadd.f32 %v1361_v59, %v1325_v35  ;;  %v1331_v56 = vmul.f32 %v6419_v57, %v1315_v19 }
 0x2ca   : > { %1410 = vst.msk [vmem:[#allocation3 + $0x68] sm:$0xff] %vm10985_vm4, %v1393_v10  ;;  %1665 = vmatmul.bf16.gmra.mxu1 %v10990_v6 }
 0x2cb   : > { %1406 = vst.msk [vmem:[#allocation3 + $0x48] sm:$0xff] %vm10989_vm15, %v1389_v2  ;;  %vm10992_vm15 = vmmov %vm10991_vm12  ;;  %v1584_v2 = vpop.f32.mrf.mxu0 }
 0x2cc   : > { %v1914_v52 = vpop.xlane.xlu1 %1913 }
 0x2cd   : > { %v1934_v14 = vmax.f32 %v10978_v63, %v1914_v52 }
 0x2cf   : > { %v8540_v4 = vmax.f32 %v1934_v14, 0.0  ;;  %v1911_v39 = vpop.xlane.xlu2 %1910  ;;  %v8545_v53 = vpop.f32.mrf.mxu1 }
 0x2d0   : > { %v1370_v27 = vpop.xlane.xlu0 %1369  ;;  %v1933_v49 = vmax.f32 %v10983_v34, %v1911_v39 }
 0x2d1   : > { %v1392_v26 = vadd.f32 %v1370_v27, %v1328_v1  ;;  %2303 = vst.msk [vmem:[#allocation2 + $0x68] sm:$0xff] %vm10991_vm12, %v8540_v4  ;;  %2020 = vperm.xlu1 %6309, %v8540_v4   ;;  %vm10993_vm12 = vmmov %vm10985_vm4 }
 0x2d2   : > { %v8548_v48 = vmax.f32 %v1933_v49, 0.0 }
 0x2d3   : > { %1409 = vst.msk [vmem:[#allocation3 + $0x60] sm:$0xff] %vm10985_vm4, %v1392_v26  ;;  %v1587_v14 = vpop.f32.mrf.mxu0 }
 0x2d4   : > { %2302 = vst.msk [vmem:[#allocation2 + $0x60] sm:$0xff] %vm10992_vm15, %v8548_v48 }
 0x2d7   : > { %v1631_v59 = vpop.f32.mrf.mxu1 }
 0x2d8   : > { %v1379_v35 = vpop.xlane.xlu0 %1378  ;;  %v1632_v10 = vadd.f32 %v1631_v59, %v1582_v38 }
 0x2d9   : > { %v1395_v44 = vadd.f32 %v1379_v35, %v1331_v56  ;;  %v10995_v56 = vld [vmem:[#allocation80_spill] sm:$0xff] }
 0x2da   : > { %5801 = vmatmul.msk.f32.vlgmr.msra.gmra.mxu1 %vm10607_vm10, %v1632_v10  ;;  %vm10996_vm4 = vnez %v10995_v56  ;;  %v11072_v56 = vld [vmem:[#allocation36_spill] sm:$0xff] }
 0x2db   : > { %1412 = vst.msk [vmem:[#allocation3 + $0x78] sm:$0xff] %vm10993_vm12, %v1395_v44  ;;  %v1589_v59 = vpop.f32.mrf.mxu0 }
 0x2df   : > { %v1633_v60 = vpop.f32.mrf.mxu1 }
 0x2e0   : > { %v1634_v32 = vadd.f32 %v1633_v60, %v1584_v2 }
 0x2e2   : > { %5802 = vmatmul.msk.f32.gmra.mxu1 %vm10607_vm10, %v1634_v32 }
 0x2e4   : > { %v1733_v6 = vpop.permute.xlu1 %1732 }
 0x2e5   : > { %v1773_v11 = vadd.f32 %v8086_v46, %v1733_v6  ;;  %v1774_v52 = vadd.f32 %v8088_v20, %v1733_v6 }
 0x2e7   : > { %v1805_v1 = vmul.f32 0.2, %v1773_v11  ;;  %v1806_v39 = vmul.f32 0.2, %v1774_v52  ;;  %v1636_v27 = vpop.f32.mrf.mxu1 }
 0x2e8   : > { %v1637_v38 = vadd.f32 %v1636_v27, %v1587_v14 }
 0x2e9   : > { %v1837_v49 = vmax.f32 %v1773_v11, %v1805_v1  ;;  %v1838_v26 = vmax.f32 %v1774_v52, %v1806_v39 }
 0x2ea   : > { %5803 = vmatmul.msk.f32.gmra.mxu1 %vm10607_vm10, %v1637_v38 }
 0x2eb   : > { %v8560_v19 = vsel %vm7920_vm5, %v1837_v49, -1e+30  ;;  %v8564_v35 = vsel %vm10996_vm4, %v1838_v26, -1e+30  ;;  %v6741_v49 = vld [vmem:[%s7361_s7 + $0x78] sm:$0xff] }
 0x2ec   : > { %v1915_v44 = vmax.f32 %v8560_v19, %v8564_v35 }
 0x2ee   : > { %1916 = vmax.xlane.f32.xlu0 %v1915_v44 }
 0x2ef   : > { %v1638_v10 = vpop.f32.mrf.mxu1 }
 0x2f0   : > { %v1639_v2 = vadd.f32 %v1638_v10, %v1589_v59  ;;  %v1602_v59 = vpop.f32.mrf.mxu2 }
 0x2f2   : > { %5804 = vmatmul.msk.f32.gmra.mxu1 %vm10607_vm10, %v1639_v2 }
 0x2f7   : > { %v1641_v32 = vpop.f32.mrf.mxu1 }
 0x2f8   : > { %v1642_v52 = vadd.f32 %v1641_v32, %v8515_v3 }
 0x2fa   : > { %5805 = vmatmul.msk.f32.gmra.mxu1 %vm10607_vm10, %v1642_v52 }
 0x2fb   : > { %v1956_v60 = vpop.permute.xlu1 %1955 }
 0x2fc   : > { %v2033_v6 = vsub.f32 %v8158_v30, %v1956_v60  ;;  %v2034_v11 = vsub.f32 %v8162_v36, %v1956_v60  ;;  %v1604_v60 = vpop.f32.mrf.mxu2 }
 0x2fe   : > { %v2065_v14 = vmul.f32 1.442695, %v2033_v6  ;;  %v2067_v1 = vmul.f32 1.442695, %v2034_v11 }
 0x2ff   : > { %v1643_v39 = vpop.f32.mrf.mxu1 }
 0x300   : > { %6420 = vpow2.f32 %v2065_v14  ;;  %v1644_v27 = vadd.f32 %v1643_v39, %v8525_v9  ;;  %v1612_v39 = vpop.f32.mrf.mxu3 }
 0x301   : > { %6422 = vpow2.f32 %v2067_v1 }
 0x302   : > { %1736 = vperm.xlu0 %6310, %v6741_v49   ;;  %5806 = vmatmul.msk.f32.gmra.mxu1 %vm10607_vm10, %v1644_v27 }
 0x304   : > { %v1607_v6 = vpop.f32.mrf.mxu2 }
 0x306   : > { %v8576_v26 = vpop.eup %6420 }
 0x307   : > { %v8579_v30 = vpop.eup %6422  ;;  %v1646_v3 = vpop.f32.mrf.mxu1 }
 0x308   : > { %v2209_v36 = vadd.f32 %v8579_v30, %v8576_v26  ;;  %v1647_v38 = vadd.f32 %v1646_v3, %v8532_v31 }
 0x30a   : > { %2210 = vadd.xlane.f32.xlu1 %v2209_v36  ;;  %1960 = vperm.xlu0 %6310, %v8420_v22   ;;  %v1614_v36 = vpop.f32.mrf.mxu3 }
 0x30b   : > { %5807 = vmatmul.msk.f32.gmra.mxu1 %vm10607_vm10, %v1647_v38 }
 0x30c   : > { %v1609_v52 = vpop.f32.mrf.mxu2 }
 0x30f   : > { %v1648_v9 = vpop.f32.mrf.mxu1 }
 0x310   : > { %v1649_v44 = vadd.f32 %v1648_v9, %v8545_v53 }
 0x312   : > { %1970 = vperm.xlu0 %6310, %v8446_v8   ;;  %v1617_v9 = vpop.f32.mrf.mxu3 }
 0x313   : > { %5808 = vmatmul.msk.f32.gmra.mxu1 %vm10607_vm10, %v1649_v44 }
 0x317   : > { %v1651_v10 = vpop.f32.mrf.mxu1 }
 0x318   : > { %v1652_v2 = vadd.f32 %v1651_v10, %v1602_v59 }
 0x31a   : > { %1985 = vperm.xlu0 %6310, %v8463_v51   ;;  %v1619_v10 = vpop.f32.mrf.mxu3 }
 0x31b   : > { %5809 = vmatmul.msk.f32.gmra.mxu1 %vm10607_vm10, %v1652_v2 }
 0x31f   : > { %v1653_v31 = vpop.f32.mrf.mxu1 }
 0x320   : > { %v1654_v32 = vadd.f32 %v1653_v31, %v1604_v60  ;;  %v8600_v31 = vpop.permute.xlu1 %1975 }
 0x322   : > { %2000 = vperm.xlu0 %6310, %v8481_v5  }
 0x323   : > { %5810 = vmatmul.msk.f32.gmra.mxu1 %vm10607_vm10, %v1654_v32 }
 0x327   : > { %v1656_v53 = vpop.f32.mrf.mxu1 }
 0x328   : > { %v1657_v11 = vadd.f32 %v1656_v53, %v1607_v6  ;;  %v8602_v32 = vpop.permute.xlu1 %1990 }
 0x32a   : > { %2015 = vperm.xlu0 %6310, %v8548_v48  }
 0x32b   : > { %5811 = vmatmul.msk.f32.gmra.mxu1 %vm10607_vm10, %v1657_v11 }
 0x32f   : > { %v1658_v14 = vpop.f32.mrf.mxu1 }
 0x330   : > { %v1659_v1 = vadd.f32 %v1658_v14, %v1609_v52  ;;  %v2129_v52 = vsub.f32 %v7955_v12, %v8427_v7  ;;  %v8611_v14 = vpop.permute.xlu1 %2005  ;;  %v10997_v7 = vld [vmem:[#allocation75_spill] sm:$0xff] }
 0x331   : > { %vm10998_vm12 = vnez %v10997_v7  ;;  %v11013_v7 = vld [vmem:[#allocation115_spill] sm:$0xff] }
 0x333   : > { %5812 = vmatmul.msk.f32.gmra.mxu1 %vm10607_vm10, %v1659_v1  ;;  %v2145_v1 = vmul.f32 1.442695, %v2129_v52 }
 0x335   : > { %6424 = vpow2.f32 %v2145_v1 }
 0x337   : > { %v1661_v27 = vpop.f32.mrf.mxu1 }
 0x338   : > { %v1662_v49 = vadd.f32 %v1661_v27, %v1612_v39 }
 0x33b   : > { %5813 = vmatmul.msk.f32.gmra.mxu1 %vm10607_vm10, %v1662_v49 }
 0x33f   : > { %v1663_v3 = vpop.f32.mrf.mxu1 }
 0x340   : > { %v1664_v38 = vadd.f32 %v1663_v3, %v1614_v36 }
 0x343   : > { %5814 = vmatmul.msk.f32.gmra.mxu1 %vm10607_vm10, %v1664_v38  ;;  %v8613_v39 = vpop.permute.xlu1 %2020 }
 0x347   : > { %v1666_v44 = vpop.f32.mrf.mxu1 }
 0x348   : > { %v1667_v59 = vadd.f32 %v1666_v44, %v1617_v9  ;;  %v2177_v9 = vld [vmem:[#allocation3] sm:$0xff]  ;;  %v6425_v44 = vpop.eup %6424 }
 0x34b   : > { %5815 = vmatmul.msk.f32.gmra.mxu1 %vm10607_vm10, %v1667_v59 }
 0x34f   : > { %v1668_v2 = vpop.f32.mrf.mxu1 }
 0x350   : > { %v1669_v60 = vadd.f32 %v1668_v2, %v1619_v10  ;;  %v2193_v2 = vmul.f32 %v6425_v44, %v2177_v9 }
 0x353   : > { %5816 = vmatmul.msk.f32.gmra.mxu1 %vm10607_vm10, %v1669_v60  ;;  %vm11001_vm10 = vcmask 15368  }
 0x361   : > { %v1917_v6 = vpop.xlane.xlu0 %1916 }
 0x362   : > { %v1935_v53 = vmax.f32 %v10975_v0, %v1917_v6 }
 0x364   : > { %v8605_v11 = vmax.f32 %v1935_v53, 0.0  ;;  %v10999_v53 = vld [vmem:[#allocation76_spill] sm:$0xff] }
 0x366   : > { %2304 = vst.msk [vmem:[#allocation2 + $0x70] sm:$0xff] %vm10992_vm15, %v8605_v11  ;;  %vm11000_vm15 = vnez %v10999_v53 }
 0x374   : > { %v1737_v27 = vpop.permute.xlu0 %1736 }
 0x375   : > { %v1775_v49 = vadd.f32 %v8086_v46, %v1737_v27  ;;  %v1776_v36 = vadd.f32 %v8088_v20, %v1737_v27 }
 0x377   : > { %v1807_v3 = vmul.f32 0.2, %v1775_v49  ;;  %v1808_v38 = vmul.f32 0.2, %v1776_v36 }
 0x379   : > { %v1839_v59 = vmax.f32 %v1775_v49, %v1807_v3  ;;  %v1840_v10 = vmax.f32 %v1776_v36, %v1808_v38 }
 0x37b   : > { %v8619_v6 = vsel %vm10998_vm12, %v1839_v59, -1e+30  ;;  %v8623_v52 = vsel %vm11000_vm15, %v1840_v10, -1e+30  ;;  %vm11011_vm15 = vmmov %vm11001_vm10 }
 0x37c   : > { %v1961_v46 = vpop.permute.xlu0 %1960  ;;  %v1918_v20 = vmax.f32 %v8619_v6, %v8623_v52 }
 0x37d   : > { %v2211_v60 = vpop.xlane.xlu1 %2210 }
 0x37e   : > { %v2257_v1 = vadd.f32 %v2211_v60, %v2193_v2  ;;  %1919 = vmax.xlane.f32.xlu2 %v1918_v20 }
 0x380   : > { %2274 = vst.msk [vmem:[#allocation3] sm:$0xff] %vm11001_vm10, %v2257_v1 }
 0x384   : > { %v1971_v27 = vpop.permute.xlu0 %1970 }
 0x385   : > { %v2039_v49 = vsub.f32 %v8192_v13, %v1971_v27  ;;  %v2040_v36 = vsub.f32 %v8196_v33, %v1971_v27 }
 0x387   : > { %v2077_v3 = vmul.f32 1.442695, %v2039_v49  ;;  %v2079_v38 = vmul.f32 1.442695, %v2040_v36 }
 0x389   : > { %6426 = vpow2.f32 %v2077_v3 }
 0x38a   : > { %6428 = vpow2.f32 %v2079_v38 }
 0x38c   : > { %v1986_v9 = vpop.permute.xlu0 %1985 }
 0x38d   : > { %v2045_v44 = vsub.f32 %v8223_v24, %v1986_v9  ;;  %v2046_v59 = vsub.f32 %v8227_v42, %v1986_v9 }
 0x38f   : > { %v8632_v10 = vpop.eup %6426  ;;  %v2089_v2 = vmul.f32 1.442695, %v2045_v44  ;;  %v2091_v60 = vmul.f32 1.442695, %v2046_v59 }
 0x390   : > { %v8634_v1 = vpop.eup %6428 }
 0x391   : > { %6430 = vpow2.f32 %v2089_v2  ;;  %v2218_v13 = vadd.f32 %v8634_v1, %v8632_v10 }
 0x392   : > { %6432 = vpow2.f32 %v2091_v60 }
 0x393   : > { %2219 = vadd.xlane.f32.xlu1 %v2218_v13 }
 0x394   : > { %v2001_v33 = vpop.permute.xlu0 %2000 }
 0x395   : > { %v2051_v20 = vsub.f32 %v8245_v23, %v2001_v33  ;;  %v2052_v27 = vsub.f32 %v8249_v50, %v2001_v33  ;;  %v11004_v33 = vld [vmem:[#allocation116_spill] sm:$0xff] }
 0x396   : > { %1965 = vperm.xlu2 %6311, %v8406_v25  }
 0x397   : > { %v8641_v24 = vpop.eup %6430  ;;  %v2101_v42 = vmul.f32 1.442695, %v2051_v20  ;;  %v2103_v49 = vmul.f32 1.442695, %v2052_v27  ;;  %v2035_v20 = vsub.f32 %v11004_v33, %v1961_v46  ;;  %v11005_v27 = vld [vmem:[#allocation117_spill] sm:$0xff] }
 0x398   : > { %v8643_v36 = vpop.eup %6432 }
 0x399   : > { %6434 = vpow2.f32 %v2101_v42  ;;  %v2227_v3 = vadd.f32 %v8643_v36, %v8641_v24  ;;  %v2036_v42 = vsub.f32 %v11005_v27, %v1961_v46  ;;  %v2047_v46 = vsub.f32 %v8212_v45, %v8602_v32 }
 0x39a   : > { %6436 = vpow2.f32 %v2103_v49  ;;  %v2069_v49 = vmul.f32 1.442695, %v2035_v20  ;;  %v2053_v27 = vsub.f32 %v8237_v58, %v8611_v14  ;;  %v2054_v45 = vsub.f32 %v8241_v15, %v8611_v14 }
 0x39b   : > { %2228 = vadd.xlane.f32.xlu1 %v2227_v3  ;;  %v2071_v3 = vmul.f32 1.442695, %v2036_v42  ;;  %v2093_v33 = vmul.f32 1.442695, %v2047_v46  ;;  %v2060_v58 = vsub.f32 %v8371_v62, %v8613_v39 }
 0x39c   : > { %v2016_v38 = vpop.permute.xlu0 %2015  ;;  %v2107_v42 = vmul.f32 1.442695, %v2054_v45  ;;  %v2135_v45 = vsub.f32 %v10956_v47, %v8463_v51 }
 0x39d   : > { %v2057_v9 = vsub.f32 %v8381_v55, %v2016_v38  ;;  %v2058_v23 = vsub.f32 %v8385_v16, %v2016_v38  ;;  %v2041_v38 = vsub.f32 %v8174_v54, %v8600_v31 }
 0x39e   : > { %1980 = vperm.xlu2 %6311, %v8411_v29  }
 0x39f   : > { %v8650_v50 = vpop.eup %6434  ;;  %v2113_v44 = vmul.f32 1.442695, %v2057_v9  ;;  %v2115_v59 = vmul.f32 1.442695, %v2058_v23  ;;  %v2042_v9 = vsub.f32 %v8178_v40, %v8600_v31  ;;  %v2081_v23 = vmul.f32 1.442695, %v2041_v38 }
 0x3a0   : > { %v8652_v2 = vpop.eup %6436  ;;  %v2059_v38 = vsub.f32 %v8367_v17, %v8613_v39  ;;  %v2132_v39 = vsub.f32 %v10950_v28, %v8446_v8 }
 0x3a1   : > { %6438 = vpow2.f32 %v2113_v44  ;;  %v2236_v60 = vadd.f32 %v8652_v2, %v8650_v50  ;;  %v2083_v44 = vmul.f32 1.442695, %v2042_v9  ;;  %v2119_v9 = vmul.f32 1.442695, %v2060_v58 }
 0x3a2   : > { %6440 = vpow2.f32 %v2115_v59  ;;  %v2117_v14 = vmul.f32 1.442695, %v2059_v38  ;;  %v2138_v58 = vsub.f32 %v10961_v37, %v8481_v5 }
 0x3a3   : > { %2237 = vadd.xlane.f32.xlu1 %v2236_v60  ;;  %6442 = vpow2.f32 %v2069_v49 }
 0x3a4   : > { %6444 = vpow2.f32 %v2071_v3 }
 0x3a5   : > { %6446 = vpow2.f32 %v2081_v23 }
 0x3a6   : > { %1995 = vperm.xlu2 %6311, %v8423_v61   ;;  %6448 = vpow2.f32 %v2083_v44 }
 0x3a7   : > { %v8657_v13 = vpop.eup %6438  ;;  %6450 = vpow2.f32 %v2093_v33 }
 0x3a8   : > { %11002 = vst [vmem:[#allocation46_spill] sm:$0xff] %v8657_v13  ;;  %v8659_v55 = vpop.eup %6440 }
 0x3a9   : > { %11003 = vst [vmem:[#allocation47_spill] sm:$0xff] %v8659_v55  ;;  %v2245_v16 = vadd.f32 %v8659_v55, %v8657_v13  ;;  %v8671_v59 = vpop.eup %6442 }
 0x3aa   : > { %v8673_v60 = vpop.eup %6444 }
 0x3ab   : > { %2246 = vadd.xlane.f32.xlu1 %v2245_v16  ;;  %v2048_v16 = vsub.f32 %v8216_v41, %v8602_v32  ;;  %v2212_v54 = vadd.f32 %v8673_v60, %v8671_v59  ;;  %v8681_v31 = vpop.eup %6446  ;;  %v2105_v32 = vmul.f32 1.442695, %v2053_v27 }
 0x3ac   : > { %v8683_v20 = vpop.eup %6448 }
 0x3ad   : > { %v2095_v40 = vmul.f32 1.442695, %v2048_v16  ;;  %v2221_v41 = vadd.f32 %v8683_v20, %v8681_v31  ;;  %v8691_v49 = vpop.eup %6450 }
 0x3ae   : > { %2010 = vperm.xlu2 %6311, %v8439_v21  }
 0x3af   : > { %6452 = vpow2.f32 %v2095_v40  ;;  %v2151_v40 = vmul.f32 1.442695, %v2132_v39  ;;  %v11009_v39 = vld [vmem:[#allocation112_spill] sm:$0xff] }
 0x3b0   : > { %6454 = vpow2.f32 %v2105_v32  ;;  %v2180_v32 = vld [vmem:[#allocation3 + $0x18] sm:$0xff] }
 0x3b1   : > { %6456 = vpow2.f32 %v2107_v42 }
 0x3b2   : > { %6458 = vpow2.f32 %v2117_v14 }
 0x3b3   : > { %6460 = vpow2.f32 %v2119_v9  ;;  %v2163_v9 = vmul.f32 1.442695, %v2138_v58  ;;  %v2186_v58 = vld [vmem:[#allocation3 + $0x48] sm:$0xff] }
 0x3b4   : > { %6462 = vpow2.f32 %v2151_v40 }
 0x3b5   : > { %v8693_v3 = vpop.eup %6452 }
 0x3b6   : > { %2025 = vperm.xlu2 %6311, %v8605_v11   ;;  %v2230_v15 = vadd.f32 %v8693_v3, %v8691_v49  ;;  %v8701_v23 = vpop.eup %6454 }
 0x3b7   : > { %v8703_v46 = vpop.eup %6456 }
 0x3b8   : > { %11006 = vst [vmem:[#allocation48_spill] sm:$0xff] %v8703_v46  ;;  %v2239_v62 = vadd.f32 %v8703_v46, %v8701_v23 }
 0x3df   : > { %2213 = vadd.xlane.f32.xlu2 %v2212_v54  ;;  %v8715_v54 = vpop.eup %6458 }
 0x3e0   : > { %11007 = vst [vmem:[#allocation34_spill] sm:$0xff] %v8715_v54  ;;  %v8717_v33 = vpop.eup %6460 }
 0x3e1   : > { %11008 = vst [vmem:[#allocation35_spill] sm:$0xff] %v8717_v33  ;;  %v2248_v27 = vadd.f32 %v8717_v33, %v8715_v54  ;;  %v6463_v42 = vpop.eup %6462 }
 0x3e2   : > { %v2196_v38 = vmul.f32 %v6463_v42, %v2180_v32 }
 0x3e7   : > { %2222 = vadd.xlane.f32.xlu2 %v2221_v41  ;;  %v2157_v41 = vmul.f32 1.442695, %v2135_v45 }
 0x3e9   : > { %6464 = vpow2.f32 %v2157_v41 }
 0x3ea   : > { %6466 = vpow2.f32 %v2163_v9 }
 0x3ef   : > { %2231 = vadd.xlane.f32.xlu2 %v2230_v15 }
 0x3f1   : > { %v1920_v44 = vpop.xlane.xlu2 %1919 }
 0x3f2   : > { %v1936_v16 = vmax.f32 %v10987_v43, %v1920_v44  ;;  %v2183_v44 = vld [vmem:[#allocation3 + $0x30] sm:$0xff] }
 0x3f4   : > { %v8706_v17 = vmax.f32 %v1936_v16, 0.0  ;;  %v2141_v16 = vsub.f32 %v10983_v34, %v8548_v48  ;;  %v11012_v48 = vld [vmem:[#allocation114_spill] sm:$0xff] }
 0x3f6   : > { %2305 = vst.msk [vmem:[#allocation2 + $0x78] sm:$0xff] %vm11001_vm10, %v8706_v17  ;;  %2030 = vperm.xlu0 %6310, %v8706_v17   ;;  %v2169_v42 = vmul.f32 1.442695, %v2141_v16 }
 0x3f7   : > { %2240 = vadd.xlane.f32.xlu2 %v2239_v62  ;;  %v6465_v62 = vpop.eup %6464 }
 0x3f8   : > { %v2199_v32 = vmul.f32 %v6465_v62, %v2183_v44  ;;  %6468 = vpow2.f32 %v2169_v42  ;;  %v11015_v42 = vld [vmem:[#allocation119_spill] sm:$0xff] }
 0x3f9   : > { %v1966_v8 = vpop.permute.xlu2 %1965 }
 0x3fa   : > { %v2037_v40 = vsub.f32 %v11009_v39, %v1966_v8 }
 0x3fc   : > { %v2073_v53 = vmul.f32 1.442695, %v2037_v40 }
 0x3fe   : > { %6470 = vpow2.f32 %v2073_v53  ;;  %v11014_v53 = vld [vmem:[#allocation118_spill] sm:$0xff] }
 0x3ff   : > { %2249 = vadd.xlane.f32.xlu2 %v2248_v27  ;;  %v11010_v27 = vld [vmem:[#allocation113_spill] sm:$0xff] }
 0x400   : > { %v2038_v45 = vsub.f32 %v11010_v27, %v1966_v8 }
 0x401   : > { %v1981_v51 = vpop.permute.xlu2 %1980 }
 0x402   : > { %v2044_v39 = vsub.f32 %v11013_v7, %v1981_v51 }
 0x404   : > { %v2087_v27 = vmul.f32 1.442695, %v2044_v39 }
 0x406   : > { %v2220_v15 = vpop.xlane.xlu1 %2219 }
 0x407   : > { %v2260_v14 = vadd.f32 %v2220_v15, %v2196_v38  ;;  %v2075_v38 = vmul.f32 1.442695, %v2038_v45  ;;  %v6467_v15 = vpop.eup %6466 }
 0x408   : > { %v2202_v8 = vmul.f32 %v6467_v15, %v2186_v58  ;;  %v6469_v16 = vpop.eup %6468 }
 0x409   : > { %2277 = vst.msk [vmem:[#allocation3 + $0x18] sm:$0xff] %vm11001_vm10, %v2260_v14  ;;  %v2043_v14 = vsub.f32 %v11012_v48, %v1981_v51  ;;  %6472 = vpow2.f32 %v2075_v38  ;;  %v1996_v34 = vpop.permute.xlu2 %1995  ;;  %v8734_v40 = vpop.eup %6470 }
 0x40a   : > { %v2050_v7 = vsub.f32 %v11015_v42, %v1996_v34 }
 0x40b   : > { %v2085_v62 = vmul.f32 1.442695, %v2043_v14 }
 0x40c   : > { %v2099_v14 = vmul.f32 1.442695, %v2050_v7 }
 0x40d   : > { %6474 = vpow2.f32 %v2085_v62 }
 0x40e   : > { %v2229_v41 = vpop.xlane.xlu1 %2228  ;;  %6476 = vpow2.f32 %v2087_v27 }
 0x40f   : > { %v2263_v5 = vadd.f32 %v2229_v41, %v2199_v32  ;;  %v8736_v45 = vpop.eup %6472  ;;  %v2049_v32 = vsub.f32 %v11014_v53, %v1996_v34  ;;  %v2189_v41 = vld [vmem:[#allocation3 + $0x60] sm:$0xff]  ;;  %v11018_v34 = vld [vmem:[#allocation121_spill] sm:$0xff] }
 0x410   : > { %v2205_v51 = vmul.f32 %v6469_v16, %v2189_v41  ;;  %v2215_v38 = vadd.f32 %v8736_v45, %v8734_v40 }
 0x411   : > { %2280 = vst.msk [vmem:[#allocation3 + $0x30] sm:$0xff] %vm11011_vm15, %v2263_v5  ;;  %v2011_v58 = vpop.permute.xlu2 %2010  ;;  %v2097_v48 = vmul.f32 1.442695, %v2049_v32  ;;  %vm11016_vm15 = vmmov %vm11001_vm10 }
 0x412   : > { %v2056_v62 = vsub.f32 %v11018_v34, %v2011_v58 }
 0x413   : > { %v8743_v39 = vpop.eup %6474  ;;  %6478 = vpow2.f32 %v2097_v48 }
 0x414   : > { %6480 = vpow2.f32 %v2099_v14  ;;  %v2111_v53 = vmul.f32 1.442695, %v2056_v62  ;;  %v11022_v62 = vld [vmem:[#allocation54_spill] sm:$0xff] }
 0x416   : > { %v2238_v44 = vpop.xlane.xlu1 %2237 }
 0x417   : > { %v2266_v9 = vadd.f32 %v2238_v44, %v2202_v8  ;;  %v8745_v8 = vpop.eup %6476  ;;  %v11017_v44 = vld [vmem:[#allocation120_spill] sm:$0xff] }
 0x418   : > { %v2224_v16 = vadd.f32 %v8745_v8, %v8743_v39 }
 0x419   : > { %2283 = vst.msk [vmem:[#allocation3 + $0x48] sm:$0xff] %vm11001_vm10, %v2266_v9  ;;  %v2055_v9 = vsub.f32 %v11017_v44, %v2011_v58  ;;  %v2026_v32 = vpop.permute.xlu2 %2025  ;;  %v8751_v41 = vpop.eup %6478 }
 0x41a   : > { %v8753_v42 = vpop.eup %6480  ;;  %v2061_v7 = vsub.f32 %v8560_v19, %v2026_v32 }
 0x41b   : > { %v2109_v27 = vmul.f32 1.442695, %v2055_v9  ;;  %v2130_v9 = vsub.f32 %v7970_v18, %v8420_v22  ;;  %v6035_v22 = vld [vmem:[%s7336_s12] sm:$0xff] }
 0x41c   : > { %2434 = vrot.lane.b32.xlu2 %v6035_v22, %s7094_s5  ;;  %v2184_v22 = vld [vmem:[#allocation3 + $0x38] sm:$0xff] }
 0x41d   : > { %6482 = vpow2.f32 %v2109_v27  ;;  %v2147_v34 = vmul.f32 1.442695, %v2130_v9 }
 0x41e   : > { %v2247_v5 = vpop.xlane.xlu1 %2246  ;;  %6484 = vpow2.f32 %v2111_v53 }
 0x41f   : > { %v2269_v15 = vadd.f32 %v2247_v5, %v2205_v51  ;;  %v2062_v51 = vsub.f32 %v8564_v35, %v2026_v32  ;;  %v2233_v5 = vadd.f32 %v8753_v42, %v8751_v41  ;;  %v2178_v32 = vld [vmem:[#allocation3 + $0x8] sm:$0xff] }
 0x420   : > { %2216 = vadd.xlane.f32.xlu0 %v2215_v38  ;;  %v2121_v38 = vmul.f32 1.442695, %v2061_v7 }
 0x421   : > { %2286 = vst.msk [vmem:[#allocation3 + $0x60] sm:$0xff] %vm11016_vm15, %v2269_v15  ;;  %v2123_v58 = vmul.f32 1.442695, %v2062_v51  ;;  %v6036_v51 = vld [vmem:[%s7336_s12 + $0x8] sm:$0xff]  ;;  %vm11028_vm15 = vmmov %vm11001_vm10 }
 0x422   : > { %6486 = vpow2.f32 %v2121_v38  ;;  %v11024_v38 = vld [vmem:[#allocation55_spill] sm:$0xff] }
 0x423   : > { %v8759_v15 = vpop.eup %6482  ;;  %6488 = vpow2.f32 %v2123_v58  ;;  %v11025_v58 = vld [vmem:[#allocation90_spill] sm:$0xff] }
 0x424   : > { %v8761_v48 = vpop.eup %6484  ;;  %6490 = vpow2.f32 %v2147_v34  ;;  %v2181_v34 = vld [vmem:[#allocation3 + $0x20] sm:$0xff] }
 0x425   : > { %11019 = vst [vmem:[#allocation56_spill] sm:$0xff] %v8761_v48  ;;  %v2242_v14 = vadd.f32 %v8761_v48, %v8759_v15 }
 0x428   : > { %2225 = vadd.xlane.f32.xlu0 %v2224_v16  ;;  %v8765_v19 = vpop.eup %6486  ;;  %v11023_v16 = vld [vmem:[#allocation85_spill] sm:$0xff] }
 0x429   : > { %11020 = vst [vmem:[#allocation57_spill] sm:$0xff] %v8765_v19  ;;  %v8767_v35 = vpop.eup %6488  ;;  %v2133_v27 = vsub.f32 %v11023_v16, %v11022_v62  ;;  %v8895_v16 = vld [vmem:[%s7366_s10] sm:$0xff] }
 0x42a   : > { %11021 = vst [vmem:[#allocation63_spill] sm:$0xff] %v8767_v35  ;;  %v2251_v44 = vadd.f32 %v8767_v35, %v8765_v19  ;;  %v6491_v7 = vpop.eup %6490  ;;  %v2876_v47 = vperm.slane %v8895_v16, 6 }
 0x42b   : > { %v2153_v53 = vmul.f32 1.442695, %v2133_v27  ;;  %v6038_v27 = vld [vmem:[%s7336_s12 + $0x18] sm:$0xff]  ;;  %11044 = vst [vmem:[#allocation82_spill] sm:$0xff] %v8895_v16 }
 0x42d   : > { %6492 = vpow2.f32 %v2153_v53  ;;  %v11026_v53 = vld [vmem:[#allocation45_spill] sm:$0xff] }
 0x430   : > { %2234 = vadd.xlane.f32.xlu0 %v2233_v5  ;;  %v2194_v5 = vmul.f32 %v6491_v7, %v2178_v32  ;;  %v11027_v7 = vld [vmem:[#allocation96_spill] sm:$0xff] }
 0x433   : > { %v6493_v62 = vpop.eup %6492 }
 0x434   : > { %v2197_v32 = vmul.f32 %v6493_v62, %v2181_v34  ;;  %v2142_v34 = vsub.f32 %v10978_v63, %v8540_v4  ;;  %v6040_v62 = vld [vmem:[%s7336_s12 + $0x28] sm:$0xff] }
 0x438   : > { %2243 = vadd.xlane.f32.xlu0 %v2242_v14  ;;  %v2136_v14 = vsub.f32 %v11025_v58, %v11024_v38  ;;  %v2139_v38 = vsub.f32 %v11027_v7, %v11026_v53  ;;  %v6043_v7 = vld [vmem:[%s7336_s12 + $0x40] sm:$0xff]  ;;  %v6747_v58 = vld [vmem:[%s7361_s7 + $0x48] sm:$0xff] }
 0x43a   : > { %v2159_v9 = vmul.f32 1.442695, %v2136_v14  ;;  %v2165_v14 = vmul.f32 1.442695, %v2139_v38  ;;  %v6042_v38 = vld [vmem:[%s7336_s12 + $0x38] sm:$0xff] }
 0x43c   : > { %6494 = vpow2.f32 %v2159_v9 }
 0x43d   : > { %6496 = vpow2.f32 %v2165_v14 }
 0x440   : > { %2252 = vadd.xlane.f32.xlu0 %v2251_v44 }
 0x442   : > { %v6495_v9 = vpop.eup %6494 }
 0x452   : > { %v2214_v44 = vpop.xlane.xlu2 %2213 }
 0x453   : > { %v2258_v37 = vadd.f32 %v2214_v44, %v2194_v5 }
 0x454   : > { %2436 = vrot.lane.b32.xlu0 %v6036_v51, %s7094_s5  ;;  %v6039_v51 = vld [vmem:[%s7336_s12 + $0x20] sm:$0xff] }
 0x455   : > { %2275 = vst.msk [vmem:[#allocation3 + $0x8] sm:$0xff] %vm11001_vm10, %v2258_v37  ;;  %v10610_v37 = vmov 2   ;;  %2442 = vrot.lane.b32.xlu2 %v6039_v51, %s7094_s5  ;;  %v6497_v51 = vpop.eup %6496 }
 0x456   : > { %6313 = vset.pattern.permute.xlu0 %v10610_v37  ;;  %6312 = vset.pattern.permute.xlu2 %v10610_v37 }
 0x457   : > { %6314 = vset.pattern.permute.xlu1 %v10610_v37 }
 0x45a   : > { %v2223_v5 = vpop.xlane.xlu2 %2222 }
 0x45b   : > { %v2261_v44 = vadd.f32 %v2223_v5, %v2197_v32  ;;  %v2171_v5 = vmul.f32 1.442695, %v2142_v34 }
 0x45c   : > { %2440 = vrot.lane.b32.xlu0 %v6038_v27, %s7094_s5  ;;  %v2200_v27 = vmul.f32 %v6495_v9, %v2184_v22 }
 0x45d   : > { %2278 = vst.msk [vmem:[#allocation3 + $0x20] sm:$0xff] %vm11028_vm15, %v2261_v44  ;;  %v2187_v44 = vld [vmem:[#allocation3 + $0x50] sm:$0xff]  ;;  %2448 = vrot.lane.b32.xlu2 %v6042_v38, %s7094_s5  ;;  %6498 = vpow2.f32 %v2171_v5  ;;  %vm11029_vm15 = vmmov %vm11001_vm10 }
 0x45e   : > { %v2203_v22 = vmul.f32 %v6497_v51, %v2187_v44 }
 0x462   : > { %v2232_v32 = vpop.xlane.xlu2 %2231 }
 0x463   : > { %v2264_v53 = vadd.f32 %v2232_v32, %v2200_v27  ;;  %v6045_v32 = vld [vmem:[%s7336_s12 + $0x50] sm:$0xff] }
 0x464   : > { %2444 = vrot.lane.b32.xlu0 %v6040_v62, %s7094_s5 }
 0x465   : > { %2281 = vst.msk [vmem:[#allocation3 + $0x38] sm:$0xff] %vm11001_vm10, %v2264_v53  ;;  %v6499_v53 = vpop.eup %6498  ;;  %2454 = vrot.lane.b32.xlu2 %v6045_v32, %s7094_s5  ;;  %v8830_v32 = vld [vmem:[%s7361_s7 + $0x18] sm:$0xff] }
 0x466   : > { %11035 = vst [vmem:[#allocation73_spill] sm:$0xff] %v8830_v32 }
 0x468   : > { %v2031_v37 = vpop.permute.xlu0 %2030 }
 0x469   : > { %v2063_v4 = vsub.f32 %v8619_v6, %v2031_v37  ;;  %v2064_v14 = vsub.f32 %v8623_v52, %v2031_v37  ;;  %v2190_v6 = vld [vmem:[#allocation3 + $0x68] sm:$0xff]  ;;  %v6046_v52 = vld [vmem:[%s7336_s12 + $0x58] sm:$0xff] }
 0x46a   : > { %v2241_v9 = vpop.xlane.xlu2 %2240  ;;  %v2206_v37 = vmul.f32 %v6499_v53, %v2190_v6  ;;  %v11036_v53 = vld [vmem:[#allocation95_spill] sm:$0xff] }
 0x46b   : > { %v2125_v34 = vmul.f32 1.442695, %v2063_v4  ;;  %v2127_v62 = vmul.f32 1.442695, %v2064_v14  ;;  %v2267_v27 = vadd.f32 %v2241_v9, %v2203_v22  ;;  %v6048_v4 = vld [vmem:[%s7336_s12 + $0x68] sm:$0xff]  ;;  %v6049_v14 = vld [vmem:[%s7336_s12 + $0x70] sm:$0xff]  ;;  %v2134_v6 = vsub.f32 %v11036_v53, %v8411_v29 }
 0x46c   : > { %2450 = vrot.lane.b32.xlu0 %v6043_v7, %s7094_s5  ;;  %v8820_v22 = vld [vmem:[%s7361_s7] sm:$0xff]  ;;  %v11033_v9 = vld [vmem:[#allocation81_spill] sm:$0xff] }
 0x46d   : > { %6500 = vpow2.f32 %v2125_v34  ;;  %2284 = vst.msk [vmem:[#allocation3 + $0x50] sm:$0xff] %vm11029_vm15, %v2267_v27  ;;  %2460 = vrot.lane.b32.xlu2 %v6048_v4, %s7094_s5  ;;  %v2131_v34 = vsub.f32 %v11033_v9, %v8406_v25  ;;  %v2179_v25 = vld [vmem:[#allocation3 + $0x10] sm:$0xff]  ;;  %vm11038_vm15 = vmmov %vm11001_vm10 }
 0x46e   : > { %6502 = vpow2.f32 %v2127_v62  ;;  %11032 = vst [vmem:[#allocation65_spill] sm:$0xff] %v8820_v22  ;;  %v8826_v62 = vld [vmem:[%s7361_s7 + $0x8] sm:$0xff]  ;;  %v6041_v29 = vld [vmem:[%s7336_s12 + $0x30] sm:$0xff] }
 0x46f   : > { %11034 = vst [vmem:[#allocation68_spill] sm:$0xff] %v8826_v62  ;;  %v2149_v27 = vmul.f32 1.442695, %v2131_v34 }
 0x471   : > { %6504 = vpow2.f32 %v2149_v27 }
 0x472   : > { %v2250_v5 = vpop.xlane.xlu2 %2249 }
 0x473   : > { %v8807_v38 = vpop.eup %6500  ;;  %v2270_v44 = vadd.f32 %v2250_v5, %v2206_v37  ;;  %v6745_v37 = vld [vmem:[%s7361_s7 + $0x30] sm:$0xff]  ;;  %v2155_v5 = vmul.f32 1.442695, %v2134_v6 }
 0x474   : > { %11030 = vst [vmem:[#allocation64_spill] sm:$0xff] %v8807_v38  ;;  %v8809_v7 = vpop.eup %6502  ;;  %2456 = vrot.lane.b32.xlu0 %v6046_v52, %s7094_s5  ;;  %v6037_v52 = vld [vmem:[%s7336_s12 + $0x10] sm:$0xff] }
 0x475   : > { %11031 = vst [vmem:[#allocation62_spill] sm:$0xff] %v8809_v7  ;;  %v2254_v51 = vadd.f32 %v8809_v7, %v8807_v38  ;;  %2812 = vperm.xlu2 %6312, %v8820_v22   ;;  %6506 = vpow2.f32 %v2155_v5 }
 0x476   : > { %2287 = vst.msk [vmem:[#allocation3 + $0x68] sm:$0xff] %vm11001_vm10, %v2270_v44  ;;  %v6746_v44 = vld [vmem:[%s7361_s7 + $0x28] sm:$0xff] }
 0x477   : > { %2255 = vadd.xlane.f32.xlu1 %v2254_v51  ;;  %v6505_v51 = vpop.eup %6504 }
 0x478   : > { %v2195_v4 = vmul.f32 %v6505_v51, %v2179_v25 }
 0x47b   : > { %v6507_v5 = vpop.eup %6506 }
 0x47c   : > { %2462 = vrot.lane.b32.xlu0 %v6049_v14, %s7094_s5  ;;  %v11037_v14 = vld [vmem:[#allocation101_spill] sm:$0xff] }
 0x47d   : > { %2824 = vperm.xlu2 %6312, %v8830_v32   ;;  %v2137_v34 = vsub.f32 %v11037_v14, %v8423_v61  ;;  %v11039_v61 = vld [vmem:[#allocation107_spill] sm:$0xff] }
 0x47e   : > { %v2192_v32 = vld [vmem:[#allocation3 + $0x78] sm:$0xff] }
 0x47f   : > { %v2161_v6 = vmul.f32 1.442695, %v2137_v34  ;;  %v2185_v34 = vld [vmem:[#allocation3 + $0x40] sm:$0xff] }
 0x481   : > { %6508 = vpow2.f32 %v2161_v6  ;;  %v2143_v6 = vsub.f32 %v10975_v0, %v8605_v11 }
 0x484   : > { %2816 = vperm.xlu0 %6313, %v8826_v62  }
 0x485   : > { %2832 = vperm.xlu2 %6312, %v6746_v44   ;;  %v2140_v44 = vsub.f32 %v11039_v61, %v8439_v21 }
 0x48c   : > { %2836 = vperm.xlu0 %6313, %v6745_v37   ;;  %v6748_v37 = vld [vmem:[%s7361_s7 + $0x40] sm:$0xff] }
 0x48d   : > { %2844 = vperm.xlu2 %6312, %v6748_v37  }
 0x490   : > { %2438 = vrot.lane.b32.xlu1 %v6037_v52, %s7094_s5  ;;  %v2182_v52 = vld [vmem:[#allocation3 + $0x28] sm:$0xff] }
 0x491   : > { %v2198_v25 = vmul.f32 %v6507_v5, %v2182_v52  ;;  %v6509_v52 = vpop.eup %6508 }
 0x492   : > { %v2201_v21 = vmul.f32 %v6509_v52, %v2185_v34  ;;  %v2191_v52 = vld [vmem:[#allocation3 + $0x70] sm:$0xff] }
 0x493   : > { %v2217_v27 = vpop.xlane.xlu0 %2216 }
 0x494   : > { %v2259_v63 = vadd.f32 %v2217_v27, %v2195_v4  ;;  %2848 = vperm.xlu0 %6313, %v6747_v58   ;;  %v6044_v27 = vld [vmem:[%s7336_s12 + $0x48] sm:$0xff]  ;;  %v6749_v58 = vld [vmem:[%s7361_s7 + $0x60] sm:$0xff] }
 0x496   : > { %2276 = vst.msk [vmem:[#allocation3 + $0x10] sm:$0xff] %vm11038_vm15, %v2259_v63  ;;  %v2167_v63 = vmul.f32 1.442695, %v2140_v44  ;;  %vm11040_vm15 = vmmov %vm11001_vm10  ;;  %v2188_v44 = vld [vmem:[#allocation3 + $0x58] sm:$0xff] }
 0x498   : > { %2446 = vrot.lane.b32.xlu1 %v6041_v29, %s7094_s5  ;;  %v6750_v29 = vld [vmem:[%s7361_s7 + $0x58] sm:$0xff]  ;;  %6510 = vpow2.f32 %v2167_v63 }
 0x499   : > { %2856 = vperm.xlu2 %6312, %v6750_v29   ;;  %v6050_v29 = vld [vmem:[%s7336_s12 + $0x78] sm:$0xff] }
 0x49b   : > { %v2226_v51 = vpop.xlane.xlu0 %2225 }
 0x49c   : > { %v2262_v4 = vadd.f32 %v2226_v51, %v2198_v25  ;;  %2860 = vperm.xlu0 %6313, %v6749_v58   ;;  %v6047_v25 = vld [vmem:[%s7336_s12 + $0x60] sm:$0xff]  ;;  %v2173_v51 = vmul.f32 1.442695, %v2143_v6  ;;  %v8862_v6 = vpop.permute.xlu2 %2434 }
 0x49e   : > { %2279 = vst.msk [vmem:[#allocation3 + $0x28] sm:$0xff] %vm11001_vm10, %v2262_v4  ;;  %v6751_v4 = vld [vmem:[%s7361_s7 + $0x70] sm:$0xff]  ;;  %6512 = vpow2.f32 %v2173_v51 }
 0x4a0   : > { %2452 = vrot.lane.b32.xlu1 %v6044_v27, %s7094_s5  ;;  %v6511_v27 = vpop.eup %6510 }
 0x4a1   : > { %2868 = vperm.xlu2 %6312, %v6751_v4   ;;  %v2204_v58 = vmul.f32 %v6511_v27, %v2188_v44  ;;  %v8872_v44 = vld [vmem:[%s7361_s7 + $0x20] sm:$0xff] }
 0x4a2   : > { %11043 = vst [vmem:[#allocation86_spill] sm:$0xff] %v8872_v44 }
 0x4a3   : > { %v2235_v37 = vpop.xlane.xlu0 %2234 }
 0x4a4   : > { %v2265_v5 = vadd.f32 %v2235_v37, %v2201_v21  ;;  %v6513_v63 = vpop.eup %6512 }
 0x4a5   : > { %v2207_v21 = vmul.f32 %v6513_v63, %v2191_v52 }
 0x4a6   : > { %2282 = vst.msk [vmem:[#allocation3 + $0x40] sm:$0xff] %vm11040_vm15, %v2265_v5  ;;  %vm11041_vm15 = vmmov %vm11001_vm10 }
 0x4a8   : > { %2458 = vrot.lane.b32.xlu1 %v6047_v25, %s7094_s5  ;;  %v8866_v25 = vld [vmem:[%s7361_s7 + $0x10] sm:$0xff] }
 0x4a9   : > { %11042 = vst [vmem:[#allocation74_spill] sm:$0xff] %v8866_v25 }
 0x4ab   : > { %v2244_v11 = vpop.xlane.xlu0 %2243 }
 0x4ac   : > { %v2268_v34 = vadd.f32 %v2244_v11, %v2204_v58  ;;  %v6754_v58 = vld [vmem:[%s7361_s7 + $0x38] sm:$0xff] }
 0x4ae   : > { %2285 = vst.msk [vmem:[#allocation3 + $0x58] sm:$0xff] %vm11001_vm10, %v2268_v34 }
 0x4af   : > { %v8869_v51 = vpop.permute.xlu2 %2442 }
 0x4b0   : > { %2464 = vrot.lane.b32.xlu1 %v6050_v29, %s7094_s5  ;;  %v6755_v29 = vld [vmem:[%s7361_s7 + $0x50] sm:$0xff] }
 0x4b3   : > { %v2253_v37 = vpop.xlane.xlu0 %2252 }
 0x4b4   : > { %v2271_v5 = vadd.f32 %v2253_v37, %v2207_v21  ;;  %v2144_v21 = vsub.f32 %v10987_v43, %v8706_v17  ;;  %v6756_v37 = vld [vmem:[%s7361_s7 + $0x68] sm:$0xff] }
 0x4b6   : > { %2288 = vst.msk [vmem:[#allocation3 + $0x70] sm:$0xff] %vm11041_vm15, %v2271_v5  ;;  %v2175_v5 = vmul.f32 1.442695, %v2144_v21  ;;  %v8901_v21 = vperm.slane %v2876_v47, 2 }
 0x4b7   : > { %v2449_v4 = vpop.permute.xlu2 %2448 }
 0x4b8   : > { %2820 = vperm.xlu1 %6314, %v8866_v25   ;;  %2482 = vmatpush.bf16.msrb.mxu2 %v2449_v4  ;;  %6514 = vpow2.f32 %v2175_v5 }
 0x4be   : > { %v6515_v7 = vpop.eup %6514 }
 0x4bf   : > { %v8878_v11 = vpop.permute.xlu2 %2454  ;;  %v2208_v9 = vmul.f32 %v6515_v7, %v2192_v32 }
 0x4c0   : > { %2828 = vperm.xlu1 %6314, %v8872_v44  }
 0x4c6   : > { %v8875_v27 = vpop.permute.xlu0 %2436 }
 0x4c7   : > { %v8885_v52 = vpop.permute.xlu2 %2460 }
 0x4c8   : > { %2840 = vperm.xlu1 %6314, %v6754_v58  }
 0x4ce   : > { %v8880_v34 = vpop.permute.xlu0 %2440 }
 0x4cf   : > { %v2813_v58 = vpop.permute.xlu2 %2812 }
 0x4d0   : > { %2852 = vperm.xlu1 %6314, %v6755_v29   ;;  %v2875_v29 = vperm.slane %v8895_v16, 2  ;;  %v2882_v55 = vadd.f32 %v8901_v21, %v2813_v58 }
 0x4d2   : > { %v2914_v44 = vmul.f32 0.2, %v2882_v55 }
 0x4d6   : > { %v8883_v63 = vpop.permute.xlu0 %2444 }
 0x4d7   : > { %v2825_v17 = vpop.permute.xlu2 %2824 }
 0x4d8   : > { %2864 = vperm.xlu1 %6314, %v6756_v37   ;;  %v8899_v37 = vperm.slane %v2875_v29, 2  ;;  %v2888_v32 = vadd.f32 %v8901_v21, %v2825_v17 }
 0x4da   : > { %v2881_v33 = vadd.f32 %v8899_v37, %v2813_v58  ;;  %v2887_v16 = vadd.f32 %v8899_v37, %v2825_v17  ;;  %v2920_v48 = vmul.f32 0.2, %v2888_v32 }
 0x4dc   : > { %v2913_v0 = vmul.f32 0.2, %v2881_v33  ;;  %v2919_v38 = vmul.f32 0.2, %v2887_v16 }
 0x4de   : > { %v8890_v4 = vpop.permute.xlu0 %2450  ;;  %v2945_v29 = vmax.f32 %v2881_v33, %v2913_v0  ;;  %v2951_v54 = vmax.f32 %v2887_v16, %v2919_v38 }
 0x4df   : > { %v2833_v7 = vpop.permute.xlu2 %2832 }
 0x4e0   : > { %v8914_v14 = vsel %vm7545_vm1, %v2945_v29, -1e+30  ;;  %v2891_v13 = vadd.f32 %v8899_v37, %v2833_v7 }
 0x4e1   : > { %11046 = vst [vmem:[#allocation83_spill] sm:$0xff] %v8914_v14 }
 0x4e2   : > { %v2923_v38 = vmul.f32 0.2, %v2891_v13 }
 0x4e6   : > { %v8892_v35 = vpop.permute.xlu0 %2456 }
 0x4e7   : > { %v2845_v16 = vpop.permute.xlu2 %2844 }
 0x4ea   : > { %v2256_v22 = vpop.xlane.xlu1 %2255 }
 0x4eb   : > { %v2272_v43 = vadd.f32 %v2256_v22, %v2208_v9 }
 0x4ed   : > { %2289 = vst.msk [vmem:[#allocation3 + $0x78] sm:$0xff] %vm11001_vm10, %v2272_v43  ;;  %v2946_v43 = vmax.f32 %v2882_v55, %v2914_v44 }
 0x4ee   : > { %v8904_v5 = vpop.permute.xlu0 %2462 }
 0x4ef   : > { %v8918_v17 = vsel %vm10905_vm3, %v2946_v43, -1e+30  ;;  %v2955_v43 = vmax.f32 %v2891_v13, %v2923_v38 }
 0x4f0   : > { %11048 = vst [vmem:[#allocation98_spill] sm:$0xff] %v8918_v17 }
 0x4f6   : > { %v2817_v22 = vpop.permute.xlu0 %2816 }
 0x4f7   : > { %v2883_v9 = vadd.f32 %v8899_v37, %v2817_v22  ;;  %v2884_v47 = vadd.f32 %v8901_v21, %v2817_v22  ;;  %v2952_v22 = vmax.f32 %v2888_v32, %v2920_v48  ;;  %v11062_v32 = vld [vmem:[#allocation70_spill] sm:$0xff] }
 0x4f8   : > { %vm11063_vm15 = vnez %v11062_v32  ;;  %v11067_v32 = vld [vmem:[#allocation78_spill] sm:$0xff] }
 0x4f9   : > { %v2915_v19 = vmul.f32 0.2, %v2883_v9  ;;  %v2916_v61 = vmul.f32 0.2, %v2884_v47  ;;  %v8940_v29 = vsel %vm10915_vm0, %v2952_v22, -1e+30  ;;  %vm11068_vm10 = vnez %v11067_v32 }
 0x4fa   : > { %11055 = vst [vmem:[#allocation92_spill] sm:$0xff] %v8940_v29 }
 0x4fb   : > { %v2947_v46 = vmax.f32 %v2883_v9, %v2915_v19  ;;  %v2948_v58 = vmax.f32 %v2884_v47, %v2916_v61  ;;  %v2892_v61 = vadd.f32 %v8901_v21, %v2833_v7  ;;  %v3009_v9 = vmax.f32 %v8914_v14, %v8918_v17 }
 0x4fc   : > { %v2897_v17 = vadd.f32 %v8899_v37, %v2845_v16 }
 0x4fd   : > { %v8923_v55 = vsel %vm7588_vm7, %v2947_v46, -1e+30  ;;  %v8927_v19 = vsel %vm7595_vm8, %v2948_v58, -1e+30  ;;  %v2924_v48 = vmul.f32 0.2, %v2892_v61 }
 0x4fe   : > { %11050 = vst [vmem:[#allocation87_spill] sm:$0xff] %v8923_v55  ;;  %v3012_v44 = vmax.f32 %v8923_v55, %v8927_v19  ;;  %v8936_v46 = vsel %vm10913_vm9, %v2951_v54, -1e+30  ;;  %v8948_v54 = vsel %vm7612_vm11, %v2955_v43, -1e+30  ;;  %v2857_v55 = vpop.permute.xlu2 %2856 }
 0x4ff   : > { %11052 = vst [vmem:[#allocation104_spill] sm:$0xff] %v8927_v19  ;;  %v3018_v58 = vmax.f32 %v8936_v46, %v8940_v29  ;;  %v2956_v19 = vmax.f32 %v2892_v61, %v2924_v48  ;;  %v2929_v47 = vmul.f32 0.2, %v2897_v17  ;;  %v2903_v38 = vadd.f32 %v8899_v37, %v2857_v55 }
 0x500   : > { %3013 = vmax.xlane.f32.xlu2 %v3012_v44  ;;  %v2898_v44 = vadd.f32 %v8901_v21, %v2845_v16  ;;  %11057 = vst [vmem:[#allocation93_spill] sm:$0xff] %v8948_v54 }
 0x501   : > { %v2961_v16 = vmax.f32 %v2897_v17, %v2929_v47  ;;  %v2935_v43 = vmul.f32 0.2, %v2903_v38 }
 0x502   : > { %3010 = vmax.xlane.f32.xlu1 %v3009_v9  ;;  %v2439_v7 = vpop.permute.xlu1 %2438  ;;  %v2930_v22 = vmul.f32 0.2, %v2898_v44  ;;  %v8952_v9 = vsel %vm7636_vm14, %v2956_v19, -1e+30 }
 0x503   : > { %11059 = vst [vmem:[#allocation109_spill] sm:$0xff] %v8952_v9  ;;  %v3024_v61 = vmax.f32 %v8948_v54, %v8952_v9  ;;  %v8961_v19 = vsel %vm7810_vm2, %v2961_v16, -1e+30  ;;  %v2967_v17 = vmax.f32 %v2903_v38, %v2935_v43 }
 0x504   : > { %v2962_v48 = vmax.f32 %v2898_v44, %v2930_v22  ;;  %11061 = vst [vmem:[#allocation91_spill] sm:$0xff] %v8961_v19 }
 0x506   : > { %v2869_v54 = vpop.permute.xlu2 %2868 }
 0x507   : > { %v2909_v47 = vadd.f32 %v8899_v37, %v2869_v54  ;;  %v2910_v44 = vadd.f32 %v8901_v21, %v2869_v54 }
 0x508   : > { %3019 = vmax.xlane.f32.xlu2 %v3018_v58  ;;  %v2904_v58 = vadd.f32 %v8901_v21, %v2857_v55 }
 0x509   : > { %v2941_v16 = vmul.f32 0.2, %v2909_v47 }
 0x50a   : > { %v2447_v13 = vpop.permute.xlu1 %2446  ;;  %v2936_v14 = vmul.f32 0.2, %v2904_v58 }
 0x50b   : > { %2483 = vmatpush.bf16.msrb.mxu2 %v2447_v13  ;;  %v8965_v13 = vsel %vm11063_vm15, %v2962_v48, -1e+30  ;;  %v2942_v48 = vmul.f32 0.2, %v2910_v44 }
 0x50c   : > { %11064 = vst [vmem:[#allocation99_spill] sm:$0xff] %v8965_v13  ;;  %v2968_v55 = vmax.f32 %v2904_v58, %v2936_v14  ;;  %v2973_v58 = vmax.f32 %v2909_v47, %v2941_v16 }
 0x50d   : > { %v2974_v54 = vmax.f32 %v2910_v44, %v2942_v48 }
 0x50f   : > { %2484 = vmatpush.bf16.msrb.mxu2 %v8883_v63  ;;  %v3033_v63 = vmax.f32 %v8961_v19, %v8965_v13  ;;  %v8992_v43 = vsel %vm10996_vm4, %v2974_v54, -1e+30  ;;  %vm11073_vm4 = vnez %v11072_v56  ;;  %v11093_v13 = vld [vmem:[#allocation52_spill] sm:$0xff] }
 0x510   : > { %3025 = vmax.xlane.f32.xlu2 %v3024_v61  ;;  %v8977_v61 = vsel %vm7902_vm6, %v2967_v17, -1e+30  ;;  %11071 = vst [vmem:[#allocation103_spill] sm:$0xff] %v8992_v43  ;;  %v2837_v17 = vpop.permute.xlu0 %2836 }
 0x511   : > { %11066 = vst [vmem:[#allocation111_spill] sm:$0xff] %v8977_v61  ;;  %v2894_v47 = vadd.f32 %v8901_v21, %v2837_v17 }
 0x512   : > { %v8967_v9 = vpop.permute.xlu1 %2452 }
 0x513   : > { %2485 = vmatpush.bf16.msrb.mxu2 %v8869_v51  ;;  %v8981_v51 = vsel %vm11068_vm10, %v2968_v55, -1e+30  ;;  %v2893_v55 = vadd.f32 %v8899_v37, %v2837_v17 }
 0x514   : > { %11069 = vst [vmem:[#allocation97_spill] sm:$0xff] %v8981_v51  ;;  %v3042_v14 = vmax.f32 %v8977_v61, %v8981_v51 }
 0x517   : > { %2486 = vmatpush.bf16.msrb.mxu2 %v8880_v34  ;;  %v8988_v34 = vsel %vm7920_vm5, %v2973_v58, -1e+30  ;;  %v2926_v58 = vmul.f32 0.2, %v2894_v47 }
 0x518   : > { %3034 = vmax.xlane.f32.xlu2 %v3033_v63  ;;  %11070 = vst [vmem:[#allocation105_spill] sm:$0xff] %v8988_v34  ;;  %v2849_v48 = vpop.permute.xlu0 %2848 }
 0x519   : > { %v2900_v17 = vadd.f32 %v8901_v21, %v2849_v48 }
 0x51a   : > { %v2459_v38 = vpop.permute.xlu1 %2458 }
 0x51b   : > { %2487 = vmatpush.bf16.msrb.mxu2 %v2439_v7  ;;  %v2306_v7 = vpack.c.bf16 %v8671_v59, %v8576_v26  ;;  %v2925_v26 = vmul.f32 0.2, %v2893_v55 }
 0x51f   : > { %2488 = vmatpush.bf16.msrb.mxu2 %v8875_v27  ;;  %v3051_v27 = vmax.f32 %v8988_v34, %v8992_v43 }
 0x520   : > { %3043 = vmax.xlane.f32.xlu2 %v3042_v14  ;;  %v2861_v22 = vpop.permute.xlu0 %2860 }
 0x522   : > { %v2465_v63 = vpop.permute.xlu1 %2464 }
 0x523   : > { %2489 = vmatpush.bf16.msrb.mxu2 %v8862_v6  ;;  %2531 = vmatpush.bf16.msrb.mxu3 %v2465_v63 }
 0x526   : > { %2490 = vmatmul.bf16.vlgmr.msrb.gmra.mxu2 %v2306_v7  ;;  %v2899_v7 = vadd.f32 %v8899_v37, %v2849_v48  ;;  %v2932_v48 = vmul.f32 0.2, %v2900_v17 }
 0x527   : > { %2532 = vmatpush.bf16.msrb.mxu3 %v8904_v5  ;;  %v2957_v5 = vmax.f32 %v2893_v55, %v2925_v26  ;;  %v11078_v26 = vld [vmem:[#allocation50_spill] sm:$0xff] }
 0x528   : > { %3052 = vmax.xlane.f32.xlu2 %v3051_v27  ;;  %v2958_v27 = vmax.f32 %v2894_v47, %v2926_v58  ;;  %v2308_v47 = vpack.c.bf16 %v8632_v10, %v8734_v40  ;;  %vm11079_vm10 = vnez %v11078_v26  ;;  %v2905_v40 = vadd.f32 %v8899_v37, %v2861_v22  ;;  %v11082_v26 = vld [vmem:[#allocation32_spill] sm:$0xff] }
 0x529   : > { %v2964_v29 = vmax.f32 %v2900_v17, %v2932_v48  ;;  %vm11083_vm15 = vnez %v11082_v26 }
 0x52a   : > { %v2821_v44 = vpop.permute.xlu1 %2820 }
 0x52b   : > { %v2885_v16 = vadd.f32 %v8899_v37, %v2821_v44  ;;  %v2886_v6 = vadd.f32 %v8901_v21, %v2821_v44  ;;  %2533 = vmatpush.bf16.msrb.mxu3 %v8885_v52  ;;  %v11075_v44 = vld [vmem:[#allocation37_spill] sm:$0xff] }
 0x52c   : > { %vm11076_vm5 = vnez %v11075_v44 }
 0x52d   : > { %v2917_v59 = vmul.f32 0.2, %v2885_v16  ;;  %v2918_v14 = vmul.f32 0.2, %v2886_v6 }
 0x52f   : > { %v2949_v54 = vmax.f32 %v2885_v16, %v2917_v59  ;;  %v2950_v63 = vmax.f32 %v2886_v6, %v2918_v14  ;;  %2534 = vmatpush.bf16.msrb.mxu3 %v2459_v38  ;;  %v2931_v6 = vmul.f32 0.2, %v2899_v7  ;;  %v9024_v59 = vsel %vm11079_vm10, %v2957_v5, -1e+30 }
 0x530   : > { %v2906_v5 = vadd.f32 %v8901_v21, %v2861_v22  ;;  %v2937_v22 = vmul.f32 0.2, %v2905_v40  ;;  %vm11094_vm10 = vnez %v11093_v13 }
 0x531   : > { %v9009_v57 = vsel %vm11073_vm4, %v2949_v54, -1e+30  ;;  %v9013_v52 = vsel %vm11076_vm5, %v2950_v63, -1e+30  ;;  %v11080_v54 = vld [vmem:[#allocation53_spill] sm:$0xff] }
 0x532   : > { %11074 = vst [vmem:[#allocation108_spill] sm:$0xff] %v9009_v57  ;;  %v2829_v32 = vpop.permute.xlu1 %2828  ;;  %v3015_v16 = vmax.f32 %v9009_v57, %v9013_v52  ;;  %vm11081_vm6 = vnez %v11080_v54  ;;  %v2938_v17 = vmul.f32 0.2, %v2906_v5 }
 0x533   : > { %11077 = vst [vmem:[#allocation116_spill] sm:$0xff] %v9013_v52  ;;  %v2889_v38 = vadd.f32 %v8899_v37, %v2829_v32  ;;  %v2890_v55 = vadd.f32 %v8901_v21, %v2829_v32  ;;  %2535 = vmatpush.bf16.msrb.mxu3 %v8892_v35  ;;  %v9028_v63 = vsel %vm11081_vm6, %v2958_v27, -1e+30  ;;  %v11085_v27 = vld [vmem:[#allocation33_spill] sm:$0xff] }
 0x534   : > { %3016 = vmax.xlane.f32.xlu0 %v3015_v16  ;;  %v2963_v16 = vmax.f32 %v2899_v7, %v2931_v6  ;;  %v3027_v10 = vmax.f32 %v9024_v59, %v9028_v63  ;;  %vm11086_vm2 = vnez %v11085_v27 }
 0x535   : > { %v2921_v14 = vmul.f32 0.2, %v2889_v38  ;;  %v2922_v58 = vmul.f32 0.2, %v2890_v55 }
 0x536   : > { %2495 = vmatmul.bf16.gmra.mxu2 %v2308_v47  ;;  %v9050_v48 = vsel %vm10923_vm13, %v2963_v16, -1e+30  ;;  %v11091_v16 = vld [vmem:[#allocation51_spill] sm:$0xff] }
 0x537   : > { %v2953_v32 = vmax.f32 %v2889_v38, %v2921_v14  ;;  %v2954_v35 = vmax.f32 %v2890_v55, %v2922_v58  ;;  %2536 = vmatpush.bf16.msrb.mxu3 %v8878_v11  ;;  %vm11092_vm13 = vnez %v11091_v16  ;;  %v11146_v16 = vld [vmem:[#allocation96_spill] sm:$0xff] }
 0x539   : > { %v9037_v54 = vsel %vm11083_vm15, %v2953_v32, -1e+30  ;;  %v9041_v47 = vsel %vm11086_vm2, %v2954_v35, -1e+30  ;;  %v11089_v32 = vld [vmem:[#allocation61_spill] sm:$0xff] }
 0x53a   : > { %11084 = vst [vmem:[#allocation117_spill] sm:$0xff] %v9037_v54  ;;  %v2841_v38 = vpop.permute.xlu1 %2840  ;;  %v3021_v11 = vmax.f32 %v9037_v54, %v9041_v47  ;;  %vm11090_vm6 = vnez %v11089_v32 }
 0x53b   : > { %11087 = vst [vmem:[#allocation112_spill] sm:$0xff] %v9041_v47  ;;  %v2895_v7 = vadd.f32 %v8899_v37, %v2841_v38  ;;  %v2896_v55 = vadd.f32 %v8901_v21, %v2841_v38  ;;  %2537 = vmatpush.bf16.msrb.mxu3 %v8967_v9  ;;  %v9054_v35 = vsel %vm11090_vm6, %v2964_v29, -1e+30  ;;  %v2969_v38 = vmax.f32 %v2905_v40, %v2937_v22  ;;  %v11097_v22 = vld [vmem:[#allocation67_spill] sm:$0xff] }
 0x53c   : > { %3028 = vmax.xlane.f32.xlu0 %v3027_v10  ;;  %3022 = vmax.xlane.f32.xlu1 %v3021_v11  ;;  %v2307_v9 = vpack.c.bf16 %v8673_v60, %v8579_v30  ;;  %v3036_v10 = vmax.f32 %v9050_v48, %v9054_v35  ;;  %v2970_v11 = vmax.f32 %v2906_v5, %v2938_v17 }
 0x53d   : > { %v2927_v14 = vmul.f32 0.2, %v2895_v7  ;;  %v2928_v58 = vmul.f32 0.2, %v2896_v55  ;;  %v2310_v60 = vpack.c.bf16 %v8743_v39, %v8681_v31  ;;  %v11102_v31 = vld [vmem:[#allocation60_spill] sm:$0xff] }
 0x53e   : > { %vm11103_vm14 = vnez %v11102_v31 }
 0x53f   : > { %v2959_v43 = vmax.f32 %v2895_v7, %v2927_v14  ;;  %v2960_v34 = vmax.f32 %v2896_v55, %v2928_v58  ;;  %2538 = vmatpush.bf16.msrb.mxu3 %v8890_v4 }
 0x541   : > { %v9063_v6 = vsel %vm11092_vm13, %v2959_v43, -1e+30  ;;  %v9067_v29 = vsel %vm11094_vm10, %v2960_v34, -1e+30  ;;  %v11095_v43 = vld [vmem:[#allocation66_spill] sm:$0xff]  ;;  %vm11098_vm10 = vnez %v11097_v22 }
 0x542   : > { %2539 = vmatmul.bf16.vlgmr.msrb.gmra.mxu3 %v2307_v9  ;;  %v2853_v7 = vpop.permute.xlu1 %2852  ;;  %v3030_v4 = vmax.f32 %v9063_v6, %v9067_v29  ;;  %vm11096_vm13 = vnez %v11095_v43  ;;  %v9081_v17 = vsel %vm11098_vm10, %v2970_v11, -1e+30  ;;  %v11107_v43 = vld [vmem:[#allocation72_spill] sm:$0xff] }
 0x543   : > { %v2901_v40 = vadd.f32 %v8899_v37, %v2853_v7  ;;  %v2902_v30 = vadd.f32 %v8901_v21, %v2853_v7  ;;  %v9077_v5 = vsel %vm11096_vm13, %v2969_v38, -1e+30  ;;  %vm11108_vm13 = vnez %v11107_v43  ;;  %v11138_v43 = vld [vmem:[#allocation62_spill] sm:$0xff] }
 0x544   : > { %3037 = vmax.xlane.f32.xlu0 %v3036_v10  ;;  %3031 = vmax.xlane.f32.xlu1 %v3030_v4  ;;  %v3045_v9 = vmax.f32 %v9077_v5, %v9081_v17  ;;  %v11099_v10 = vld [vmem:[#allocation59_spill] sm:$0xff] }
 0x545   : > { %v2933_v34 = vmul.f32 0.2, %v2901_v40  ;;  %v2934_v55 = vmul.f32 0.2, %v2902_v30  ;;  %vm11100_vm6 = vnez %v11099_v10 }
 0x546   : > { %2500 = vmatmul.bf16.gmra.mxu2 %v2310_v60 }
 0x547   : > { %v2965_v14 = vmax.f32 %v2901_v40, %v2933_v34  ;;  %v2966_v58 = vmax.f32 %v2902_v30, %v2934_v55 }
 0x549   : > { %v9087_v7 = vsel %vm11100_vm6, %v2965_v14, -1e+30  ;;  %v9091_v39 = vsel %vm11103_vm14, %v2966_v58, -1e+30  ;;  %v2309_v14 = vpack.c.bf16 %v8634_v1, %v8736_v45  ;;  %v11105_v58 = vld [vmem:[#allocation71_spill] sm:$0xff]  ;;  %v2311_v45 = vpack.c.bf16 %v8745_v8, %v8683_v20  ;;  %v6065_v20 = vld [vmem:[%s7336_s12 + $0x70] sm:$0xff] }
 0x54a   : > { %11101 = vst [vmem:[#allocation113_spill] sm:$0xff] %v9087_v7  ;;  %v2865_v38 = vpop.permute.xlu1 %2864  ;;  %v3039_v4 = vmax.f32 %v9087_v7, %v9091_v39  ;;  %vm11106_vm10 = vnez %v11105_v58  ;;  %v6058_v1 = vld [vmem:[%s7336_s12 + $0x38] sm:$0xff] }
 0x54b   : > { %11104 = vst [vmem:[#allocation114_spill] sm:$0xff] %v9091_v39  ;;  %v2907_v11 = vadd.f32 %v8899_v37, %v2865_v38  ;;  %v2908_v40 = vadd.f32 %v8901_v21, %v2865_v38  ;;  %v2312_v38 = vpack.c.bf16 %v8691_v49, %v8641_v24  ;;  %v6055_v24 = vld [vmem:[%s7336_s12 + $0x20] sm:$0xff]  ;;  %v6066_v49 = vld [vmem:[%s7336_s12 + $0x78] sm:$0xff] }
 0x54c   : > { %3046 = vmax.xlane.f32.xlu0 %v3045_v9  ;;  %3040 = vmax.xlane.f32.xlu1 %v3039_v4  ;;  %v2314_v4 = vpack.c.bf16 %v8650_v50, %v8751_v41  ;;  %v2313_v50 = vpack.c.bf16 %v8693_v3, %v8643_v36 }
 0x54d   : > { %v2939_v30 = vmul.f32 0.2, %v2907_v11  ;;  %v2940_v60 = vmul.f32 0.2, %v2908_v40  ;;  %3600 = vrot.lane.b32.xlu2 %v6066_v49, %s7096_s16 }
 0x54f   : > { %v2971_v34 = vmax.f32 %v2907_v11, %v2939_v30  ;;  %v2972_v55 = vmax.f32 %v2908_v40, %v2940_v60  ;;  %v6056_v11 = vld [vmem:[%s7336_s12 + $0x28] sm:$0xff]  ;;  %v6057_v40 = vld [vmem:[%s7336_s12 + $0x30] sm:$0xff]  ;;  %v10651_v30 = vmov 3   ;;  %v2316_v60 = vpack.c.bf16 %v8759_v15, %v8701_v23  ;;  %v6054_v23 = vld [vmem:[%s7336_s12 + $0x18] sm:$0xff] }
 0x550   : > { %6316 = vset.pattern.permute.xlu0 %v10651_v30  ;;  %6315 = vset.pattern.permute.xlu1 %v10651_v30 }
 0x551   : > { %v9101_v22 = vsel %vm11106_vm10, %v2971_v34, -1e+30  ;;  %v9105_v31 = vsel %vm11108_vm13, %v2972_v55, -1e+30  ;;  %6318 = vset.pattern.permute.xlu2 %v10651_v30  ;;  %v6053_v34 = vld [vmem:[%s7336_s12 + $0x10] sm:$0xff]  ;;  %v6064_v55 = vld [vmem:[%s7336_s12 + $0x68] sm:$0xff] }
 0x552   : > { %2544 = vmatmul.bf16.gmra.mxu3 %v2309_v14  ;;  %v3048_v9 = vmax.f32 %v9101_v22, %v9105_v31  ;;  %vm3409_vm13 = vcmask 23568   ;;  %v11134_v30 = vld [vmem:[#allocation73_spill] sm:$0xff]  ;;  %vm11150_vm10 = vcmask 261120  }
 0x553   : > { %vm11152_vm14 = vmmov %vm11150_vm10 }
 0x554   : > { %3049 = vmax.xlane.f32.xlu1 %v3048_v9  ;;  %vm11153_vm6 = vmmov %vm11150_vm10 }
 0x555   : > { %3596 = vrot.lane.b32.xlu2 %v6064_v55, %s7096_s16  ;;  %v11116_v55 = vld [vmem:[#allocation101_spill] sm:$0xff] }
 0x556   : > { %2505 = vmatmul.bf16.gmra.mxu2 %v2312_v38 }
 0x560   : > { %3584 = vrot.lane.b32.xlu0 %v6058_v1, %s7096_s16  ;;  %v6061_v1 = vld [vmem:[%s7336_s12 + $0x50] sm:$0xff] }
 0x562   : > { %2549 = vmatmul.bf16.gmra.mxu3 %v2311_v45  ;;  %v6062_v45 = vld [vmem:[%s7336_s12 + $0x58] sm:$0xff] }
 0x563   : > { %3592 = vrot.lane.b32.xlu2 %v6062_v45, %s7096_s16 }
 0x566   : > { %2510 = vmatmul.bf16.gmra.mxu2 %v2314_v4 }
 0x568   : > { %3580 = vrot.lane.b32.xlu0 %v6056_v11, %s7096_s16  ;;  %v2315_v11 = vpack.c.bf16 %v8652_v2, %v8753_v42  ;;  %v11115_v2 = vld [vmem:[#allocation68_spill] sm:$0xff] }
 0x569   : > { %v6052_v42 = vld [vmem:[%s7336_s12 + $0x8] sm:$0xff] }
 0x56d   : > { %3582 = vrot.lane.b32.xlu1 %v6057_v40, %s7096_s16  ;;  %v6063_v40 = vld [vmem:[%s7336_s12 + $0x60] sm:$0xff] }
 0x570   : > { %3578 = vrot.lane.b32.xlu0 %v6055_v24, %s7096_s16 }
 0x572   : > { %2554 = vmatmul.bf16.gmra.mxu3 %v2313_v50  ;;  %v11112_v50 = vld [vmem:[#allocation46_spill] sm:$0xff] }
 0x573   : > { %v3014_v8 = vpop.xlane.xlu2 %3013 }
 0x574   : > { %v3058_v41 = vmax.f32 %v7970_v18, %v3014_v8 }
 0x575   : > { %3598 = vrot.lane.b32.xlu1 %v6065_v20, %s7096_s16  ;;  %v3011_v14 = vpop.xlane.xlu1 %3010  ;;  %v11113_v20 = vld [vmem:[#allocation34_spill] sm:$0xff] }
 0x576   : > { %v9137_v9 = vmax.f32 %v3058_v41, 0.0  ;;  %v3057_v36 = vmax.f32 %v7955_v12, %v3011_v14  ;;  %2515 = vmatmul.bf16.gmra.mxu2 %v2316_v60  ;;  %v2318_v8 = vpack.c.bf16 %v11113_v20, %v11112_v50  ;;  %v6051_v41 = vld [vmem:[%s7336_s12] sm:$0xff]  ;;  %v11123_v20 = vld [vmem:[#allocation57_spill] sm:$0xff] }
 0x577   : > { %3570 = vrot.lane.b32.xlu2 %v6051_v41, %s7096_s16 }
 0x578   : > { %11109 = vst [vmem:[#allocation115_spill] sm:$0xff] %v9137_v9  ;;  %v9143_v3 = vmax.f32 %v3057_v36, 0.0  ;;  %3574 = vrot.lane.b32.xlu0 %v6053_v34, %s7096_s16 }
 0x579   : > { %3427 = vst.msk [vmem:[#allocation2 + $0x8] sm:$0xff] %vm3409_vm13, %v9137_v9 }
 0x57a   : > { %11110 = vst [vmem:[#allocation118_spill] sm:$0xff] %v9143_v3 }
 0x57b   : > { %3426 = vst.msk [vmem:[#allocation2] sm:$0xff] %vm3409_vm13, %v9143_v3  ;;  %v3020_v15 = vpop.xlane.xlu2 %3019 }
 0x57c   : > { %v3060_v38 = vmax.f32 %v10950_v28, %v3020_v15  ;;  %v11119_v15 = vmov 2  }
 0x57d   : > { %3576 = vrot.lane.b32.xlu1 %v6054_v23, %s7096_s16  ;;  %v11118_v23 = vld [vmem:[#allocation74_spill] sm:$0xff] }
 0x57e   : > { %v9153_v4 = vmax.f32 %v3060_v38, 0.0  ;;  %v11120_v38 = vld [vmem:[#allocation48_spill] sm:$0xff] }
 0x57f   : > { %3858 = vperm.xlu2 %6318, %v11118_v23   ;;  %v11127_v23 = vld [vmem:[#allocation110_spill] sm:$0xff] }
 0x580   : > { %11111 = vst [vmem:[#allocation119_spill] sm:$0xff] %v9153_v4  ;;  %3590 = vrot.lane.b32.xlu0 %v6061_v1, %s7096_s16  ;;  %v11121_v1 = vld [vmem:[#allocation56_spill] sm:$0xff] }
 0x581   : > { %3429 = vst.msk [vmem:[#allocation2 + $0x18] sm:$0xff] %vm3409_vm13, %v9153_v4  ;;  %v2317_v45 = vpack.c.bf16 %v11121_v1, %v11120_v38 }
 0x582   : > { %2559 = vmatmul.bf16.gmra.mxu3 %v2315_v11  ;;  %v6758_v11 = vld [vmem:[%s7361_s7 + $0x78] sm:$0xff] }
 0x583   : > { %v3026_v24 = vpop.xlane.xlu2 %3025 }
 0x584   : > { %v3062_v49 = vmax.f32 %v11036_v53, %v3026_v24  ;;  %v11149_v53 = vld [vmem:[#allocation102_spill] sm:$0xff] }
 0x585   : > { %3594 = vrot.lane.b32.xlu1 %v6063_v40, %s7096_s16  ;;  %v6060_v40 = vld [vmem:[%s7336_s12 + $0x48] sm:$0xff] }
 0x586   : > { %v9167_v60 = vmax.f32 %v3062_v49, 0.0  ;;  %2520 = vmatmul.bf16.gmra.mxu2 %v2318_v8  ;;  %v11122_v49 = vld [vmem:[#allocation107_spill] sm:$0xff]  ;;  %v11124_v8 = vld [vmem:[#allocation64_spill] sm:$0xff] }
 0x587   : > { %v2320_v41 = vpack.c.bf16 %v11124_v8, %v11123_v20  ;;  %v11132_v20 = vld [vmem:[#allocation81_spill] sm:$0xff] }
 0x588   : > { %11114 = vst [vmem:[#allocation120_spill] sm:$0xff] %v9167_v60  ;;  %3854 = vperm.xlu0 %6316, %v11115_v2  }
 0x589   : > { %3431 = vst.msk [vmem:[#allocation2 + $0x28] sm:$0xff] %vm3409_vm13, %v9167_v60 }
 0x58b   : > { %v3035_v34 = vpop.xlane.xlu2 %3034 }
 0x58c   : > { %v3065_v14 = vmax.f32 %v11116_v55, %v3035_v34  ;;  %v6059_v34 = vld [vmem:[%s7336_s12 + $0x40] sm:$0xff] }
 0x58d   : > { %3572 = vrot.lane.b32.xlu1 %v6052_v42, %s7096_s16  ;;  %v11126_v42 = vld [vmem:[#allocation86_spill] sm:$0xff]  ;;  %v11137_v55 = vld [vmem:[#allocation63_spill] sm:$0xff] }
 0x58e   : > { %v9176_v36 = vmax.f32 %v3065_v14, 0.0  ;;  %3866 = vperm.xlu2 %6318, %v11126_v42   ;;  %v2583_v42 = vld [vmem:[#allocation13 + $0x38] sm:$0xff] }
 0x58f   : > { %2645 = vmatpush.msrb.mxu0 %v2583_v42 }
 0x590   : > { %11117 = vst [vmem:[#allocation121_spill] sm:$0xff] %v9176_v36  ;;  %6317 = vset.pattern.permute.xlu0 %v11119_v15 }
 0x591   : > { %3434 = vst.msk [vmem:[#allocation2 + $0x40] sm:$0xff] %vm3409_vm13, %v9176_v36  ;;  %2872 = vperm.xlu0 %6317, %v6758_v11   ;;  %v11130_v11 = vld [vmem:[#allocation35_spill] sm:$0xff] }
 0x592   : > { %2564 = vmatmul.bf16.gmra.mxu3 %v2317_v45  ;;  %v11129_v45 = vld [vmem:[#allocation47_spill] sm:$0xff] }
 0x593   : > { %v3044_v24 = vpop.xlane.xlu2 %3043 }
 0x594   : > { %v3068_v50 = vmax.f32 %v11122_v49, %v3044_v24  ;;  %v11131_v24 = vld [vmem:[#allocation65_spill] sm:$0xff] }
 0x595   : > { %3588 = vrot.lane.b32.xlu1 %v6060_v40, %s7096_s16  ;;  %v2319_v40 = vpack.c.bf16 %v11130_v11, %v11129_v45  ;;  %v2580_v45 = vld [vmem:[#allocation13 + $0x20] sm:$0xff] }
 0x596   : > { %v9190_v2 = vmax.f32 %v3068_v50, 0.0  ;;  %2525 = vmatmul.bf16.gmra.mxu2 %v2320_v41  ;;  %6320 = vset.pattern.permute.xlu2 %v11119_v15 }
 0x598   : > { %11125 = vst [vmem:[#allocation54_spill] sm:$0xff] %v9190_v2 }
 0x599   : > { %3437 = vst.msk [vmem:[#allocation2 + $0x58] sm:$0xff] %vm3409_vm13, %v9190_v2 }
 0x59b   : > { %v3053_v14 = vpop.xlane.xlu2 %3052 }
 0x59c   : > { %v3071_v38 = vmax.f32 %v11127_v23, %v3053_v14  ;;  %v2582_v14 = vld [vmem:[#allocation13 + $0x30] sm:$0xff] }
 0x59d   : > { %3586 = vrot.lane.b32.xlu1 %v6059_v34, %s7096_s16  ;;  %2646 = vmatpush.msrb.mxu0 %v2582_v14 }
 0x59e   : > { %v9198_v1 = vmax.f32 %v3071_v38, 0.0  ;;  %v2581_v38 = vld [vmem:[#allocation13 + $0x28] sm:$0xff] }
 0x59f   : > { %2647 = vmatpush.msrb.mxu0 %v2581_v38  ;;  %v11141_v38 = vld [vmem:[#allocation94_spill] sm:$0xff] }
 0x5a0   : > { %11128 = vst [vmem:[#allocation55_spill] sm:$0xff] %v9198_v1 }
 0x5a1   : > { %3440 = vst.msk [vmem:[#allocation2 + $0x70] sm:$0xff] %vm3409_vm13, %v9198_v1  ;;  %2648 = vmatpush.msrb.mxu0 %v2580_v45 }
 0x5a2   : > { %2569 = vmatmul.bf16.gmra.mxu3 %v2319_v40 }
 0x5a5   : > { %3850 = vperm.xlu1 %6315, %v11131_v24   ;;  %v11135_v24 = vld [vmem:[#allocation88_spill] sm:$0xff] }
 0x5a7   : > { %v3017_v50 = vpop.xlane.xlu0 %3016 }
 0x5a8   : > { %v3059_v8 = vmax.f32 %v11132_v20, %v3017_v50  ;;  %v11136_v50 = vld [vmem:[#allocation85_spill] sm:$0xff] }
 0x5a9   : > { %v2491_v41 = vpop.f32.mrf.mxu2 }
 0x5aa   : > { %v9207_v34 = vmax.f32 %v3059_v8, 0.0  ;;  %v2321_v8 = vpack.c.bf16 %v11138_v43, %v11137_v55  ;;  %v11142_v43 = vld [vmem:[#allocation90_spill] sm:$0xff] }
 0x5ac   : > { %11133 = vst [vmem:[#allocation45_spill] sm:$0xff] %v9207_v34 }
 0x5ad   : > { %3428 = vst.msk [vmem:[#allocation2 + $0x10] sm:$0xff] %vm3409_vm13, %v9207_v34  ;;  %3862 = vperm.xlu1 %6315, %v11134_v30  }
 0x5af   : > { %v3029_v11 = vpop.xlane.xlu0 %3028  ;;  %v3023_v40 = vpop.xlane.xlu1 %3022 }
 0x5b0   : > { %v3063_v23 = vmax.f32 %v11135_v24, %v3029_v11  ;;  %v3061_v49 = vmax.f32 %v11136_v50, %v3023_v40 }
 0x5b1   : > { %v2493_v42 = vpop.f32.mrf.mxu2 }
 0x5b2   : > { %v9216_v58 = vmax.f32 %v3063_v23, 0.0  ;;  %v9218_v10 = vmax.f32 %v3061_v49, 0.0  ;;  %2574 = vmatmul.bf16.gmra.mxu3 %v2321_v8 }
 0x5b4   : > { %11139 = vst [vmem:[#allocation38_spill] sm:$0xff] %v9216_v58 }
 0x5b5   : > { %11140 = vst [vmem:[#allocation39_spill] sm:$0xff] %v9218_v10  ;;  %6319 = vset.pattern.permute.xlu1 %v11119_v15  ;;  %v11145_v15 = vld [vmem:[#allocation100_spill] sm:$0xff] }
 0x5b6   : > { %3432 = vst.msk [vmem:[#allocation2 + $0x30] sm:$0xff] %vm3409_vm13, %v9216_v58 }
 0x5b7   : > { %3430 = vst.msk [vmem:[#allocation2 + $0x20] sm:$0xff] %vm3409_vm13, %v9218_v10  ;;  %v3038_v30 = vpop.xlane.xlu0 %3037  ;;  %v3032_v14 = vpop.xlane.xlu1 %3031 }
 0x5b8   : > { %v3066_v11 = vmax.f32 %v11141_v38, %v3038_v30  ;;  %v3064_v55 = vmax.f32 %v11142_v43, %v3032_v14 }
 0x5b9   : > { %v2496_v49 = vpop.f32.mrf.mxu2 }
 0x5ba   : > { %v9227_v45 = vmax.f32 %v3066_v11, 0.0  ;;  %v9229_v23 = vmax.f32 %v3064_v55, 0.0 }
 0x5bc   : > { %11143 = vst [vmem:[#allocation40_spill] sm:$0xff] %v9227_v45 }
 0x5bd   : > { %11144 = vst [vmem:[#allocation41_spill] sm:$0xff] %v9229_v23 }
 0x5be   : > { %3435 = vst.msk [vmem:[#allocation2 + $0x48] sm:$0xff] %vm3409_vm13, %v9227_v45 }
 0x5bf   : > { %3433 = vst.msk [vmem:[#allocation2 + $0x38] sm:$0xff] %vm3409_vm13, %v9229_v23  ;;  %v3047_v40 = vpop.xlane.xlu0 %3046  ;;  %v3041_v8 = vpop.xlane.xlu1 %3040 }
 0x5c0   : > { %v3069_v13 = vmax.f32 %v11145_v15, %v3047_v40  ;;  %v3067_v24 = vmax.f32 %v11146_v16, %v3041_v8  ;;  %v3601_v40 = vpop.permute.xlu2 %3600 }
 0x5c1   : > { %v2498_v11 = vpop.f32.mrf.mxu2  ;;  %3667 = vmatpush.bf16.msra.mxu3 %v3601_v40 }
 0x5c2   : > { %v9237_v30 = vmax.f32 %v3069_v13, 0.0  ;;  %v9239_v14 = vmax.f32 %v3067_v24, 0.0 }
 0x5c4   : > { %11147 = vst [vmem:[#allocation36_spill] sm:$0xff] %v9237_v30 }
 0x5c5   : > { %11148 = vst [vmem:[#allocation37_spill] sm:$0xff] %v9239_v14  ;;  %v2540_v55 = vpop.f32.mrf.mxu3 }
 0x5c6   : > { %3438 = vst.msk [vmem:[#allocation2 + $0x60] sm:$0xff] %vm3409_vm13, %v9237_v30  ;;  %v2541_v43 = vadd.f32 %v2540_v55, %v2491_v41 }
 0x5c7   : > { %3436 = vst.msk [vmem:[#allocation2 + $0x50] sm:$0xff] %vm3409_vm13, %v9239_v14  ;;  %v3050_v38 = vpop.xlane.xlu1 %3049 }
 0x5c8   : > { %v3070_v32 = vmax.f32 %v11149_v53, %v3050_v38  ;;  %5785 = vmatmul.msk.f32.vlgmr.msrb.gmra.mxu0 %vm11150_vm10, %v2541_v43  ;;  %v3597_v50 = vpop.permute.xlu2 %3596  ;;  %vm11154_vm10 = vmmov %vm11153_vm6 }
 0x5c9   : > { %v2501_v15 = vpop.f32.mrf.mxu2 }
 0x5ca   : > { %v9247_v13 = vmax.f32 %v3070_v32, 0.0 }
 0x5cc   : > { %11151 = vst [vmem:[#allocation32_spill] sm:$0xff] %v9247_v13 }
 0x5cd   : > { %3439 = vst.msk [vmem:[#allocation2 + $0x68] sm:$0xff] %vm3409_vm13, %v9247_v13  ;;  %v2542_v24 = vpop.f32.mrf.mxu3 }
 0x5ce   : > { %v2543_v8 = vadd.f32 %v2542_v24, %v2493_v42 }
 0x5d0   : > { %5786 = vmatmul.msk.f32.gmra.mxu0 %vm11152_vm14, %v2543_v8  ;;  %v3593_v28 = vpop.permute.xlu2 %3592  ;;  %vm11155_vm14 = vmmov %vm11153_vm6 }
 0x5d1   : > { %v2503_v38 = vpop.f32.mrf.mxu2 }
 0x5d2   : > { %v3585_v16 = vpop.permute.xlu0 %3584 }
 0x5d3   : > { %3618 = vmatpush.bf16.msra.mxu2 %v3585_v16 }
 0x5d5   : > { %v2545_v41 = vpop.f32.mrf.mxu3 }
 0x5d6   : > { %v2546_v55 = vadd.f32 %v2545_v41, %v2496_v49 }
 0x5d8   : > { %5787 = vmatmul.msk.f32.gmra.mxu0 %vm11153_vm6, %v2546_v55  ;;  %v3571_v41 = vpop.permute.xlu2 %3570 }
 0x5d9   : > { %v2506_v24 = vpop.f32.mrf.mxu2 }
 0x5da   : > { %v3581_v43 = vpop.permute.xlu0 %3580 }
 0x5dd   : > { %v2547_v40 = vpop.f32.mrf.mxu3 }
 0x5de   : > { %v2548_v32 = vadd.f32 %v2547_v40, %v2498_v11 }
 0x5df   : > { %v3583_v53 = vpop.permute.xlu1 %3582 }
 0x5e0   : > { %5788 = vmatmul.msk.f32.gmra.mxu0 %vm11154_vm10, %v2548_v32  ;;  %3619 = vmatpush.bf16.msra.mxu2 %v3583_v53  ;;  %v11156_v32 = vld [vmem:[#allocation82_spill] sm:$0xff]  ;;  %vm11157_vm10 = vmmov %vm11153_vm6 }
 0x5e1   : > { %v2508_v55 = vpop.f32.mrf.mxu2 }
 0x5e2   : > { %v3579_v42 = vpop.permute.xlu0 %3578 }
 0x5e4   : > { %3620 = vmatpush.bf16.msra.mxu2 %v3581_v43  ;;  %v3913_v43 = vperm.slane %v11156_v32, 3 }
 0x5e5   : > { %v2550_v8 = vpop.f32.mrf.mxu3 }
 0x5e6   : > { %v2551_v19 = vadd.f32 %v2550_v8, %v2501_v15  ;;  %v3914_v15 = vperm.slane %v11156_v32, 7 }
 0x5e7   : > { %v3599_v16 = vpop.permute.xlu1 %3598 }
 0x5e8   : > { %5789 = vmatmul.msk.f32.gmra.mxu0 %vm11155_vm14, %v2551_v19  ;;  %3668 = vmatpush.bf16.msra.mxu3 %v3599_v16  ;;  %v3859_v19 = vpop.permute.xlu2 %3858  ;;  %v9260_v51 = vperm.slane %v3914_v15, 3  ;;  %vm11158_vm14 = vmmov %vm11153_vm6 }
 0x5e9   : > { %3621 = vmatpush.bf16.msra.mxu2 %v3579_v42  ;;  %v9258_v42 = vperm.slane %v3913_v43, 3  ;;  %v2511_v54 = vpop.f32.mrf.mxu2 }
 0x5ea   : > { %v3575_v49 = vpop.permute.xlu0 %3574 }
 0x5ec   : > { %3669 = vmatpush.bf16.msra.mxu3 %v3597_v50 }
 0x5ed   : > { %v2552_v11 = vpop.f32.mrf.mxu3 }
 0x5ee   : > { %v2553_v40 = vadd.f32 %v2552_v11, %v2503_v38  ;;  %v3924_v38 = vadd.f32 %v9260_v51, %v3859_v19 }
 0x5ef   : > { %v3577_v47 = vpop.permute.xlu1 %3576 }
 0x5f0   : > { %5790 = vmatmul.msk.f32.gmra.mxu0 %vm11153_vm6, %v2553_v40  ;;  %3622 = vmatpush.bf16.msra.mxu2 %v3577_v47  ;;  %v3923_v47 = vadd.f32 %v9258_v42, %v3859_v19  ;;  %v3956_v61 = vmul.f32 0.2, %v3924_v38 }
 0x5f2   : > { %v3591_v53 = vpop.permute.xlu0 %3590  ;;  %v3988_v39 = vmax.f32 %v3924_v38, %v3956_v61 }
 0x5f4   : > { %3623 = vmatpush.bf16.msra.mxu2 %v3575_v49 }
 0x5f5   : > { %v2555_v8 = vpop.f32.mrf.mxu3 }
 0x5f6   : > { %v2556_v16 = vadd.f32 %v2555_v8, %v2506_v24  ;;  %v3955_v24 = vmul.f32 0.2, %v3923_v47 }
 0x5f7   : > { %v3595_v50 = vpop.permute.xlu1 %3594 }
 0x5f8   : > { %5791 = vmatmul.msk.f32.gmra.mxu0 %vm11157_vm10, %v2556_v16  ;;  %3670 = vmatpush.bf16.msra.mxu3 %v3595_v50  ;;  %v2513_v50 = vpop.f32.mrf.mxu2  ;;  %v3987_v19 = vmax.f32 %v3923_v47, %v3955_v24 }
 0x5fa   : > { %v3855_v11 = vpop.permute.xlu0 %3854  ;;  %v9282_v0 = vsel %vm11073_vm4, %v3987_v19, -1e+30 }
 0x5fb   : > { %v3921_v40 = vadd.f32 %v9258_v42, %v3855_v11  ;;  %v3922_v49 = vadd.f32 %v9260_v51, %v3855_v11 }
 0x5fc   : > { %3671 = vmatpush.bf16.msra.mxu3 %v3593_v28 }
 0x5fd   : > { %v3953_v32 = vmul.f32 0.2, %v3921_v40  ;;  %v3954_v43 = vmul.f32 0.2, %v3922_v49  ;;  %v2557_v8 = vpop.f32.mrf.mxu3 }
 0x5fe   : > { %v2558_v15 = vadd.f32 %v2557_v8, %v2508_v55 }
 0x5ff   : > { %v3985_v52 = vmax.f32 %v3921_v40, %v3953_v32  ;;  %v3986_v57 = vmax.f32 %v3922_v49, %v3954_v43  ;;  %v3573_v16 = vpop.permute.xlu1 %3572 }
 0x600   : > { %5792 = vmatmul.msk.f32.gmra.mxu0 %vm11158_vm14, %v2558_v15  ;;  %3624 = vmatpush.bf16.msra.mxu2 %v3573_v16 }
 0x601   : > { %v9270_v7 = vsel %vm7588_vm7, %v3985_v52, -1e+30  ;;  %v9274_v28 = vsel %vm7595_vm8, %v3986_v57, -1e+30  ;;  %3672 = vmatpush.bf16.msra.mxu3 %v3591_v53  ;;  %v9286_v57 = vsel %vm11076_vm5, %v3988_v39, -1e+30  ;;  %vm11159_vm7 = vmmov %vm11153_vm6  ;;  %v2516_v39 = vpop.f32.mrf.mxu2 }
 0x602   : > { %v4050_v55 = vmax.f32 %v9270_v7, %v9274_v28  ;;  %vm11163_vm5 = vmmov %vm11153_vm6 }
 0x603   : > { %v2873_v11 = vpop.permute.xlu0 %2872  ;;  %vm11164_vm4 = vmmov %vm11163_vm5 }
 0x604   : > { %v2911_v40 = vadd.f32 %v8899_v37, %v2873_v11  ;;  %v2912_v49 = vadd.f32 %v8901_v21, %v2873_v11  ;;  %4051 = vmax.xlane.f32.xlu2 %v4050_v55  ;;  %3625 = vmatpush.bf16.msra.mxu2 %v3571_v41  ;;  %v4053_v37 = vmax.f32 %v9282_v0, %v9286_v57  ;;  %v11161_v41 = vld [vmem:[#allocation76_spill] sm:$0xff]  ;;  %vm11165_vm6 = vmmov %vm11164_vm4 }
 0x605   : > { %v2560_v61 = vpop.f32.mrf.mxu3  ;;  %vm11162_vm8 = vnez %v11161_v41  ;;  %vm11166_vm10 = vmmov %vm11164_vm4 }
 0x606   : > { %v2943_v33 = vmul.f32 0.2, %v2911_v40  ;;  %v2944_v52 = vmul.f32 0.2, %v2912_v49  ;;  %v2561_v53 = vadd.f32 %v2560_v61, %v2511_v54 }
 0x607   : > { %v3589_v47 = vpop.permute.xlu1 %3588 }
 0x608   : > { %v2975_v38 = vmax.f32 %v2911_v40, %v2943_v33  ;;  %v2976_v24 = vmax.f32 %v2912_v49, %v2944_v52  ;;  %5793 = vmatmul.msk.f32.gmra.mxu0 %vm11159_vm7, %v2561_v53  ;;  %3673 = vmatpush.bf16.msra.mxu3 %v3589_v47 }
 0x609   : > { %v2518_v15 = vpop.f32.mrf.mxu2 }
 0x60a   : > { %v9293_v56 = vsel %vm10998_vm12, %v2975_v38, -1e+30  ;;  %v9297_v44 = vsel %vm11162_vm8, %v2976_v24, -1e+30 }
 0x60b   : > { %v3054_v54 = vmax.f32 %v9293_v56, %v9297_v44 }
 0x60c   : > { %4054 = vmax.xlane.f32.xlu2 %v4053_v37 }
 0x60d   : > { %v2562_v32 = vpop.f32.mrf.mxu3  ;;  %3055 = vmax.xlane.f32.xlu1 %v3054_v54 }
 0x60e   : > { %v2563_v43 = vadd.f32 %v2562_v32, %v2513_v50 }
 0x60f   : > { %v3587_v8 = vpop.permute.xlu1 %3586 }
 0x610   : > { %5794 = vmatmul.msk.f32.gmra.mxu0 %vm11163_vm5, %v2563_v43  ;;  %3674 = vmatpush.bf16.msra.mxu3 %v3587_v8 }
 0x611   : > { %v2521_v24 = vpop.f32.mrf.mxu2 }
 0x615   : > { %v2565_v16 = vpop.f32.mrf.mxu3 }
 0x616   : > { %v2566_v19 = vadd.f32 %v2565_v16, %v2516_v39 }
 0x617   : > { %v3851_v55 = vpop.permute.xlu1 %3850 }
 0x618   : > { %v3919_v11 = vadd.f32 %v9258_v42, %v3851_v55  ;;  %v3920_v40 = vadd.f32 %v9260_v51, %v3851_v55  ;;  %5795 = vmatmul.msk.f32.gmra.mxu0 %vm11164_vm4, %v2566_v19 }
 0x619   : > { %v2523_v25 = vpop.f32.mrf.mxu2 }
 0x61a   : > { %v3951_v49 = vmul.f32 0.2, %v3919_v11  ;;  %v3952_v61 = vmul.f32 0.2, %v3920_v40 }
 0x61c   : > { %v3983_v33 = vmax.f32 %v3919_v11, %v3951_v49  ;;  %v3984_v52 = vmax.f32 %v3920_v40, %v3952_v61  ;;  %v11169_v11 = vmov 3  }
 0x61d   : > { %v2567_v53 = vpop.f32.mrf.mxu3 }
 0x61e   : > { %v2568_v50 = vadd.f32 %v2567_v53, %v2518_v15  ;;  %v9307_v47 = vsel %vm7545_vm1, %v3983_v33, -1e+30  ;;  %v9311_v38 = vsel %vm10905_vm3, %v3984_v52, -1e+30  ;;  %vm11167_vm1 = vmmov %vm11164_vm4  ;;  %v3867_v53 = vpop.permute.xlu2 %3866 }
 0x61f   : > { %v4047_v37 = vmax.f32 %v9307_v47, %v9311_v38  ;;  %vm11168_vm3 = vmmov %vm11167_vm1  ;;  %v3863_v40 = vpop.permute.xlu1 %3862 }
 0x620   : > { %5796 = vmatmul.msk.f32.gmra.mxu0 %vm11165_vm6, %v2568_v50  ;;  %vm11170_vm14 = vmmov %vm11167_vm1  ;;  %v3925_v49 = vadd.f32 %v9258_v42, %v3863_v40  ;;  %v3926_v61 = vadd.f32 %v9260_v51, %v3863_v40  ;;  %v6082_v40 = vld [vmem:[%s7336_s12 + $0x78] sm:$0xff] }
 0x621   : > { %4048 = vmax.xlane.f32.xlu0 %v4047_v37  ;;  %v2526_v43 = vpop.f32.mrf.mxu2  ;;  %v3927_v37 = vadd.f32 %v9258_v42, %v3867_v53  ;;  %vm11227_vm5 = vmmov %vm11167_vm1 }
 0x622   : > { %v3957_v33 = vmul.f32 0.2, %v3925_v49  ;;  %v3958_v52 = vmul.f32 0.2, %v3926_v61  ;;  %vm11228_vm4 = vmmov %vm11167_vm1 }
 0x623   : > { %vm11229_vm6 = vmmov %vm11167_vm1 }
 0x624   : > { %3096 = vperm.xlu2 %6320, %v9137_v9   ;;  %v3989_v50 = vmax.f32 %v3925_v49, %v3957_v33  ;;  %v6760_v33 = vld [vmem:[%s7361_s7 + $0x30] sm:$0xff] }
 0x625   : > { %v2570_v39 = vpop.f32.mrf.mxu3 }
 0x626   : > { %v2571_v54 = vadd.f32 %v2570_v39, %v2521_v24  ;;  %3126 = vperm.xlu1 %6319, %v9229_v23   ;;  %v3990_v24 = vmax.f32 %v3926_v61, %v3958_v52  ;;  %v3928_v39 = vadd.f32 %v9260_v51, %v3867_v53  ;;  %v6761_v53 = vld [vmem:[%s7361_s7 + $0x48] sm:$0xff] }
 0x627   : > { %v11198_v23 = vld [vmem:[#allocation112_spill] sm:$0xff] }
 0x628   : > { %5797 = vmatmul.msk.f32.gmra.mxu0 %vm11166_vm10, %v2571_v54  ;;  %vm11232_vm10 = vmmov %vm11167_vm1 }
 0x629   : > { %v2528_v16 = vpop.f32.mrf.mxu2 }
 0x62c   : > { %3106 = vperm.xlu2 %6320, %v9153_v4  }
 0x62d   : > { %v2572_v62 = vpop.f32.mrf.mxu3 }
 0x62e   : > { %v2573_v32 = vadd.f32 %v2572_v62, %v2523_v25  ;;  %3151 = vperm.xlu1 %6319, %v9237_v30   ;;  %v9342_v25 = vsel %vm10913_vm9, %v3989_v50, -1e+30  ;;  %v3959_v62 = vmul.f32 0.2, %v3927_v37  ;;  %v6081_v50 = vld [vmem:[%s7336_s12 + $0x70] sm:$0xff] }
 0x630   : > { %5798 = vmatmul.msk.f32.gmra.mxu0 %vm11167_vm1, %v2573_v32  ;;  %v3960_v32 = vmul.f32 0.2, %v3928_v39 }
 0x634   : > { %3116 = vperm.xlu2 %6320, %v9167_v60  }
 0x635   : > { %v2575_v8 = vpop.f32.mrf.mxu3  ;;  %3091 = vperm.xlu0 %6317, %v9143_v3  }
 0x636   : > { %v2576_v15 = vadd.f32 %v2575_v8, %v2526_v43  ;;  %3156 = vperm.xlu1 %6319, %v9247_v13   ;;  %v9346_v8 = vsel %vm10915_vm0, %v3990_v24, -1e+30  ;;  %vm4447_vm0 = vcmask 31768  }
 0x638   : > { %5799 = vmatmul.msk.f32.gmra.mxu0 %vm11168_vm3, %v2576_v15  ;;  %v6759_v15 = vld [vmem:[%s7361_s7 + $0x28] sm:$0xff] }
 0x63c   : > { %3121 = vperm.xlu2 %6320, %v9216_v58  }
 0x63d   : > { %v2577_v19 = vpop.f32.mrf.mxu3  ;;  %3101 = vperm.xlu0 %6317, %v9207_v34  }
 0x63e   : > { %v2578_v55 = vadd.f32 %v2577_v19, %v2528_v16  ;;  %6323 = vset.pattern.permute.xlu1 %v11169_v11  ;;  %v4056_v16 = vmax.f32 %v9342_v25, %v9346_v8  ;;  %v3991_v19 = vmax.f32 %v3927_v37, %v3959_v62  ;;  %v11174_v62 = vld [vmem:[#allocation106_spill] sm:$0xff] }
 0x640   : > { %5800 = vmatmul.msk.f32.gmra.mxu0 %vm11170_vm14, %v2578_v55  ;;  %v3992_v55 = vmax.f32 %v3928_v39, %v3960_v32  ;;  %v9356_v49 = vsel %vm11083_vm15, %v3991_v19, -1e+30  ;;  %vm11239_vm14 = vmmov %vm11228_vm4 }
 0x642   : > { %v9360_v61 = vsel %vm11086_vm2, %v3992_v55, -1e+30  ;;  %v11177_v55 = vld [vmem:[#allocation87_spill] sm:$0xff] }
 0x643   : > { %v4059_v52 = vmax.f32 %v9356_v49, %v9360_v61 }
 0x644   : > { %3136 = vperm.xlu2 %6320, %v9227_v45  }
 0x645   : > { %3111 = vperm.xlu0 %6317, %v9218_v10  }
 0x64c   : > { %3141 = vperm.xlu2 %6320, %v9239_v14  }
 0x64d   : > { %3131 = vperm.xlu0 %6317, %v9176_v36  }
 0x654   : > { %3146 = vperm.xlu2 %6320, %v9190_v2  }
 0x655   : > { %3161 = vperm.xlu0 %6317, %v9198_v1  }
 0x65c   : > { %4638 = vrot.lane.b32.xlu2 %v6082_v40, %s7098_s6 }
 0x65d   : > { %6321 = vset.pattern.permute.xlu0 %v11169_v11 }
 0x65e   : > { %3870 = vperm.xlu0 %6321, %v6759_v15  }
 0x660   : > { %4057 = vmax.xlane.f32.xlu1 %v4056_v16  ;;  %v6080_v16 = vld [vmem:[%s7336_s12 + $0x68] sm:$0xff] }
 0x666   : > { %3874 = vperm.xlu0 %6321, %v6760_v33   ;;  %v11178_v33 = vld [vmem:[#allocation104_spill] sm:$0xff] }
 0x668   : > { %4060 = vmax.xlane.f32.xlu1 %v4059_v52 }
 0x66e   : > { %3886 = vperm.xlu0 %6321, %v6761_v53  }
 0x676   : > { %4636 = vrot.lane.b32.xlu0 %v6081_v50, %s7098_s6 }
 0x677   : > { %v4052_v24 = vpop.xlane.xlu2 %4051 }
 0x678   : > { %v4096_v26 = vmax.f32 %v7970_v18, %v4052_v24  ;;  %v6073_v24 = vld [vmem:[%s7336_s12 + $0x30] sm:$0xff] }
 0x67a   : > { %v9369_v37 = vmax.f32 %v4096_v26, 0.0 }
 0x67c   : > { %11173 = vst [vmem:[#allocation33_spill] sm:$0xff] %v9369_v37 }
 0x67d   : > { %4465 = vst.msk [vmem:[#allocation2 + $0x8] sm:$0xff] %vm4447_vm0, %v9369_v37 }
 0x67e   : > { %4634 = vrot.lane.b32.xlu0 %v6080_v16, %s7098_s6 }
 0x67f   : > { %v4055_v27 = vpop.xlane.xlu2 %4054 }
 0x680   : > { %v4097_v39 = vmax.f32 %v11132_v20, %v4055_v27  ;;  %v3056_v54 = vpop.xlane.xlu1 %3055 }
 0x681   : > { %v3072_v32 = vmax.f32 %v11174_v62, %v3056_v54 }
 0x682   : > { %v9375_v43 = vmax.f32 %v4097_v39, 0.0  ;;  %v11179_v39 = vld [vmem:[#allocation92_spill] sm:$0xff] }
 0x683   : > { %v9377_v15 = vmax.f32 %v3072_v32, 0.0 }
 0x684   : > { %11175 = vst [vmem:[#allocation46_spill] sm:$0xff] %v9375_v43 }
 0x685   : > { %11176 = vst [vmem:[#allocation34_spill] sm:$0xff] %v9377_v15  ;;  %3166 = vperm.xlu2 %6320, %v9377_v15  }
 0x686   : > { %4466 = vst.msk [vmem:[#allocation2 + $0x10] sm:$0xff] %vm4447_vm0, %v9375_v43  ;;  %4620 = vrot.lane.b32.xlu0 %v6073_v24, %s7098_s6  ;;  %v11183_v24 = vld [vmem:[#allocation109_spill] sm:$0xff] }
 0x687   : > { %3441 = vst.msk [vmem:[#allocation2 + $0x78] sm:$0xff] %vm3409_vm13, %v9377_v15  ;;  %v3097_v19 = vpop.permute.xlu2 %3096 }
 0x688   : > { %v3171_v40 = vsub.f32 %v11177_v55, %v3097_v19  ;;  %v3172_v52 = vsub.f32 %v11178_v33, %v3097_v19  ;;  %v6079_v19 = vld [vmem:[%s7336_s12 + $0x60] sm:$0xff] }
 0x68a   : > { %v3205_v53 = vmul.f32 1.442695, %v3171_v40  ;;  %v3207_v50 = vmul.f32 1.442695, %v3172_v52 }
 0x68c   : > { %6516 = vpow2.f32 %v3205_v53  ;;  %v11182_v53 = vld [vmem:[#allocation93_spill] sm:$0xff] }
 0x68d   : > { %6518 = vpow2.f32 %v3207_v50  ;;  %6322 = vset.pattern.permute.xlu2 %v11169_v11 }
 0x68e   : > { %4632 = vrot.lane.b32.xlu0 %v6079_v19, %s7098_s6  ;;  %v6078_v19 = vld [vmem:[%s7336_s12 + $0x58] sm:$0xff] }
 0x68f   : > { %v3107_v26 = vpop.permute.xlu2 %3106 }
 0x690   : > { %v3175_v27 = vsub.f32 %v8936_v46, %v3107_v26  ;;  %v3176_v54 = vsub.f32 %v11179_v39, %v3107_v26 }
 0x692   : > { %v9393_v32 = vpop.eup %6516  ;;  %v3213_v16 = vmul.f32 1.442695, %v3175_v27  ;;  %v3215_v55 = vmul.f32 1.442695, %v3176_v54 }
 0x693   : > { %v9395_v1 = vpop.eup %6518 }
 0x694   : > { %6520 = vpow2.f32 %v3213_v16  ;;  %v4049_v40 = vpop.xlane.xlu0 %4048  ;;  %v9400_v33 = vadd.f32 %v9395_v1, %v9393_v32 }
 0x695   : > { %6522 = vpow2.f32 %v3215_v55  ;;  %v4095_v11 = vmax.f32 %v7955_v12, %v4049_v40 }
 0x696   : > { %11180 = vst [vmem:[#allocation68_spill] sm:$0xff] %v9400_v33  ;;  %4630 = vrot.lane.b32.xlu0 %v6078_v19, %s7098_s6 }
 0x697   : > { %v9403_v46 = vmax.f32 %v4095_v11, 0.0  ;;  %v3117_v52 = vpop.permute.xlu2 %3116 }
 0x698   : > { %v3179_v50 = vsub.f32 %v11182_v53, %v3117_v52  ;;  %v3180_v26 = vsub.f32 %v11183_v24, %v3117_v52  ;;  %v3127_v27 = vpop.permute.xlu1 %3126 }
 0x699   : > { %11181 = vst [vmem:[#allocation74_spill] sm:$0xff] %v9403_v46  ;;  %v3183_v39 = vsub.f32 %v9063_v6, %v3127_v27  ;;  %v3184_v54 = vsub.f32 %v9067_v29, %v3127_v27 }
 0x69a   : > { %4464 = vst.msk [vmem:[#allocation2] sm:$0xff] %vm4447_vm0, %v9403_v46  ;;  %v9412_v16 = vpop.eup %6520  ;;  %v3221_v55 = vmul.f32 1.442695, %v3179_v50  ;;  %v3223_v40 = vmul.f32 1.442695, %v3180_v26 }
 0x69b   : > { %v9414_v11 = vpop.eup %6522  ;;  %v3229_v2 = vmul.f32 1.442695, %v3183_v39  ;;  %v3231_v53 = vmul.f32 1.442695, %v3184_v54 }
 0x69c   : > { %6524 = vpow2.f32 %v3221_v55  ;;  %v9419_v52 = vadd.f32 %v9414_v11, %v9412_v16 }
 0x69d   : > { %6526 = vpow2.f32 %v3223_v40  ;;  %v6071_v40 = vld [vmem:[%s7336_s12 + $0x20] sm:$0xff] }
 0x69e   : > { %6528 = vpow2.f32 %v3229_v2  ;;  %4616 = vrot.lane.b32.xlu0 %v6071_v40, %s7098_s6 }
 0x69f   : > { %v3122_v6 = vpop.permute.xlu2 %3121  ;;  %6530 = vpow2.f32 %v3231_v53 }
 0x6a0   : > { %v3181_v29 = vsub.f32 %v9024_v59, %v3122_v6  ;;  %v3182_v50 = vsub.f32 %v9028_v63, %v3122_v6  ;;  %v3152_v24 = vpop.permute.xlu1 %3151 }
 0x6a1   : > { %v3193_v26 = vsub.f32 %v9077_v5, %v3152_v24  ;;  %v3194_v27 = vsub.f32 %v9081_v17, %v3152_v24  ;;  %v11186_v24 = vld [vmem:[#allocation83_spill] sm:$0xff] }
 0x6a2   : > { %v9426_v39 = vpop.eup %6524  ;;  %v3225_v54 = vmul.f32 1.442695, %v3181_v29  ;;  %v3227_v55 = vmul.f32 1.442695, %v3182_v50 }
 0x6a3   : > { %v3249_v36 = vmul.f32 1.442695, %v3193_v26  ;;  %v9429_v2 = vpop.eup %6526  ;;  %v3251_v19 = vmul.f32 1.442695, %v3194_v27 }
 0x6a4   : > { %6532 = vpow2.f32 %v3225_v54  ;;  %v9431_v53 = vpop.eup %6528  ;;  %v9435_v59 = vadd.f32 %v9429_v2, %v9426_v39  ;;  %v11187_v54 = vld [vmem:[#allocation98_spill] sm:$0xff] }
 0x6a5   : > { %v9437_v63 = vpop.eup %6530  ;;  %6534 = vpow2.f32 %v3227_v55 }
 0x6a6   : > { %11184 = vst [vmem:[#allocation48_spill] sm:$0xff] %v9435_v59  ;;  %6536 = vpow2.f32 %v3249_v36  ;;  %v9442_v6 = vadd.f32 %v9437_v63, %v9431_v53 }
 0x6a7   : > { %v3137_v5 = vpop.permute.xlu2 %3136  ;;  %v3092_v17 = vpop.permute.xlu0 %3091  ;;  %6538 = vpow2.f32 %v3251_v19 }
 0x6a8   : > { %11185 = vst [vmem:[#allocation56_spill] sm:$0xff] %v9442_v6  ;;  %v3187_v29 = vsub.f32 %v9050_v48, %v3137_v5  ;;  %v3188_v50 = vsub.f32 %v9054_v35, %v3137_v5  ;;  %v3169_v26 = vsub.f32 %v11186_v24, %v3092_v17  ;;  %v3157_v27 = vpop.permute.xlu1 %3156  ;;  %v3170_v34 = vsub.f32 %v11187_v54, %v3092_v17  ;;  %v11213_v6 = vld [vmem:[#allocation49_spill] sm:$0xff] }
 0x6a9   : > { %v3195_v36 = vsub.f32 %v9101_v22, %v3157_v27  ;;  %v3196_v55 = vsub.f32 %v9105_v31, %v3157_v27  ;;  %v11192_v27 = vld [vmem:[#allocation108_spill] sm:$0xff]  ;;  %vm11214_vm9 = vnez %v11213_v6 }
 0x6aa   : > { %v9450_v15 = vpop.eup %6532  ;;  %v3237_v40 = vmul.f32 1.442695, %v3187_v29  ;;  %v3239_v30 = vmul.f32 1.442695, %v3188_v50  ;;  %v3201_v45 = vmul.f32 1.442695, %v3169_v26 }
 0x6ab   : > { %v3203_v58 = vmul.f32 1.442695, %v3170_v34  ;;  %v9452_v19 = vpop.eup %6534  ;;  %v3253_v48 = vmul.f32 1.442695, %v3195_v36  ;;  %v3255_v5 = vmul.f32 1.442695, %v3196_v55 }
 0x6ac   : > { %6540 = vpow2.f32 %v3237_v40  ;;  %v9454_v35 = vpop.eup %6536  ;;  %v9458_v17 = vadd.f32 %v9452_v19, %v9450_v15  ;;  %v11190_v50 = vld [vmem:[#allocation113_spill] sm:$0xff]  ;;  %v11191_v26 = vld [vmem:[#allocation114_spill] sm:$0xff]  ;;  %v11193_v36 = vld [vmem:[#allocation116_spill] sm:$0xff] }
 0x6ad   : > { %6542 = vpow2.f32 %v3239_v30  ;;  %v9460_v22 = vpop.eup %6538 }
 0x6ae   : > { %11188 = vst [vmem:[#allocation57_spill] sm:$0xff] %v9458_v17  ;;  %6544 = vpow2.f32 %v3201_v45  ;;  %v9464_v34 = vadd.f32 %v9460_v22, %v9454_v35 }
 0x6af   : > { %6546 = vpow2.f32 %v3203_v58  ;;  %v3142_v31 = vpop.permute.xlu2 %3141  ;;  %v3102_v29 = vpop.permute.xlu0 %3101 }
 0x6b0   : > { %11189 = vst [vmem:[#allocation64_spill] sm:$0xff] %v9464_v34  ;;  %6548 = vpow2.f32 %v3253_v48  ;;  %v3189_v24 = vsub.f32 %v11190_v50, %v3142_v31  ;;  %v3190_v30 = vsub.f32 %v11191_v26, %v3142_v31  ;;  %v3173_v54 = vsub.f32 %v11192_v27, %v3102_v29 }
 0x6b1   : > { %6550 = vpow2.f32 %v3255_v5  ;;  %v3174_v55 = vsub.f32 %v11193_v36, %v3102_v29 }
 0x6b2   : > { %v9470_v40 = vpop.eup %6540  ;;  %v3241_v45 = vmul.f32 1.442695, %v3189_v24  ;;  %v3243_v58 = vmul.f32 1.442695, %v3190_v30  ;;  %v3209_v10 = vmul.f32 1.442695, %v3173_v54 }
 0x6b3   : > { %v9472_v9 = vpop.eup %6542  ;;  %v3211_v13 = vmul.f32 1.442695, %v3174_v55  ;;  %v11195_v54 = vld [vmem:[#allocation111_spill] sm:$0xff]  ;;  %v11196_v55 = vld [vmem:[#allocation97_spill] sm:$0xff] }
 0x6b4   : > { %v6545_v14 = vpop.eup %6544  ;;  %6552 = vpow2.f32 %v3241_v45  ;;  %v9476_v48 = vadd.f32 %v9472_v9, %v9470_v40 }
 0x6b5   : > { %v6547_v31 = vpop.eup %6546  ;;  %6554 = vpow2.f32 %v3243_v58  ;;  %v3442_v5 = vpack.c.bf16 %v9393_v32, %v6545_v14  ;;  %v11197_v58 = vld [vmem:[#allocation117_spill] sm:$0xff] }
 0x6b6   : > { %11194 = vst [vmem:[#allocation86_spill] sm:$0xff] %v9476_v48  ;;  %v9479_v50 = vpop.eup %6548  ;;  %6556 = vpow2.f32 %v3209_v10  ;;  %v3443_v29 = vpack.c.bf16 %v9395_v1, %v6547_v31  ;;  %v9482_v24 = vadd.f32 %v6547_v31, %v6545_v14 }
 0x6b7   : > { %v9484_v26 = vpop.eup %6550  ;;  %6558 = vpow2.f32 %v3211_v13  ;;  %3626 = vmatmul.bf16.vlgmr.msra.gmra.mxu2 %v3442_v5  ;;  %v3147_v30 = vpop.permute.xlu2 %3146 }
 0x6b8   : > { %v3112_v27 = vpop.permute.xlu0 %3111  ;;  %3675 = vmatmul.bf16.vlgmr.msra.gmra.mxu3 %v3443_v29  ;;  %v3191_v36 = vsub.f32 %v11195_v54, %v3147_v30  ;;  %v3192_v45 = vsub.f32 %v11196_v55, %v3147_v30  ;;  %v9492_v10 = vadd.f32 %v9484_v26, %v9479_v50 }
 0x6b9   : > { %v3177_v32 = vsub.f32 %v11197_v58, %v3112_v27  ;;  %v3178_v60 = vsub.f32 %v11198_v23, %v3112_v27  ;;  %v11203_v58 = vld [vmem:[#allocation99_spill] sm:$0xff] }
 0x6ba   : > { %11199 = vst [vmem:[#allocation47_spill] sm:$0xff] %v9492_v10  ;;  %v9494_v1 = vpop.eup %6552  ;;  %v3245_v14 = vmul.f32 1.442695, %v3191_v36  ;;  %v3247_v13 = vmul.f32 1.442695, %v3192_v45  ;;  %v11202_v36 = vld [vmem:[#allocation91_spill] sm:$0xff] }
 0x6bb   : > { %v3217_v31 = vmul.f32 1.442695, %v3177_v32  ;;  %v9496_v5 = vpop.eup %6554  ;;  %v3219_v29 = vmul.f32 1.442695, %v3178_v60 }
 0x6bc   : > { %v6557_v4 = vpop.eup %6556  ;;  %6560 = vpow2.f32 %v3245_v14  ;;  %v9500_v30 = vadd.f32 %v9496_v5, %v9494_v1 }
 0x6bd   : > { %v6559_v54 = vpop.eup %6558  ;;  %6562 = vpow2.f32 %v3247_v13  ;;  %v11206_v13 = vld [vmem:[#allocation105_spill] sm:$0xff] }
 0x6be   : > { %11200 = vst [vmem:[#allocation35_spill] sm:$0xff] %v9500_v30  ;;  %6564 = vpow2.f32 %v3217_v31  ;;  %v9502_v23 = vadd.f32 %v6559_v54, %v6557_v4 }
 0x6bf   : > { %6566 = vpow2.f32 %v3219_v29  ;;  %v4639_v55 = vpop.permute.xlu2 %4638 }
 0x6c0   : > { %11201 = vst [vmem:[#allocation65_spill] sm:$0xff] %v9502_v23  ;;  %v3132_v27 = vpop.permute.xlu0 %3131  ;;  %4705 = vmatpush.bf16.msrb.mxu2 %v4639_v55  ;;  %v3444_v55 = vpack.c.bf16 %v9412_v16, %v6557_v4  ;;  %v11207_v23 = vld [vmem:[#allocation103_spill] sm:$0xff] }
 0x6c1   : > { %v3185_v45 = vsub.f32 %v11202_v36, %v3132_v27  ;;  %v3186_v32 = vsub.f32 %v11203_v58, %v3132_v27 }
 0x6c2   : > { %v9506_v60 = vpop.eup %6560 }
 0x6c3   : > { %v3233_v14 = vmul.f32 1.442695, %v3185_v45  ;;  %v3235_v3 = vmul.f32 1.442695, %v3186_v32  ;;  %v9508_v34 = vpop.eup %6562  ;;  %v3445_v45 = vpack.c.bf16 %v9414_v11, %v6559_v54 }
 0x6c4   : > { %v6565_v31 = vpop.eup %6564  ;;  %v9516_v36 = vadd.f32 %v9508_v34, %v9506_v60 }
 0x6c5   : > { %6568 = vpow2.f32 %v3233_v14  ;;  %v6567_v27 = vpop.eup %6566 }
 0x6c6   : > { %11204 = vst [vmem:[#allocation73_spill] sm:$0xff] %v9516_v36  ;;  %6570 = vpow2.f32 %v3235_v3  ;;  %v9520_v58 = vadd.f32 %v6567_v27, %v6565_v31 }
 0x6c7   : > { %3631 = vmatmul.bf16.gmra.mxu2 %v3444_v55 }
 0x6c8   : > { %11205 = vst [vmem:[#allocation63_spill] sm:$0xff] %v9520_v58  ;;  %v3162_v32 = vpop.permute.xlu0 %3161  ;;  %3680 = vmatmul.bf16.gmra.mxu3 %v3445_v45  ;;  %v11209_v45 = vld [vmem:[#allocation89_spill] sm:$0xff] }
 0x6c9   : > { %v3197_v14 = vsub.f32 %v11206_v13, %v3162_v32  ;;  %v3198_v48 = vsub.f32 %v11207_v23, %v3162_v32 }
 0x6cb   : > { %v9524_v29 = vpop.eup %6568  ;;  %v3257_v17 = vmul.f32 1.442695, %v3197_v14  ;;  %v3259_v33 = vmul.f32 1.442695, %v3198_v48 }
 0x6cc   : > { %v9526_v36 = vpop.eup %6570 }
 0x6cd   : > { %6572 = vpow2.f32 %v3257_v17  ;;  %v9530_v3 = vadd.f32 %v9526_v36, %v9524_v29 }
 0x6ce   : > { %6574 = vpow2.f32 %v3259_v33 }
 0x6cf   : > { %11208 = vst [vmem:[#allocation62_spill] sm:$0xff] %v9530_v3  ;;  %v3446_v3 = vpack.c.bf16 %v9426_v39, %v6565_v31 }
 0x6d0   : > { %v3871_v4 = vpop.permute.xlu0 %3870 }
 0x6d1   : > { %v3929_v16 = vadd.f32 %v9258_v42, %v3871_v4  ;;  %v3930_v11 = vadd.f32 %v9260_v51, %v3871_v4  ;;  %v3447_v4 = vpack.c.bf16 %v9429_v2, %v6567_v27 }
 0x6d3   : > { %v9534_v54 = vpop.eup %6572  ;;  %v3961_v13 = vmul.f32 0.2, %v3929_v16  ;;  %v3962_v55 = vmul.f32 0.2, %v3930_v11  ;;  %v4058_v48 = vpop.xlane.xlu1 %4057 }
 0x6d4   : > { %v9536_v23 = vpop.eup %6574  ;;  %v4098_v32 = vmax.f32 %v11209_v45, %v4058_v48 }
 0x6d5   : > { %v9541_v17 = vadd.f32 %v9536_v23, %v9534_v54  ;;  %v3993_v14 = vmax.f32 %v3929_v16, %v3961_v13  ;;  %v3994_v33 = vmax.f32 %v3930_v11, %v3962_v55  ;;  %v11215_v11 = vld [vmem:[#allocation85_spill] sm:$0xff] }
 0x6d6   : > { %v9544_v58 = vmax.f32 %v4098_v32, 0.0 }
 0x6d7   : > { %11210 = vst [vmem:[#allocation82_spill] sm:$0xff] %v9541_v17  ;;  %3636 = vmatmul.bf16.gmra.mxu2 %v3446_v3  ;;  %v9549_v30 = vsel %vm7612_vm11, %v3993_v14, -1e+30  ;;  %v9553_v48 = vsel %vm11214_vm9, %v3994_v33, -1e+30  ;;  %v11217_v33 = vld [vmem:[#allocation50_spill] sm:$0xff]  ;;  %vm11243_vm9 = vmmov %vm11228_vm4 }
 0x6d8   : > { %11211 = vst [vmem:[#allocation75_spill] sm:$0xff] %v9544_v58  ;;  %3685 = vmatmul.bf16.gmra.mxu3 %v3447_v4  ;;  %v3875_v16 = vpop.permute.xlu0 %3874  ;;  %v4062_v39 = vmax.f32 %v9549_v30, %v9553_v48  ;;  %vm11218_vm11 = vnez %v11217_v33  ;;  %v11219_v17 = vld [vmem:[#allocation53_spill] sm:$0xff] }
 0x6d9   : > { %4467 = vst.msk [vmem:[#allocation2 + $0x18] sm:$0xff] %vm4447_vm0, %v9544_v58  ;;  %v3931_v31 = vadd.f32 %v9258_v42, %v3875_v16  ;;  %v3932_v2 = vadd.f32 %v9260_v51, %v3875_v16  ;;  %vm11220_vm2 = vnez %v11219_v17 }
 0x6da   : > { %4063 = vmax.xlane.f32.xlu2 %v4062_v39 }
 0x6db   : > { %v3963_v10 = vmul.f32 0.2, %v3931_v31  ;;  %v3964_v27 = vmul.f32 0.2, %v3932_v2  ;;  %v4061_v3 = vpop.xlane.xlu1 %4060 }
 0x6dc   : > { %v4099_v6 = vmax.f32 %v11215_v11, %v4061_v3 }
 0x6dd   : > { %v3995_v13 = vmax.f32 %v3931_v31, %v3963_v10  ;;  %v3996_v55 = vmax.f32 %v3932_v2, %v3964_v27 }
 0x6de   : > { %v9562_v32 = vmax.f32 %v4099_v6, 0.0 }
 0x6df   : > { %v3167_v14 = vpop.permute.xlu2 %3166  ;;  %v9566_v4 = vsel %vm11218_vm11, %v3995_v13, -1e+30  ;;  %v9570_v59 = vsel %vm11220_vm2, %v3996_v55, -1e+30  ;;  %vm11245_vm11 = vmmov %vm11228_vm4 }
 0x6e0   : > { %11216 = vst [vmem:[#allocation76_spill] sm:$0xff] %v9562_v32  ;;  %v3199_v16 = vsub.f32 %v9293_v56, %v3167_v14  ;;  %v3200_v39 = vsub.f32 %v9297_v44, %v3167_v14  ;;  %v3887_v31 = vpop.permute.xlu0 %3886  ;;  %v4065_v2 = vmax.f32 %v9566_v4, %v9570_v59  ;;  %v3448_v56 = vpack.c.bf16 %v9431_v53, %v9450_v15  ;;  %v11221_v14 = vld [vmem:[#allocation58_spill] sm:$0xff]  ;;  %vm11247_vm2 = vmmov %vm11228_vm4 }
 0x6e1   : > { %4468 = vst.msk [vmem:[#allocation2 + $0x20] sm:$0xff] %vm4447_vm0, %v9562_v32  ;;  %v3937_v10 = vadd.f32 %v9258_v42, %v3887_v31  ;;  %v3938_v27 = vadd.f32 %v9260_v51, %v3887_v31  ;;  %v3449_v44 = vpack.c.bf16 %v9437_v63, %v9452_v19  ;;  %vm11222_vm15 = vnez %v11221_v14  ;;  %v6762_v19 = vld [vmem:[%s7361_s7 + $0x38] sm:$0xff]  ;;  %v3717_v14 = vld [vmem:[#allocation13 + $0x48] sm:$0xff] }
 0x6e2   : > { %v3261_v3 = vmul.f32 1.442695, %v3199_v16  ;;  %v3263_v6 = vmul.f32 1.442695, %v3200_v39  ;;  %4066 = vmax.xlane.f32.xlu0 %v4065_v2  ;;  %v11223_v39 = vld [vmem:[#allocation61_spill] sm:$0xff] }
 0x6e3   : > { %v3969_v17 = vmul.f32 0.2, %v3937_v10  ;;  %v3970_v13 = vmul.f32 0.2, %v3938_v27  ;;  %vm11224_vm7 = vnez %v11223_v39  ;;  %v3716_v39 = vld [vmem:[#allocation13 + $0x40] sm:$0xff] }
 0x6e4   : > { %6576 = vpow2.f32 %v3261_v3 }
 0x6e5   : > { %v4001_v55 = vmax.f32 %v3937_v10, %v3969_v17  ;;  %v4002_v33 = vmax.f32 %v3938_v27, %v3970_v13  ;;  %6578 = vpow2.f32 %v3263_v6  ;;  %v3450_v10 = vpack.c.bf16 %v9470_v40, %v9524_v29  ;;  %v6074_v6 = vld [vmem:[%s7336_s12 + $0x38] sm:$0xff]  ;;  %v6763_v17 = vld [vmem:[%s7361_s7 + $0x50] sm:$0xff] }
 0x6e6   : > { %v3451_v27 = vpack.c.bf16 %v9472_v9, %v9526_v36  ;;  %4622 = vrot.lane.b32.xlu1 %v6074_v6, %s7098_s6  ;;  %v6764_v13 = vld [vmem:[%s7361_s7 + $0x58] sm:$0xff]  ;;  %v11225_v40 = vpack.c.bf16 %v9506_v60, %v9494_v1  ;;  %v11226_v9 = vpack.c.bf16 %v9508_v34, %v9496_v5  ;;  %v6072_v36 = vld [vmem:[%s7336_s12 + $0x28] sm:$0xff]  ;;  %v3454_v34 = vpack.c.bf16 %v9479_v50, %v9454_v35 }
 0x6e7   : > { %3641 = vmatmul.bf16.gmra.mxu2 %v3448_v56  ;;  %v9586_v16 = vsel %vm11222_vm15, %v4001_v55, -1e+30  ;;  %v9590_v31 = vsel %vm11224_vm7, %v4002_v33, -1e+30  ;;  %v6765_v55 = vld [vmem:[%s7361_s7 + $0x60] sm:$0xff]  ;;  %v3718_v56 = vld [vmem:[#allocation13 + $0x50] sm:$0xff]  ;;  %v3455_v5 = vpack.c.bf16 %v9484_v26, %v9460_v22  ;;  %vm11249_vm15 = vmmov %vm11247_vm2 }
 0x6e8   : > { %3690 = vmatmul.bf16.gmra.mxu3 %v3449_v44  ;;  %v4074_v2 = vmax.f32 %v9586_v16, %v9590_v31  ;;  %v4637_v3 = vpop.permute.xlu0 %4636  ;;  %v3719_v33 = vld [vmem:[#allocation13 + $0x58] sm:$0xff]  ;;  %v6077_v44 = vld [vmem:[%s7336_s12 + $0x50] sm:$0xff]  ;;  %vm11250_vm7 = vmmov %vm11247_vm2 }
 0x6e9   : > { %4706 = vmatpush.bf16.msrb.mxu2 %v4637_v3  ;;  %3780 = vmatpush.msra.mxu0 %v3719_v33  ;;  %v6766_v60 = vld [vmem:[%s7361_s7 + $0x78] sm:$0xff] }
 0x6ea   : > { %4075 = vmax.xlane.f32.xlu0 %v4074_v2  ;;  %v6577_v15 = vpop.eup %6576 }
 0x6eb   : > { %v6579_v53 = vpop.eup %6578  ;;  %3781 = vmatpush.msra.mxu0 %v3718_v56 }
 0x6ec   : > { %v9594_v63 = vadd.f32 %v6579_v53, %v6577_v15 }
 0x6ed   : > { %3782 = vmatpush.msra.mxu0 %v3717_v14 }
 0x6ee   : > { %4618 = vrot.lane.b32.xlu1 %v6072_v36, %s7098_s6 }
 0x6ef   : > { %3783 = vmatpush.msra.mxu0 %v3716_v39 }
 0x6f0   : > { %v4635_v29 = vpop.permute.xlu0 %4634 }
 0x6f1   : > { %4707 = vmatpush.bf16.msrb.mxu2 %v4635_v29 }
 0x6f2   : > { %3878 = vperm.xlu2 %6322, %v6762_v19   ;;  %v3456_v19 = vpack.c.bf16 %v6577_v15, %v9534_v54  ;;  %v11230_v15 = vld [vmem:[#allocation95_spill] sm:$0xff] }
 0x6f6   : > { %4628 = vrot.lane.b32.xlu1 %v6077_v44, %s7098_s6  ;;  %v11233_v44 = vld [vmem:[#allocation88_spill] sm:$0xff] }
 0x6f7   : > { %3646 = vmatmul.bf16.gmra.mxu2 %v3450_v10  ;;  %v3457_v10 = vpack.c.bf16 %v6579_v53, %v9536_v23 }
 0x6f8   : > { %3695 = vmatmul.bf16.gmra.mxu3 %v3451_v27  ;;  %v9617_v1 = vpop.permute.xlu0 %4620 }
 0x6fa   : > { %3890 = vperm.xlu2 %6322, %v6763_v17  }
 0x6fe   : > { %3894 = vperm.xlu0 %6321, %v6764_v13  }
 0x700   : > { %v4633_v2 = vpop.permute.xlu0 %4632 }
 0x701   : > { %4708 = vmatpush.bf16.msrb.mxu2 %v4633_v2 }
 0x706   : > { %3898 = vperm.xlu0 %6321, %v6765_v55  }
 0x707   : > { %3651 = vmatmul.bf16.gmra.mxu2 %v11225_v40 }
 0x708   : > { %3700 = vmatmul.bf16.gmra.mxu3 %v11226_v9  ;;  %v4631_v27 = vpop.permute.xlu0 %4630 }
 0x709   : > { %4709 = vmatpush.bf16.msrb.mxu2 %v4631_v27 }
 0x70e   : > { %4139 = vperm.xlu0 %6321, %v9375_v43  }
 0x710   : > { %v9628_v55 = vpop.permute.xlu0 %4616 }
 0x716   : > { %3910 = vperm.xlu0 %6321, %v6766_v60  }
 0x717   : > { %3656 = vmatmul.bf16.gmra.mxu2 %v3454_v34 }
 0x718   : > { %3705 = vmatmul.bf16.gmra.mxu3 %v3455_v5 }
 0x727   : > { %3661 = vmatmul.bf16.gmra.mxu2 %v3456_v19 }
 0x728   : > { %3710 = vmatmul.bf16.gmra.mxu3 %v3457_v10 }
 0x73a   : > { %v3627_v35 = vpop.f32.mrf.mxu2 }
 0x73b   : > { %v3676_v22 = vpop.f32.mrf.mxu3 }
 0x73c   : > { %v3677_v50 = vadd.f32 %v3676_v22, %v3627_v35 }
 0x73e   : > { %5881 = vmatmul.msk.f32.vlgmr.msra.gmra.mxu0 %vm11227_vm5, %v3677_v50  ;;  %v11235_v50 = vld [vmem:[#allocation51_spill] sm:$0xff]  ;;  %vm11252_vm5 = vmmov %vm11247_vm2 }
 0x73f   : > { %vm11236_vm1 = vnez %v11235_v50 }
 0x742   : > { %v3629_v26 = vpop.f32.mrf.mxu2 }
 0x743   : > { %v3678_v3 = vpop.f32.mrf.mxu3 }
 0x744   : > { %v3679_v6 = vadd.f32 %v3678_v3, %v3629_v26  ;;  %v11237_v3 = vld [vmem:[#allocation52_spill] sm:$0xff] }
 0x745   : > { %vm11238_vm3 = vnez %v11237_v3 }
 0x746   : > { %5882 = vmatmul.msk.f32.gmra.mxu0 %vm11228_vm4, %v3679_v6  ;;  %vm11254_vm4 = vmmov %vm11247_vm2 }
 0x74a   : > { %v3632_v17 = vpop.f32.mrf.mxu2 }
 0x74b   : > { %v3681_v13 = vpop.f32.mrf.mxu3 }
 0x74c   : > { %v3682_v54 = vadd.f32 %v3681_v13, %v3632_v17 }
 0x74d   : > { %v4064_v23 = vpop.xlane.xlu2 %4063 }
 0x74e   : > { %5883 = vmatmul.msk.f32.gmra.mxu0 %vm11229_vm6, %v3682_v54  ;;  %v4100_v53 = vmax.f32 %v11230_v15, %v4064_v23  ;;  %v11240_v54 = vld [vmem:[#allocation94_spill] sm:$0xff]  ;;  %vm5001_vm6 = vcmask 1043456  }
 0x750   : > { %v9632_v40 = vmax.f32 %v4100_v53, 0.0  ;;  %v9657_v53 = vpop.f32.mrf.mxu0 }
 0x751   : > { %11241 = vst [vmem:[#allocation106_spill] sm:$0xff] %v9657_v53 }
 0x752   : > { %11231 = vst [vmem:[#allocation42_spill] sm:$0xff] %v9632_v40  ;;  %v3634_v9 = vpop.f32.mrf.mxu2 }
 0x753   : > { %4469 = vst.msk [vmem:[#allocation2 + $0x28] sm:$0xff] %vm4447_vm0, %v9632_v40  ;;  %v3683_v29 = vpop.f32.mrf.mxu3 }
 0x754   : > { %v3684_v36 = vadd.f32 %v3683_v29, %v3634_v9 }
 0x755   : > { %v4067_v33 = vpop.xlane.xlu0 %4066  ;;  %v3879_v56 = vpop.permute.xlu2 %3878 }
 0x756   : > { %5884 = vmatmul.msk.f32.gmra.mxu0 %vm11232_vm10, %v3684_v36  ;;  %v4101_v34 = vmax.f32 %v11233_v44, %v4067_v33  ;;  %v3933_v5 = vadd.f32 %v9258_v42, %v3879_v56  ;;  %v3934_v60 = vadd.f32 %v9260_v51, %v3879_v56  ;;  %vm11256_vm10 = vmmov %vm11247_vm2 }
 0x758   : > { %v9640_v14 = vmax.f32 %v4101_v34, 0.0  ;;  %v3965_v39 = vmul.f32 0.2, %v3933_v5  ;;  %v3966_v2 = vmul.f32 0.2, %v3934_v60  ;;  %v9664_v56 = vpop.f32.mrf.mxu0 }
 0x759   : > { %11244 = vst [vmem:[#allocation104_spill] sm:$0xff] %v9664_v56 }
 0x75a   : > { %11234 = vst [vmem:[#allocation43_spill] sm:$0xff] %v9640_v14  ;;  %v3997_v19 = vmax.f32 %v3933_v5, %v3965_v39  ;;  %v3998_v10 = vmax.f32 %v3934_v60, %v3966_v2  ;;  %v3637_v27 = vpop.f32.mrf.mxu2  ;;  %4159 = vperm.xlu0 %6321, %v9640_v14  }
 0x75b   : > { %4470 = vst.msk [vmem:[#allocation2 + $0x30] sm:$0xff] %vm4447_vm0, %v9640_v14  ;;  %v3686_v35 = vpop.f32.mrf.mxu3 }
 0x75c   : > { %v3687_v22 = vadd.f32 %v3686_v35, %v3637_v27  ;;  %v9647_v26 = vsel %vm11236_vm1, %v3997_v19, -1e+30  ;;  %v9651_v6 = vsel %vm11238_vm3, %v3998_v10, -1e+30  ;;  %v4623_v27 = vpop.permute.xlu1 %4622  ;;  %v6767_v35 = vld [vmem:[%s7361_s7 + $0x40] sm:$0xff]  ;;  %vm11258_vm1 = vmmov %vm11247_vm2 }
 0x75d   : > { %v4076_v17 = vpop.xlane.xlu0 %4075  ;;  %v4068_v13 = vmax.f32 %v9647_v26, %v9651_v6  ;;  %4656 = vmatpush.bf16.msrb.mxu1 %v4623_v27  ;;  %vm11259_vm3 = vmmov %vm11258_vm1 }
 0x75e   : > { %5885 = vmatmul.msk.f32.gmra.mxu0 %vm11239_vm14, %v3687_v22  ;;  %v4104_v23 = vmax.f32 %v11240_v54, %v4076_v17  ;;  %vm11261_vm14 = vmmov %vm11258_vm1 }
 0x75f   : > { %4069 = vmax.xlane.f32.xlu1 %v4068_v13 }
 0x760   : > { %v9659_v9 = vmax.f32 %v4104_v23, 0.0  ;;  %v9667_v19 = vpop.f32.mrf.mxu0 }
 0x761   : > { %11246 = vst [vmem:[#allocation92_spill] sm:$0xff] %v9667_v19  ;;  %4657 = vmatpush.bf16.msrb.mxu1 %v9617_v1 }
 0x762   : > { %11242 = vst [vmem:[#allocation87_spill] sm:$0xff] %v9659_v9  ;;  %v3639_v29 = vpop.f32.mrf.mxu2 }
 0x763   : > { %4473 = vst.msk [vmem:[#allocation2 + $0x48] sm:$0xff] %vm4447_vm0, %v9659_v9  ;;  %v3688_v36 = vpop.f32.mrf.mxu3 }
 0x764   : > { %v3689_v33 = vadd.f32 %v3688_v36, %v3639_v29  ;;  %v4619_v13 = vpop.permute.xlu1 %4618 }
 0x765   : > { %4658 = vmatpush.bf16.msrb.mxu1 %v4619_v13 }
 0x766   : > { %5886 = vmatmul.msk.f32.gmra.mxu0 %vm11243_vm9, %v3689_v33  ;;  %v6070_v33 = vld [vmem:[%s7336_s12 + $0x18] sm:$0xff]  ;;  %vm4952_vm9 = vcmask 31744  }
 0x767   : > { %4614 = vrot.lane.b32.xlu2 %v6070_v33, %s7098_s6  ;;  %v6075_v33 = vld [vmem:[%s7336_s12 + $0x40] sm:$0xff] }
 0x768   : > { %v9672_v17 = vpop.f32.mrf.mxu0 }
 0x769   : > { %11248 = vst [vmem:[#allocation93_spill] sm:$0xff] %v9672_v17  ;;  %4659 = vmatpush.bf16.msrb.mxu1 %v9628_v55 }
 0x76a   : > { %v3642_v34 = vpop.f32.mrf.mxu2 }
 0x76b   : > { %v3691_v5 = vpop.f32.mrf.mxu3 }
 0x76c   : > { %v3692_v60 = vadd.f32 %v3691_v5, %v3642_v34  ;;  %v4629_v1 = vpop.permute.xlu1 %4628  ;;  %v6768_v5 = vld [vmem:[%s7361_s7 + $0x68] sm:$0xff] }
 0x76d   : > { %4710 = vmatpush.bf16.msrb.mxu2 %v4629_v1 }
 0x76e   : > { %5887 = vmatmul.msk.f32.gmra.mxu0 %vm11245_vm11, %v3692_v60 }
 0x770   : > { %v9680_v34 = vpop.f32.mrf.mxu0 }
 0x771   : > { %11251 = vst [vmem:[#allocation109_spill] sm:$0xff] %v9680_v34  ;;  %v4890_v34 = vld [vmem:[#allocation2 + $0x18] sm:$0xff] }
 0x772   : > { %v3644_v39 = vpop.f32.mrf.mxu2 }
 0x773   : > { %v3693_v2 = vpop.f32.mrf.mxu3 }
 0x774   : > { %v3694_v10 = vadd.f32 %v3693_v2, %v3644_v39 }
 0x776   : > { %5888 = vmatmul.msk.f32.gmra.mxu0 %vm11247_vm2, %v3694_v10  ;;  %v6076_v10 = vld [vmem:[%s7336_s12 + $0x48] sm:$0xff] }
 0x777   : > { %4626 = vrot.lane.b32.xlu2 %v6076_v10, %s7098_s6 }
 0x778   : > { %3882 = vperm.xlu1 %6323, %v6767_v35   ;;  %v9687_v55 = vpop.f32.mrf.mxu0 }
 0x779   : > { %11253 = vst [vmem:[#allocation83_spill] sm:$0xff] %v9687_v55 }
 0x77a   : > { %v3647_v22 = vpop.f32.mrf.mxu2 }
 0x77b   : > { %v3696_v50 = vpop.f32.mrf.mxu3 }
 0x77c   : > { %v3697_v3 = vadd.f32 %v3696_v50, %v3647_v22  ;;  %v6069_v50 = vld [vmem:[%s7336_s12 + $0x10] sm:$0xff] }
 0x77e   : > { %5889 = vmatmul.msk.f32.gmra.mxu0 %vm11249_vm15, %v3697_v3 }
 0x77f   : > { %4612 = vrot.lane.b32.xlu2 %v6069_v50, %s7098_s6  ;;  %v6067_v50 = vld [vmem:[%s7336_s12] sm:$0xff] }
 0x780   : > { %4129 = vperm.xlu1 %6323, %v9403_v46  }
 0x782   : > { %v3649_v23 = vpop.f32.mrf.mxu2 }
 0x783   : > { %v3698_v29 = vpop.f32.mrf.mxu3 }
 0x784   : > { %v3699_v36 = vadd.f32 %v3698_v29, %v3649_v23  ;;  %v9693_v23 = vpop.f32.mrf.mxu0 }
 0x785   : > { %11255 = vst [vmem:[#allocation98_spill] sm:$0xff] %v9693_v23 }
 0x786   : > { %5890 = vmatmul.msk.f32.gmra.mxu0 %vm11250_vm7, %v3699_v36  ;;  %v4951_v36 = vld [vmem:[#allocation11] sm:$0xf] }
 0x787   : > { %5977 = vmatpush.msk.msrb.mxu0 %vm5001_vm6, %v4951_v36  ;;  %4624 = vrot.lane.b32.xlu2 %v6075_v33, %s7098_s6 }
 0x788   : > { %3902 = vperm.xlu1 %6323, %v6768_v5  }
 0x78a   : > { %v3652_v60 = vpop.f32.mrf.mxu2 }
 0x78b   : > { %v3701_v39 = vpop.f32.mrf.mxu3 }
 0x78c   : > { %v3702_v2 = vadd.f32 %v3701_v39, %v3652_v60  ;;  %v6068_v39 = vld [vmem:[%s7336_s12 + $0x8] sm:$0xff] }
 0x78e   : > { %5891 = vmatmul.msk.f32.gmra.mxu0 %vm11252_vm5, %v3702_v2  ;;  %v9700_v2 = vpop.f32.mrf.mxu0 }
 0x78f   : > { %11257 = vst [vmem:[#allocation113_spill] sm:$0xff] %v9700_v2  ;;  %4610 = vrot.lane.b32.xlu2 %v6068_v39, %s7098_s6  ;;  %v3891_v39 = vpop.permute.xlu2 %3890 }
 0x790   : > { %4144 = vperm.xlu1 %6323, %v9544_v58  }
 0x792   : > { %v3654_v27 = vpop.f32.mrf.mxu2 }
 0x793   : > { %v3703_v35 = vpop.f32.mrf.mxu3 }
 0x794   : > { %v3704_v22 = vadd.f32 %v3703_v35, %v3654_v27  ;;  %v4887_v35 = vld [vmem:[#allocation2] sm:$0xff] }
 0x796   : > { %5892 = vmatmul.msk.f32.gmra.mxu0 %vm11254_vm4, %v3704_v22 }
 0x797   : > { %4608 = vrot.lane.b32.xlu2 %v6067_v50, %s7098_s6 }
 0x798   : > { %4149 = vperm.xlu1 %6323, %v9562_v32  }
 0x79a   : > { %v3657_v3 = vpop.f32.mrf.mxu2 }
 0x79b   : > { %v3706_v13 = vpop.f32.mrf.mxu3 }
 0x79c   : > { %v3707_v29 = vadd.f32 %v3706_v13, %v3657_v3  ;;  %v4903_v3 = vsub.f32 %v7955_v12, %v4887_v35  ;;  %v9708_v13 = vpop.f32.mrf.mxu0 }
 0x79d   : > { %11260 = vst [vmem:[#allocation114_spill] sm:$0xff] %v9708_v13  ;;  %v4889_v13 = vld [vmem:[#allocation2 + $0x10] sm:$0xff] }
 0x79e   : > { %5893 = vmatmul.msk.f32.gmra.mxu0 %vm11256_vm10, %v3707_v29  ;;  %v4919_v36 = vmul.f32 1.442695, %v4903_v3 }
 0x7a0   : > { %4154 = vperm.xlu1 %6323, %v9632_v40   ;;  %6580 = vpow2.f32 %v4919_v36  ;;  %v4905_v36 = vsub.f32 %v11132_v20, %v4889_v13  ;;  %v11278_v20 = vld [vmem:[#allocation69_spill] sm:$0xff] }
 0x7a1   : > { %vm11279_vm5 = vnez %v11278_v20 }
 0x7a2   : > { %v3659_v1 = vpop.f32.mrf.mxu2  ;;  %v4923_v23 = vmul.f32 1.442695, %v4905_v36  ;;  %v4891_v36 = vld [vmem:[#allocation2 + $0x20] sm:$0xff] }
 0x7a3   : > { %v3708_v5 = vpop.f32.mrf.mxu3 }
 0x7a4   : > { %v3709_v60 = vadd.f32 %v3708_v5, %v3659_v1  ;;  %v9710_v1 = vpop.permute.xlu0 %3894  ;;  %v9716_v35 = vpop.f32.mrf.mxu0 }
 0x7a5   : > { %11262 = vst [vmem:[#allocation108_spill] sm:$0xff] %v9716_v35 }
 0x7a6   : > { %5894 = vmatmul.msk.f32.gmra.mxu0 %vm11258_vm1, %v3709_v60  ;;  %v4888_v60 = vld [vmem:[#allocation2 + $0x8] sm:$0xff]  ;;  %v6581_v2 = vpop.eup %6580 }
 0x7aa   : > { %v3662_v10 = vpop.f32.mrf.mxu2 }
 0x7ab   : > { %v3711_v27 = vpop.f32.mrf.mxu3 }
 0x7ac   : > { %v3712_v22 = vadd.f32 %v3711_v27, %v3662_v10  ;;  %v4904_v10 = vsub.f32 %v7970_v18, %v4888_v60  ;;  %v3939_v27 = vadd.f32 %v9258_v42, %v3891_v39  ;;  %v9722_v35 = vpop.f32.mrf.mxu0 }
 0x7ad   : > { %11263 = vst [vmem:[#allocation116_spill] sm:$0xff] %v9722_v35 }
 0x7ae   : > { %5895 = vmatmul.msk.f32.gmra.mxu0 %vm11259_vm3, %v3712_v22  ;;  %v3940_v22 = vadd.f32 %v9260_v51, %v3891_v39  ;;  %v4921_v50 = vmul.f32 1.442695, %v4904_v10  ;;  %v3971_v3 = vmul.f32 0.2, %v3939_v27  ;;  %v11264_v10 = vld [vmem:[#allocation59_spill] sm:$0xff] }
 0x7af   : > { %vm11265_vm11 = vnez %v11264_v10  ;;  %v11268_v10 = vld [vmem:[#allocation66_spill] sm:$0xff] }
 0x7b0   : > { %v3972_v32 = vmul.f32 0.2, %v3940_v22  ;;  %6582 = vpow2.f32 %v4921_v50  ;;  %v11266_v50 = vld [vmem:[#allocation60_spill] sm:$0xff]  ;;  %vm11269_vm15 = vnez %v11268_v10 }
 0x7b1   : > { %vm11267_vm2 = vnez %v11266_v50  ;;  %6584 = vpow2.f32 %v4923_v23 }
 0x7b2   : > { %v3664_v29 = vpop.f32.mrf.mxu2 }
 0x7b3   : > { %v3713_v33 = vpop.f32.mrf.mxu3 }
 0x7b4   : > { %v3714_v5 = vadd.f32 %v3713_v33, %v3664_v29  ;;  %v3899_v29 = vpop.permute.xlu0 %3898  ;;  %v4003_v33 = vmax.f32 %v3939_v27, %v3971_v3 }
 0x7b5   : > { %v3943_v60 = vadd.f32 %v9258_v42, %v3899_v29  ;;  %v3944_v39 = vadd.f32 %v9260_v51, %v3899_v29 }
 0x7b6   : > { %5896 = vmatmul.msk.f32.gmra.mxu0 %vm11261_vm14, %v3714_v5  ;;  %v4004_v5 = vmax.f32 %v3940_v22, %v3972_v32  ;;  %v9726_v55 = vsel %vm11265_vm11, %v4003_v33, -1e+30  ;;  %v6583_v43 = vpop.eup %6582  ;;  %v4906_v32 = vsub.f32 %v11209_v45, %v4890_v34  ;;  %vm11325_vm11 = vmmov %vm11261_vm14 }
 0x7b7   : > { %v3975_v17 = vmul.f32 0.2, %v3943_v60  ;;  %v6585_v33 = vpop.eup %6584 }
 0x7b8   : > { %v9730_v13 = vsel %vm11267_vm2, %v4004_v5, -1e+30  ;;  %v4925_v29 = vmul.f32 1.442695, %v4906_v32  ;;  %v11270_v5 = vld [vmem:[#allocation67_spill] sm:$0xff]  ;;  %v4892_v32 = vld [vmem:[#allocation2 + $0x28] sm:$0xff]  ;;  %vm11327_vm2 = vmmov %vm11325_vm11 }
 0x7b9   : > { %v4077_v27 = vmax.f32 %v9726_v55, %v9730_v13  ;;  %v4007_v22 = vmax.f32 %v3943_v60, %v3975_v17  ;;  %vm11271_vm7 = vnez %v11270_v5  ;;  %v4907_v17 = vsub.f32 %v11215_v11, %v4891_v36  ;;  %v11273_v60 = vld [vmem:[#allocation90_spill] sm:$0xff] }
 0x7ba   : > { %6586 = vpow2.f32 %v4925_v29 }
 0x7bb   : > { %v9738_v35 = vsel %vm11269_vm15, %v4007_v22, -1e+30  ;;  %vm11330_vm15 = vmmov %vm11327_vm2 }
 0x7bc   : > { %v9790_v20 = vpop.permute.xlu0 %4139 }
 0x7be   : > { %5978 = vmatmul.msk.f32.vlgmr.msrb.gmra.mxu0 %vm4952_vm9, %v6581_v2  ;;  %v3976_v2 = vmul.f32 0.2, %v3944_v39 }
 0x7c0   : > { %v4008_v3 = vmax.f32 %v3944_v39, %v3976_v2  ;;  %v4927_v2 = vmul.f32 1.442695, %v4907_v17 }
 0x7c1   : > { %v4615_v17 = vpop.permute.xlu2 %4614 }
 0x7c2   : > { %v9742_v50 = vsel %vm11271_vm7, %v4008_v3, -1e+30  ;;  %6588 = vpow2.f32 %v4927_v2  ;;  %v4908_v3 = vsub.f32 %v11230_v15, %v4892_v32  ;;  %4660 = vmatpush.bf16.msrb.mxu1 %v4615_v17  ;;  %vm11333_vm7 = vmmov %vm11327_vm2 }
 0x7c3   : > { %v4083_v34 = vmax.f32 %v9738_v35, %v9742_v50 }
 0x7c4   : > { %v4929_v36 = vmul.f32 1.442695, %v4908_v3  ;;  %v3941_v3 = vadd.f32 %v9258_v42, %v9710_v1 }
 0x7c6   : > { %5979 = vmatmul.msk.f32.gmra.mxu0 %vm4952_vm9, %v6583_v43  ;;  %v9744_v43 = vpop.f32.mrf.mxu0  ;;  %6590 = vpow2.f32 %v4929_v36 }
 0x7c7   : > { %11272 = vst [vmem:[#allocation111_spill] sm:$0xff] %v9744_v43 }
 0x7ca   : > { %4078 = vmax.xlane.f32.xlu1 %v4077_v27  ;;  %v6587_v27 = vpop.eup %6586 }
 0x7cb   : > { %v6589_v10 = vpop.eup %6588 }
 0x7ce   : > { %5980 = vmatmul.msk.f32.gmra.mxu0 %vm4952_vm9, %v6585_v33  ;;  %v9757_v29 = vpop.f32.mrf.mxu0  ;;  %v4893_v33 = vld [vmem:[#allocation2 + $0x30] sm:$0xff] }
 0x7cf   : > { %11275 = vst [vmem:[#allocation117_spill] sm:$0xff] %v9757_v29  ;;  %v4909_v5 = vsub.f32 %v11233_v44, %v4893_v33  ;;  %v3942_v33 = vadd.f32 %v9260_v51, %v9710_v1 }
 0x7d1   : > { %v4627_v32 = vpop.permute.xlu2 %4626  ;;  %v3974_v29 = vmul.f32 0.2, %v3942_v33 }
 0x7d2   : > { %4084 = vmax.xlane.f32.xlu1 %v4083_v34  ;;  %v4070_v23 = vpop.xlane.xlu1 %4069  ;;  %4711 = vmatpush.bf16.msrb.mxu2 %v4627_v32  ;;  %v3973_v32 = vmul.f32 0.2, %v3941_v3 }
 0x7d3   : > { %v4102_v39 = vmax.f32 %v11273_v60, %v4070_v23  ;;  %v4931_v23 = vmul.f32 1.442695, %v4909_v5  ;;  %v4006_v40 = vmax.f32 %v3942_v33, %v3974_v29 }
 0x7d5   : > { %v9751_v22 = vmax.f32 %v4102_v39, 0.0  ;;  %6592 = vpow2.f32 %v4931_v23 }
 0x7d6   : > { %5981 = vmatmul.msk.f32.gmra.mxu0 %vm4952_vm9, %v6587_v27  ;;  %v9761_v34 = vpop.f32.mrf.mxu0  ;;  %v6591_v27 = vpop.eup %6590 }
 0x7d7   : > { %11274 = vst [vmem:[#allocation97_spill] sm:$0xff] %v9751_v22 }
 0x7d8   : > { %4471 = vst.msk [vmem:[#allocation2 + $0x38] sm:$0xff] %vm4447_vm0, %v9751_v22 }
 0x7d9   : > { %11276 = vst [vmem:[#allocation112_spill] sm:$0xff] %v9761_v34  ;;  %v4613_v1 = vpop.permute.xlu2 %4612 }
 0x7da   : > { %4661 = vmatpush.bf16.msrb.mxu1 %v4613_v1 }
 0x7db   : > { %v6593_v23 = vpop.eup %6592 }
 0x7de   : > { %5982 = vmatmul.msk.f32.gmra.mxu0 %vm4952_vm9, %v6589_v10 }
 0x7df   : > { %v4894_v39 = vld [vmem:[#allocation2 + $0x38] sm:$0xff] }
 0x7e0   : > { %v4910_v2 = vsub.f32 %v11273_v60, %v4894_v39 }
 0x7e2   : > { %v4933_v17 = vmul.f32 1.442695, %v4910_v2 }
 0x7e4   : > { %6594 = vpow2.f32 %v4933_v17 }
 0x7e6   : > { %5983 = vmatmul.msk.f32.gmra.mxu0 %vm4952_vm9, %v6591_v27  ;;  %v9772_v27 = vpop.f32.mrf.mxu0 }
 0x7e7   : > { %11277 = vst [vmem:[#allocation91_spill] sm:$0xff] %v9772_v27 }
 0x7ea   : > { %v3883_v36 = vpop.permute.xlu1 %3882 }
 0x7eb   : > { %v3935_v10 = vadd.f32 %v9258_v42, %v3883_v36  ;;  %v3936_v5 = vadd.f32 %v9260_v51, %v3883_v36  ;;  %4174 = vperm.xlu1 %6323, %v9659_v9   ;;  %v11280_v36 = vld [vmem:[#allocation70_spill] sm:$0xff] }
 0x7ec   : > { %vm11281_vm4 = vnez %v11280_v36 }
 0x7ed   : > { %v3967_v39 = vmul.f32 0.2, %v3935_v10  ;;  %v3968_v34 = vmul.f32 0.2, %v3936_v5 }
 0x7ee   : > { %5984 = vmatmul.msk.f32.gmra.mxu0 %vm4952_vm9, %v6593_v23  ;;  %v4005_v23 = vmax.f32 %v3941_v3, %v3973_v32 }
 0x7ef   : > { %v3999_v43 = vmax.f32 %v3935_v10, %v3967_v39  ;;  %v4000_v19 = vmax.f32 %v3936_v5, %v3968_v34  ;;  %v6595_v34 = vpop.eup %6594  ;;  %v9787_v10 = vpop.f32.mrf.mxu0  ;;  %v11285_v5 = vld [vmem:[#allocation78_spill] sm:$0xff] }
 0x7f0   : > { %11282 = vst [vmem:[#allocation99_spill] sm:$0xff] %v9787_v10  ;;  %vm11286_vm10 = vnez %v11285_v5  ;;  %v4625_v39 = vpop.permute.xlu2 %4624  ;;  %v11287_v5 = vld [vmem:[#allocation71_spill] sm:$0xff] }
 0x7f1   : > { %v9777_v56 = vsel %vm11279_vm5, %v3999_v43, -1e+30  ;;  %v9781_v2 = vsel %vm11281_vm4, %v4000_v19, -1e+30  ;;  %v11283_v43 = vld [vmem:[#allocation77_spill] sm:$0xff]  ;;  %4712 = vmatpush.bf16.msrb.mxu2 %v4625_v39  ;;  %vm11288_vm1 = vnez %v11287_v5  ;;  %v11289_v39 = vld [vmem:[#allocation72_spill] sm:$0xff]  ;;  %vm11338_vm5 = vmmov %vm11327_vm2 }
 0x7f2   : > { %v9783_v27 = vpop.permute.xlu1 %4129  ;;  %v4071_v53 = vmax.f32 %v9777_v56, %v9781_v2  ;;  %vm11284_vm6 = vnez %v11283_v43  ;;  %v9798_v17 = vsel %vm11286_vm10, %v4006_v40, -1e+30  ;;  %v3911_v43 = vpop.permute.xlu0 %3910  ;;  %vm11290_vm3 = vnez %v11289_v39  ;;  %vm11343_vm4 = vmmov %vm11327_vm2 }
 0x7f3   : > { %v9794_v19 = vsel %vm11284_vm6, %v4005_v23, -1e+30  ;;  %vm11352_vm6 = vmmov %vm11327_vm2 }
 0x7f4   : > { %4072 = vmax.xlane.f32.xlu2 %v4071_v53  ;;  %v4080_v53 = vmax.f32 %v9794_v19, %v9798_v17  ;;  %vm11356_vm10 = vmmov %vm11327_vm2 }
 0x7f6   : > { %5985 = vmatmul.msk.f32.gmra.mxu0 %vm4952_vm9, %v6595_v34 }
 0x7f8   : > { %v4611_v34 = vpop.permute.xlu2 %4610 }
 0x7f9   : > { %4662 = vmatpush.bf16.msrb.mxu1 %v4611_v34 }
 0x7fa   : > { %v3903_v3 = vpop.permute.xlu1 %3902 }
 0x7fb   : > { %v3945_v29 = vadd.f32 %v9258_v42, %v3903_v3  ;;  %v3946_v33 = vadd.f32 %v9260_v51, %v3903_v3 }
 0x7fc   : > { %4081 = vmax.xlane.f32.xlu2 %v4080_v53 }
 0x7fd   : > { %v3977_v32 = vmul.f32 0.2, %v3945_v29  ;;  %v3978_v1 = vmul.f32 0.2, %v3946_v33 }
 0x7ff   : > { %v4009_v36 = vmax.f32 %v3945_v29, %v3977_v32  ;;  %v4010_v23 = vmax.f32 %v3946_v33, %v3978_v1  ;;  %v3949_v33 = vadd.f32 %v9258_v42, %v3911_v43  ;;  %v3950_v32 = vadd.f32 %v9260_v51, %v3911_v43 }
 0x800   : > { %v4609_v34 = vpop.permute.xlu2 %4608 }
 0x801   : > { %v9806_v40 = vsel %vm11288_vm1, %v4009_v36, -1e+30  ;;  %v9810_v10 = vsel %vm11290_vm3, %v4010_v23, -1e+30  ;;  %v3981_v5 = vmul.f32 0.2, %v3949_v33  ;;  %4663 = vmatpush.bf16.msrb.mxu1 %v4609_v34  ;;  %vm11375_vm1 = vmmov %vm11327_vm2 }
 0x802   : > { %v4145_v9 = vpop.permute.xlu1 %4144  ;;  %v4086_v3 = vmax.f32 %v9806_v40, %v9810_v10  ;;  %v3982_v23 = vmul.f32 0.2, %v3950_v32  ;;  %vm11379_vm3 = vmmov %vm11375_vm1 }
 0x803   : > { %v4213_v53 = vsub.f32 %v9342_v25, %v4145_v9  ;;  %v4214_v29 = vsub.f32 %v9346_v8, %v4145_v9  ;;  %v4013_v44 = vmax.f32 %v3949_v33, %v3981_v5  ;;  %v11300_v5 = vld [vmem:[#allocation107_spill] sm:$0xff] }
 0x804   : > { %4087 = vmax.xlane.f32.xlu0 %v4086_v3  ;;  %v4014_v8 = vmax.f32 %v3950_v32, %v3982_v23 }
 0x805   : > { %v4251_v1 = vmul.f32 1.442695, %v4213_v53  ;;  %v4253_v36 = vmul.f32 1.442695, %v4214_v29 }
 0x807   : > { %6596 = vpow2.f32 %v4251_v1 }
 0x808   : > { %6598 = vpow2.f32 %v4253_v36 }
 0x80a   : > { %v4150_v39 = vpop.permute.xlu1 %4149 }
 0x80b   : > { %v4215_v14 = vsub.f32 %v9356_v49, %v4150_v39  ;;  %v4216_v25 = vsub.f32 %v9360_v61, %v4150_v39  ;;  %v9830_v49 = vsel %vm10998_vm12, %v4013_v44, -1e+30  ;;  %v9834_v61 = vsel %vm11162_vm8, %v4014_v8, -1e+30 }
 0x80d   : > { %v9820_v9 = vpop.eup %6596  ;;  %v4255_v11 = vmul.f32 1.442695, %v4215_v14  ;;  %v4257_v43 = vmul.f32 1.442695, %v4216_v25  ;;  %v11292_v25 = vld [vmem:[#allocation96_spill] sm:$0xff] }
 0x80e   : > { %v9822_v3 = vpop.eup %6598 }
 0x80f   : > { %6600 = vpow2.f32 %v4255_v11  ;;  %v9826_v53 = vadd.f32 %v9822_v3, %v9820_v9  ;;  %v4092_v11 = vmax.f32 %v9830_v49, %v9834_v61 }
 0x810   : > { %6602 = vpow2.f32 %v4257_v43 }
 0x812   : > { %v4155_v29 = vpop.permute.xlu1 %4154 }
 0x813   : > { %v4217_v14 = vsub.f32 %v9549_v30, %v4155_v29  ;;  %v4218_v33 = vsub.f32 %v9553_v48, %v4155_v29  ;;  %v6769_v30 = vld [vmem:[%s7361_s7 + $0x70] sm:$0xff] }
 0x814   : > { %4134 = vperm.xlu2 %6322, %v9369_v37  }
 0x815   : > { %v9841_v32 = vpop.eup %6600  ;;  %v4259_v21 = vmul.f32 1.442695, %v4217_v14  ;;  %v4261_v1 = vmul.f32 1.442695, %v4218_v33  ;;  %4093 = vmax.xlane.f32.xlu1 %v4092_v11  ;;  %v11294_v14 = vld [vmem:[#allocation100_spill] sm:$0xff] }
 0x816   : > { %v9843_v44 = vpop.eup %6602 }
 0x817   : > { %6604 = vpow2.f32 %v4259_v21  ;;  %v9847_v41 = vadd.f32 %v9843_v44, %v9841_v32  ;;  %v9875_v21 = vpop.f32.mrf.mxu1 }
 0x818   : > { %6606 = vpow2.f32 %v4261_v1  ;;  %11296 = vst [vmem:[#allocation44_spill] sm:$0xff] %v9875_v21 }
 0x819   : > { %11291 = vst [vmem:[#allocation105_spill] sm:$0xff] %v9847_v41  ;;  %v4896_v41 = vld [vmem:[#allocation2 + $0x48] sm:$0xff] }
 0x81a   : > { %v4912_v60 = vsub.f32 %v11240_v54, %v4896_v41 }
 0x81c   : > { %3906 = vperm.xlu2 %6322, %v6769_v30   ;;  %v11297_v30 = vld [vmem:[#allocation101_spill] sm:$0xff] }
 0x81d   : > { %v9850_v48 = vpop.eup %6604 }
 0x81e   : > { %v9852_v36 = vpop.eup %6606 }
 0x81f   : > { %v9860_v34 = vadd.f32 %v9852_v36, %v9850_v48 }
 0x824   : > { %4164 = vperm.xlu2 %6322, %v9751_v22   ;;  %v4207_v22 = vsub.f32 %v9307_v47, %v9783_v27 }
 0x826   : > { %v4239_v21 = vmul.f32 1.442695, %v4207_v22 }
 0x83d   : > { %v4079_v39 = vpop.xlane.xlu1 %4078 }
 0x83e   : > { %v4105_v8 = vmax.f32 %v11292_v25, %v4079_v39 }
 0x840   : > { %v9864_v43 = vmax.f32 %v4105_v8, 0.0 }
 0x842   : > { %11293 = vst [vmem:[#allocation103_spill] sm:$0xff] %v9864_v43  ;;  %4179 = vperm.xlu0 %6321, %v9864_v43  }
 0x843   : > { %4474 = vst.msk [vmem:[#allocation2 + $0x50] sm:$0xff] %vm4447_vm0, %v9864_v43 }
 0x845   : > { %v4085_v29 = vpop.xlane.xlu1 %4084 }
 0x846   : > { %v4107_v33 = vmax.f32 %v11294_v14, %v4085_v29  ;;  %v9883_v29 = vpop.f32.mrf.mxu1 }
 0x847   : > { %11299 = vst [vmem:[#allocation50_spill] sm:$0xff] %v9883_v29  ;;  %v9897_v29 = vpop.f32.mrf.mxu0 }
 0x848   : > { %v9870_v11 = vmax.f32 %v4107_v33, 0.0  ;;  %v9885_v33 = vpop.permute.xlu0 %4159  ;;  %11301 = vst [vmem:[#allocation53_spill] sm:$0xff] %v9897_v29 }
 0x84a   : > { %11295 = vst [vmem:[#allocation89_spill] sm:$0xff] %v9870_v11  ;;  %4189 = vperm.xlu0 %6321, %v9870_v11  }
 0x84b   : > { %4476 = vst.msk [vmem:[#allocation2 + $0x60] sm:$0xff] %vm4447_vm0, %v9870_v11 }
 0x84e   : > { %v9899_v47 = vpop.f32.mrf.mxu1 }
 0x84f   : > { %11302 = vst [vmem:[#allocation58_spill] sm:$0xff] %v9899_v47  ;;  %v9912_v41 = vpop.f32.mrf.mxu0 }
 0x850   : > { %11305 = vst [vmem:[#allocation95_spill] sm:$0xff] %v9912_v41 }
 0x867   : > { %v4073_v1 = vpop.xlane.xlu2 %4072 }
 0x868   : > { %v4103_v39 = vmax.f32 %v11297_v30, %v4073_v1  ;;  %v4208_v1 = vsub.f32 %v9311_v38, %v9783_v27  ;;  %v11303_v27 = vld [vmem:[#allocation102_spill] sm:$0xff] }
 0x86a   : > { %v9878_v8 = vmax.f32 %v4103_v39, 0.0 }
 0x86c   : > { %11298 = vst [vmem:[#allocation49_spill] sm:$0xff] %v9878_v8  ;;  %4169 = vperm.xlu2 %6322, %v9878_v8  }
 0x86d   : > { %4472 = vst.msk [vmem:[#allocation2 + $0x40] sm:$0xff] %vm4447_vm0, %v9878_v8 }
 0x86f   : > { %v4082_v23 = vpop.xlane.xlu2 %4081 }
 0x870   : > { %v4106_v43 = vmax.f32 %v11300_v5, %v4082_v23  ;;  %v4241_v23 = vmul.f32 1.442695, %v4208_v1 }
 0x872   : > { %v9890_v37 = vmax.f32 %v4106_v43, 0.0 }
 0x874   : > { %v4895_v39 = vld [vmem:[#allocation2 + $0x40] sm:$0xff]  ;;  %4475 = vst.msk [vmem:[#allocation2 + $0x58] sm:$0xff] %vm4447_vm0, %v9890_v37 }
 0x875   : > { %v4911_v8 = vsub.f32 %v11297_v30, %v4895_v39 }
 0x877   : > { %v4935_v11 = vmul.f32 1.442695, %v4911_v8  ;;  %v4135_v58 = vpop.permute.xlu2 %4134  ;;  %v4088_v18 = vpop.xlane.xlu0 %4087 }
 0x878   : > { %v4209_v43 = vsub.f32 %v9270_v7, %v4135_v58  ;;  %v4210_v38 = vsub.f32 %v9274_v28, %v4135_v58  ;;  %v4108_v46 = vmax.f32 %v11303_v27, %v4088_v18  ;;  %v4937_v7 = vmul.f32 1.442695, %v4912_v60  ;;  %v4897_v28 = vld [vmem:[#allocation2 + $0x50] sm:$0xff] }
 0x879   : > { %6608 = vpow2.f32 %v4935_v11  ;;  %v4913_v8 = vsub.f32 %v11292_v25, %v4897_v28  ;;  %v4211_v60 = vsub.f32 %v9282_v0, %v9790_v20 }
 0x87a   : > { %6610 = vpow2.f32 %v4239_v21  ;;  %v4243_v39 = vmul.f32 1.442695, %v4209_v43  ;;  %v4245_v30 = vmul.f32 1.442695, %v4210_v38  ;;  %v9905_v22 = vmax.f32 %v4108_v46, 0.0  ;;  %v9914_v21 = vpop.permute.xlu1 %4174 }
 0x87b   : > { %6612 = vpow2.f32 %v4241_v23  ;;  %v9920_v23 = vpop.f32.mrf.mxu1  ;;  %v4212_v43 = vsub.f32 %v9286_v57, %v9790_v20  ;;  %v4939_v28 = vmul.f32 1.442695, %v4913_v8  ;;  %v4898_v47 = vld [vmem:[#allocation2 + $0x58] sm:$0xff]  ;;  %v9937_v8 = vpop.f32.mrf.mxu0 }
 0x87c   : > { %11304 = vst [vmem:[#allocation61_spill] sm:$0xff] %v9905_v22  ;;  %6614 = vpow2.f32 %v4243_v39  ;;  %4194 = vperm.xlu0 %6321, %v9905_v22  }
 0x87d   : > { %4477 = vst.msk [vmem:[#allocation2 + $0x68] sm:$0xff] %vm4447_vm0, %v9905_v22  ;;  %6616 = vpow2.f32 %v4245_v30  ;;  %v4249_v41 = vmul.f32 1.442695, %v4212_v43 }
 0x87e   : > { %6618 = vpow2.f32 %v4937_v7  ;;  %11306 = vst [vmem:[#allocation51_spill] sm:$0xff] %v9920_v23  ;;  %v4247_v23 = vmul.f32 1.442695, %v4211_v60 }
 0x87f   : > { %v6609_v58 = vpop.eup %6608  ;;  %v3907_v18 = vpop.permute.xlu2 %3906  ;;  %6620 = vpow2.f32 %v4939_v28 }
 0x880   : > { %v9910_v11 = vpop.eup %6610  ;;  %5986 = vmatmul.msk.f32.gmra.mxu0 %vm4952_vm9, %v6609_v58  ;;  %v3947_v58 = vadd.f32 %v9258_v42, %v3907_v18  ;;  %v3948_v7 = vadd.f32 %v9260_v51, %v3907_v18  ;;  %v4914_v18 = vsub.f32 %v11300_v5, %v4898_v47  ;;  %6622 = vpow2.f32 %v4247_v23  ;;  %v11307_v23 = vld [vmem:[#allocation79_spill] sm:$0xff] }
 0x881   : > { %v9917_v46 = vpop.eup %6612  ;;  %6624 = vpow2.f32 %v4249_v41  ;;  %vm11308_vm12 = vnez %v11307_v23  ;;  %v4219_v23 = vsub.f32 %v9566_v4, %v9885_v33 }
 0x882   : > { %v6615_v1 = vpop.eup %6614  ;;  %v3979_v54 = vmul.f32 0.2, %v3947_v58  ;;  %v3980_v57 = vmul.f32 0.2, %v3948_v7 }
 0x883   : > { %v6617_v30 = vpop.eup %6616  ;;  %v4480_v38 = vpack.c.bf16 %v6615_v1, %v9910_v11  ;;  %v9941_v43 = vpop.f32.mrf.mxu1 }
 0x884   : > { %v4481_v39 = vpack.c.bf16 %v6617_v30, %v9917_v46  ;;  %v9930_v22 = vadd.f32 %v6617_v30, %v6615_v1  ;;  %v6619_v0 = vpop.eup %6618 }
 0x885   : > { %4664 = vmatmul.bf16.vlgmr.msrb.gmra.mxu1 %v4480_v38  ;;  %v4011_v38 = vmax.f32 %v3947_v58, %v3979_v54 }
 0x886   : > { %4713 = vmatmul.bf16.vlgmr.msrb.gmra.mxu2 %v4481_v39  ;;  %v11309_v39 = vld [vmem:[#allocation80_spill] sm:$0xff] }
 0x887   : > { %v4165_v29 = vpop.permute.xlu2 %4164  ;;  %v9950_v41 = vsel %vm11308_vm12, %v4011_v38, -1e+30  ;;  %vm11310_vm8 = vnez %v11309_v39  ;;  %v4900_v38 = vld [vmem:[#allocation2 + $0x68] sm:$0xff]  ;;  %v4220_v39 = vsub.f32 %v9570_v59, %v9885_v33  ;;  %vm11383_vm12 = vmmov %vm11375_vm1 }
 0x888   : > { %5987 = vmatmul.msk.f32.gmra.mxu0 %vm4952_vm9, %v6619_v0  ;;  %v4221_v20 = vsub.f32 %v9647_v26, %v4165_v29  ;;  %v4222_v42 = vsub.f32 %v9651_v6, %v4165_v29  ;;  %v4094_v25 = vpop.xlane.xlu1 %4093  ;;  %v4012_v26 = vmax.f32 %v3948_v7, %v3980_v57  ;;  %v4941_v6 = vmul.f32 1.442695, %v4914_v18  ;;  %v6621_v29 = vpop.eup %6620 }
 0x889   : > { %v4110_v51 = vmax.f32 %v11174_v62, %v4094_v25  ;;  %v4899_v25 = vld [vmem:[#allocation2 + $0x60] sm:$0xff]  ;;  %v9945_v47 = vpop.eup %6622  ;;  %v4265_v4 = vmul.f32 1.442695, %v4220_v39 }
 0x88a   : > { %v4267_v1 = vmul.f32 1.442695, %v4221_v20  ;;  %v4269_v60 = vmul.f32 1.442695, %v4222_v42  ;;  %v9954_v54 = vsel %vm11310_vm8, %v4012_v26, -1e+30  ;;  %v9956_v58 = vpop.eup %6624  ;;  %v4915_v7 = vsub.f32 %v11294_v14, %v4899_v25  ;;  %v9963_v42 = vpop.f32.mrf.mxu0  ;;  %vm11386_vm8 = vmmov %vm11375_vm1 }
 0x88b   : > { %v9939_v30 = vmax.f32 %v4110_v51, 0.0  ;;  %v4089_v57 = vmax.f32 %v9950_v41, %v9954_v54  ;;  %v4482_v20 = vpack.c.bf16 %v9820_v9, %v9945_v47  ;;  %v4483_v51 = vpack.c.bf16 %v9822_v3, %v9956_v58 }
 0x88c   : > { %6626 = vpow2.f32 %v4267_v1  ;;  %v4943_v1 = vmul.f32 1.442695, %v4915_v7  ;;  %v4916_v9 = vsub.f32 %v11303_v27, %v4900_v38  ;;  %v11311_v7 = vpack.c.bf16 %v9850_v48, %v9841_v32 }
 0x88d   : > { %6628 = vpow2.f32 %v4269_v60  ;;  %4479 = vst.msk [vmem:[#allocation2 + $0x78] sm:$0xff] %vm4447_vm0, %v9939_v30  ;;  %v9969_v60 = vpop.f32.mrf.mxu1 }
 0x88e   : > { %6630 = vpow2.f32 %v4941_v6  ;;  %v4945_v6 = vmul.f32 1.442695, %v4916_v9  ;;  %v4225_v9 = vsub.f32 %v9586_v16, %v9914_v21  ;;  %v11316_v16 = vld [vmem:[#allocation47_spill] sm:$0xff] }
 0x88f   : > { %6632 = vpow2.f32 %v4943_v1 }
 0x890   : > { %5988 = vmatmul.msk.f32.gmra.mxu0 %vm4952_vm9, %v6621_v29  ;;  %6634 = vpow2.f32 %v4945_v6 }
 0x892   : > { %v6627_v28 = vpop.eup %6626  ;;  %v9973_v25 = vpop.f32.mrf.mxu0 }
 0x893   : > { %v6629_v0 = vpop.eup %6628 }
 0x894   : > { %v9967_v18 = vadd.f32 %v6629_v0, %v6627_v28  ;;  %v6631_v26 = vpop.eup %6630 }
 0x895   : > { %4090 = vmax.xlane.f32.xlu2 %v4089_v57  ;;  %4669 = vmatmul.bf16.gmra.mxu1 %v4482_v20  ;;  %v6633_v29 = vpop.eup %6632  ;;  %v9975_v3 = vpop.f32.mrf.mxu1  ;;  %v11312_v57 = vpack.c.bf16 %v9852_v36, %v9843_v44  ;;  %v11313_v36 = vld [vmem:[#allocation48_spill] sm:$0xff] }
 0x896   : > { %4718 = vmatmul.bf16.gmra.mxu2 %v4483_v51  ;;  %v6635_v20 = vpop.eup %6634  ;;  %v4263_v51 = vmul.f32 1.442695, %v4219_v23 }
 0x898   : > { %5989 = vmatmul.msk.f32.gmra.mxu0 %vm4952_vm9, %v6631_v26  ;;  %6636 = vpow2.f32 %v4263_v51  ;;  %v11314_v26 = vld [vmem:[#allocation56_spill] sm:$0xff] }
 0x899   : > { %6638 = vpow2.f32 %v4265_v4 }
 0x89a   : > { %v9989_v1 = vpop.f32.mrf.mxu0 }
 0x89d   : > { %v9992_v38 = vpop.f32.mrf.mxu1 }
 0x89e   : > { %v6637_v59 = vpop.eup %6636 }
 0x89f   : > { %v6639_v32 = vpop.eup %6638  ;;  %v4486_v44 = vpack.c.bf16 %v6627_v28, %v6637_v59  ;;  %v4275_v28 = vmul.f32 1.442695, %v4225_v9 }
 0x8a0   : > { %5990 = vmatmul.msk.f32.gmra.mxu0 %vm4952_vm9, %v6633_v29 }
 0x8a1   : > { %6640 = vpow2.f32 %v4275_v28 }
 0x8a5   : > { %4674 = vmatmul.bf16.gmra.mxu1 %v11311_v7  ;;  %v9996_v48 = vpop.f32.mrf.mxu1 }
 0x8a6   : > { %4723 = vmatmul.bf16.gmra.mxu2 %v11312_v57  ;;  %3346 = vadd.xlane.f32.xlu0 %v9482_v24  ;;  %v4487_v24 = vpack.c.bf16 %v6629_v0, %v6639_v32  ;;  %v11315_v0 = vld [vmem:[#allocation35_spill] sm:$0xff] }
 0x8a8   : > { %5991 = vmatmul.msk.f32.gmra.mxu0 %vm4952_vm9, %v6635_v20 }
 0x8ad   : > { %4184 = vperm.xlu2 %6322, %v9890_v37   ;;  %v10000_v33 = vpop.f32.mrf.mxu1 }
 0x8ae   : > { %3355 = vadd.xlane.f32.xlu0 %v9419_v52  ;;  %v4226_v52 = vsub.f32 %v9590_v31, %v9914_v21  ;;  %v6641_v31 = vpop.eup %6640 }
 0x8b0   : > { %v4277_v6 = vmul.f32 1.442695, %v4226_v52  ;;  %v11317_v52 = vld [vmem:[#allocation68_spill] sm:$0xff] }
 0x8b2   : > { %6642 = vpow2.f32 %v4277_v6 }
 0x8b5   : > { %4679 = vmatmul.bf16.gmra.mxu1 %v4486_v44  ;;  %4204 = vperm.xlu2 %6322, %v9939_v30   ;;  %v10010_v7 = vpop.f32.mrf.mxu1 }
 0x8b6   : > { %4728 = vmatmul.bf16.gmra.mxu2 %v4487_v24  ;;  %3361 = vadd.xlane.f32.xlu0 %v11313_v36 }
 0x8b8   : > { %v6643_v21 = vpop.eup %6642 }
 0x8bd   : > { %v10013_v44 = vpop.f32.mrf.mxu1 }
 0x8be   : > { %3367 = vadd.xlane.f32.xlu0 %v11314_v26  ;;  %v10019_v26 = vpop.permute.xlu0 %4179 }
 0x8c5   : > { %v10021_v9 = vpop.f32.mrf.mxu1 }
 0x8c6   : > { %v4170_v29 = vpop.permute.xlu2 %4169  ;;  %3376 = vadd.xlane.f32.xlu0 %v11315_v0  ;;  %v4190_v28 = vpop.permute.xlu0 %4189 }
 0x8c7   : > { %v4223_v23 = vsub.f32 %v9777_v56, %v4170_v29  ;;  %v4224_v39 = vsub.f32 %v9781_v2, %v4170_v29  ;;  %v4383_v2 = vadd.f32 %v9917_v46, %v9910_v11  ;;  %v4231_v6 = vsub.f32 %v9738_v35, %v4190_v28  ;;  %v4757_v29 = vld [vmem:[#allocation13 + $0x78] sm:$0xff] }
 0x8c8   : > { %v4232_v0 = vsub.f32 %v9742_v50, %v4190_v28  ;;  %4818 = vmatpush.msrb.mxu3 %v4757_v29  ;;  %v11318_v46 = vld [vmem:[#allocation63_spill] sm:$0xff]  ;;  %v11321_v29 = vld [vmem:[#allocation64_spill] sm:$0xff] }
 0x8c9   : > { %v4271_v57 = vmul.f32 1.442695, %v4223_v23  ;;  %v4273_v20 = vmul.f32 1.442695, %v4224_v39  ;;  %v4401_v23 = vadd.f32 %v6639_v32, %v6637_v59  ;;  %v4287_v11 = vmul.f32 1.442695, %v4231_v6 }
 0x8cb   : > { %6644 = vpow2.f32 %v4271_v57  ;;  %v4756_v57 = vld [vmem:[#allocation13 + $0x70] sm:$0xff] }
 0x8cc   : > { %6646 = vpow2.f32 %v4273_v20  ;;  %v4755_v20 = vld [vmem:[#allocation13 + $0x68] sm:$0xff]  ;;  %4819 = vmatpush.msrb.mxu3 %v4756_v57  ;;  %v11323_v57 = vld [vmem:[#allocation110_spill] sm:$0xff] }
 0x8cd   : > { %v10027_v39 = vpop.f32.mrf.mxu1  ;;  %6648 = vpow2.f32 %v4287_v11 }
 0x8ce   : > { %3385 = vadd.xlane.f32.xlu0 %v11316_v16  ;;  %v4289_v16 = vmul.f32 1.442695, %v4232_v0  ;;  %4820 = vmatpush.msrb.mxu3 %v4755_v20 }
 0x8d0   : > { %6650 = vpow2.f32 %v4289_v16 }
 0x8d1   : > { %v6645_v51 = vpop.eup %6644 }
 0x8d2   : > { %v6647_v4 = vpop.eup %6646  ;;  %v4488_v24 = vpack.c.bf16 %v6641_v31, %v6645_v51 }
 0x8d3   : > { %v4489_v56 = vpack.c.bf16 %v6643_v21, %v6647_v4  ;;  %v10015_v36 = vadd.f32 %v6647_v4, %v6645_v51  ;;  %v11319_v51 = vld [vmem:[#allocation57_spill] sm:$0xff]  ;;  %v10033_v32 = vpop.eup %6648 }
 0x8d4   : > { %4684 = vmatmul.bf16.gmra.mxu1 %v4488_v24 }
 0x8d5   : > { %4733 = vmatmul.bf16.gmra.mxu2 %v4489_v56  ;;  %v10035_v4 = vpop.f32.mrf.mxu1 }
 0x8d6   : > { %4384 = vadd.xlane.f32.xlu0 %v4383_v2  ;;  %v10037_v24 = vpop.eup %6650 }
 0x8dd   : > { %v10046_v28 = vpop.f32.mrf.mxu1 }
 0x8de   : > { %4393 = vadd.xlane.f32.xlu0 %v9826_v53  ;;  %3349 = vadd.xlane.f32.xlu2 %v11317_v52  ;;  %v4410_v53 = vadd.f32 %v6643_v21, %v6641_v31  ;;  %v4754_v52 = vld [vmem:[#allocation13 + $0x60] sm:$0xff]  ;;  %v4419_v31 = vadd.f32 %v10037_v24, %v10033_v32  ;;  %v11320_v21 = vld [vmem:[#allocation86_spill] sm:$0xff] }
 0x8df   : > { %4821 = vmatpush.msrb.mxu3 %v4754_v52 }
 0x8e6   : > { %4402 = vadd.xlane.f32.xlu0 %v4401_v23  ;;  %3358 = vadd.xlane.f32.xlu2 %v11318_v46  ;;  %v11322_v23 = vld [vmem:[#allocation118_spill] sm:$0xff] }
 0x8e7   : > { %v3265_v11 = vsub.f32 %v7955_v12, %v11322_v23 }
 0x8ee   : > { %v4195_v35 = vpop.permute.xlu0 %4194  ;;  %4411 = vadd.xlane.f32.xlu0 %v4410_v53  ;;  %3364 = vadd.xlane.f32.xlu2 %v11319_v51  ;;  %v3281_v51 = vmul.f32 1.442695, %v3265_v11 }
 0x8ef   : > { %v4233_v50 = vsub.f32 %v9806_v40, %v4195_v35  ;;  %v4234_v59 = vsub.f32 %v9810_v10, %v4195_v35 }
 0x8f1   : > { %v4291_v56 = vmul.f32 1.442695, %v4233_v50  ;;  %v4293_v2 = vmul.f32 1.442695, %v4234_v59  ;;  %v4227_v50 = vsub.f32 %v9726_v55, %v10019_v26 }
 0x8f3   : > { %6652 = vpow2.f32 %v4291_v56  ;;  %v4228_v56 = vsub.f32 %v9730_v13, %v10019_v26  ;;  %v4279_v52 = vmul.f32 1.442695, %v4227_v50 }
 0x8f4   : > { %6654 = vpow2.f32 %v4293_v2  ;;  %v11324_v2 = vld [vmem:[#allocation119_spill] sm:$0xff] }
 0x8f5   : > { %6656 = vpow2.f32 %v3281_v51  ;;  %v3268_v55 = vsub.f32 %v11209_v45, %v11324_v2 }
 0x8f6   : > { %4420 = vadd.xlane.f32.xlu0 %v4419_v31  ;;  %3373 = vadd.xlane.f32.xlu2 %v11320_v21  ;;  %v4281_v31 = vmul.f32 1.442695, %v4228_v56  ;;  %6658 = vpow2.f32 %v4279_v52 }
 0x8f8   : > { %6660 = vpow2.f32 %v4281_v31 }
 0x8f9   : > { %v10042_v40 = vpop.eup %6652 }
 0x8fa   : > { %v10044_v10 = vpop.eup %6654 }
 0x8fb   : > { %v10050_v6 = vadd.f32 %v10044_v10, %v10042_v40 }
 0x8fe   : > { %3382 = vadd.xlane.f32.xlu2 %v11321_v29 }
 0x902   : > { %v4665_v0 = vpop.f32.mrf.mxu1 }
 0x906   : > { %3391 = vadd.xlane.f32.xlu2 %v9594_v63  ;;  %v4389_v63 = vadd.f32 %v9956_v58, %v9945_v47  ;;  %v3287_v58 = vmul.f32 1.442695, %v3268_v55 }
 0x908   : > { %v4091_v46 = vpop.xlane.xlu2 %4090 }
 0x909   : > { %v4109_v20 = vmax.f32 %v11323_v57, %v4091_v46  ;;  %v4714_v16 = vpop.f32.mrf.mxu2 }
 0x90a   : > { %v4715_v53 = vadd.f32 %v4714_v16, %v4665_v0  ;;  %v4667_v35 = vpop.f32.mrf.mxu1 }
 0x90b   : > { %v10059_v59 = vmax.f32 %v4109_v20, 0.0  ;;  %v6657_v20 = vpop.eup %6656 }
 0x90c   : > { %5961 = vmatmul.msk.f32.vlgmr.msrb.gmra.mxu3 %vm11261_vm14, %v4715_v53  ;;  %vm11395_vm14 = vmmov %vm11375_vm1 }
 0x90d   : > { %4478 = vst.msk [vmem:[#allocation2 + $0x70] sm:$0xff] %vm4447_vm0, %v10059_v59  ;;  %4199 = vperm.xlu1 %6323, %v10059_v59  }
 0x90e   : > { %4390 = vadd.xlane.f32.xlu2 %v4389_v63  ;;  %v10078_v63 = vpop.eup %6658 }
 0x910   : > { %v4185_v21 = vpop.permute.xlu2 %4184 }
 0x911   : > { %v4229_v13 = vsub.f32 %v9794_v19, %v4185_v21  ;;  %v4230_v26 = vsub.f32 %v9798_v17, %v4185_v21  ;;  %v4716_v29 = vpop.f32.mrf.mxu2  ;;  %v4902_v19 = vld [vmem:[#allocation2 + $0x78] sm:$0xff]  ;;  %v11326_v17 = vld [vmem:[#allocation120_spill] sm:$0xff]  ;;  %v10083_v21 = vpop.eup %6660 }
 0x912   : > { %v4717_v0 = vadd.f32 %v4716_v29, %v4667_v35  ;;  %v4670_v47 = vpop.f32.mrf.mxu1  ;;  %v3270_v53 = vsub.f32 %v11230_v15, %v11326_v17  ;;  %v3313_v35 = vld [vmem:[#allocation3] sm:$0xff]  ;;  %v11328_v17 = vld [vmem:[#allocation41_spill] sm:$0xff] }
 0x913   : > { %v4283_v23 = vmul.f32 1.442695, %v4229_v13  ;;  %v4285_v11 = vmul.f32 1.442695, %v4230_v26  ;;  %v3329_v56 = vmul.f32 %v6657_v20, %v3313_v35  ;;  %v10085_v13 = vpop.f32.mrf.mxu0 }
 0x914   : > { %5962 = vmatmul.msk.f32.gmra.mxu3 %vm11325_vm11, %v4717_v0  ;;  %v4901_v46 = vld [vmem:[#allocation2 + $0x70] sm:$0xff] }
 0x915   : > { %6662 = vpow2.f32 %v4283_v23  ;;  %v4917_v16 = vsub.f32 %v11323_v57, %v4901_v46  ;;  %v3291_v23 = vmul.f32 1.442695, %v3270_v53  ;;  %v11329_v53 = vld [vmem:[#allocation90_spill] sm:$0xff] }
 0x916   : > { %6664 = vpow2.f32 %v4285_v11  ;;  %4399 = vadd.xlane.f32.xlu2 %v9860_v34  ;;  %v4918_v34 = vsub.f32 %v11174_v62, %v4902_v19  ;;  %v3272_v35 = vsub.f32 %v11329_v53, %v11328_v17 }
 0x917   : > { %6666 = vpow2.f32 %v3287_v58  ;;  %v4947_v51 = vmul.f32 1.442695, %v4917_v16 }
 0x918   : > { %v4205_v50 = vpop.permute.xlu2 %4204  ;;  %v4949_v19 = vmul.f32 1.442695, %v4918_v34 }
 0x919   : > { %v4719_v2 = vpop.f32.mrf.mxu2  ;;  %v4237_v55 = vsub.f32 %v9830_v49, %v4205_v50  ;;  %v4238_v52 = vsub.f32 %v9834_v61, %v4205_v50  ;;  %v3347_v31 = vpop.xlane.xlu0 %3346  ;;  %6668 = vpow2.f32 %v4947_v51  ;;  %v3316_v51 = vld [vmem:[#allocation3 + $0x18] sm:$0xff] }
 0x91a   : > { %v4720_v26 = vadd.f32 %v4719_v2, %v4670_v47  ;;  %v3393_v29 = vadd.f32 %v3347_v31, %v3329_v56  ;;  %v4672_v0 = vpop.f32.mrf.mxu1 }
 0x91b   : > { %v6663_v58 = vpop.eup %6662  ;;  %v4299_v11 = vmul.f32 1.442695, %v4237_v55  ;;  %v4301_v46 = vmul.f32 1.442695, %v4238_v52 }
 0x91c   : > { %v6665_v20 = vpop.eup %6664  ;;  %3410 = vst.msk [vmem:[#allocation3] sm:$0xff] %vm3409_vm13, %v3393_v29  ;;  %5963 = vmatmul.msk.f32.gmra.mxu3 %vm11327_vm2, %v4720_v26  ;;  %v4490_v49 = vpack.c.bf16 %v6663_v58, %v10078_v63  ;;  %v3295_v26 = vmul.f32 1.442695, %v3272_v35  ;;  %v10099_v29 = vpop.f32.mrf.mxu0 }
 0x91d   : > { %v6667_v61 = vpop.eup %6666  ;;  %6670 = vpow2.f32 %v4299_v11  ;;  %v4491_v16 = vpack.c.bf16 %v6665_v20, %v10083_v21 }
 0x91e   : > { %6672 = vpow2.f32 %v4301_v46  ;;  %4689 = vmatmul.bf16.gmra.mxu1 %v4490_v49  ;;  %4408 = vadd.xlane.f32.xlu2 %v10015_v36  ;;  %v3332_v50 = vmul.f32 %v6667_v61, %v3316_v51  ;;  %v11331_v49 = vld [vmem:[#allocation37_spill] sm:$0xff]  ;;  %v11332_v61 = vld [vmem:[#allocation96_spill] sm:$0xff] }
 0x91f   : > { %v6669_v47 = vpop.eup %6668  ;;  %6674 = vpow2.f32 %v3291_v23  ;;  %4738 = vmatmul.bf16.gmra.mxu2 %v4491_v16  ;;  %v4416_v23 = vadd.f32 %v6665_v20, %v6663_v58  ;;  %v3275_v16 = vsub.f32 %v11332_v61, %v11331_v49 }
 0x920   : > { %5992 = vmatmul.msk.f32.gmra.mxu0 %vm4952_vm9, %v6669_v47  ;;  %6676 = vpow2.f32 %v4949_v19  ;;  %v3318_v19 = vld [vmem:[#allocation3 + $0x28] sm:$0xff] }
 0x921   : > { %v4721_v56 = vpop.f32.mrf.mxu2  ;;  %v3356_v2 = vpop.xlane.xlu0 %3355  ;;  %6678 = vpow2.f32 %v3295_v26  ;;  %v3301_v58 = vmul.f32 1.442695, %v3275_v16  ;;  %v11334_v26 = vld [vmem:[#allocation32_spill] sm:$0xff] }
 0x922   : > { %v4722_v55 = vadd.f32 %v4721_v56, %v4672_v0  ;;  %v3396_v52 = vadd.f32 %v3356_v2, %v3332_v50  ;;  %v4675_v31 = vpop.f32.mrf.mxu1  ;;  %v4492_v56 = vpack.c.bf16 %v10042_v40, %v10033_v32  ;;  %v11336_v40 = vld [vmem:[#allocation65_spill] sm:$0xff] }
 0x923   : > { %v10095_v34 = vpop.eup %6670  ;;  %6680 = vpow2.f32 %v3301_v58 }
 0x924   : > { %v10097_v36 = vpop.eup %6672  ;;  %3413 = vst.msk [vmem:[#allocation3 + $0x18] sm:$0xff] %vm3409_vm13, %v3396_v52  ;;  %5964 = vmatmul.msk.f32.gmra.mxu3 %vm11330_vm15, %v4722_v55  ;;  %v4493_v55 = vpack.c.bf16 %v10044_v10, %v10037_v24  ;;  %v10114_v52 = vpop.f32.mrf.mxu0  ;;  %v3323_v10 = vld [vmem:[#allocation3 + $0x50] sm:$0xff] }
 0x925   : > { %v6675_v11 = vpop.eup %6674  ;;  %v4428_v46 = vadd.f32 %v10097_v36, %v10095_v34 }
 0x926   : > { %4417 = vadd.xlane.f32.xlu2 %v4416_v23  ;;  %v6677_v0 = vpop.eup %6676  ;;  %v3334_v47 = vmul.f32 %v6675_v11, %v3318_v19  ;;  %v3320_v23 = vld [vmem:[#allocation3 + $0x38] sm:$0xff] }
 0x927   : > { %4429 = vadd.xlane.f32.xlu0 %v4428_v46  ;;  %v6679_v2 = vpop.eup %6678 }
 0x928   : > { %5993 = vmatmul.msk.f32.gmra.mxu0 %vm4952_vm9, %v6677_v0  ;;  %v3336_v11 = vmul.f32 %v6679_v2, %v3320_v23  ;;  %vm11335_vm9 = vmmov %vm11327_vm2  ;;  %v11340_v23 = vld [vmem:[#allocation115_spill] sm:$0xff] }
 0x929   : > { %v4724_v17 = vpop.f32.mrf.mxu2  ;;  %v3362_v35 = vpop.xlane.xlu0 %3361 }
 0x92a   : > { %v4725_v51 = vadd.f32 %v4724_v17, %v4675_v31  ;;  %v3398_v50 = vadd.f32 %v3362_v35, %v3334_v47  ;;  %v4677_v20 = vpop.f32.mrf.mxu1  ;;  %v3278_v31 = vsub.f32 %v11303_v27, %v11334_v26  ;;  %v6681_v32 = vpop.eup %6680  ;;  %v11337_v35 = vld [vmem:[#allocation74_spill] sm:$0xff] }
 0x92b   : > { %v3339_v17 = vmul.f32 %v6681_v32, %v3323_v10  ;;  %v11339_v26 = vld [vmem:[#allocation62_spill] sm:$0xff] }
 0x92c   : > { %3415 = vst.msk [vmem:[#allocation3 + $0x28] sm:$0xff] %vm3409_vm13, %v3398_v50  ;;  %5965 = vmatmul.msk.f32.gmra.mxu3 %vm11333_vm7, %v4725_v51  ;;  %v3307_v19 = vmul.f32 1.442695, %v3278_v31  ;;  %v10121_v47 = vpop.f32.mrf.mxu0  ;;  %v4303_v51 = vsub.f32 %v7955_v12, %v11337_v35  ;;  %v3326_v31 = vld [vmem:[#allocation3 + $0x68] sm:$0xff]  ;;  %v11342_v12 = vld [vmem:[#allocation75_spill] sm:$0xff] }
 0x92e   : > { %4694 = vmatmul.bf16.gmra.mxu1 %v4492_v56  ;;  %6682 = vpow2.f32 %v3307_v19 }
 0x92f   : > { %4743 = vmatmul.bf16.gmra.mxu2 %v4493_v55  ;;  %v4319_v55 = vmul.f32 1.442695, %v4303_v51  ;;  %v4351_v51 = vld [vmem:[#allocation3] sm:$0xff] }
 0x931   : > { %v4726_v46 = vpop.f32.mrf.mxu2  ;;  %v3368_v0 = vpop.xlane.xlu0 %3367  ;;  %6684 = vpow2.f32 %v4319_v55 }
 0x932   : > { %v4727_v49 = vadd.f32 %v4726_v46, %v4677_v20  ;;  %v3400_v16 = vadd.f32 %v3368_v0, %v3336_v11  ;;  %v4680_v24 = vpop.f32.mrf.mxu1  ;;  %v11341_v11 = vld [vmem:[#allocation84_spill] sm:$0xff] }
 0x933   : > { %v3266_v46 = vsub.f32 %v11341_v11, %v11340_v23 }
 0x934   : > { %3417 = vst.msk [vmem:[#allocation3 + $0x38] sm:$0xff] %vm3409_vm13, %v3400_v16  ;;  %5966 = vmatmul.msk.f32.gmra.mxu3 %vm11335_vm9, %v4727_v49  ;;  %v6683_v2 = vpop.eup %6682  ;;  %v4306_v16 = vsub.f32 %v11209_v45, %v11342_v12  ;;  %v10132_v10 = vpop.f32.mrf.mxu0  ;;  %v11347_v12 = vld [vmem:[#allocation82_spill] sm:$0xff] }
 0x935   : > { %v3342_v49 = vmul.f32 %v6683_v2, %v3326_v31 }
 0x936   : > { %v4325_v35 = vmul.f32 1.442695, %v4306_v16  ;;  %v11348_v16 = vld [vmem:[#allocation38_spill] sm:$0xff] }
 0x937   : > { %3352 = vadd.xlane.f32.xlu1 %v11336_v40 }
 0x939   : > { %v4729_v50 = vpop.f32.mrf.mxu2  ;;  %v3377_v58 = vpop.xlane.xlu0 %3376 }
 0x93a   : > { %v4730_v20 = vadd.f32 %v4729_v50, %v4680_v24  ;;  %v3403_v56 = vadd.f32 %v3377_v58, %v3339_v17  ;;  %v4682_v0 = vpop.f32.mrf.mxu1  ;;  %v3283_v17 = vmul.f32 1.442695, %v3266_v46  ;;  %v6685_v50 = vpop.eup %6684  ;;  %v11344_v58 = vld [vmem:[#allocation73_spill] sm:$0xff]  ;;  %v4354_v46 = vld [vmem:[#allocation3 + $0x18] sm:$0xff] }
 0x93b   : > { %v4367_v2 = vmul.f32 %v6685_v50, %v4351_v51 }
 0x93c   : > { %3420 = vst.msk [vmem:[#allocation3 + $0x50] sm:$0xff] %vm3409_vm13, %v3403_v56  ;;  %5967 = vmatmul.msk.f32.gmra.mxu3 %vm11338_vm5, %v4730_v20  ;;  %6686 = vpow2.f32 %v3283_v17  ;;  %v11345_v20 = vld [vmem:[#allocation39_spill] sm:$0xff]  ;;  %v11346_v56 = vld [vmem:[#allocation85_spill] sm:$0xff]  ;;  %v10140_v23 = vpop.f32.mrf.mxu0 }
 0x93d   : > { %v3269_v45 = vsub.f32 %v11346_v56, %v11345_v20  ;;  %6688 = vpow2.f32 %v4325_v35 }
 0x93f   : > { %3370 = vadd.xlane.f32.xlu1 %v11339_v26  ;;  %v3289_v31 = vmul.f32 1.442695, %v3269_v45 }
 0x941   : > { %v4731_v19 = vpop.f32.mrf.mxu2  ;;  %v3386_v32 = vpop.xlane.xlu0 %3385  ;;  %6690 = vpow2.f32 %v3289_v31  ;;  %v11351_v31 = vld [vmem:[#allocation94_spill] sm:$0xff] }
 0x942   : > { %v4732_v24 = vadd.f32 %v4731_v19, %v4682_v0  ;;  %v3406_v40 = vadd.f32 %v3386_v32, %v3342_v49  ;;  %v6687_v0 = vpop.eup %6686  ;;  %v11349_v19 = vld [vmem:[#allocation88_spill] sm:$0xff] }
 0x943   : > { %v6689_v49 = vpop.eup %6688  ;;  %v3271_v32 = vsub.f32 %v11349_v19, %v11348_v16 }
 0x944   : > { %3423 = vst.msk [vmem:[#allocation3 + $0x68] sm:$0xff] %vm3409_vm13, %v3406_v40  ;;  %5968 = vmatmul.msk.f32.gmra.mxu3 %vm11343_vm4, %v4732_v24  ;;  %v4370_v24 = vmul.f32 %v6689_v49, %v4354_v46  ;;  %v3314_v40 = vld [vmem:[#allocation3 + $0x8] sm:$0xff] }
 0x945   : > { %v3330_v35 = vmul.f32 %v6687_v0, %v3314_v40  ;;  %v3293_v20 = vmul.f32 1.442695, %v3271_v32  ;;  %v3317_v0 = vld [vmem:[#allocation3 + $0x20] sm:$0xff] }
 0x947   : > { %3379 = vadd.xlane.f32.xlu1 %v11344_v58  ;;  %v6691_v45 = vpop.eup %6690  ;;  %6692 = vpow2.f32 %v3293_v20 }
 0x948   : > { %v3333_v16 = vmul.f32 %v6691_v45, %v3317_v0  ;;  %v3319_v45 = vld [vmem:[#allocation3 + $0x30] sm:$0xff] }
 0x949   : > { %v4385_v55 = vpop.xlane.xlu0 %4384 }
 0x94a   : > { %v4431_v26 = vadd.f32 %v4385_v55, %v4367_v2  ;;  %v10147_v55 = vpop.f32.mrf.mxu0 }
 0x94c   : > { %4448 = vst.msk [vmem:[#allocation3] sm:$0xff] %vm4447_vm0, %v4431_v26  ;;  %v11350_v26 = vld [vmem:[#allocation40_spill] sm:$0xff] }
 0x94d   : > { %v3274_v46 = vsub.f32 %v11351_v31, %v11350_v26 }
 0x94f   : > { %3388 = vadd.xlane.f32.xlu1 %v11347_v12  ;;  %v3299_v40 = vmul.f32 1.442695, %v3274_v46 }
 0x951   : > { %v4394_v17 = vpop.xlane.xlu0 %4393  ;;  %v3350_v50 = vpop.xlane.xlu2 %3349  ;;  %6694 = vpow2.f32 %v3299_v40 }
 0x952   : > { %v4434_v51 = vadd.f32 %v4394_v17, %v4370_v24  ;;  %v3394_v58 = vadd.f32 %v3350_v50, %v3330_v35  ;;  %v4685_v2 = vpop.f32.mrf.mxu1  ;;  %v6693_v17 = vpop.eup %6692  ;;  %v11353_v35 = vld [vmem:[#allocation43_spill] sm:$0xff]  ;;  %v11355_v50 = vld [vmem:[#allocation36_spill] sm:$0xff] }
 0x953   : > { %v10159_v26 = vpop.f32.mrf.mxu0  ;;  %v3335_v0 = vmul.f32 %v6693_v17, %v3319_v45  ;;  %v3322_v17 = vld [vmem:[#allocation3 + $0x48] sm:$0xff] }
 0x954   : > { %4451 = vst.msk [vmem:[#allocation3 + $0x18] sm:$0xff] %vm4447_vm0, %v4434_v51  ;;  %v4309_v51 = vsub.f32 %v11349_v19, %v11353_v35  ;;  %v11358_v35 = vld [vmem:[#allocation34_spill] sm:$0xff] }
 0x955   : > { %3411 = vst.msk [vmem:[#allocation3 + $0x8] sm:$0xff] %vm3409_vm13, %v3394_v58  ;;  %v3277_v58 = vsub.f32 %v11294_v14, %v11355_v50 }
 0x956   : > { %v4331_v46 = vmul.f32 1.442695, %v4309_v51 }
 0x957   : > { %4387 = vadd.xlane.f32.xlu1 %v9930_v22  ;;  %v11354_v22 = vld [vmem:[#allocation105_spill] sm:$0xff]  ;;  %v6695_v19 = vpop.eup %6694 }
 0x958   : > { %v4734_v49 = vpop.f32.mrf.mxu2  ;;  %6696 = vpow2.f32 %v4331_v46  ;;  %v3338_v51 = vmul.f32 %v6695_v19, %v3322_v17 }
 0x959   : > { %v4735_v12 = vadd.f32 %v4734_v49, %v4685_v2  ;;  %v3359_v24 = vpop.xlane.xlu2 %3358 }
 0x95a   : > { %v3397_v32 = vadd.f32 %v3359_v24, %v3333_v16  ;;  %v4687_v20 = vpop.f32.mrf.mxu1  ;;  %v3305_v24 = vmul.f32 1.442695, %v3277_v58 }
 0x95b   : > { %5969 = vmatmul.msk.f32.gmra.mxu3 %vm11352_vm6, %v4735_v12  ;;  %v10168_v45 = vpop.f32.mrf.mxu0 }
 0x95c   : > { %3414 = vst.msk [vmem:[#allocation3 + $0x20] sm:$0xff] %vm3409_vm13, %v3397_v32  ;;  %v11357_v32 = vld [vmem:[#allocation87_spill] sm:$0xff]  ;;  %6698 = vpow2.f32 %v3305_v24 }
 0x95d   : > { %v4312_v40 = vsub.f32 %v11351_v31, %v11357_v32  ;;  %v3325_v32 = vld [vmem:[#allocation3 + $0x60] sm:$0xff] }
 0x95f   : > { %4396 = vadd.xlane.f32.xlu1 %v11354_v22  ;;  %v3280_v22 = vsub.f32 %v11174_v62, %v11358_v35  ;;  %v4337_v50 = vmul.f32 1.442695, %v4312_v40 }
 0x960   : > { %v4736_v2 = vpop.f32.mrf.mxu2 }
 0x961   : > { %v4737_v49 = vadd.f32 %v4736_v2, %v4687_v20  ;;  %v3365_v12 = vpop.xlane.xlu2 %3364  ;;  %v4403_v20 = vpop.xlane.xlu0 %4402  ;;  %6700 = vpow2.f32 %v4337_v50  ;;  %v3328_v50 = vld [vmem:[#allocation3 + $0x78] sm:$0xff] }
 0x962   : > { %v3399_v16 = vadd.f32 %v3365_v12, %v3335_v0  ;;  %v3311_v0 = vmul.f32 1.442695, %v3280_v22 }
 0x963   : > { %5970 = vmatmul.msk.f32.gmra.mxu3 %vm11356_vm10, %v4737_v49  ;;  %v6697_v49 = vpop.eup %6696 }
 0x964   : > { %3416 = vst.msk [vmem:[#allocation3 + $0x30] sm:$0xff] %vm3409_vm13, %v3399_v16  ;;  %v6699_v31 = vpop.eup %6698  ;;  %v11359_v16 = vld [vmem:[#allocation89_spill] sm:$0xff]  ;;  %6702 = vpow2.f32 %v3311_v0  ;;  %v11360_v0 = vld [vmem:[#allocation42_spill] sm:$0xff] }
 0x965   : > { %v4315_v24 = vsub.f32 %v11294_v14, %v11359_v16  ;;  %v3341_v40 = vmul.f32 %v6699_v31, %v3325_v32 }
 0x967   : > { %4405 = vadd.xlane.f32.xlu1 %v9967_v18  ;;  %v4413_v18 = vadd.f32 %v10083_v21, %v10078_v63  ;;  %v4343_v35 = vmul.f32 1.442695, %v4315_v24 }
 0x969   : > { %v3374_v2 = vpop.xlane.xlu2 %3373  ;;  %6704 = vpow2.f32 %v4343_v35 }
 0x96a   : > { %v3402_v58 = vadd.f32 %v3374_v2, %v3338_v51  ;;  %v6701_v51 = vpop.eup %6700  ;;  %v4412_v2 = vpop.xlane.xlu0 %4411 }
 0x96b   : > { %v4357_v46 = vld [vmem:[#allocation3 + $0x30] sm:$0xff]  ;;  %v6703_v21 = vpop.eup %6702 }
 0x96c   : > { %v4373_v12 = vmul.f32 %v6697_v49, %v4357_v46  ;;  %3419 = vst.msk [vmem:[#allocation3 + $0x48] sm:$0xff] %vm3409_vm13, %v3402_v58  ;;  %v10176_v49 = vpop.f32.mrf.mxu0  ;;  %v4308_v46 = vsub.f32 %v11230_v15, %v11360_v0 }
 0x96e   : > { %v4437_v19 = vadd.f32 %v4403_v20, %v4373_v12  ;;  %v3344_v20 = vmul.f32 %v6703_v21, %v3328_v50 }
 0x96f   : > { %4414 = vadd.xlane.f32.xlu1 %v4413_v18  ;;  %v6705_v31 = vpop.eup %6704 }
 0x970   : > { %4454 = vst.msk [vmem:[#allocation3 + $0x30] sm:$0xff] %vm4447_vm0, %v4437_v19  ;;  %v4329_v19 = vmul.f32 1.442695, %v4308_v46 }
 0x971   : > { %v3383_v22 = vpop.xlane.xlu2 %3382 }
 0x972   : > { %v3405_v17 = vadd.f32 %v3383_v22, %v3341_v40  ;;  %v4421_v32 = vpop.xlane.xlu0 %4420  ;;  %6706 = vpow2.f32 %v4329_v19  ;;  %v5070_v19 = vld [vmem:[#allocation4 + $0x30] sm:$0xff] }
 0x973   : > { %v4360_v58 = vld [vmem:[#allocation3 + $0x48] sm:$0xff] }
 0x974   : > { %v4376_v63 = vmul.f32 %v6701_v51, %v4360_v58  ;;  %3422 = vst.msk [vmem:[#allocation3 + $0x60] sm:$0xff] %vm3409_vm13, %v3405_v17  ;;  %v5022_v40 = vpop.f32.mrf.mxu0  ;;  %v4356_v58 = vld [vmem:[#allocation3 + $0x28] sm:$0xff] }
 0x976   : > { %v4440_v14 = vadd.f32 %v4412_v2, %v4376_v63 }
 0x977   : > { %4423 = vadd.xlane.f32.xlu1 %v10050_v6 }
 0x978   : > { %4457 = vst.msk [vmem:[#allocation3 + $0x48] sm:$0xff] %vm4447_vm0, %v4440_v14  ;;  %v6707_v63 = vpop.eup %6706 }
 0x979   : > { %v3392_v12 = vpop.xlane.xlu2 %3391  ;;  %v4372_v14 = vmul.f32 %v6707_v63, %v4356_v58  ;;  %v11366_v63 = vld [vmem:[#allocation95_spill] sm:$0xff] }
 0x97a   : > { %v3408_v18 = vadd.f32 %v3392_v12, %v3344_v20  ;;  %v4318_v20 = vsub.f32 %v11174_v62, %v9939_v30  ;;  %v11361_v12 = vld [vmem:[#allocation106_spill] sm:$0xff]  ;;  %v5086_v30 = vmul.f32 %v5070_v19, %v5022_v40 }
 0x97b   : > { %v4363_v16 = vld [vmem:[#allocation3 + $0x60] sm:$0xff] }
 0x97c   : > { %v4379_v24 = vmul.f32 %v6705_v31, %v4363_v16  ;;  %3425 = vst.msk [vmem:[#allocation3 + $0x78] sm:$0xff] %vm3409_vm13, %v3408_v18  ;;  %v5025_v21 = vpop.f32.mrf.mxu0  ;;  %v11362_v18 = vld [vmem:[#allocation44_spill] sm:$0xff] }
 0x97d   : > { %v2764_v31 = vadd.f32 %v11362_v18, %v11361_v12 }
 0x97e   : > { %v4443_v35 = vadd.f32 %v4421_v32, %v4379_v24  ;;  %v11363_v32 = vld [vmem:[#allocation53_spill] sm:$0xff] }
 0x97f   : > { %v4200_v22 = vpop.permute.xlu1 %4199 }
 0x980   : > { %v4235_v6 = vsub.f32 %v9950_v41, %v4200_v22  ;;  %v4236_v17 = vsub.f32 %v9954_v54, %v4200_v22  ;;  %4460 = vst.msk [vmem:[#allocation3 + $0x60] sm:$0xff] %vm4447_vm0, %v4443_v35  ;;  %v3833_v35 = vadd.f32 %v11363_v32, %v2764_v31  ;;  %v4349_v22 = vmul.f32 1.442695, %v4318_v20  ;;  %v11368_v20 = vld [vmem:[#allocation81_spill] sm:$0xff] }
 0x981   : > { %v10187_v2 = vpop.xlane.xlu2 %4390 }
 0x982   : > { %v4295_v15 = vmul.f32 1.442695, %v4235_v6  ;;  %v4297_v51 = vmul.f32 1.442695, %v4236_v17 }
 0x984   : > { %6708 = vpow2.f32 %v4295_v15  ;;  %v5028_v17 = vpop.f32.mrf.mxu0  ;;  %v11364_v15 = vld [vmem:[#allocation104_spill] sm:$0xff] }
 0x985   : > { %6710 = vpow2.f32 %v4297_v51  ;;  %v11365_v51 = vld [vmem:[#allocation50_spill] sm:$0xff] }
 0x986   : > { %6712 = vpow2.f32 %v4349_v22  ;;  %v2767_v58 = vadd.f32 %v11365_v51, %v11364_v15  ;;  %v11370_v22 = vld [vmem:[#allocation58_spill] sm:$0xff]  ;;  %v11371_v51 = vld [vmem:[#allocation121_spill] sm:$0xff] }
 0x989   : > { %v4400_v41 = vpop.xlane.xlu2 %4399 }
 0x98a   : > { %v6709_v50 = vpop.eup %6708  ;;  %v4436_v54 = vadd.f32 %v4400_v41, %v4372_v14  ;;  %v3834_v14 = vadd.f32 %v11366_v63, %v2767_v58 }
 0x98b   : > { %v6711_v0 = vpop.eup %6710  ;;  %v4494_v46 = vpack.c.bf16 %v10095_v34, %v6709_v50 }
 0x98c   : > { %v4495_v16 = vpack.c.bf16 %v10097_v36, %v6711_v0  ;;  %v4425_v24 = vadd.f32 %v6711_v0, %v6709_v50  ;;  %4453 = vst.msk [vmem:[#allocation3 + $0x28] sm:$0xff] %vm4447_vm0, %v4436_v54  ;;  %v5071_v36 = vld [vmem:[#allocation4] sm:$0xff]  ;;  %v4366_v50 = vld [vmem:[#allocation3 + $0x78] sm:$0xff]  ;;  %v6713_v0 = vpop.eup %6712  ;;  %v11367_v54 = vld [vmem:[#allocation45_spill] sm:$0xff] }
 0x98d   : > { %4699 = vmatmul.bf16.gmra.mxu1 %v4494_v46  ;;  %v3267_v46 = vsub.f32 %v11368_v20, %v11367_v54  ;;  %v5087_v12 = vmul.f32 %v5071_v36, %v5025_v21  ;;  %v4382_v40 = vmul.f32 %v6713_v0, %v4366_v50  ;;  %v11372_v21 = vld [vmem:[#allocation101_spill] sm:$0xff] }
 0x98e   : > { %4748 = vmatmul.bf16.gmra.mxu2 %v4495_v16  ;;  %4426 = vadd.xlane.f32.xlu2 %v4425_v24  ;;  %v3273_v58 = vsub.f32 %v11372_v21, %v11371_v51  ;;  %v11373_v54 = vld [vmem:[#allocation93_spill] sm:$0xff] }
 0x98f   : > { %v4823_v62 = vpop.f32.mrf.mxu3  ;;  %v3285_v32 = vmul.f32 1.442695, %v3267_v46  ;;  %v11374_v46 = vld [vmem:[#allocation51_spill] sm:$0xff] }
 0x990   : > { %v4871_v6 = vadd.f32 %v4823_v62, %v3833_v35  ;;  %v11369_v35 = vld [vmem:[#allocation92_spill] sm:$0xff]  ;;  %v3297_v0 = vmul.f32 1.442695, %v3273_v58 }
 0x991   : > { %v2770_v62 = vadd.f32 %v11370_v22, %v11369_v35  ;;  %6714 = vpow2.f32 %v3285_v32  ;;  %v11377_v35 = vld [vmem:[#allocation54_spill] sm:$0xff] }
 0x992   : > { %v5102_v34 = vadd.f32 %v5086_v30, %v4871_v6  ;;  %v5072_v30 = vld [vmem:[#allocation4 + $0x58] sm:$0xff]  ;;  %v5031_v6 = vpop.f32.mrf.mxu0  ;;  %6716 = vpow2.f32 %v3297_v0 }
 0x993   : > { %v5088_v36 = vmul.f32 %v5072_v30, %v5028_v17  ;;  %v3315_v30 = vld [vmem:[#allocation3 + $0x10] sm:$0xff] }
 0x994   : > { %5118 = vst [vmem:[#allocation4 + $0x30] sm:$0xff] %v5102_v34  ;;  %v3835_v34 = vadd.f32 %v9937_v8, %v2770_v62 }
 0x997   : > { %v4826_v41 = vpop.f32.mrf.mxu3  ;;  %v6715_v8 = vpop.eup %6714 }
 0x998   : > { %v4872_v18 = vadd.f32 %v4826_v41, %v3834_v14 }
 0x99a   : > { %v5103_v31 = vadd.f32 %v5087_v12, %v4872_v18  ;;  %v4430_v16 = vpop.xlane.xlu0 %4429  ;;  %v2773_v12 = vadd.f32 %v11374_v46, %v11373_v54  ;;  %v5073_v18 = vld [vmem:[#allocation4 + $0x18] sm:$0xff]  ;;  %v5034_v17 = vpop.f32.mrf.mxu0  ;;  %v11380_v54 = vld [vmem:[#allocation49_spill] sm:$0xff] }
 0x99b   : > { %v4446_v24 = vadd.f32 %v4430_v16, %v4382_v40  ;;  %v4690_v19 = vpop.f32.mrf.mxu1  ;;  %v5089_v22 = vmul.f32 %v5073_v18, %v5031_v6  ;;  %v6717_v6 = vpop.eup %6716  ;;  %v4311_v46 = vsub.f32 %v11372_v21, %v11380_v54  ;;  %v11382_v21 = vld [vmem:[#allocation83_spill] sm:$0xff] }
 0x99c   : > { %5119 = vst [vmem:[#allocation4] sm:$0xff] %v5103_v31  ;;  %v11376_v31 = vld [vmem:[#allocation46_spill] sm:$0xff] }
 0x99d   : > { %4463 = vst.msk [vmem:[#allocation3 + $0x78] sm:$0xff] %vm4447_vm0, %v4446_v24  ;;  %v4305_v16 = vsub.f32 %v11368_v20, %v11376_v31  ;;  %v3836_v24 = vadd.f32 %v9963_v42, %v2773_v12  ;;  %v11378_v20 = vld [vmem:[#allocation109_spill] sm:$0xff] }
 0x99e   : > { %v2776_v42 = vadd.f32 %v9941_v43, %v11378_v20 }
 0x99f   : > { %v4829_v15 = vpop.f32.mrf.mxu3 }
 0x9a0   : > { %v4873_v63 = vadd.f32 %v4829_v15, %v3835_v34  ;;  %v3331_v34 = vmul.f32 %v6715_v8, %v3315_v30  ;;  %v4323_v15 = vmul.f32 1.442695, %v4305_v16  ;;  %v3837_v0 = vadd.f32 %v9973_v25, %v2776_v42  ;;  %v3321_v16 = vld [vmem:[#allocation3 + $0x40] sm:$0xff] }
 0x9a2   : > { %v5104_v14 = vadd.f32 %v5088_v36, %v4873_v63  ;;  %v4739_v50 = vpop.f32.mrf.mxu2  ;;  %6718 = vpow2.f32 %v4323_v15 }
 0x9a3   : > { %v4740_v41 = vadd.f32 %v4739_v50, %v4690_v19  ;;  %v4692_v40 = vpop.f32.mrf.mxu1  ;;  %v3276_v19 = vsub.f32 %v11300_v5, %v11377_v35  ;;  %v4335_v35 = vmul.f32 1.442695, %v4311_v46  ;;  %v11384_v46 = vld [vmem:[#allocation33_spill] sm:$0xff] }
 0x9a4   : > { %5120 = vst [vmem:[#allocation4 + $0x58] sm:$0xff] %v5104_v14 }
 0x9a5   : > { %5971 = vmatmul.msk.f32.gmra.mxu3 %vm11375_vm1, %v4740_v41  ;;  %v3303_v50 = vmul.f32 1.442695, %v3276_v19  ;;  %v5074_v41 = vld [vmem:[#allocation4 + $0x50] sm:$0xff] }
 0x9a6   : > { %v5090_v43 = vmul.f32 %v5074_v41, %v5034_v17 }
 0x9a7   : > { %v4832_v32 = vpop.f32.mrf.mxu3  ;;  %6720 = vpow2.f32 %v3303_v50  ;;  %v4314_v50 = vsub.f32 %v11300_v5, %v9890_v37 }
 0x9a8   : > { %v4874_v62 = vadd.f32 %v4832_v32, %v3836_v24  ;;  %v5037_v24 = vpop.f32.mrf.mxu0  ;;  %v3337_v32 = vmul.f32 %v6717_v6, %v3321_v16  ;;  %6722 = vpow2.f32 %v4335_v35  ;;  %v3324_v6 = vld [vmem:[#allocation3 + $0x58] sm:$0xff]  ;;  %v5076_v35 = vld [vmem:[#allocation4 + $0x8] sm:$0xff] }
 0x9aa   : > { %v5105_v51 = vadd.f32 %v5089_v22, %v4874_v62  ;;  %v4741_v58 = vpop.f32.mrf.mxu2  ;;  %v3353_v36 = vpop.xlane.xlu1 %3352 }
 0x9ab   : > { %v4742_v63 = vadd.f32 %v4741_v58, %v4692_v40  ;;  %v3395_v14 = vadd.f32 %v3353_v36, %v3331_v34  ;;  %v4695_v12 = vpop.f32.mrf.mxu1  ;;  %v11381_v40 = vld [vmem:[#allocation55_spill] sm:$0xff]  ;;  %v6719_v34 = vpop.eup %6718  ;;  %v5075_v36 = vld [vmem:[#allocation4 + $0x68] sm:$0xff] }
 0x9ac   : > { %5121 = vst [vmem:[#allocation4 + $0x18] sm:$0xff] %v5105_v51  ;;  %v3279_v8 = vsub.f32 %v11323_v57, %v11381_v40  ;;  %v2779_v51 = vadd.f32 %v9969_v60, %v11382_v21  ;;  %v5091_v60 = vmul.f32 %v5075_v36, %v5037_v24  ;;  %v4409_v24 = vpop.xlane.xlu2 %4408  ;;  %v3327_v21 = vld [vmem:[#allocation3 + $0x70] sm:$0xff] }
 0x9ad   : > { %3412 = vst.msk [vmem:[#allocation3 + $0x10] sm:$0xff] %vm3409_vm13, %v3395_v14  ;;  %5972 = vmatmul.msk.f32.gmra.mxu3 %vm11379_vm3, %v4742_v63  ;;  %v6721_v17 = vpop.eup %6720 }
 0x9ae   : > { %v3309_v15 = vmul.f32 1.442695, %v3279_v8  ;;  %v3838_v14 = vadd.f32 %v9989_v1, %v2779_v51  ;;  %v3340_v54 = vmul.f32 %v6721_v17, %v3324_v6  ;;  %v11387_v51 = vld [vmem:[#allocation76_spill] sm:$0xff] }
 0x9af   : > { %v4835_v18 = vpop.f32.mrf.mxu3 }
 0x9b0   : > { %v4875_v31 = vadd.f32 %v4835_v18, %v3837_v0  ;;  %6724 = vpow2.f32 %v3309_v15  ;;  %v4341_v18 = vmul.f32 1.442695, %v4314_v50  ;;  %v11388_v50 = vld [vmem:[#allocation113_spill] sm:$0xff] }
 0x9b2   : > { %v5106_v19 = vadd.f32 %v5090_v43, %v4875_v31  ;;  %v4744_v22 = vpop.f32.mrf.mxu2  ;;  %v3371_v62 = vpop.xlane.xlu1 %3370  ;;  %v11385_v31 = vld [vmem:[#allocation98_spill] sm:$0xff]  ;;  %6726 = vpow2.f32 %v4341_v18 }
 0x9b3   : > { %v4745_v30 = vadd.f32 %v4744_v22, %v4695_v12  ;;  %v3401_v25 = vadd.f32 %v3371_v62, %v3337_v32  ;;  %v4697_v0 = vpop.f32.mrf.mxu1  ;;  %v4304_v12 = vsub.f32 %v11341_v11, %v11384_v46  ;;  %v5040_v43 = vpop.f32.mrf.mxu0  ;;  %v2782_v16 = vadd.f32 %v9975_v3, %v11385_v31  ;;  %v4352_v46 = vld [vmem:[#allocation3 + $0x8] sm:$0xff]  ;;  %v4355_v31 = vld [vmem:[#allocation3 + $0x20] sm:$0xff] }
 0x9b4   : > { %v4353_v58 = vld [vmem:[#allocation3 + $0x10] sm:$0xff]  ;;  %5122 = vst [vmem:[#allocation4 + $0x50] sm:$0xff] %v5106_v19 }
 0x9b5   : > { %v4369_v63 = vmul.f32 %v6719_v34, %v4353_v58  ;;  %3418 = vst.msk [vmem:[#allocation3 + $0x40] sm:$0xff] %vm3409_vm13, %v3401_v25  ;;  %5973 = vmatmul.msk.f32.gmra.mxu3 %vm11383_vm12, %v4745_v30  ;;  %v4321_v22 = vmul.f32 1.442695, %v4304_v12  ;;  %v3839_v62 = vadd.f32 %v10085_v13, %v2782_v16  ;;  %v5092_v34 = vmul.f32 %v5076_v35, %v5040_v43 }
 0x9b6   : > { %v4307_v58 = vsub.f32 %v11346_v56, %v11387_v51  ;;  %v2785_v13 = vadd.f32 %v9992_v38, %v11388_v50 }
 0x9b7   : > { %v4433_v20 = vadd.f32 %v10187_v2, %v4369_v63  ;;  %v4838_v42 = vpop.f32.mrf.mxu3  ;;  %v6723_v2 = vpop.eup %6722  ;;  %6728 = vpow2.f32 %v4321_v22 }
 0x9b8   : > { %v4876_v41 = vadd.f32 %v4838_v42, %v3838_v14  ;;  %v6725_v11 = vpop.eup %6724  ;;  %v4327_v6 = vmul.f32 1.442695, %v4307_v58 }
 0x9b9   : > { %4450 = vst.msk [vmem:[#allocation3 + $0x10] sm:$0xff] %vm4447_vm0, %v4433_v20  ;;  %v3343_v3 = vmul.f32 %v6725_v11, %v3327_v21  ;;  %v6727_v14 = vpop.eup %6726 }
 0x9ba   : > { %v5107_v1 = vadd.f32 %v5091_v60, %v4876_v41  ;;  %v4746_v40 = vpop.f32.mrf.mxu2  ;;  %v3380_v8 = vpop.xlane.xlu1 %3379  ;;  %v5077_v60 = vld [vmem:[#allocation4 + $0x48] sm:$0xff]  ;;  %6730 = vpow2.f32 %v4327_v6 }
 0x9bb   : > { %v4747_v37 = vadd.f32 %v4746_v40, %v4697_v0  ;;  %v3404_v5 = vadd.f32 %v3380_v8, %v3340_v54  ;;  %v5043_v42 = vpop.f32.mrf.mxu0  ;;  %v3840_v0 = vadd.f32 %v10099_v29, %v2785_v13  ;;  %v4418_v54 = vpop.xlane.xlu2 %4417  ;;  %v11389_v8 = vld [vmem:[#allocation97_spill] sm:$0xff] }
 0x9bc   : > { %v4359_v32 = vld [vmem:[#allocation3 + $0x40] sm:$0xff]  ;;  %5123 = vst [vmem:[#allocation4 + $0x68] sm:$0xff] %v5107_v1  ;;  %v5093_v1 = vmul.f32 %v5077_v60, %v5043_v42  ;;  %v4310_v43 = vsub.f32 %v11329_v53, %v11389_v8  ;;  %v4358_v53 = vld [vmem:[#allocation3 + $0x38] sm:$0xff] }
 0x9bd   : > { %v4375_v19 = vmul.f32 %v6723_v2, %v4359_v32  ;;  %3421 = vst.msk [vmem:[#allocation3 + $0x58] sm:$0xff] %vm3409_vm13, %v3404_v5  ;;  %5974 = vmatmul.msk.f32.gmra.mxu3 %vm11386_vm8, %v4747_v37  ;;  %v6729_v18 = vpop.eup %6728  ;;  %v11390_v32 = vld [vmem:[#allocation103_spill] sm:$0xff] }
 0x9be   : > { %v4368_v38 = vmul.f32 %v6729_v18, %v4352_v46  ;;  %v4333_v29 = vmul.f32 1.442695, %v4310_v43  ;;  %v4313_v35 = vsub.f32 %v11332_v61, %v11390_v32 }
 0x9bf   : > { %v4439_v30 = vadd.f32 %v4409_v24, %v4375_v19  ;;  %v4841_v25 = vpop.f32.mrf.mxu3 }
 0x9c0   : > { %v4877_v15 = vadd.f32 %v4841_v25, %v3839_v62  ;;  %v6731_v16 = vpop.eup %6730  ;;  %6732 = vpow2.f32 %v4333_v29  ;;  %v4339_v22 = vmul.f32 1.442695, %v4313_v35  ;;  %v11391_v25 = vld [vmem:[#allocation61_spill] sm:$0xff] }
 0x9c1   : > { %4456 = vst.msk [vmem:[#allocation3 + $0x40] sm:$0xff] %vm4447_vm0, %v4439_v30  ;;  %v4371_v24 = vmul.f32 %v6731_v16, %v4355_v31 }
 0x9c2   : > { %v5108_v36 = vadd.f32 %v5092_v34, %v4877_v15  ;;  %v3389_v63 = vpop.xlane.xlu1 %3388  ;;  %6734 = vpow2.f32 %v4339_v22  ;;  %v4316_v34 = vsub.f32 %v11303_v27, %v11391_v25 }
 0x9c3   : > { %v3407_v17 = vadd.f32 %v3389_v63, %v3343_v3  ;;  %v5046_v15 = vpop.f32.mrf.mxu0  ;;  %v11392_v3 = vld [vmem:[#allocation114_spill] sm:$0xff] }
 0x9c4   : > { %v4362_v20 = vld [vmem:[#allocation3 + $0x58] sm:$0xff]  ;;  %5124 = vst [vmem:[#allocation4 + $0x8] sm:$0xff] %v5108_v36  ;;  %v2788_v51 = vadd.f32 %v9996_v48, %v11392_v3  ;;  %v5078_v36 = vld [vmem:[#allocation4 + $0x40] sm:$0xff]  ;;  %v4345_v63 = vmul.f32 1.442695, %v4316_v34 }
 0x9c5   : > { %v4378_v41 = vmul.f32 %v6727_v14, %v4362_v20  ;;  %3424 = vst.msk [vmem:[#allocation3 + $0x70] sm:$0xff] %vm3409_vm13, %v3407_v17  ;;  %v4361_v14 = vld [vmem:[#allocation3 + $0x50] sm:$0xff]  ;;  %v5094_v50 = vmul.f32 %v5078_v36, %v5046_v15  ;;  %vm11394_vm13 = vmmov %vm11375_vm1  ;;  %v11397_v3 = vld [vmem:[#allocation111_spill] sm:$0xff] }
 0x9c6   : > { %v6733_v62 = vpop.eup %6732  ;;  %v3841_v61 = vadd.f32 %v10114_v52, %v2788_v51  ;;  %6736 = vpow2.f32 %v4345_v63  ;;  %v2797_v51 = vadd.f32 %v10013_v44, %v11397_v3 }
 0x9c7   : > { %v4442_v56 = vadd.f32 %v4418_v54, %v4378_v41  ;;  %v4844_v12 = vpop.f32.mrf.mxu3  ;;  %v4374_v30 = vmul.f32 %v6733_v62, %v4358_v53  ;;  %v11393_v41 = vld [vmem:[#allocation108_spill] sm:$0xff]  ;;  %v5080_v53 = vld [vmem:[#allocation4 + $0x10] sm:$0xff] }
 0x9c8   : > { %v4878_v40 = vadd.f32 %v4844_v12, %v3840_v0  ;;  %v6735_v20 = vpop.eup %6734  ;;  %v2791_v6 = vadd.f32 %v10000_v33, %v11393_v41  ;;  %v5079_v54 = vld [vmem:[#allocation4 + $0x20] sm:$0xff]  ;;  %v4317_v33 = vsub.f32 %v11323_v57, %v10059_v59  ;;  %v3844_v36 = vadd.f32 %v10140_v23, %v2797_v51 }
 0x9c9   : > { %4459 = vst.msk [vmem:[#allocation3 + $0x58] sm:$0xff] %vm4447_vm0, %v4442_v56  ;;  %v4377_v60 = vmul.f32 %v6735_v20, %v4361_v14  ;;  %v4364_v56 = vld [vmem:[#allocation3 + $0x68] sm:$0xff] }
 0x9ca   : > { %v5109_v37 = vadd.f32 %v5093_v1, %v4878_v40  ;;  %v4388_v5 = vpop.xlane.xlu1 %4387  ;;  %v3842_v52 = vadd.f32 %v10121_v47, %v2791_v6  ;;  %v11396_v59 = vld [vmem:[#allocation116_spill] sm:$0xff] }
 0x9cb   : > { %v4432_v2 = vadd.f32 %v4388_v5, %v4368_v38  ;;  %v5049_v0 = vpop.f32.mrf.mxu0  ;;  %v2794_v22 = vadd.f32 %v10010_v7, %v11396_v59  ;;  %v11399_v41 = vld [vmem:[#allocation112_spill] sm:$0xff] }
 0x9cc   : > { %5125 = vst [vmem:[#allocation4 + $0x48] sm:$0xff] %v5109_v37  ;;  %v5095_v12 = vmul.f32 %v5079_v54, %v5049_v0  ;;  %v6737_v1 = vpop.eup %6736  ;;  %v4347_v37 = vmul.f32 1.442695, %v4317_v33  ;;  %v4365_v47 = vld [vmem:[#allocation3 + $0x70] sm:$0xff]  ;;  %v2803_v6 = vadd.f32 %v10027_v39, %v11399_v41 }
 0x9cd   : > { %4449 = vst.msk [vmem:[#allocation3 + $0x8] sm:$0xff] %vm4447_vm0, %v4432_v2  ;;  %v4380_v38 = vmul.f32 %v6737_v1, %v4364_v56  ;;  %v3843_v62 = vadd.f32 %v10132_v10, %v2794_v22 }
 0x9ce   : > { %6738 = vpow2.f32 %v4347_v37  ;;  %v3846_v0 = vadd.f32 %v10159_v26, %v2803_v6  ;;  %v5085_v37 = vld [vmem:[#allocation4 + $0x28] sm:$0xff] }
 0x9d2   : > { %v4397_v19 = vpop.xlane.xlu1 %4396 }
 0x9d3   : > { %v4435_v11 = vadd.f32 %v4397_v19, %v4371_v24  ;;  %v5052_v57 = vpop.f32.mrf.mxu0 }
 0x9d4   : > { %v6739_v5 = vpop.eup %6738  ;;  %v5096_v25 = vmul.f32 %v5080_v53, %v5052_v57 }
 0x9d5   : > { %4452 = vst.msk [vmem:[#allocation3 + $0x20] sm:$0xff] %vm4447_vm0, %v4435_v11  ;;  %v4381_v2 = vmul.f32 %v6739_v5, %v4365_v47 }
 0x9da   : > { %v4406_v21 = vpop.xlane.xlu1 %4405 }
 0x9db   : > { %v4438_v58 = vadd.f32 %v4406_v21, %v4374_v30  ;;  %v5055_v15 = vpop.f32.mrf.mxu0 }
 0x9dd   : > { %4455 = vst.msk [vmem:[#allocation3 + $0x38] sm:$0xff] %vm4447_vm0, %v4438_v58  ;;  %v5081_v58 = vld [vmem:[#allocation4 + $0x38] sm:$0xff] }
 0x9de   : > { %v4847_v17 = vpop.f32.mrf.mxu3  ;;  %v5097_v63 = vmul.f32 %v5081_v58, %v5055_v15 }
 0x9df   : > { %v4879_v13 = vadd.f32 %v4847_v17, %v3841_v61 }
 0x9e1   : > { %v5110_v42 = vadd.f32 %v5094_v50, %v4879_v13  ;;  %v11398_v50 = vld [vmem:[#allocation117_spill] sm:$0xff]  ;;  %v5082_v13 = vld [vmem:[#allocation4 + $0x60] sm:$0xff] }
 0x9e2   : > { %v4415_v27 = vpop.xlane.xlu1 %4414  ;;  %v2800_v10 = vadd.f32 %v10021_v9, %v11398_v50 }
 0x9e3   : > { %5126 = vst [vmem:[#allocation4 + $0x40] sm:$0xff] %v5110_v42  ;;  %v4441_v48 = vadd.f32 %v4415_v27, %v4377_v60  ;;  %v5058_v7 = vpop.f32.mrf.mxu0 }
 0x9e4   : > { %v3845_v20 = vadd.f32 %v10147_v55, %v2800_v10  ;;  %v5098_v60 = vmul.f32 %v5082_v13, %v5058_v7 }
 0x9e5   : > { %4458 = vst.msk [vmem:[#allocation3 + $0x50] sm:$0xff] %vm4447_vm0, %v4441_v48  ;;  %v5083_v48 = vld [vmem:[#allocation4 + $0x70] sm:$0xff] }
 0x9e6   : > { %v4850_v46 = vpop.f32.mrf.mxu3 }
 0x9e7   : > { %v4880_v18 = vadd.f32 %v4850_v46, %v3842_v52 }
 0x9e9   : > { %v5111_v40 = vadd.f32 %v5095_v12, %v4880_v18  ;;  %v11400_v12 = vld [vmem:[#allocation91_spill] sm:$0xff] }
 0x9ea   : > { %v4424_v8 = vpop.xlane.xlu1 %4423  ;;  %v2806_v55 = vadd.f32 %v10035_v4, %v11400_v12  ;;  %v5084_v18 = vld [vmem:[#allocation4 + $0x78] sm:$0xff] }
 0x9eb   : > { %5127 = vst [vmem:[#allocation4 + $0x20] sm:$0xff] %v5111_v40  ;;  %v4444_v43 = vadd.f32 %v4424_v8, %v4380_v38  ;;  %v5061_v23 = vpop.f32.mrf.mxu0 }
 0x9ec   : > { %v5099_v52 = vmul.f32 %v5083_v48, %v5061_v23  ;;  %v3847_v1 = vadd.f32 %v10168_v45, %v2806_v55 }
 0x9ed   : > { %4461 = vst.msk [vmem:[#allocation3 + $0x68] sm:$0xff] %vm4447_vm0, %v4444_v43  ;;  %v11401_v43 = vld [vmem:[#allocation99_spill] sm:$0xff] }
 0x9ee   : > { %v2809_v33 = vadd.f32 %v10046_v28, %v11401_v43 }
 0x9f0   : > { %v3848_v47 = vadd.f32 %v10176_v49, %v2809_v33 }
 0x9f3   : > { %v5064_v56 = vpop.f32.mrf.mxu0 }
 0x9f4   : > { %v5100_v38 = vmul.f32 %v5084_v18, %v5064_v56 }
 0x9fb   : > { %v5067_v26 = vpop.f32.mrf.mxu0 }
 0xa01   : > { %v4427_v29 = vpop.xlane.xlu2 %4426 }
 0xa02   : > { %v4445_v31 = vadd.f32 %v4427_v29, %v4381_v2  ;;  %v5101_v2 = vmul.f32 %v5085_v37, %v5067_v26 }
 0xa04   : > { %4462 = vst.msk [vmem:[#allocation3 + $0x70] sm:$0xff] %vm4447_vm0, %v4445_v31 }
 0xa0a   : > { %v4700_v16 = vpop.f32.mrf.mxu1 }
 0xa11   : > { %v4749_v24 = vpop.f32.mrf.mxu2 }
 0xa12   : > { %v4750_v32 = vadd.f32 %v4749_v24, %v4700_v16  ;;  %v4702_v35 = vpop.f32.mrf.mxu1 }
 0xa14   : > { %5975 = vmatmul.msk.f32.gmra.mxu3 %vm11394_vm13, %v4750_v32 }
 0xa19   : > { %v4751_v19 = vpop.f32.mrf.mxu2 }
 0xa1a   : > { %v4752_v11 = vadd.f32 %v4751_v19, %v4702_v35 }
 0xa1c   : > { %5976 = vmatmul.msk.f32.gmra.mxu3 %vm11395_vm14, %v4752_v11 }
 0xa28   : > { %v4853_v30 = vpop.f32.mrf.mxu3 }
 0xa29   : > { %v4881_v34 = vadd.f32 %v4853_v30, %v3843_v62 }
 0xa2b   : > { %v5112_v21 = vadd.f32 %v5096_v25, %v4881_v34 }
 0xa2d   : > { %5128 = vst [vmem:[#allocation4 + $0x10] sm:$0xff] %v5112_v21 }
 0xa30   : > { %v4856_v61 = vpop.f32.mrf.mxu3 }
 0xa31   : > { %v4882_v17 = vadd.f32 %v4856_v61, %v3844_v36 }
 0xa33   : > { %v5113_v14 = vadd.f32 %v5097_v63, %v4882_v17 }
 0xa35   : > { %5129 = vst [vmem:[#allocation4 + $0x38] sm:$0xff] %v5113_v14 }
 0xa38   : > { %v4859_v42 = vpop.f32.mrf.mxu3 }
 0xa39   : > { %v4883_v27 = vadd.f32 %v4859_v42, %v3845_v20 }
 0xa3b   : > { %v5114_v44 = vadd.f32 %v5098_v60, %v4883_v27 }
 0xa3d   : > { %5130 = vst [vmem:[#allocation4 + $0x60] sm:$0xff] %v5114_v44 }
 0xa40   : > { %v4862_v54 = vpop.f32.mrf.mxu3 }
 0xa41   : > { %v4884_v46 = vadd.f32 %v4862_v54, %v3846_v0 }
 0xa43   : > { %v5115_v9 = vadd.f32 %v5099_v52, %v4884_v46 }
 0xa45   : > { %5131 = vst [vmem:[#allocation4 + $0x70] sm:$0xff] %v5115_v9 }
 0xa97   : > { %v4865_v40 = vpop.f32.mrf.mxu3 }
 0xa98   : > { %v4885_v39 = vadd.f32 %v4865_v40, %v3847_v1 }
 0xa9a   : > { %v5116_v8 = vadd.f32 %v5100_v38, %v4885_v39 }
 0xa9c   : > { %5132 = vst [vmem:[#allocation4 + $0x78] sm:$0xff] %v5116_v8 }
 0xa9f   : > { %v4868_v5 = vpop.f32.mrf.mxu3 }
 0xaa0   : > { %v4886_v29 = vadd.f32 %v4868_v5, %v3848_v47 }
 0xaa2   : > { %v5117_v31 = vadd.f32 %v5101_v2, %v4886_v29 }
 0xaa4   : > { %5133 = vst [vmem:[#allocation4 + $0x28] sm:$0xff] %v5117_v31 }
 0xaa5 PF: > { %s11402_s12 = sld [smem:[#allocation24_spill]] }
 0xaab   : > { %p5994_p4 = scmp.ne.s32.totalorder %s11402_s12, 1 }
 0xaac   : > { %s11403_s3 = sld [smem:[#allocation127_spill]] (!%p5994_p4) }
 0xaad   : > { %5137 = sbr.rel (%p5994_p4) target bundleno = 3110 (0xc26), region = 103 }
 0xab2   : > { %v5186_v4 = vld [vmem:[#allocation11] sm:$0xf]  ;;  %vm5236_vm0 = vcmask 1043456   ;;  %v5139_v28 = vld [vmem:[#allocation3 + $0x8] sm:$0xff]  ;;  %vm5187_vm11 = vcmask 31744   ;;  %v5140_v32 = vld [vmem:[#allocation3 + $0x10] sm:$0xff] }
 0xab3   : > { %v5138_v45 = vld [vmem:[#allocation3] sm:$0xff]  ;;  %5995 = vmatpush.msk.msra.mxu0 %vm5236_vm0, %v5186_v4  ;;  %6108 = vmatpush.msk.msra.mxu3 %vm5236_vm0, %v5186_v4  ;;  %v5155_v24 = vmax.f32 %v5139_v28, 1e-20  ;;  %v5156_v35 = vmax.f32 %v5140_v32, 1e-20  ;;  %v5141_v11 = vld [vmem:[#allocation3 + $0x18] sm:$0xff] }
 0xab4   : > { %v5154_v16 = vmax.f32 %v5138_v45, 1e-20  ;;  %v5148_v57 = vld [vmem:[#allocation3 + $0x50] sm:$0xff]  ;;  %v5157_v22 = vmax.f32 %v5141_v11, 1e-20  ;;  %v5142_v62 = vld [vmem:[#allocation3 + $0x20] sm:$0xff] }
 0xab5   : > { %v5164_v59 = vmax.f32 %v5148_v57, 1e-20  ;;  %v5149_v30 = vld [vmem:[#allocation3 + $0x58] sm:$0xff]  ;;  %v5158_v15 = vmax.f32 %v5142_v62, 1e-20  ;;  %v5143_v3 = vld [vmem:[#allocation3 + $0x28] sm:$0xff] }
 0xab6   : > { %6771 = vrcp.f32 %v5154_v16  ;;  %v5165_v34 = vmax.f32 %v5149_v30, 1e-20  ;;  %v5150_v51 = vld [vmem:[#allocation3 + $0x60] sm:$0xff]  ;;  %v5159_v61 = vmax.f32 %v5143_v3, 1e-20  ;;  %v5144_v17 = vld [vmem:[#allocation3 + $0x30] sm:$0xff] }
 0xab7   : > { %6773 = vrcp.f32 %v5155_v24  ;;  %v5166_v36 = vmax.f32 %v5150_v51, 1e-20  ;;  %v5151_v14 = vld [vmem:[#allocation3 + $0x68] sm:$0xff]  ;;  %v5160_v10 = vmax.f32 %v5144_v17, 1e-20  ;;  %v5145_v20 = vld [vmem:[#allocation3 + $0x38] sm:$0xff] }
 0xab8   : > { %6775 = vrcp.f32 %v5156_v35  ;;  %v5167_v50 = vmax.f32 %v5151_v14, 1e-20  ;;  %v5152_v42 = vld [vmem:[#allocation3 + $0x70] sm:$0xff]  ;;  %v5352_v60 = vld [vmem:[#allocation14 + $0x78] sm:$0xff]  ;;  %v5161_v48 = vmax.f32 %v5145_v20, 1e-20 }
 0xab9   : > { %6777 = vrcp.f32 %v5164_v59  ;;  %v5168_v44 = vmax.f32 %v5152_v42, 1e-20  ;;  %5357 = vmatpush.msra.mxu1 %v5352_v60  ;;  %v5351_v41 = vld [vmem:[#allocation14 + $0x70] sm:$0xff]  ;;  %6109 = vmatpush.msra.mxu2 %v5352_v60  ;;  %v5350_v23 = vld [vmem:[#allocation14 + $0x68] sm:$0xff]  ;;  %v5349_v0 = vld [vmem:[#allocation14 + $0x60] sm:$0xff] }
 0xaba   : > { %6779 = vrcp.f32 %v5157_v22  ;;  %v5153_v6 = vld [vmem:[#allocation3 + $0x78] sm:$0xff]  ;;  %6110 = vmatpush.msrb.mxu3 %v5352_v60  ;;  %v5146_v9 = vld [vmem:[#allocation3 + $0x40] sm:$0xff]  ;;  %v5346_v55 = vld [vmem:[#allocation14 + $0x48] sm:$0xff] }
 0xabb   : > { %6781 = vrcp.f32 %v5165_v34  ;;  %5358 = vmatpush.msra.mxu1 %v5351_v41  ;;  %6111 = vmatpush.msra.mxu2 %v5351_v41  ;;  %v5169_v52 = vmax.f32 %v5153_v6, 1e-20  ;;  %v5348_v46 = vld [vmem:[#allocation14 + $0x58] sm:$0xff]  ;;  %v5347_v56 = vld [vmem:[#allocation14 + $0x50] sm:$0xff]  ;;  %v5162_v18 = vmax.f32 %v5146_v9, 1e-20 }
 0xabc   : > { %v6772_v49 = vpop.eup %6771  ;;  %6783 = vrcp.f32 %v5158_v15  ;;  %6112 = vmatpush.msrb.mxu3 %v5351_v41  ;;  %v5345_v1 = vld [vmem:[#allocation14 + $0x40] sm:$0xff]  ;;  %v5344_v38 = vld [vmem:[#allocation14 + $0x38] sm:$0xff]  ;;  %v5343_v43 = vld [vmem:[#allocation14 + $0x30] sm:$0xff] }
 0xabd   : > { %5996 = vmatmul.msk.f32.vlgmr.msra.gmra.mxu0 %vm5187_vm11, %v6772_v49  ;;  %v6774_v19 = vpop.eup %6773  ;;  %6785 = vrcp.f32 %v5166_v36  ;;  %5359 = vmatpush.msra.mxu1 %v5350_v23  ;;  %v5147_v8 = vld [vmem:[#allocation3 + $0x48] sm:$0xff]  ;;  %v5340_v5 = vld [vmem:[#allocation14 + $0x18] sm:$0xff]  ;;  %v5339_v2 = vld [vmem:[#allocation14 + $0x10] sm:$0xff] }
 0xabe   : > { %v6776_v53 = vpop.eup %6775  ;;  %6787 = vrcp.f32 %v5159_v61  ;;  %6113 = vmatpush.msra.mxu2 %v5350_v23  ;;  %6114 = vmatpush.msrb.mxu3 %v5350_v23  ;;  %v5342_v33 = vld [vmem:[#allocation14 + $0x28] sm:$0xff]  ;;  %v5163_v26 = vmax.f32 %v5147_v8, 1e-20  ;;  %v5341_v37 = vld [vmem:[#allocation14 + $0x20] sm:$0xff]  ;;  %v5307_v35 = vld [vmem:[#allocation4 + $0x58] sm:$0xff] }
 0xabf   : > { %v6778_v25 = vpop.eup %6777  ;;  %6789 = vrcp.f32 %v5167_v50  ;;  %5360 = vmatpush.msra.mxu1 %v5349_v0  ;;  %v5338_v31 = vld [vmem:[#allocation14 + $0x8] sm:$0xff]  ;;  %v5337_v4 = vld [vmem:[#allocation14] sm:$0xff]  ;;  %v5308_v57 = vld [vmem:[#allocation4 + $0x18] sm:$0xff] }
 0xac0   : > { %6006 = vmatmul.msk.f32.vlgmr.msra.gmra.mxu3 %vm5187_vm11, %v6778_v25  ;;  %v6780_v21 = vpop.eup %6779  ;;  %6791 = vrcp.f32 %v5160_v10  ;;  %6115 = vmatpush.msra.mxu2 %v5349_v0  ;;  %v5305_v45 = vld [vmem:[#allocation4 + $0x30] sm:$0xff]  ;;  %v5306_v24 = vld [vmem:[#allocation4] sm:$0xff]  ;;  %v5310_v15 = vld [vmem:[#allocation4 + $0x68] sm:$0xff] }
 0xac1   : > { %v6782_v58 = vpop.eup %6781  ;;  %6793 = vrcp.f32 %v5168_v44  ;;  %5361 = vmatpush.msra.mxu1 %v5348_v46  ;;  %6116 = vmatpush.msrb.mxu3 %v5349_v0  ;;  %v5309_v62 = vld [vmem:[#allocation4 + $0x50] sm:$0xff]  ;;  %v5319_v50 = vld [vmem:[#allocation4 + $0x78] sm:$0xff]  ;;  %v5313_v60 = vld [vmem:[#allocation4 + $0x40] sm:$0xff] }
 0xac2   : > { %v6784_v63 = vpop.eup %6783  ;;  %6795 = vrcp.f32 %v5161_v48  ;;  %6117 = vmatpush.msra.mxu2 %v5348_v46  ;;  %v5318_v36 = vld [vmem:[#allocation4 + $0x70] sm:$0xff]  ;;  %v5314_v48 = vld [vmem:[#allocation4 + $0x20] sm:$0xff]  ;;  %v5316_v9 = vld [vmem:[#allocation4 + $0x38] sm:$0xff] }
 0xac3   : > { %v6786_v7 = vpop.eup %6785  ;;  %6797 = vrcp.f32 %v5169_v52  ;;  %5362 = vmatpush.msra.mxu1 %v5347_v56  ;;  %6118 = vmatpush.msrb.mxu3 %v5348_v46  ;;  %v5315_v52 = vld [vmem:[#allocation4 + $0x10] sm:$0xff] }
 0xac4   : > { %v6788_v13 = vpop.eup %6787  ;;  %6119 = vmatpush.msra.mxu2 %v5347_v56  ;;  %6799 = vrcp.f32 %v5162_v18  ;;  %v6770_v18 = vld [vmem:[%s11403_s3] ss:$0 sm:$0xff] }
 0xac5   : > { %5997 = vmatmul.msk.f32.gmra.mxu0 %vm5187_vm11, %v6774_v19  ;;  %v6790_v27 = vpop.eup %6789  ;;  %5363 = vmatpush.msra.mxu1 %v5346_v55  ;;  %6801 = vrcp.f32 %v5163_v26 }
 0xac6   : > { %v6792_v54 = vpop.eup %6791  ;;  %6121 = vmatpush.msra.mxu2 %v5346_v55  ;;  %6120 = vmatpush.msrb.mxu3 %v5347_v56 }
 0xac7   : > { %v6794_v12 = vpop.eup %6793  ;;  %5364 = vmatpush.msra.mxu1 %v5345_v1 }
 0xac8   : > { %6007 = vmatmul.msk.f32.gmra.mxu3 %vm5187_vm11, %v6782_v58  ;;  %v6796_v40 = vpop.eup %6795  ;;  %6123 = vmatpush.msra.mxu2 %v5345_v1  ;;  %v5311_v58 = vld [vmem:[#allocation4 + $0x8] sm:$0xff] }
 0xac9   : > { %v6798_v39 = vpop.eup %6797  ;;  %5365 = vmatpush.msra.mxu1 %v5344_v38  ;;  %6122 = vmatpush.msrb.mxu3 %v5346_v55 }
 0xaca   : > { %6125 = vmatpush.msra.mxu2 %v5344_v38  ;;  %v6800_v47 = vpop.eup %6799 }
 0xacb   : > { %5366 = vmatpush.msra.mxu1 %v5343_v43  ;;  %6124 = vmatpush.msrb.mxu3 %v5345_v1  ;;  %v6802_v29 = vpop.eup %6801 }
 0xacc   : > { %6127 = vmatpush.msra.mxu2 %v5343_v43 }
 0xacd   : > { %5998 = vmatmul.msk.f32.gmra.mxu0 %vm5187_vm11, %v6776_v53  ;;  %5367 = vmatpush.msra.mxu1 %v5342_v33 }
 0xace   : > { %6129 = vmatpush.msra.mxu2 %v5342_v33  ;;  %6126 = vmatpush.msrb.mxu3 %v5344_v38 }
 0xacf   : > { %5368 = vmatpush.msra.mxu1 %v5341_v37 }
 0xad0   : > { %6008 = vmatmul.msk.f32.gmra.mxu3 %vm5187_vm11, %v6786_v7  ;;  %6131 = vmatpush.msra.mxu2 %v5341_v37  ;;  %v5312_v7 = vld [vmem:[#allocation4 + $0x48] sm:$0xff] }
 0xad1   : > { %5369 = vmatpush.msra.mxu1 %v5340_v5  ;;  %6128 = vmatpush.msrb.mxu3 %v5343_v43 }
 0xad2   : > { %6133 = vmatpush.msra.mxu2 %v5340_v5 }
 0xad3   : > { %5370 = vmatpush.msra.mxu1 %v5339_v2  ;;  %6130 = vmatpush.msrb.mxu3 %v5342_v33 }
 0xad4   : > { %6135 = vmatpush.msra.mxu2 %v5339_v2 }
 0xad5   : > { %5999 = vmatmul.msk.f32.gmra.mxu0 %vm5187_vm11, %v6780_v21  ;;  %6132 = vmatpush.msrb.mxu3 %v5341_v37 }
 0xad6   : > { %5371 = vmatpush.msra.mxu1 %v5338_v31  ;;  %6137 = vmatpush.msra.mxu2 %v5338_v31 }
 0xad7   : > { %6134 = vmatpush.msrb.mxu3 %v5340_v5 }
 0xad8   : > { %6009 = vmatmul.msk.f32.gmra.mxu3 %vm5187_vm11, %v6790_v27  ;;  %5372 = vmatpush.msra.mxu1 %v5337_v4  ;;  %v5320_v27 = vld [vmem:[#allocation4 + $0x28] sm:$0xff] }
 0xad9   : > { %6136 = vmatpush.msrb.mxu3 %v5339_v2  ;;  %6139 = vmatpush.msra.mxu2 %v5337_v4 }
 0xadb   : > { %6138 = vmatpush.msrb.mxu3 %v5338_v31 }
 0xadd   : > { %6000 = vmatmul.msk.f32.gmra.mxu0 %vm5187_vm11, %v6784_v63  ;;  %6140 = vmatpush.msrb.mxu3 %v5337_v4 }
 0xae0   : > { %6010 = vmatmul.msk.f32.gmra.mxu3 %vm5187_vm11, %v6794_v12  ;;  %v5317_v12 = vld [vmem:[#allocation4 + $0x60] sm:$0xff] }
 0xae5   : > { %6001 = vmatmul.msk.f32.gmra.mxu0 %vm5187_vm11, %v6788_v13 }
 0xae8   : > { %6011 = vmatmul.msk.f32.gmra.mxu3 %vm5187_vm11, %v6798_v39 }
 0xaed   : > { %6002 = vmatmul.msk.f32.gmra.mxu0 %vm5187_vm11, %v6792_v54 }
 0xaf5   : > { %6003 = vmatmul.msk.f32.gmra.mxu0 %vm5187_vm11, %v6796_v40 }
 0xafd   : > { %6004 = vmatmul.msk.f32.gmra.mxu0 %vm5187_vm11, %v6800_v47 }
 0xb05   : > { %6005 = vmatmul.msk.f32.gmra.mxu0 %vm5187_vm11, %v6802_v29 }
 0xb3a   : > { %v5257_v16 = vpop.f32.mrf.mxu0 }
 0xb3b   : > { %v5321_v28 = vmul.f32 %v5305_v45, %v5257_v16 }
 0xb3d   : > { %5373 = vmatmul.f32.vlgmr.msra.gmra.mxu1 %v5321_v28 }
 0xb42   : > { %v5260_v49 = vpop.f32.mrf.mxu0 }
 0xb43   : > { %v5322_v32 = vmul.f32 %v5306_v24, %v5260_v49  ;;  %v5287_v22 = vpop.f32.mrf.mxu3 }
 0xb44   : > { %v5331_v46 = vmul.f32 %v5315_v52, %v5287_v22 }
 0xb45   : > { %5376 = vmatmul.f32.gmra.mxu1 %v5322_v32 }
 0xb4a   : > { %v5263_v19 = vpop.f32.mrf.mxu0 }
 0xb4b   : > { %v5323_v11 = vmul.f32 %v5307_v35, %v5263_v19  ;;  %v5290_v25 = vpop.f32.mrf.mxu3 }
 0xb4c   : > { %v5332_v56 = vmul.f32 %v5316_v9, %v5290_v25 }
 0xb4d   : > { %5379 = vmatmul.f32.gmra.mxu1 %v5323_v11 }
 0xb52   : > { %v5266_v59 = vpop.f32.mrf.mxu0 }
 0xb53   : > { %v5324_v53 = vmul.f32 %v5308_v57, %v5266_v59  ;;  %v5293_v3 = vpop.f32.mrf.mxu3 }
 0xb54   : > { %v5333_v55 = vmul.f32 %v5317_v12, %v5293_v3 }
 0xb55   : > { %5382 = vmatmul.f32.gmra.mxu1 %v5324_v53 }
 0xb5a   : > { %v5269_v30 = vpop.f32.mrf.mxu0 }
 0xb5b   : > { %v5325_v34 = vmul.f32 %v5309_v62, %v5269_v30  ;;  %v5296_v63 = vpop.f32.mrf.mxu3 }
 0xb5c   : > { %v5334_v14 = vmul.f32 %v5318_v36, %v5296_v63 }
 0xb5d   : > { %5385 = vmatmul.f32.gmra.mxu1 %v5325_v34 }
 0xb5e   : > { %5412 = vmatmul.f32.vlgmr.msrb.gmra.mxu3 %v5334_v14 }
 0xb62   : > { %v5272_v21 = vpop.f32.mrf.mxu0 }
 0xb63   : > { %v5326_v51 = vmul.f32 %v5310_v15, %v5272_v21  ;;  %v5299_v13 = vpop.f32.mrf.mxu3 }
 0xb64   : > { %v5335_v42 = vmul.f32 %v5319_v50, %v5299_v13 }
 0xb65   : > { %5388 = vmatmul.f32.gmra.mxu1 %v5326_v51 }
 0xb66   : > { %5415 = vmatmul.f32.gmra.mxu3 %v5335_v42 }
 0xb6a   : > { %v5275_v61 = vpop.f32.mrf.mxu0 }
 0xb6b   : > { %v5327_v17 = vmul.f32 %v5311_v58, %v5275_v61  ;;  %v5302_v41 = vpop.f32.mrf.mxu3 }
 0xb6c   : > { %v5336_v23 = vmul.f32 %v5320_v27, %v5302_v41 }
 0xb6d   : > { %5391 = vmatmul.f32.vlgmr.msra.gmra.mxu2 %v5327_v17 }
 0xb6e   : > { %5418 = vmatmul.f32.gmra.mxu3 %v5336_v23 }
 0xb72   : > { %v5278_v10 = vpop.f32.mrf.mxu0 }
 0xb73   : > { %v5328_v20 = vmul.f32 %v5312_v7, %v5278_v10 }
 0xb75   : > { %5394 = vmatmul.f32.gmra.mxu2 %v5328_v20 }
 0xb7a   : > { %v5281_v44 = vpop.f32.mrf.mxu0 }
 0xb7b   : > { %v5329_v6 = vmul.f32 %v5313_v60, %v5281_v44 }
 0xb7d   : > { %5397 = vmatmul.f32.gmra.mxu2 %v5329_v6 }
 0xb82   : > { %v5284_v0 = vpop.f32.mrf.mxu0 }
 0xb83   : > { %v5330_v54 = vmul.f32 %v5314_v48, %v5284_v0 }
 0xb85   : > { %5400 = vmatmul.f32.gmra.mxu2 %v5330_v54 }
 0xb8d   : > { %5403 = vmatmul.f32.gmra.mxu2 %v5331_v46 }
 0xb95   : > { %5406 = vmatmul.f32.gmra.mxu2 %v5332_v56 }
 0xb9d   : > { %5409 = vmatmul.f32.gmra.mxu2 %v5333_v55 }
 0xbba   : > { %v5374_v1 = vpop.f32.mrf.mxu1 }
 0xbbb   : > { %v5375_v40 = vadd.f32 %v6770_v18, %v5374_v1 }
 0xbbd   : > { %v5422_v38 = vmax.f32 %v5375_v40, 0.0 }
 0xbbf   : > { %5438 = vst [vmem:[%s7368_s29] sm:$0xff] %v5422_v38 }
 0xbc2   : > { %v5377_v39 = vpop.f32.mrf.mxu1 }
 0xbc3   : > { %v5378_v8 = vadd.f32 %v6770_v18, %v5377_v39 }
 0xbc5   : > { %v5423_v43 = vmax.f32 %v5378_v8, 0.0 }
 0xbc7   : > { %5439 = vst [vmem:[%s7368_s29 + $0x8] sm:$0xff] %v5423_v43 }
 0xbca   : > { %v5380_v33 = vpop.f32.mrf.mxu1 }
 0xbcb   : > { %v5381_v26 = vadd.f32 %v6770_v18, %v5380_v33 }
 0xbcd   : > { %v5424_v37 = vmax.f32 %v5381_v26, 0.0 }
 0xbcf   : > { %5440 = vst [vmem:[%s7368_s29 + $0x10] sm:$0xff] %v5424_v37 }
 0xbd2   : > { %v5383_v47 = vpop.f32.mrf.mxu1 }
 0xbd3   : > { %v5384_v5 = vadd.f32 %v6770_v18, %v5383_v47 }
 0xbd5   : > { %v5425_v2 = vmax.f32 %v5384_v5, 0.0 }
 0xbd7   : > { %5441 = vst [vmem:[%s7368_s29 + $0x18] sm:$0xff] %v5425_v2 }
 0xbda   : > { %v5386_v29 = vpop.f32.mrf.mxu1 }
 0xbdb   : > { %v5387_v31 = vadd.f32 %v6770_v18, %v5386_v29 }
 0xbdd   : > { %v5426_v4 = vmax.f32 %v5387_v31, 0.0 }
 0xbdf   : > { %5442 = vst [vmem:[%s7368_s29 + $0x20] sm:$0xff] %v5426_v4 }
 0xbe1   : > { %v5413_v49 = vpop.f32.mrf.mxu3 }
 0xbe2   : > { %v5389_v45 = vpop.f32.mrf.mxu1  ;;  %v5414_v35 = vadd.f32 %v6770_v18, %v5413_v49 }
 0xbe3   : > { %v5390_v16 = vadd.f32 %v6770_v18, %v5389_v45 }
 0xbe4   : > { %v5435_v11 = vmax.f32 %v5414_v35, 0.0 }
 0xbe5   : > { %v5427_v28 = vmax.f32 %v5390_v16, 0.0 }
 0xbe6   : > { %5451 = vst [vmem:[%s7368_s29 + $0x68] sm:$0xff] %v5435_v11 }
 0xbe7   : > { %5443 = vst [vmem:[%s7368_s29 + $0x28] sm:$0xff] %v5427_v28 }
 0xbe9   : > { %v5416_v59 = vpop.f32.mrf.mxu3 }
 0xbea   : > { %v5417_v53 = vadd.f32 %v6770_v18, %v5416_v59 }
 0xbec   : > { %v5436_v30 = vmax.f32 %v5417_v53, 0.0 }
 0xbee   : > { %5452 = vst [vmem:[%s7368_s29 + $0x70] sm:$0xff] %v5436_v30 }
 0xbf0   : > { %v5392_v24 = vpop.f32.mrf.mxu2 }
 0xbf1   : > { %v5393_v32 = vadd.f32 %v6770_v18, %v5392_v24  ;;  %v5419_v34 = vpop.f32.mrf.mxu3 }
 0xbf2   : > { %v5420_v21 = vadd.f32 %v6770_v18, %v5419_v34 }
 0xbf3   : > { %v5428_v19 = vmax.f32 %v5393_v32, 0.0 }
 0xbf4   : > { %v5437_v51 = vmax.f32 %v5420_v21, 0.0 }
 0xbf5   : > { %5444 = vst [vmem:[%s7368_s29 + $0x30] sm:$0xff] %v5428_v19 }
 0xbf6   : > { %5453 = vst [vmem:[%s7368_s29 + $0x78] sm:$0xff] %v5437_v51 }
 0xbf8   : > { %v5395_v57 = vpop.f32.mrf.mxu2 }
 0xbf9   : > { %v5396_v22 = vadd.f32 %v6770_v18, %v5395_v57 }
 0xbfb   : > { %v5429_v62 = vmax.f32 %v5396_v22, 0.0 }
 0xbfd   : > { %5445 = vst [vmem:[%s7368_s29 + $0x38] sm:$0xff] %v5429_v62 }
 0xc00   : > { %v5398_v25 = vpop.f32.mrf.mxu2 }
 0xc01   : > { %v5399_v15 = vadd.f32 %v6770_v18, %v5398_v25 }
 0xc03   : > { %v5430_v3 = vmax.f32 %v5399_v15, 0.0 }
 0xc05   : > { %5446 = vst [vmem:[%s7368_s29 + $0x40] sm:$0xff] %v5430_v3 }
 0xc08   : > { %v5401_v58 = vpop.f32.mrf.mxu2 }
 0xc09   : > { %v5402_v36 = vadd.f32 %v6770_v18, %v5401_v58 }
 0xc0b   : > { %v5431_v61 = vmax.f32 %v5402_v36, 0.0 }
 0xc0d   : > { %5447 = vst [vmem:[%s7368_s29 + $0x48] sm:$0xff] %v5431_v61 }
 0xc10   : > { %v5404_v63 = vpop.f32.mrf.mxu2 }
 0xc11   : > { %v5405_v17 = vadd.f32 %v6770_v18, %v5404_v63 }
 0xc13   : > { %v5432_v14 = vmax.f32 %v5405_v17, 0.0 }
 0xc15   : > { %5448 = vst [vmem:[%s7368_s29 + $0x50] sm:$0xff] %v5432_v14 }
 0xc18   : > { %v5407_v7 = vpop.f32.mrf.mxu2 }
 0xc19   : > { %v5408_v50 = vadd.f32 %v6770_v18, %v5407_v7 }
 0xc1b   : > { %v5433_v10 = vmax.f32 %v5408_v50, 0.0 }
 0xc1d   : > { %5449 = vst [vmem:[%s7368_s29 + $0x58] sm:$0xff] %v5433_v10 }
 0xc20   : > { %v5410_v13 = vpop.f32.mrf.mxu2 }
 0xc21   : > { %v5411_v20 = vadd.f32 %v6770_v18, %v5410_v13 }
 0xc23   : > { %v5434_v42 = vmax.f32 %v5411_v20, 0.0 }
 0xc25   : > { %5450 = vst [vmem:[%s7368_s29 + $0x60] sm:$0xff] %v5434_v42 }
 0xc26 PF: > { %s6083_s28 = sshll.u32 %s7069_s21, 7  ;;  %s11405_s9 = sld [smem:[#allocation128_spill]] }
 0xc27   : > { %s5467_s20 = sshll.u32 %s7368_s29, 4  ;;  %s5455_s15 = scalar_lea.sflag [#allocation9], %s483_s17  ;;  %s5468_s20 = int_to_ptr.vmem [resolvable:$true] %s5467_s20 }
 0xc2c   : > { %s5466_s8 = scalar_lea.hbm %s11405_s9, %s6083_s28  ;;  %s6953_s21 = scalar_lea.hbm %s11405_s9, 512 }
 0xc2d   : > { %s5469_s10 = sshll.u32 %s5466_s8, 4  ;;  %s5470_s10 = int_to_ptr.hbm [resolvable:$true] %s5469_s10 }
 0xc2e   : > { %s6947_s25 = sshra.s32 %s5470_s10, 4  ;;  %s6948_s25 = int_to_ptr.hbm [resolvable:$true] %s6947_s25 }
 0xc2f   : > { %s6949_s2 = scalar_lea.hbm %s6948_s25, 128  ;;  %p6954_p10 = scmp.lt.s32.totalorder %s6948_s25, %s11405_s9 }
 0xc30   : > { %p6950_p5 = scmp.ne.s32.totalorder %s6948_s25, %s6949_s2  ;;  %p6955_p11 = scmp.lt.s32.totalorder %s6953_s21, %s6949_s2 }
 0xc32   : > { %p6951_p9 = pnand %p6950_p5, %p7281_p6  ;;  %p6956_p13 = por %p6955_p11, %p6954_p10 }
 0xc34   : > { %p6952_p2 = pneg %p6951_p9 }
 0xc36   : > { %p6957_p3 = pnand %p6956_p13, %p6952_p2 }
 0xc38   : > { %6960 = shalt.err (!%p6957_p3)
}
 0xc39   : > { %s7099_s17 = smov 128   ;;  %s7100_s29 = smov 8  }
 0xc3a   : > { %6155 = dma.vmem_to_hbm [thread:$0]  (%p7281_p6), %s5468_s20, 2048, %s5470_s10, %s5455_s15, %s7099_s17, %s7099_s17, %s7100_s29  }
 0xc3b PF: > { %s11406_s12 = sld [smem:[#allocation22_spill]]  ;;  %p6177_p12 = scmp.ge.s32.totalorder %s7081_s24, 2 }
 0xc3d   : > { %p6168_p0 = pnand %p6177_p12, %p7286_p8 }
 0xc3f   : > { %p6169_p7 = pneg %p6168_p0 }
 0xc41   : > { %s5484_s30 = sand.u32 1, %s11406_s12  }
 0xc42   : > { %s5485_s3 = scalar_lea.sflag [#allocation9], %s5484_s30 }
 0xc43   : > { %7028 = dma.done.wait (%p6169_p7), %s5485_s3, 2048  }
 0xc44   : > { %7030 = vsyncadd (%p6169_p7), %s5485_s3, 4294965248  ;;  %s35_s24 = sadd.s32 1, %s7081_s24   ;;  %s11409_s7 = sld [smem:[#allocation23_spill]] }
 0xc45   : > { %p10347_p1 = scmp.ge.s32.totalorder %s35_s24, 10   ;;  %s11410_s15 = sld [smem:[#allocation29_spill]] }
 0xc46   : > { %s11411_s11 = sld [smem:[#allocation28_spill]]  ;;  %s11415_s13 = smov %s7037_s14 }
 0xc47   : > { %s11412_s8 = sld [smem:[#allocation27_spill]]  ;;  %s11417_s16 = smov %s7049_s0 }
 0xc48   : > { %s11413_s10 = sld [smem:[#allocation25_spill]]  ;;  %s11419_s17 = smov %s7057_s18 }
 0xc49   : > { %s11414_s25 = sld [smem:[#allocation26_spill]]  ;;  %s11420_s18 = smov %s7061_s19 }
 0xc4a   : > { %s11416_s14 = smov %s11409_s7  ;;  %s11422_s20 = smov %s7073_s22 }
 0xc4b   : > { %s11423_s21 = smov %s7077_s23  ;;  %34 = sbr.rel (!%p10347_p1) target bundleno = 24 (0x18), region = 158 }
 0xc4c   : > { %s11418_s0 = smov %s11411_s11 }
 0xc4d   : > { %s11421_s19 = smov %s11412_s8 }
 0xc4e   : > { %s11424_s22 = smov %s11413_s10 }
 0xc4f   : > { %s11425_s23 = smov %s11414_s25 }
 0xc50   :  { %5491 = vsyncpa [#allocation8], 1 }
 0xc51   :  { %5493 = vsyncpa [#allocation8 + $0x1], 1 }
 0xc52   :  { %5494 = vsyncpa [#allocation12], 1 }
 0xc53   :  { %5495 = vsyncpa [#allocation15], 1 }
 0xc54   :  { %5496 = vsyncpa [#allocation9], 1 }
 0xc55   :  { %5498 = vsyncpa [#allocation9 + $0x1], 1 }

</bundles_post_ra>
